<compile_context>
chip_gen: v5e
topology: v5e:2x2
jax: 0.10.0
libtpu: 0.0.40
codegen_flags: <defaults>
</compile_context>

<pallas_src>
import functools

import jax
import jax.numpy as jnp
from jax.experimental import pallas as pl
from jax.experimental.pallas import tpu as pltpu


LANE = 128     # TPU lane width


def _round_up(a, b):
    return (a + b - 1) // b * b


def _pad2(a, rows, cols):
    return jnp.pad(a, ((0, rows - a.shape[0]), (0, cols - a.shape[1]))).astype(jnp.float32)


def _vmem_budget_bytes():
    # Conv working-set budget ~40% of physical VMEM (v7x: 64 MiB/TC, v5e/v6e: 128 MiB),
    # leaving headroom for double-buffering and compiler scratch.
    cap = None
    try:
        cap = getattr(pltpu.get_tpu_info(), "vmem_capacity_bytes", None)
    except Exception:
        cap = None
    if not cap:
        cap = 64 * 1024 * 1024
    return max(16 * 1024 * 1024, int(cap * 0.4))


def _conv_block_vmem_bytes(tm, sample_len, pad, c_small, cin):
    # Rough per-grid-block VMEM footprint of the conv+pool kernel.
    lw = tm * sample_len
    bw = lw + 2 * pad
    slab = _round_up(cin, 16) * bw * 2        # bf16 input block (sublane tile-padded)
    y = c_small * lw * 4                      # f32 conv activations (+1x transient)
    out = max(tm, 8) * LANE * 4
    fixed = 64 * 1024                         # weights / bias / mask / misc
    return 2 * (slab + out) + 2 * y + fixed


def _pick_tm(n, sample_len, pad, c_small, cin, budget):
    # Largest number of slices per grid step whose conv working set fits the VMEM
    # budget.  Prefer tm that keeps the (tm, 128) output block sublane-aligned
    # (tm % 8 == 0 or tm == n) and leaves >= 2 grid blocks so v7x megacore can split
    # the "parallel" axis (costs at most one extra ~0.35us step on 1-TC v5e/v6e).
    divisors = [d for d in range(1, n + 1) if n % d == 0]
    fits = [d for d in divisors
            if _conv_block_vmem_bytes(d, sample_len, pad, c_small, cin) <= budget]
    if not fits:
        # TODO(synk): needs an inner spatial pipeline for images this large.
        return 1
    aligned = [d for d in fits if d % 8 == 0 or d == n]
    cand = aligned if aligned else fits
    two_blocks = [d for d in cand if n // d >= 2]
    return max(two_blocks) if two_blocks else max(cand)


# ----------------------------------------------------------------------------
# Kernel 1: fused  conv3x3 (MXU) -> bias -> ReLU -> masked global avg pool (VPU)
# ----------------------------------------------------------------------------
def backbone_pool_kernel(x_ref, w_ref, b_ref, mask_ref, out_ref, *,
                         tap_offsets, lw, tm, sample_len, c_small, inv_hw):
    # x_ref:    (Cin, lw + 2*pad) bf16   zero-padded images, flattened spatial, one
    #                                    sample_len stripe per slice (lane-dense)
    # w_ref:    (9, c_small, Cin) bf16   conv weight, one (c_small, Cin) block per tap
    # b_ref:    (c_small, 1)      f32    conv bias (zero in padded channels)
    # mask_ref: (1, sample_len)   f32    0/1 interior mask (shared by every slice)
    # out_ref:  (tm, c_pad)       f32    pooled slice features (lane-dense store)

    # Conv3x3 as 9 accumulated MXU matmuls (one per tap) over statically shifted
    # views of the flattened padded image slab (in-kernel im2col, nothing in HBM).
    y = None
    for t, off in enumerate(tap_offsets):
        part = x_ref[:, off:off + lw]                          # (Cin, lw) bf16
        contrib = jnp.dot(w_ref[t], part,
                          preferred_element_type=jnp.float32)  # (c_small, lw) f32
        y = contrib if y is None else y + contrib
    y = jnp.maximum(y + b_ref[...], 0.0)                       # bias + ReLU (f32)

    # AdaptiveAvgPool2d((1,1)): masked VPU multiply + per-slice lane reduction
    # (keeps the MXU free; no lane-sparse pooling matmul).
    mask = mask_ref[...]                                       # (1, sample_len)
    lane_m = jax.lax.broadcasted_iota(jnp.int32, (1, tm), 1)
    pooled = jnp.zeros((c_small, tm), jnp.float32)
    for m in range(tm):
        seg = y[:, m * sample_len:(m + 1) * sample_len]        # (c_small, sample_len)
        s = jnp.sum(seg * mask, axis=1, keepdims=True)         # (c_small, 1)
        pooled = pooled + s * (lane_m == m).astype(jnp.float32)
    pooled = pooled * inv_hw                                   # 1/(H*W) in f32

    # Zero-pad the channel axis to 128 only at the store (lane-dense output).
    c_pad = out_ref.shape[1]
    if c_pad > c_small:
        pooled = jnp.concatenate(
            [pooled, jnp.zeros((c_pad - c_small, tm), jnp.float32)], axis=0)
    out_ref[...] = pooled.T                                    # (tm, c_pad)


def backbone_and_pool(xslab, wk, bk, mask, n, c_small, c_pad, tm, lw, pad,
                      sample_len, tap_offsets, inv_hw):
    cin = xslab.shape[0]
    bw = lw + 2 * pad   # per-grid-block width of the image slab (multiple of 128)
    est = _conv_block_vmem_bytes(tm, sample_len, pad, c_small, cin)
    vmem_limit = int(min(64 * 1024 * 1024, max(16 * 1024 * 1024, 2 * est)))
    kernel = functools.partial(
        backbone_pool_kernel, tap_offsets=tap_offsets, lw=lw, tm=tm,
        sample_len=sample_len, c_small=c_small, inv_hw=inv_hw)
    return pl.pallas_call(
        kernel,
        out_shape=jax.ShapeDtypeStruct((n, c_pad), jnp.float32),
        grid_spec=pltpu.PrefetchScalarGridSpec(
            num_scalar_prefetch=0,
            grid=(n // tm,),
            in_specs=[
                pl.BlockSpec((cin, bw), lambda i: (0, i)),
                pl.BlockSpec((9, c_small, cin), lambda i: (0, 0, 0)),
                pl.BlockSpec((c_small, 1), lambda i: (0, 0)),
                pl.BlockSpec((1, sample_len), lambda i: (0, 0)),
            ],
            out_specs=pl.BlockSpec((tm, c_pad), lambda i: (i, 0)),
        ),
        compiler_params=pltpu.CompilerParams(
            dimension_semantics=("parallel",),
            vmem_limit_bytes=vmem_limit,
        ),
    )(xslab, wk, bk, mask)


# ----------------------------------------------------------------------------
# Kernel 2: attention pooling over slices + classifier (whole batch, one block)
# ----------------------------------------------------------------------------
def attn_classifier_kernel(feat_ref, w1_ref, b1_ref, v_ref, wc_ref, bc_ref, out_ref):
    # feat_ref: (B, S, c_pad)  w1: (c_pad, c_pad)  b1: (1, c_pad)  v: (1, c_pad)
    # wc: (c_pad, nc_pad)  bc: (1, nc_pad)  out_ref: (B, nc_pad)
    B, S, C = feat_ref.shape
    x3 = feat_ref[...]                                         # (B, S, C)
    x2 = x3.reshape(B * S, C)                                  # free leading-dim merge
    h = jnp.tanh(jnp.dot(x2, w1_ref[...], preferred_element_type=jnp.float32) + b1_ref[...])
    h3 = h.reshape(B, S, C)
    # Scalar score bias is folded out: softmax is invariant to a constant shift.
    scores = jnp.sum(h3 * v_ref[...], axis=-1, keepdims=True)  # (B, S, 1)
    m = jnp.max(scores, axis=1, keepdims=True)                 # softmax over slices
    e = jnp.exp(scores - m)
    attn = e * pl.reciprocal(jnp.sum(e, axis=1, keepdims=True), approx=True)
    ctx = jnp.sum(attn * x3, axis=1)                           # (B, C) attention pooling
    out_ref[...] = jnp.dot(ctx, wc_ref[...], preferred_element_type=jnp.float32) + bc_ref[...]


def attention_and_classifier(feats3, w1, b1, v, wc, bc, nc_pad):
    # Whole batch in a single collapsed-grid invocation: inputs total a few KB of VMEM,
    # so any finer grid would be pure per-step pipeline overhead.
    B = feats3.shape[0]
    vmem = pl.BlockSpec(memory_space=pltpu.MemorySpace.VMEM)
    return pl.pallas_call(
        attn_classifier_kernel,
        out_shape=jax.ShapeDtypeStruct((B, nc_pad), jnp.float32),
        in_specs=[vmem] * 6,
        out_specs=vmem,
    )(feats3, w1, b1, v, wc, bc)


# ----------------------------------------------------------------------------
# Host-side layout preparation (no im2col materialization, bf16 slab, Cin kept at 3)
# ----------------------------------------------------------------------------
def prepare_image_slab(x_nchw, tm, sample_len, pad):
    # (N, Cin, H, W) -> (Cin, nb * (tm*sample_len + 2*pad)) lane-dense bf16 slab.
    # Each slice occupies one sample_len stripe holding its zero-padded image flattened
    # row-major; each grid block gets `pad` zero columns on both sides so the 9 conv
    # tap views are plain static slices inside the kernel.
    N, Cin, H, W = x_nchw.shape
    Hp, Wp = H + 2, W + 2
    hpwp = Hp * Wp
    nb = N // tm
    lw = tm * sample_len

    xp = jnp.pad(x_nchw, ((0, 0), (0, 0), (1, 1), (1, 1)))         # (N, Cin, Hp, Wp)
    xf = xp.reshape(N, Cin, hpwp)
    xf = jnp.pad(xf, ((0, 0), (0, 0), (0, sample_len - hpwp)))     # (N, Cin, sample_len)
    xb = xf.reshape(nb, tm, Cin, sample_len)
    xb = jnp.transpose(xb, (0, 2, 1, 3)).reshape(nb, Cin, lw)
    xb = jnp.pad(xb, ((0, 0), (0, 0), (pad, pad)))                 # (nb, Cin, lw + 2*pad)
    xslab = jnp.transpose(xb, (1, 0, 2)).reshape(Cin, nb * (lw + 2 * pad))
    return xslab.astype(jnp.bfloat16), lw


def build_interior_mask(H, W, sample_len):
    # 0/1 mask over one sample_len stripe: 1 iff the flat padded position is an
    # interior (non-padding, non-rounding) pixel.  Lane-dense (1, sample_len).
    Hp, Wp = H + 2, W + 2
    q = jnp.arange(sample_len)
    i = q // Wp
    j = q % Wp
    interior = (q < Hp * Wp) & (i >= 1) & (i <= H) & (j >= 1) & (j <= W)
    return interior.astype(jnp.float32).reshape(1, sample_len)


def pack_conv_params(w_conv, b_conv, c_small):
    # PyTorch Conv2d weight (C, Cin, 3, 3) -> (9, c_small, Cin) bf16, one block per tap
    # (tap index = kh*3 + kw, matching tap_offsets).  Padded output channels are zero
    # so padded feature columns stay exactly zero.
    C, Cin = w_conv.shape[0], w_conv.shape[1]
    wk = jnp.transpose(w_conv, (2, 3, 0, 1)).reshape(9, C, Cin)
    wk = jnp.pad(wk, ((0, 0), (0, c_small - C), (0, 0))).astype(jnp.bfloat16)
    bk = jnp.pad(b_conv, (0, c_small - C)).reshape(c_small, 1).astype(jnp.float32)
    return wk, bk


# ----------------------------------------------------------------------------
# Full forward
# ----------------------------------------------------------------------------
def axial3d_forward(x, params):
    # x: (B, S, Cin, H, W)
    B, S, Cin, H, W = x.shape
    C = params["w_conv"].shape[0]
    NC = params["w_cls"].shape[1]
    c_small = _round_up(C, 8)      # conv/pool channel axis (sublane tile only)
    c_pad = _round_up(C, LANE)     # feature axis padded to 128 -> lane-dense stores
    nc_pad = _round_up(NC, LANE)
    N = B * S
    Hp, Wp = H + 2, W + 2
    sample_len = _round_up(Hp * Wp, LANE)   # 128-aligned flattened padded image stripe
    pad = _round_up(Wp + 1, LANE)           # lane-aligned halo >= largest tap shift

    tm = _pick_tm(N, sample_len, pad, c_small, Cin, _vmem_budget_bytes())

    # ---- backbone: conv3x3 + ReLU per slice, then AdaptiveAvgPool2d((1,1)) ----
    x2d = x.reshape(N, Cin, H, W)                      # x.view(-1, *x.size()[2:])
    xslab, lw = prepare_image_slab(x2d, tm, sample_len, pad)
    mask = build_interior_mask(H, W, sample_len)
    wk, bk = pack_conv_params(params["w_conv"], params["b_conv"], c_small)
    tap_offsets = tuple(pad + (kh - 1) * Wp + (kw - 1)
                        for kh in range(3) for kw in range(3))
    feats = backbone_and_pool(xslab, wk, bk, mask, N, c_small, c_pad, tm, lw, pad,
                              sample_len, tap_offsets, 1.0 / (H * W))

    # ---- attention over slices + classifier (Dropout is identity at inference) ----
    feats3 = feats.reshape(B, S, c_pad)
    w1 = _pad2(params["w_attn1"], c_pad, c_pad)
    b1 = _pad2(params["b_attn1"].reshape(1, C), 1, c_pad)
    v = _pad2(params["v_attn"].reshape(1, C), 1, c_pad)
    # params["bv_attn"] (scalar score bias) is folded out: softmax is shift-invariant.
    wc = _pad2(params["w_cls"], c_pad, nc_pad)
    bc = _pad2(params["b_cls"].reshape(1, NC), 1, nc_pad)
    logits = attention_and_classifier(feats3, w1, b1, v, wc, bc, nc_pad)
    return logits[:, :NC]


def make_params(key, embedding_dim, num_classes, in_ch=3):
    C, NC = embedding_dim, num_classes
    keys = jax.random.split(key, 7)
    # Linear weights stored directly in (in, out) layout (equivalent parameterization of
    # PyTorch's y = x @ W.T + b with (out, in) storage). Conv weight is PyTorch layout.
    return {
        "w_conv":  jax.random.normal(keys[0], (C, in_ch, 3, 3), jnp.float32) * 0.1,
        "b_conv":  jax.random.normal(keys[1], (C,), jnp.float32) * 0.01,
        "w_attn1": jax.random.normal(keys[2], (C, C), jnp.float32) * 0.1,
        "b_attn1": jax.random.normal(keys[3], (C,), jnp.float32) * 0.01,
        "v_attn":  jax.random.normal(keys[4], (C,), jnp.float32) * 0.1,
        "bv_attn": jnp.zeros((), jnp.float32),
        "w_cls":   jax.random.normal(keys[5], (C, NC), jnp.float32) * 0.1,
        "b_cls":   jax.random.normal(keys[6], (NC,), jnp.float32) * 0.01,
    }


if __name__ == "__main__":
    # Small shapes consistent with the module's forward.
    B, S, Cin, H, W = 2, 8, 3, 16, 16
    embedding_dim, num_classes = 32, 4

    key = jax.random.PRNGKey(0)
    k_x, k_p = jax.random.split(key)
    x = jax.random.normal(k_x, (B, S, Cin, H, W), jnp.float32)
    params = make_params(k_p, embedding_dim, num_classes, in_ch=Cin)

    logits = jax.jit(axial3d_forward)(x, params)
    logits = jax.block_until_ready(logits)
    assert logits.shape == (B, num_classes), logits.shape
    assert bool(jnp.all(jnp.isfinite(logits)))
    print("KERNEL_OK")
</pallas_src>

<mosaic_0001>
module attributes {stable_mosaic.version = 11 : i64} {
  func.func @backbone_pool_kernel(%arg0: i32, %arg1: memref<3x3328xbf16, #tpu.memory_space<vmem>>, %arg2: memref<9x32x3xbf16, #tpu.memory_space<vmem>>, %arg3: memref<32x1xf32, #tpu.memory_space<vmem>>, %arg4: memref<1x384xf32, #tpu.memory_space<vmem>>, %arg5: memref<8x128xf32, #tpu.memory_space<vmem>>) attributes {dimension_semantics = [#tpu.dimension_semantics<parallel>], iteration_bounds = array<i64: 2>, scalar_prefetch = 0 : i64, scratch_operands = 0 : i64, tpu.core_type = #tpu.core_type<tc>, window_params = [{transform_indices = @transform_0, window_bounds = array<i64: 3, 3328>}, {pipeline_mode = #tpu.pipeline_mode<synchronous>, transform_indices = @transform_1, window_bounds = array<i64: 9, 32, 3>}, {pipeline_mode = #tpu.pipeline_mode<synchronous>, transform_indices = @transform_2, window_bounds = array<i64: 32, 1>}, {pipeline_mode = #tpu.pipeline_mode<synchronous>, transform_indices = @transform_3, window_bounds = array<i64: 1, 384>}, {transform_indices = @transform_4, window_bounds = array<i64: 8, 128>}]} {
    %c0 = arith.constant 0 : index
    %c109 = arith.constant 109 : index
    %0 = vector.load %arg1[%c0, %c109] : memref<3x3328xbf16, #tpu.memory_space<vmem>>, vector<3x3072xbf16>
    %c0_0 = arith.constant 0 : index
    %c0_1 = arith.constant 0 : index
    %c0_2 = arith.constant 0 : index
    %1 = vector.load %arg2[%c0_0, %c0_1, %c0_2] : memref<9x32x3xbf16, #tpu.memory_space<vmem>>, vector<1x32x3xbf16>
    %2 = vector.shape_cast %1 : vector<1x32x3xbf16> to vector<32x3xbf16>
    %cst = arith.constant dense<0.000000e+00> : vector<32x3072xf32>
    %3 = tpu.matmul %2, %0, %cst {dimension_numbers = #tpu.dot_dimension_numbers<[1], [0], [0], [1], [0, 0, 1, 1], [], []>} : vector<32x3xbf16>, vector<3x3072xbf16>, vector<32x3072xf32> -> vector<32x3072xf32>
    %c0_3 = arith.constant 0 : index
    %c110 = arith.constant 110 : index
    %4 = vector.load %arg1[%c0_3, %c110] : memref<3x3328xbf16, #tpu.memory_space<vmem>>, vector<3x3072xbf16>
    %c1 = arith.constant 1 : index
    %c0_4 = arith.constant 0 : index
    %c0_5 = arith.constant 0 : index
    %5 = vector.load %arg2[%c1, %c0_4, %c0_5] : memref<9x32x3xbf16, #tpu.memory_space<vmem>>, vector<1x32x3xbf16>
    %6 = vector.shape_cast %5 : vector<1x32x3xbf16> to vector<32x3xbf16>
    %cst_6 = arith.constant dense<0.000000e+00> : vector<32x3072xf32>
    %7 = tpu.matmul %6, %4, %cst_6 {dimension_numbers = #tpu.dot_dimension_numbers<[1], [0], [0], [1], [0, 0, 1, 1], [], []>} : vector<32x3xbf16>, vector<3x3072xbf16>, vector<32x3072xf32> -> vector<32x3072xf32>
    %8 = arith.addf %3, %7 : vector<32x3072xf32>
    %c0_7 = arith.constant 0 : index
    %c111 = arith.constant 111 : index
    %9 = vector.load %arg1[%c0_7, %c111] : memref<3x3328xbf16, #tpu.memory_space<vmem>>, vector<3x3072xbf16>
    %c2 = arith.constant 2 : index
    %c0_8 = arith.constant 0 : index
    %c0_9 = arith.constant 0 : index
    %10 = vector.load %arg2[%c2, %c0_8, %c0_9] : memref<9x32x3xbf16, #tpu.memory_space<vmem>>, vector<1x32x3xbf16>
    %11 = vector.shape_cast %10 : vector<1x32x3xbf16> to vector<32x3xbf16>
    %cst_10 = arith.constant dense<0.000000e+00> : vector<32x3072xf32>
    %12 = tpu.matmul %11, %9, %cst_10 {dimension_numbers = #tpu.dot_dimension_numbers<[1], [0], [0], [1], [0, 0, 1, 1], [], []>} : vector<32x3xbf16>, vector<3x3072xbf16>, vector<32x3072xf32> -> vector<32x3072xf32>
    %13 = arith.addf %8, %12 : vector<32x3072xf32>
    %c0_11 = arith.constant 0 : index
    %c127 = arith.constant 127 : index
    %14 = vector.load %arg1[%c0_11, %c127] : memref<3x3328xbf16, #tpu.memory_space<vmem>>, vector<3x3072xbf16>
    %c3 = arith.constant 3 : index
    %c0_12 = arith.constant 0 : index
    %c0_13 = arith.constant 0 : index
    %15 = vector.load %arg2[%c3, %c0_12, %c0_13] : memref<9x32x3xbf16, #tpu.memory_space<vmem>>, vector<1x32x3xbf16>
    %16 = vector.shape_cast %15 : vector<1x32x3xbf16> to vector<32x3xbf16>
    %cst_14 = arith.constant dense<0.000000e+00> : vector<32x3072xf32>
    %17 = tpu.matmul %16, %14, %cst_14 {dimension_numbers = #tpu.dot_dimension_numbers<[1], [0], [0], [1], [0, 0, 1, 1], [], []>} : vector<32x3xbf16>, vector<3x3072xbf16>, vector<32x3072xf32> -> vector<32x3072xf32>
    %18 = arith.addf %13, %17 : vector<32x3072xf32>
    %c0_15 = arith.constant 0 : index
    %c128 = arith.constant 128 : index
    %19 = vector.load %arg1[%c0_15, %c128] : memref<3x3328xbf16, #tpu.memory_space<vmem>>, vector<3x3072xbf16>
    %c4 = arith.constant 4 : index
    %c0_16 = arith.constant 0 : index
    %c0_17 = arith.constant 0 : index
    %20 = vector.load %arg2[%c4, %c0_16, %c0_17] : memref<9x32x3xbf16, #tpu.memory_space<vmem>>, vector<1x32x3xbf16>
    %21 = vector.shape_cast %20 : vector<1x32x3xbf16> to vector<32x3xbf16>
    %cst_18 = arith.constant dense<0.000000e+00> : vector<32x3072xf32>
    %22 = tpu.matmul %21, %19, %cst_18 {dimension_numbers = #tpu.dot_dimension_numbers<[1], [0], [0], [1], [0, 0, 1, 1], [], []>} : vector<32x3xbf16>, vector<3x3072xbf16>, vector<32x3072xf32> -> vector<32x3072xf32>
    %23 = arith.addf %18, %22 : vector<32x3072xf32>
    %c0_19 = arith.constant 0 : index
    %c129 = arith.constant 129 : index
    %24 = vector.load %arg1[%c0_19, %c129] : memref<3x3328xbf16, #tpu.memory_space<vmem>>, vector<3x3072xbf16>
    %c5 = arith.constant 5 : index
    %c0_20 = arith.constant 0 : index
    %c0_21 = arith.constant 0 : index
    %25 = vector.load %arg2[%c5, %c0_20, %c0_21] : memref<9x32x3xbf16, #tpu.memory_space<vmem>>, vector<1x32x3xbf16>
    %26 = vector.shape_cast %25 : vector<1x32x3xbf16> to vector<32x3xbf16>
    %cst_22 = arith.constant dense<0.000000e+00> : vector<32x3072xf32>
    %27 = tpu.matmul %26, %24, %cst_22 {dimension_numbers = #tpu.dot_dimension_numbers<[1], [0], [0], [1], [0, 0, 1, 1], [], []>} : vector<32x3xbf16>, vector<3x3072xbf16>, vector<32x3072xf32> -> vector<32x3072xf32>
    %28 = arith.addf %23, %27 : vector<32x3072xf32>
    %c0_23 = arith.constant 0 : index
    %c145 = arith.constant 145 : index
    %29 = vector.load %arg1[%c0_23, %c145] : memref<3x3328xbf16, #tpu.memory_space<vmem>>, vector<3x3072xbf16>
    %c6 = arith.constant 6 : index
    %c0_24 = arith.constant 0 : index
    %c0_25 = arith.constant 0 : index
    %30 = vector.load %arg2[%c6, %c0_24, %c0_25] : memref<9x32x3xbf16, #tpu.memory_space<vmem>>, vector<1x32x3xbf16>
    %31 = vector.shape_cast %30 : vector<1x32x3xbf16> to vector<32x3xbf16>
    %cst_26 = arith.constant dense<0.000000e+00> : vector<32x3072xf32>
    %32 = tpu.matmul %31, %29, %cst_26 {dimension_numbers = #tpu.dot_dimension_numbers<[1], [0], [0], [1], [0, 0, 1, 1], [], []>} : vector<32x3xbf16>, vector<3x3072xbf16>, vector<32x3072xf32> -> vector<32x3072xf32>
    %33 = arith.addf %28, %32 : vector<32x3072xf32>
    %c0_27 = arith.constant 0 : index
    %c146 = arith.constant 146 : index
    %34 = vector.load %arg1[%c0_27, %c146] : memref<3x3328xbf16, #tpu.memory_space<vmem>>, vector<3x3072xbf16>
    %c7 = arith.constant 7 : index
    %c0_28 = arith.constant 0 : index
    %c0_29 = arith.constant 0 : index
    %35 = vector.load %arg2[%c7, %c0_28, %c0_29] : memref<9x32x3xbf16, #tpu.memory_space<vmem>>, vector<1x32x3xbf16>
    %36 = vector.shape_cast %35 : vector<1x32x3xbf16> to vector<32x3xbf16>
    %cst_30 = arith.constant dense<0.000000e+00> : vector<32x3072xf32>
    %37 = tpu.matmul %36, %34, %cst_30 {dimension_numbers = #tpu.dot_dimension_numbers<[1], [0], [0], [1], [0, 0, 1, 1], [], []>} : vector<32x3xbf16>, vector<3x3072xbf16>, vector<32x3072xf32> -> vector<32x3072xf32>
    %38 = arith.addf %33, %37 : vector<32x3072xf32>
    %c0_31 = arith.constant 0 : index
    %c147 = arith.constant 147 : index
    %39 = vector.load %arg1[%c0_31, %c147] : memref<3x3328xbf16, #tpu.memory_space<vmem>>, vector<3x3072xbf16>
    %c8 = arith.constant 8 : index
    %c0_32 = arith.constant 0 : index
    %c0_33 = arith.constant 0 : index
    %40 = vector.load %arg2[%c8, %c0_32, %c0_33] : memref<9x32x3xbf16, #tpu.memory_space<vmem>>, vector<1x32x3xbf16>
    %41 = vector.shape_cast %40 : vector<1x32x3xbf16> to vector<32x3xbf16>
    %cst_34 = arith.constant dense<0.000000e+00> : vector<32x3072xf32>
    %42 = tpu.matmul %41, %39, %cst_34 {dimension_numbers = #tpu.dot_dimension_numbers<[1], [0], [0], [1], [0, 0, 1, 1], [], []>} : vector<32x3xbf16>, vector<3x3072xbf16>, vector<32x3072xf32> -> vector<32x3072xf32>
    %43 = arith.addf %38, %42 : vector<32x3072xf32>
    %c0_35 = arith.constant 0 : index
    %c0_36 = arith.constant 0 : index
    %44 = vector.load %arg3[%c0_35, %c0_36] : memref<32x1xf32, #tpu.memory_space<vmem>>, vector<32x1xf32>
    %45 = vector.broadcast %44 : vector<32x1xf32> to vector<32x3072xf32>
    %46 = arith.addf %43, %45 : vector<32x3072xf32>
    %cst_37 = arith.constant 0.000000e+00 : f32
    %47 = vector.broadcast %cst_37 : f32 to vector<32x3072xf32>
    %48 = arith.maximumf %46, %47 : vector<32x3072xf32>
    %c0_38 = arith.constant 0 : index
    %c0_39 = arith.constant 0 : index
    %49 = vector.load %arg4[%c0_38, %c0_39] : memref<1x384xf32, #tpu.memory_space<vmem>>, vector<1x384xf32>
    %50 = tpu.iota {dimensions = array<i32: 1>} : vector<1x8xi32>
    %cst_40 = arith.constant 0.000000e+00 : f32
    %51 = vector.broadcast %cst_40 : f32 to vector<32x8xf32>
    %52 = vector.extract_strided_slice %48 {offsets = [0, 0], sizes = [32, 384], strides = [1, 1]} : vector<32x3072xf32> to vector<32x384xf32>
    %53 = vector.broadcast %49 : vector<1x384xf32> to vector<32x384xf32>
    %54 = arith.mulf %52, %53 : vector<32x384xf32>
    %cst_41 = arith.constant dense<0.000000e+00> : vector<32xf32>
    %55 = vector.multi_reduction <add>, %54, %cst_41 [1] : vector<32x384xf32> to vector<32xf32>
    %56 = vector.shape_cast %55 : vector<32xf32> to vector<32x1xf32>
    %c0_i32 = arith.constant 0 : i32
    %57 = vector.broadcast %c0_i32 : i32 to vector<1x8xi32>
    %58 = arith.cmpi eq, %50, %57 : vector<1x8xi32>
    %59 = arith.extui %58 : vector<1x8xi1> to vector<1x8xi32>
    %60 = arith.sitofp %59 : vector<1x8xi32> to vector<1x8xf32>
    %61 = vector.broadcast %56 : vector<32x1xf32> to vector<32x8xf32>
    %62 = vector.broadcast %60 : vector<1x8xf32> to vector<32x8xf32>
    %63 = arith.mulf %61, %62 : vector<32x8xf32>
    %64 = arith.addf %51, %63 : vector<32x8xf32>
    %65 = vector.extract_strided_slice %48 {offsets = [0, 384], sizes = [32, 384], strides = [1, 1]} : vector<32x3072xf32> to vector<32x384xf32>
    %66 = vector.broadcast %49 : vector<1x384xf32> to vector<32x384xf32>
    %67 = arith.mulf %65, %66 : vector<32x384xf32>
    %cst_42 = arith.constant dense<0.000000e+00> : vector<32xf32>
    %68 = vector.multi_reduction <add>, %67, %cst_42 [1] : vector<32x384xf32> to vector<32xf32>
    %69 = vector.shape_cast %68 : vector<32xf32> to vector<32x1xf32>
    %c1_i32 = arith.constant 1 : i32
    %70 = vector.broadcast %c1_i32 : i32 to vector<1x8xi32>
    %71 = arith.cmpi eq, %50, %70 : vector<1x8xi32>
    %72 = arith.extui %71 : vector<1x8xi1> to vector<1x8xi32>
    %73 = arith.sitofp %72 : vector<1x8xi32> to vector<1x8xf32>
    %74 = vector.broadcast %69 : vector<32x1xf32> to vector<32x8xf32>
    %75 = vector.broadcast %73 : vector<1x8xf32> to vector<32x8xf32>
    %76 = arith.mulf %74, %75 : vector<32x8xf32>
    %77 = arith.addf %64, %76 : vector<32x8xf32>
    %78 = vector.extract_strided_slice %48 {offsets = [0, 768], sizes = [32, 384], strides = [1, 1]} : vector<32x3072xf32> to vector<32x384xf32>
    %79 = vector.broadcast %49 : vector<1x384xf32> to vector<32x384xf32>
    %80 = arith.mulf %78, %79 : vector<32x384xf32>
    %cst_43 = arith.constant dense<0.000000e+00> : vector<32xf32>
    %81 = vector.multi_reduction <add>, %80, %cst_43 [1] : vector<32x384xf32> to vector<32xf32>
    %82 = vector.shape_cast %81 : vector<32xf32> to vector<32x1xf32>
    %c2_i32 = arith.constant 2 : i32
    %83 = vector.broadcast %c2_i32 : i32 to vector<1x8xi32>
    %84 = arith.cmpi eq, %50, %83 : vector<1x8xi32>
    %85 = arith.extui %84 : vector<1x8xi1> to vector<1x8xi32>
    %86 = arith.sitofp %85 : vector<1x8xi32> to vector<1x8xf32>
    %87 = vector.broadcast %82 : vector<32x1xf32> to vector<32x8xf32>
    %88 = vector.broadcast %86 : vector<1x8xf32> to vector<32x8xf32>
    %89 = arith.mulf %87, %88 : vector<32x8xf32>
    %90 = arith.addf %77, %89 : vector<32x8xf32>
    %91 = vector.extract_strided_slice %48 {offsets = [0, 1152], sizes = [32, 384], strides = [1, 1]} : vector<32x3072xf32> to vector<32x384xf32>
    %92 = vector.broadcast %49 : vector<1x384xf32> to vector<32x384xf32>
    %93 = arith.mulf %91, %92 : vector<32x384xf32>
    %cst_44 = arith.constant dense<0.000000e+00> : vector<32xf32>
    %94 = vector.multi_reduction <add>, %93, %cst_44 [1] : vector<32x384xf32> to vector<32xf32>
    %95 = vector.shape_cast %94 : vector<32xf32> to vector<32x1xf32>
    %c3_i32 = arith.constant 3 : i32
    %96 = vector.broadcast %c3_i32 : i32 to vector<1x8xi32>
    %97 = arith.cmpi eq, %50, %96 : vector<1x8xi32>
    %98 = arith.extui %97 : vector<1x8xi1> to vector<1x8xi32>
    %99 = arith.sitofp %98 : vector<1x8xi32> to vector<1x8xf32>
    %100 = vector.broadcast %95 : vector<32x1xf32> to vector<32x8xf32>
    %101 = vector.broadcast %99 : vector<1x8xf32> to vector<32x8xf32>
    %102 = arith.mulf %100, %101 : vector<32x8xf32>
    %103 = arith.addf %90, %102 : vector<32x8xf32>
    %104 = vector.extract_strided_slice %48 {offsets = [0, 1536], sizes = [32, 384], strides = [1, 1]} : vector<32x3072xf32> to vector<32x384xf32>
    %105 = vector.broadcast %49 : vector<1x384xf32> to vector<32x384xf32>
    %106 = arith.mulf %104, %105 : vector<32x384xf32>
    %cst_45 = arith.constant dense<0.000000e+00> : vector<32xf32>
    %107 = vector.multi_reduction <add>, %106, %cst_45 [1] : vector<32x384xf32> to vector<32xf32>
    %108 = vector.shape_cast %107 : vector<32xf32> to vector<32x1xf32>
    %c4_i32 = arith.constant 4 : i32
    %109 = vector.broadcast %c4_i32 : i32 to vector<1x8xi32>
    %110 = arith.cmpi eq, %50, %109 : vector<1x8xi32>
    %111 = arith.extui %110 : vector<1x8xi1> to vector<1x8xi32>
    %112 = arith.sitofp %111 : vector<1x8xi32> to vector<1x8xf32>
    %113 = vector.broadcast %108 : vector<32x1xf32> to vector<32x8xf32>
    %114 = vector.broadcast %112 : vector<1x8xf32> to vector<32x8xf32>
    %115 = arith.mulf %113, %114 : vector<32x8xf32>
    %116 = arith.addf %103, %115 : vector<32x8xf32>
    %117 = vector.extract_strided_slice %48 {offsets = [0, 1920], sizes = [32, 384], strides = [1, 1]} : vector<32x3072xf32> to vector<32x384xf32>
    %118 = vector.broadcast %49 : vector<1x384xf32> to vector<32x384xf32>
    %119 = arith.mulf %117, %118 : vector<32x384xf32>
    %cst_46 = arith.constant dense<0.000000e+00> : vector<32xf32>
    %120 = vector.multi_reduction <add>, %119, %cst_46 [1] : vector<32x384xf32> to vector<32xf32>
    %121 = vector.shape_cast %120 : vector<32xf32> to vector<32x1xf32>
    %c5_i32 = arith.constant 5 : i32
    %122 = vector.broadcast %c5_i32 : i32 to vector<1x8xi32>
    %123 = arith.cmpi eq, %50, %122 : vector<1x8xi32>
    %124 = arith.extui %123 : vector<1x8xi1> to vector<1x8xi32>
    %125 = arith.sitofp %124 : vector<1x8xi32> to vector<1x8xf32>
    %126 = vector.broadcast %121 : vector<32x1xf32> to vector<32x8xf32>
    %127 = vector.broadcast %125 : vector<1x8xf32> to vector<32x8xf32>
    %128 = arith.mulf %126, %127 : vector<32x8xf32>
    %129 = arith.addf %116, %128 : vector<32x8xf32>
    %130 = vector.extract_strided_slice %48 {offsets = [0, 2304], sizes = [32, 384], strides = [1, 1]} : vector<32x3072xf32> to vector<32x384xf32>
    %131 = vector.broadcast %49 : vector<1x384xf32> to vector<32x384xf32>
    %132 = arith.mulf %130, %131 : vector<32x384xf32>
    %cst_47 = arith.constant dense<0.000000e+00> : vector<32xf32>
    %133 = vector.multi_reduction <add>, %132, %cst_47 [1] : vector<32x384xf32> to vector<32xf32>
    %134 = vector.shape_cast %133 : vector<32xf32> to vector<32x1xf32>
    %c6_i32 = arith.constant 6 : i32
    %135 = vector.broadcast %c6_i32 : i32 to vector<1x8xi32>
    %136 = arith.cmpi eq, %50, %135 : vector<1x8xi32>
    %137 = arith.extui %136 : vector<1x8xi1> to vector<1x8xi32>
    %138 = arith.sitofp %137 : vector<1x8xi32> to vector<1x8xf32>
    %139 = vector.broadcast %134 : vector<32x1xf32> to vector<32x8xf32>
    %140 = vector.broadcast %138 : vector<1x8xf32> to vector<32x8xf32>
    %141 = arith.mulf %139, %140 : vector<32x8xf32>
    %142 = arith.addf %129, %141 : vector<32x8xf32>
    %143 = vector.extract_strided_slice %48 {offsets = [0, 2688], sizes = [32, 384], strides = [1, 1]} : vector<32x3072xf32> to vector<32x384xf32>
    %144 = vector.broadcast %49 : vector<1x384xf32> to vector<32x384xf32>
    %145 = arith.mulf %143, %144 : vector<32x384xf32>
    %cst_48 = arith.constant dense<0.000000e+00> : vector<32xf32>
    %146 = vector.multi_reduction <add>, %145, %cst_48 [1] : vector<32x384xf32> to vector<32xf32>
    %147 = vector.shape_cast %146 : vector<32xf32> to vector<32x1xf32>
    %c7_i32 = arith.constant 7 : i32
    %148 = vector.broadcast %c7_i32 : i32 to vector<1x8xi32>
    %149 = arith.cmpi eq, %50, %148 : vector<1x8xi32>
    %150 = arith.extui %149 : vector<1x8xi1> to vector<1x8xi32>
    %151 = arith.sitofp %150 : vector<1x8xi32> to vector<1x8xf32>
    %152 = vector.broadcast %147 : vector<32x1xf32> to vector<32x8xf32>
    %153 = vector.broadcast %151 : vector<1x8xf32> to vector<32x8xf32>
    %154 = arith.mulf %152, %153 : vector<32x8xf32>
    %155 = arith.addf %142, %154 : vector<32x8xf32>
    %cst_49 = arith.constant 3.906250e-03 : f32
    %156 = vector.broadcast %cst_49 : f32 to vector<32x8xf32>
    %157 = arith.mulf %155, %156 : vector<32x8xf32>
    %cst_50 = arith.constant 0.000000e+00 : f32
    %158 = vector.broadcast %cst_50 : f32 to vector<96x8xf32>
    %159 = tpu.concatenate %157, %158 in 0 : vector<32x8xf32>, vector<96x8xf32> -> vector<128x8xf32>
    %160 = tpu.transpose %159, [1, 0] : vector<128x8xf32> -> vector<8x128xf32>
    %c0_51 = arith.constant 0 : index
    %c0_52 = arith.constant 0 : index
    %161 = vector.load %arg5[%c0_51, %c0_52] : memref<8x128xf32, #tpu.memory_space<vmem>>, vector<8x128xf32>
    tpu.vector_store %arg5[%c0_51, %c0_52], %160 {strides = array<i32>} : memref<8x128xf32, #tpu.memory_space<vmem>>, vector<8x128xf32>,
    return
  }
  func.func @transform_0(%arg0: i32) -> (i32, i32) {
    %c0_i32 = arith.constant 0 : i32
    %c0_i32_0 = arith.constant 0 : i32
    return %c0_i32, %arg0 : i32, i32
  }
  func.func @transform_1(%arg0: i32) -> (i32, i32, i32) {
    %c0_i32 = arith.constant 0 : i32
    %c0_i32_0 = arith.constant 0 : i32
    %c0_i32_1 = arith.constant 0 : i32
    %c0_i32_2 = arith.constant 0 : i32
    return %c0_i32, %c0_i32_0, %c0_i32_1 : i32, i32, i32
  }
  func.func @transform_2(%arg0: i32) -> (i32, i32) {
    %c0_i32 = arith.constant 0 : i32
    %c0_i32_0 = arith.constant 0 : i32
    %c0_i32_1 = arith.constant 0 : i32
    return %c0_i32, %c0_i32_0 : i32, i32
  }
  func.func @transform_3(%arg0: i32) -> (i32, i32) {
    %c0_i32 = arith.constant 0 : i32
    %c0_i32_0 = arith.constant 0 : i32
    %c0_i32_1 = arith.constant 0 : i32
    return %c0_i32, %c0_i32_0 : i32, i32
  }
  func.func @transform_4(%arg0: i32) -> (i32, i32) {
    %c0_i32 = arith.constant 0 : i32
    %c0_i32_0 = arith.constant 0 : i32
    return %arg0, %c0_i32 : i32, i32
  }
}

module attributes {stable_mosaic.version = 11 : i64} {
  func.func @attn_classifier_kernel(%arg0: memref<2x8x128xf32, #tpu.memory_space<vmem>>, %arg1: memref<128x128xf32, #tpu.memory_space<vmem>>, %arg2: memref<1x128xf32, #tpu.memory_space<vmem>>, %arg3: memref<1x128xf32, #tpu.memory_space<vmem>>, %arg4: memref<128x128xf32, #tpu.memory_space<vmem>>, %arg5: memref<1x128xf32, #tpu.memory_space<vmem>>, %arg6: memref<2x128xf32, #tpu.memory_space<vmem>>) attributes {dimension_semantics = [], scalar_prefetch = 0 : i64, scratch_operands = 0 : i64, tpu.core_type = #tpu.core_type<tc>} {
    %c0 = arith.constant 0 : index
    %c0_0 = arith.constant 0 : index
    %c0_1 = arith.constant 0 : index
    %0 = vector.load %arg0[%c0, %c0_0, %c0_1] : memref<2x8x128xf32, #tpu.memory_space<vmem>>, vector<2x8x128xf32>
    %1 = vector.shape_cast %0 : vector<2x8x128xf32> to vector<16x128xf32>
    %c0_2 = arith.constant 0 : index
    %c0_3 = arith.constant 0 : index
    %2 = vector.load %arg1[%c0_2, %c0_3] : memref<128x128xf32, #tpu.memory_space<vmem>>, vector<128x128xf32>
    %cst = arith.constant dense<0.000000e+00> : vector<16x128xf32>
    %3 = tpu.matmul %1, %2, %cst {dimension_numbers = #tpu.dot_dimension_numbers<[1], [0], [0], [1], [0, 0, 1, 1], [], []>} : vector<16x128xf32>, vector<128x128xf32>, vector<16x128xf32> -> vector<16x128xf32>
    %c0_4 = arith.constant 0 : index
    %c0_5 = arith.constant 0 : index
    %4 = vector.load %arg2[%c0_4, %c0_5] : memref<1x128xf32, #tpu.memory_space<vmem>>, vector<1x128xf32>
    %5 = vector.broadcast %4 : vector<1x128xf32> to vector<16x128xf32>
    %6 = arith.addf %3, %5 : vector<16x128xf32>
    %7 = math.tanh %6 : vector<16x128xf32>
    %8 = vector.shape_cast %7 : vector<16x128xf32> to vector<2x8x128xf32>
    %c0_6 = arith.constant 0 : index
    %c0_7 = arith.constant 0 : index
    %9 = vector.load %arg3[%c0_6, %c0_7] : memref<1x128xf32, #tpu.memory_space<vmem>>, vector<1x128xf32>
    %10 = vector.shape_cast %9 : vector<1x128xf32> to vector<1x1x128xf32>
    %11 = vector.broadcast %10 : vector<1x1x128xf32> to vector<2x8x128xf32>
    %12 = arith.mulf %8, %11 : vector<2x8x128xf32>
    %cst_8 = arith.constant dense<0.000000e+00> : vector<2x8xf32>
    %13 = vector.multi_reduction <add>, %12, %cst_8 [2] : vector<2x8x128xf32> to vector<2x8xf32>
    %14 = vector.shape_cast %13 : vector<2x8xf32> to vector<2x8x1xf32>
    %cst_9 = arith.constant dense<0xFF800000> : vector<2x1xf32>
    %15 = vector.multi_reduction <maximumf>, %14, %cst_9 [1] : vector<2x8x1xf32> to vector<2x1xf32>
    %16 = vector.shape_cast %15 : vector<2x1xf32> to vector<2x1x1xf32>
    %17 = vector.broadcast %16 : vector<2x1x1xf32> to vector<2x8x1xf32>
    %18 = arith.subf %14, %17 : vector<2x8x1xf32>
    %19 = math.exp %18 : vector<2x8x1xf32>
    %cst_10 = arith.constant dense<0.000000e+00> : vector<2x1xf32>
    %20 = vector.multi_reduction <add>, %19, %cst_10 [1] : vector<2x8x1xf32> to vector<2x1xf32>
    %21 = vector.shape_cast %20 : vector<2x1xf32> to vector<2x1x1xf32>
    %22 = tpu.reciprocal %21 {approx = true} : vector<2x1x1xf32> -> vector<2x1x1xf32>
    %23 = vector.broadcast %22 : vector<2x1x1xf32> to vector<2x8x1xf32>
    %24 = arith.mulf %19, %23 : vector<2x8x1xf32>
    %25 = vector.broadcast %24 : vector<2x8x1xf32> to vector<2x8x128xf32>
    %26 = arith.mulf %25, %0 : vector<2x8x128xf32>
    %cst_11 = arith.constant dense<0.000000e+00> : vector<2x128xf32>
    %27 = vector.multi_reduction <add>, %26, %cst_11 [1] : vector<2x8x128xf32> to vector<2x128xf32>
    %c0_12 = arith.constant 0 : index
    %c0_13 = arith.constant 0 : index
    %28 = vector.load %arg4[%c0_12, %c0_13] : memref<128x128xf32, #tpu.memory_space<vmem>>, vector<128x128xf32>
    %cst_14 = arith.constant dense<0.000000e+00> : vector<2x128xf32>
    %29 = tpu.matmul %27, %28, %cst_14 {dimension_numbers = #tpu.dot_dimension_numbers<[1], [0], [0], [1], [0, 0, 1, 1], [], []>} : vector<2x128xf32>, vector<128x128xf32>, vector<2x128xf32> -> vector<2x128xf32>
    %c0_15 = arith.constant 0 : index
    %c0_16 = arith.constant 0 : index
    %30 = vector.load %arg5[%c0_15, %c0_16] : memref<1x128xf32, #tpu.memory_space<vmem>>, vector<1x128xf32>
    %31 = vector.broadcast %30 : vector<1x128xf32> to vector<2x128xf32>
    %32 = arith.addf %29, %31 : vector<2x128xf32>
    %c0_17 = arith.constant 0 : index
    %c0_18 = arith.constant 0 : index
    %33 = vector.load %arg6[%c0_17, %c0_18] : memref<2x128xf32, #tpu.memory_space<vmem>>, vector<2x128xf32>
    tpu.vector_store %arg6[%c0_17, %c0_18], %32 {strides = array<i32>} : memref<2x128xf32, #tpu.memory_space<vmem>>, vector<2x128xf32>,
    return
  }
}

</mosaic_0001>

<bundles_post_ra>
// kernel: axial3d_forward.3
= control target key start
LH: loop header
LB: loop body
LE: loop exit
PB: predicated region body
PF: predicated region fallthrough
CT: control target
= control target key end

     0   :  { %s407_s0 = inlined_call_operand.vmem [shape: f32[2,8,128], index: 0, kind: input, shape index: {}]   ;;  %s408_s1 = inlined_call_operand.vmem [shape: f32[128,128], index: 1, kind: input, shape index: {}]   ;;  %s409_s2 = inlined_call_operand.vmem [shape: f32[1,128], index: 2, kind: input, shape index: {}]   ;;  %s410_s3 = inlined_call_operand.vmem [shape: f32[1,128], index: 3, kind: input, shape index: {}]   ;;  %s411_s4 = inlined_call_operand.vmem [shape: f32[128,128], index: 4, kind: input, shape index: {}]   ;;  %s412_s5 = inlined_call_operand.vmem [shape: f32[1,128], index: 5, kind: input, shape index: {}]   ;;  %s413_s6 = inlined_call_operand.hbm [shape: f32[2,128], index: 6, kind: output, shape index: {}]  }
   0x1   :  { %v41_v0 = vld [vmem:[%s408_s1 + $0x78] sm:$0xff]  ;;  %v40_v1 = vld [vmem:[%s408_s1 + $0x70] sm:$0xff]  ;;  %v39_v2 = vld [vmem:[%s408_s1 + $0x68] sm:$0xff] }
   0x2   :  { %46 = vmatpush.msra.mxu0 %v41_v0  ;;  %191 = vmatpush.msra.mxu2 %v41_v0  ;;  %v38_v3 = vld [vmem:[%s408_s1 + $0x60] sm:$0xff]  ;;  %v37_v4 = vld [vmem:[%s408_s1 + $0x58] sm:$0xff] }
   0x4   :  { %47 = vmatpush.msra.mxu0 %v40_v1  ;;  %192 = vmatpush.msra.mxu2 %v40_v1 }
   0x6   :  { %48 = vmatpush.msra.mxu0 %v39_v2  ;;  %193 = vmatpush.msra.mxu2 %v39_v2 }
   0x8   :  { %49 = vmatpush.msra.mxu0 %v38_v3  ;;  %194 = vmatpush.msra.mxu2 %v38_v3 }
   0x9   :  { %11 = vsyncpa [#allocation3], 0  ;;  %v36_v5 = vld [vmem:[%s408_s1 + $0x50] sm:$0xff]  ;;  %v35_v6 = vld [vmem:[%s408_s1 + $0x48] sm:$0xff]  ;;  %vm151_vm0 = vcmask 1041409   ;;  %s249_s14 = smov [#allocation2]  }
   0xa   :  { %50 = vmatpush.msra.mxu0 %v37_v4  ;;  %195 = vmatpush.msra.mxu2 %v37_v4  ;;  %v34_v7 = vld [vmem:[%s408_s1 + $0x40] sm:$0xff]  ;;  %v33_v8 = vld [vmem:[%s408_s1 + $0x38] sm:$0xff]  ;;  %v32_v9 = vld [vmem:[%s408_s1 + $0x30] sm:$0xff]  ;;  %s180_s15 = sshll.u32 %s249_s14, 4  ;;  %s182_s18 = sshll.u32 %s413_s6, 4  ;;  %s181_s15 = int_to_ptr.vmem [resolvable:$true] %s180_s15  ;;  %s183_s18 = int_to_ptr.hbm [resolvable:$true] %s182_s18 }
   0xb   :  { %v31_v10 = vld [vmem:[%s408_s1 + $0x28] sm:$0xff]  ;;  %v30_v11 = vld [vmem:[%s408_s1 + $0x20] sm:$0xff]  ;;  %v29_v12 = vld [vmem:[%s408_s1 + $0x18] sm:$0xff] }
   0xc   :  { %51 = vmatpush.msra.mxu0 %v36_v5  ;;  %196 = vmatpush.msra.mxu2 %v36_v5  ;;  %v28_v13 = vld [vmem:[%s408_s1 + $0x10] sm:$0xff]  ;;  %v27_v14 = vld [vmem:[%s408_s1 + $0x8] sm:$0xff]  ;;  %v26_v15 = vld [vmem:[%s408_s1] sm:$0xff] }
   0xd   :  { %v336_v16 = vld [vmem:[%s407_s0] sm:$0xff]  ;;  %v341_v17 = vld [vmem:[%s407_s0 + $0x8] sm:$0xff]  ;;  %v144_v31 = vld [vmem:[%s411_s4 + $0x78] sm:$0xff] }
   0xe   :  { %52 = vmatpush.msra.mxu0 %v35_v6  ;;  %197 = vmatpush.msra.mxu2 %v35_v6  ;;  %v208_v18 = vld [vmem:[%s409_s2] ss:$0 sm:$0xff]  ;;  %v143_v33 = vld [vmem:[%s411_s4 + $0x70] sm:$0xff]  ;;  %v142_v34 = vld [vmem:[%s411_s4 + $0x68] sm:$0xff] }
   0xf   :  { %v209_v22 = vld [vmem:[%s410_s3] ss:$0 sm:$0xff]  ;;  %154 = vmatpush.msra.mxu1 %v144_v31  ;;  %v140_v40 = vld [vmem:[%s411_s4 + $0x58] sm:$0xff]  ;;  %v139_v43 = vld [vmem:[%s411_s4 + $0x50] sm:$0xff] }
  0x10   :  { %53 = vmatpush.msra.mxu0 %v34_v7  ;;  %198 = vmatpush.msra.mxu2 %v34_v7  ;;  %v141_v37 = vld [vmem:[%s411_s4 + $0x60] sm:$0xff]  ;;  %v138_v46 = vld [vmem:[%s411_s4 + $0x48] sm:$0xff]  ;;  %v136_v51 = vld [vmem:[%s411_s4 + $0x38] sm:$0xff] }
  0x11   :  { %155 = vmatpush.msra.mxu1 %v143_v33  ;;  %v137_v49 = vld [vmem:[%s411_s4 + $0x40] sm:$0xff]  ;;  %v135_v53 = vld [vmem:[%s411_s4 + $0x30] sm:$0xff]  ;;  %v134_v55 = vld [vmem:[%s411_s4 + $0x28] sm:$0xff] }
  0x12   :  { %54 = vmatpush.msra.mxu0 %v33_v8  ;;  %199 = vmatpush.msra.mxu2 %v33_v8  ;;  %v133_v59 = vld [vmem:[%s411_s4 + $0x20] sm:$0xff]  ;;  %v132_v61 = vld [vmem:[%s411_s4 + $0x18] sm:$0xff]  ;;  %v131_v63 = vld [vmem:[%s411_s4 + $0x10] sm:$0xff] }
  0x13   :  { %156 = vmatpush.msra.mxu1 %v142_v34  ;;  %v130_v1 = vld [vmem:[%s411_s4 + $0x8] sm:$0xff]  ;;  %v129_v4 = vld [vmem:[%s411_s4] sm:$0xff] }
  0x14   :  { %55 = vmatpush.msra.mxu0 %v32_v9  ;;  %200 = vmatpush.msra.mxu2 %v32_v9 }
  0x15   :  { %157 = vmatpush.msra.mxu1 %v141_v37 }
  0x16   :  { %56 = vmatpush.msra.mxu0 %v31_v10  ;;  %201 = vmatpush.msra.mxu2 %v31_v10 }
  0x17   :  { %158 = vmatpush.msra.mxu1 %v140_v40 }
  0x18   :  { %57 = vmatpush.msra.mxu0 %v30_v11  ;;  %202 = vmatpush.msra.mxu2 %v30_v11 }
  0x19   :  { %159 = vmatpush.msra.mxu1 %v139_v43 }
  0x1a   :  { %58 = vmatpush.msra.mxu0 %v29_v12  ;;  %203 = vmatpush.msra.mxu2 %v29_v12 }
  0x1b   :  { %160 = vmatpush.msra.mxu1 %v138_v46 }
  0x1c   :  { %59 = vmatpush.msra.mxu0 %v28_v13  ;;  %204 = vmatpush.msra.mxu2 %v28_v13 }
  0x1d   :  { %161 = vmatpush.msra.mxu1 %v137_v49 }
  0x1e   :  { %60 = vmatpush.msra.mxu0 %v27_v14  ;;  %205 = vmatpush.msra.mxu2 %v27_v14 }
  0x1f   :  { %162 = vmatpush.msra.mxu1 %v136_v51 }
  0x20   :  { %61 = vmatpush.msra.mxu0 %v26_v15  ;;  %206 = vmatpush.msra.mxu2 %v26_v15 }
  0x21   :  { %62 = vmatmul.f32.vlgmr.msra.gmra.mxu0 %v336_v16  ;;  %65 = vmatmul.f32.vlgmr.msra.gmra.mxu2 %v341_v17 }
  0x22   :  { %163 = vmatpush.msra.mxu1 %v135_v53 }
  0x24   :  { %164 = vmatpush.msra.mxu1 %v134_v55 }
  0x26   :  { %165 = vmatpush.msra.mxu1 %v133_v59 }
  0x28   :  { %166 = vmatpush.msra.mxu1 %v132_v61 }
  0x2a   :  { %167 = vmatpush.msra.mxu1 %v131_v63 }
  0x2c   :  { %168 = vmatpush.msra.mxu1 %v130_v1 }
  0x2e   :  { %169 = vmatpush.msra.mxu1 %v129_v4 }
  0x9e   :  { %v63_v19 = vpop.f32.mrf.mxu0 }
  0x9f   :  { %v64_v20 = vadd.f32 %v208_v18, %v63_v19 }
  0xa1   :  { %211 = vtanh.f32 %v64_v20 }
  0xa4   :  { %v66_v21 = vpop.f32.mrf.mxu2 }
  0xa5   :  { %v67_v23 = vadd.f32 %v208_v18, %v66_v21 }
  0xa7   :  { %v212_v24 = vpop.eup %211  ;;  %213 = vtanh.f32 %v67_v23 }
  0xa8   :  { %v75_v25 = vmul.f32 %v212_v24, %v209_v22 }
  0xaa   :  { %77 = vadd.xlane.f32.xlu0 %v75_v25 }
  0xad   :  { %v214_v26 = vpop.eup %213 }
  0xae   :  { %v76_v27 = vmul.f32 %v214_v26, %v209_v22 }
  0xb2   :  { %79 = vadd.xlane.f32.xlu0 %v76_v27 }
 0x11d   :  { %v78_v28 = vpop.xlane.xlu0 %77 }
 0x11e   :  { %v81_v29 = vrot.slane %v78_v28, 4 }
 0x120   :  { %v82_v30 = vmax.f32 %v78_v28, %v81_v29 }
 0x122   :  { %v83_v32 = vrot.slane %v82_v30, 2 }
 0x124   :  { %v84_v35 = vmax.f32 %v82_v30, %v83_v32 }
 0x125   :  { %v80_v36 = vpop.xlane.xlu0 %79 }
 0x126   :  { %v85_v38 = vrot.slane %v84_v35, 1  ;;  %v87_v39 = vrot.slane %v80_v36, 4 }
 0x128   :  { %v86_v41 = vmax.f32 %v84_v35, %v85_v38  ;;  %v88_v42 = vmax.f32 %v80_v36, %v87_v39 }
 0x12a   :  { %v93_v44 = vsub.f32 %v78_v28, %v86_v41  ;;  %v89_v45 = vrot.slane %v88_v42, 2 }
 0x12c   :  { %v95_v47 = vmul.f32 1.442695, %v93_v44  ;;  %v90_v48 = vmax.f32 %v88_v42, %v89_v45 }
 0x12e   :  { %215 = vpow2.f32 %v95_v47  ;;  %v91_v50 = vrot.slane %v90_v48, 1 }
 0x130   :  { %v92_v52 = vmax.f32 %v90_v48, %v91_v50 }
 0x132   :  { %v94_v54 = vsub.f32 %v80_v36, %v92_v52 }
 0x134   :  { %v216_v56 = vpop.eup %215  ;;  %v97_v57 = vmul.f32 1.442695, %v94_v54 }
 0x135   :  { %v99_v58 = vrot.slane %v216_v56, 4 }
 0x136   :  { %217 = vpow2.f32 %v97_v57 }
 0x137   :  { %v100_v60 = vadd.f32 %v216_v56, %v99_v58 }
 0x139   :  { %v101_v62 = vrot.slane %v100_v60, 2 }
 0x13b   :  { %v102_v0 = vadd.f32 %v101_v62, %v100_v60 }
 0x13c   :  { %v218_v2 = vpop.eup %217 }
 0x13d   :  { %v105_v3 = vrot.slane %v218_v2, 4  ;;  %v103_v5 = vrot.slane %v102_v0, 1 }
 0x13f   :  { %v106_v6 = vadd.f32 %v218_v2, %v105_v3  ;;  %v104_v7 = vadd.f32 %v103_v5, %v102_v0 }
 0x141   :  { %v107_v8 = vrot.slane %v106_v6, 2  ;;  %219 = vrcp.f32 %v104_v7 }
 0x143   :  { %v108_v9 = vadd.f32 %v107_v8, %v106_v6 }
 0x145   :  { %v109_v10 = vrot.slane %v108_v9, 1 }
 0x147   :  { %v220_v11 = vpop.eup %219  ;;  %v110_v12 = vadd.f32 %v109_v10, %v108_v9 }
 0x148   :  { %v113_v13 = vmul.f32 %v220_v11, %v216_v56 }
 0x149   :  { %221 = vrcp.f32 %v110_v12 }
 0x14a   :  { %v115_v14 = vmul.f32 %v113_v13, %v336_v16  ;;  %v210_v16 = vld [vmem:[%s412_s5] ss:$0 sm:$0xff] }
 0x14c   :  { %v117_v15 = vrot.slane %v115_v14, 4 }
 0x14e   :  { %v118_v18 = vadd.f32 %v117_v15, %v115_v14 }
 0x14f   :  { %v222_v19 = vpop.eup %221 }
 0x150   :  { %v114_v20 = vmul.f32 %v222_v19, %v218_v2  ;;  %v119_v22 = vrot.slane %v118_v18, 2 }
 0x152   :  { %v116_v21 = vmul.f32 %v114_v20, %v341_v17  ;;  %v120_v24 = vadd.f32 %v119_v22, %v118_v18 }
 0x154   :  { %v123_v23 = vrot.slane %v116_v21, 4  ;;  %v121_v27 = vrot.slane %v120_v24, 1 }
 0x156   :  { %v124_v25 = vadd.f32 %v123_v23, %v116_v21  ;;  %v122_v30 = vadd.f32 %v121_v27, %v120_v24 }
 0x158   :  { %v125_v26 = vrot.slane %v124_v25, 2 }
 0x15a   :  { %v126_v28 = vadd.f32 %v125_v26, %v124_v25 }
 0x15c   :  { %v127_v29 = vrot.slane %v126_v28, 1 }
 0x15e   :  { %v128_v31 = vadd.f32 %v127_v29, %v126_v28 }
 0x160   :  { %v152_v32 = vsel %vm151_vm0, %v128_v31, %v122_v30 }
 0x161   :  { %170 = vmatmul.f32.vlgmr.msra.gmra.mxu1 %v152_v32 }
 0x1de   :  { %v171_v17 = vpop.f32.mrf.mxu1 }
 0x1df   :  { %v172_v33 = vadd.f32 %v210_v16, %v171_v17 }
 0x1e1   :  { %174 = vst [vmem:[#allocation2] sm:$0x3] %v172_v33 }
 0x1e2   :  { %185 = dma.vmem_to_hbm [thread:$0]  %s181_s15, 32, %s183_s18, [#allocation3]  }
 0x1e3   :  { %247 = dma.done.wait [#allocation3], 32  }
 0x1e4   :  { %248 = vsyncadd [#allocation3], 4294967264 }
 0x1e5   :  { %190 = vsyncpa [#allocation3], 1 }

// kernel: axial3d_forward.2
= control target key start
LH: loop header
LB: loop body
LE: loop exit
PB: predicated region body
PF: predicated region fallthrough
CT: control target
= control target key end

     0   :  { %s8262_s15 = smov 0   ;;  %s12628_s0 = inlined_call_operand.vmem [shape: bf16[3,6656], index: 0, kind: input, shape index: {}]   ;;  %s12629_s1 = inlined_call_operand.vmem [shape: bf16[9,32,3], index: 1, kind: input, shape index: {}]   ;;  %s12630_s2 = inlined_call_operand.vmem [shape: f32[32,1], index: 2, kind: input, shape index: {}]   ;;  %s12631_s3 = inlined_call_operand.vmem [shape: f32[1,384], index: 3, kind: input, shape index: {}]   ;;  %s12632_s4 = inlined_call_operand.vmem [shape: f32[16,128], index: 4, kind: output, shape index: {}]  }
   0x1 LB: > { %s8268_s16 = sadd.s32 4294967295, %s8224_s15   ;;  %p7629_p0 = scmp.ge.s32.totalorder %s8224_s15, 1  ;;  %s8224_s15 = sphi %s8262_s15, %s14_s15  }
   0x2   : > { %p163_p1 = scmp.lt.s32.totalorder %s8224_s15, 3 }
   0x4   : > { %p164_p2 = pnand %p7629_p0, %p163_p1 }
   0x6   : > { %167 = sbr.rel (%p164_p2) target bundleno = 2274 (0x8e2), region = 36 }
   0xb   : > { %s188_s17 = smul.u32 26, %s8268_s16  ;;  %s8226_s22 = smov 18   ;;  %vm372_vm0 = vcmask 1040384   ;;  %vm373_vm1 = vcmask 1041408   ;;  %v8227_v32 = vmov 65535   ;;  %vm340_vm2 = vcmask 146432  }
   0xc   : > { %v374_v33 = vsel %vm372_vm0, 4294967295, %v8227_v32  ;;  %v8336_v42 = vld [vmem:[%s12629_s1 + $0x10] sm:$0xff]  ;;  %vm365_vm3 = vcmask 23552   ;;  %s8228_s25 = smov 19   ;;  %v8366_v61 = vld [vmem:[%s12629_s1 + $0x18] sm:$0xff]  ;;  %vm1022_vm4 = vcmask 154624  }
   0xd   : > { %p189_p3 = scmp.lt.s32.totalorder %s188_s17, 51  ;;  %v8328_v37 = vsel %vm373_vm1, %v374_v33, 0  ;;  %s8229_s30 = smov 17   ;;  %vm1718_vm5 = vcmask 138240   ;;  %vm2510_vm6 = vcmask 7168   ;;  %vm3966_vm7 = vcmask 1039360  }
   0xe   : > { %s8230_s11 = smov 1   ;;  %s8231_s23 = smov 127   ;;  %vm4758_vm8 = vcmask 908288   ;;  %vm5550_vm9 = vcmask 900096   ;;  %vm6342_vm10 = vcmask 891904  }
   0xf   : > { %s13558_s17 = smov (!%p189_p3, %s188_s17), 51  ;;  %s8232_s28 = smov 111  }
  0x10   : > { %s7630_s18 = sshll.u32 %s13558_s17, 1  ;;  %s8233_s5 = smov 110  }
  0x11   : > { %s8276_s21 = scalar_lea.vmem %s12628_s0, %s7630_s18  ;;  %s8234_s10 = smov 109  }
  0x12   : > { %v8279_v0 = vld [vmem:[%s8276_s21 + $0x8] sm:$0xff]  ;;  %v8282_v1 = vld [vmem:[%s8276_s21] sm:$0xff]  ;;  %v8287_v3 = vld [vmem:[%s8276_s21 + $0x10] sm:$0xff]  ;;  %p194_p4 = scmp.lt.s32.totalorder %s8268_s16, 1 }
  0x13   : > { %229 = vst [vmem:[#allocation1 + $0x20] ss:$4 sm:$0xff] %v8279_v0  ;;  %v8294_v9 = vld [vmem:[%s8276_s21 + $0x18] sm:$0xff]  ;;  %v8300_v12 = vld [vmem:[%s8276_s21 + $0x20] sm:$0xff]  ;;  %v8318_v25 = vld [vmem:[%s8276_s21 + $0x28] sm:$0xff] }
  0x14   : > { %226 = vst [vmem:[#allocation1] ss:$4 sm:$0xff] %v8282_v1  ;;  %v8356_v56 = vld [vmem:[%s8276_s21 + $0x30] sm:$0x3]  ;;  %s13560_s16 = smov (!%p194_p4, %s8268_s16), 1 }
  0x15   : > { %s7631_s29 = sshll.u32 %s13560_s16, 3 }
  0x16   : > { %s197_s6 = scalar_lea.vmem %s12632_s4, %s7631_s29 }
  0x1a   : > { %v238_v2 = vld.sshfl [vmem:[#allocation1 + $0x20] sm:$0xff pattern:$0x73625140]  ;;  %v244_v8 = vld.sshfl [vmem:[#allocation1 + $0x38] sm:$0xff pattern:$0x73625140] }
  0x1b   : > { %298 = vrot.lane.b32.xlu1 %v238_v2, %s8226_s22  ;;  %v234_v4 = vld.sshfl [vmem:[#allocation1 + $0x10] sm:$0xff pattern:$0x73625140]  ;;  %v236_v5 = vld.sshfl [vmem:[#allocation1 + $0x18] sm:$0xff pattern:$0x73625140] }
  0x1c   : > { %294 = vrot.lane.b32.xlu0 %v234_v4, %s8226_s22  ;;  %v230_v6 = vld.sshfl [vmem:[#allocation1] sm:$0xff pattern:$0x73625140]  ;;  %v232_v7 = vld.sshfl [vmem:[#allocation1 + $0x8] sm:$0xff pattern:$0x73625140] }
  0x1d   : > { %292 = vrot.lane.b32.xlu2 %v232_v7, %s8226_s22  ;;  %247 = vst [vmem:[#allocation1] ss:$4 sm:$0xff] %v8287_v3  ;;  %v242_v10 = vld.sshfl [vmem:[#allocation1 + $0x30] sm:$0xff pattern:$0x73625140] }
  0x1e   : > { %v240_v11 = vld.sshfl [vmem:[#allocation1 + $0x28] sm:$0xff pattern:$0x73625140] }
  0x1f   : > { %249 = vst [vmem:[#allocation1 + $0x20] ss:$4 sm:$0xff] %v8294_v9 }
  0x23   : > { %290 = vrot.lane.b32.xlu1 %v230_v6, %s8226_s22 }
  0x24   : > { %296 = vrot.lane.b32.xlu0 %v236_v5, %s8226_s22  ;;  %v250_v13 = vld.sshfl [vmem:[#allocation1] sm:$0xff pattern:$0x73625140]  ;;  %v254_v14 = vld.sshfl [vmem:[#allocation1 + $0x10] sm:$0xff pattern:$0x73625140] }
  0x25   : > { %302 = vrot.lane.b32.xlu2 %v242_v10, %s8226_s22  ;;  %v252_v15 = vld.sshfl [vmem:[#allocation1 + $0x8] sm:$0xff pattern:$0x73625140]  ;;  %v256_v16 = vld.sshfl [vmem:[#allocation1 + $0x18] sm:$0xff pattern:$0x73625140] }
  0x26   : > { %267 = vst [vmem:[#allocation1] ss:$4 sm:$0xff] %v8300_v12  ;;  %v258_v17 = vld.sshfl [vmem:[#allocation1 + $0x20] sm:$0xff pattern:$0x73625140] }
  0x27   : > { %v262_v18 = vld.sshfl [vmem:[#allocation1 + $0x30] sm:$0xff pattern:$0x73625140]  ;;  %v264_v19 = vld.sshfl [vmem:[#allocation1 + $0x38] sm:$0xff pattern:$0x73625140] }
  0x28   : > { %v260_v20 = vld.sshfl [vmem:[#allocation1 + $0x28] sm:$0xff pattern:$0x73625140] }
  0x29   : > { %269 = vst [vmem:[#allocation1 + $0x20] ss:$4 sm:$0xff] %v8318_v25 }
  0x2b   : > { %306 = vrot.lane.b32.xlu1 %v250_v13, %s8226_s22 }
  0x2c   : > { %304 = vrot.lane.b32.xlu0 %v244_v8, %s8226_s22 }
  0x2d   : > { %300 = vrot.lane.b32.xlu2 %v240_v11, %s8226_s22  ;;  %v270_v21 = vld.sshfl [vmem:[#allocation1] sm:$0xff pattern:$0x73625140]  ;;  %v274_v22 = vld.sshfl [vmem:[#allocation1 + $0x10] sm:$0xff pattern:$0x73625140] }
  0x2e   : > { %v276_v23 = vld.sshfl [vmem:[#allocation1 + $0x18] sm:$0xff pattern:$0x73625140]  ;;  %v272_v24 = vld.sshfl [vmem:[#allocation1 + $0x8] sm:$0xff pattern:$0x73625140] }
  0x2f   : > { %287 = vst [vmem:[#allocation1] ss:$4 sm:$0xff] %v8356_v56 }
  0x30   : > { %v282_v26 = vld.sshfl [vmem:[#allocation1 + $0x30] sm:$0xff pattern:$0x73625140]  ;;  %v278_v27 = vld.sshfl [vmem:[#allocation1 + $0x20] sm:$0xff pattern:$0x73625140] }
  0x31   : > { %v280_v28 = vld.sshfl [vmem:[#allocation1 + $0x28] sm:$0xff pattern:$0x73625140]  ;;  %v284_v31 = vld.sshfl [vmem:[#allocation1 + $0x38] sm:$0xff pattern:$0x73625140] }
  0x32   : > { %916 = vst [vmem:[#allocation1 + $0x20] ss:$4 sm:$0xff] %v8279_v0 }
  0x33   : > { %312 = vrot.lane.b32.xlu1 %v256_v16, %s8226_s22 }
  0x34   : > { %310 = vrot.lane.b32.xlu0 %v254_v14, %s8226_s22 }
  0x35   : > { %314 = vrot.lane.b32.xlu2 %v258_v17, %s8226_s22 }
  0x36   : > { %v288_v6 = vld.sshfl [vmem:[#allocation1] sm:$0xff pattern:$0x73625140] }
  0x37   : > { %914 = vst [vmem:[#allocation1] ss:$4 sm:$0xff] %v8282_v1 }
  0x39   : > { %v925_v54 = vld.sshfl [vmem:[#allocation1 + $0x20] sm:$0xff pattern:$0x73625140]  ;;  %v929_v2 = vld.sshfl [vmem:[#allocation1 + $0x30] sm:$0xff pattern:$0x73625140] }
  0x3a   : > { %v927_v13 = vld.sshfl [vmem:[#allocation1 + $0x28] sm:$0xff pattern:$0x73625140]  ;;  %v931_v33 = vld.sshfl [vmem:[#allocation1 + $0x38] sm:$0xff pattern:$0x73625140] }
  0x3b   : > { %318 = vrot.lane.b32.xlu1 %v262_v18, %s8226_s22  ;;  %934 = vst [vmem:[#allocation1 + $0x20] ss:$4 sm:$0xff] %v8294_v9 }
  0x3c   : > { %308 = vrot.lane.b32.xlu0 %v252_v15, %s8226_s22 }
  0x3d   : > { %320 = vrot.lane.b32.xlu2 %v264_v19, %s8226_s22 }
  0x3e   : > { %v921_v15 = vld.sshfl [vmem:[#allocation1 + $0x10] sm:$0xff pattern:$0x73625140]  ;;  %v923_v18 = vld.sshfl [vmem:[#allocation1 + $0x18] sm:$0xff pattern:$0x73625140] }
  0x43   : > { %316 = vrot.lane.b32.xlu1 %v260_v20, %s8226_s22 }
  0x44   : > { %322 = vrot.lane.b32.xlu0 %v270_v21, %s8226_s22  ;;  %v917_v21 = vld.sshfl [vmem:[#allocation1] sm:$0xff pattern:$0x73625140] }
  0x45   : > { %326 = vrot.lane.b32.xlu2 %v274_v22, %s8226_s22 }
  0x4b   : > { %330 = vrot.lane.b32.xlu1 %v278_v27, %s8226_s22 }
  0x4c   : > { %328 = vrot.lane.b32.xlu0 %v276_v23, %s8226_s22  ;;  %v919_v23 = vld.sshfl [vmem:[#allocation1 + $0x8] sm:$0xff pattern:$0x73625140] }
  0x4d   : > { %324 = vrot.lane.b32.xlu2 %v272_v24, %s8226_s22  ;;  %933 = vst [vmem:[#allocation1] ss:$4 sm:$0xff] %v8287_v3 }
  0x53   : > { %336 = vrot.lane.b32.xlu1 %v284_v31, %s8226_s22 }
  0x54   : > { %334 = vrot.lane.b32.xlu0 %v282_v26, %s8226_s22 }
  0x55   : > { %338 = vrot.lane.b32.xlu2 %v288_v6, %s8226_s22 }
  0x5b   : > { %976 = vrot.lane.b32.xlu1 %v921_v15, %s8228_s25 }
  0x5c   : > { %332 = vrot.lane.b32.xlu0 %v280_v28, %s8226_s22 }
  0x5d   : > { %978 = vrot.lane.b32.xlu2 %v923_v18, %s8228_s25 }
  0x63   : > { %972 = vrot.lane.b32.xlu1 %v917_v21, %s8228_s25 }
  0x64   : > { %980 = vrot.lane.b32.xlu0 %v925_v54, %s8228_s25  ;;  %v943_v54 = vld.sshfl [vmem:[#allocation1 + $0x20] sm:$0xff pattern:$0x73625140] }
  0x65   : > { %974 = vrot.lane.b32.xlu2 %v919_v23, %s8228_s25 }
  0x6b   : > { %986 = vrot.lane.b32.xlu1 %v931_v33, %s8228_s25 }
  0x6c   : > { %984 = vrot.lane.b32.xlu0 %v929_v2, %s8228_s25 }
  0x74   : > { %982 = vrot.lane.b32.xlu0 %v927_v13, %s8228_s25 }
  0x77   : > { %v293_v29 = vpop.permute.xlu2 %292 }
  0x7c   : > { %996 = vrot.lane.b32.xlu0 %v943_v54, %s8228_s25 }
  0x7f   : > { %v303_v30 = vpop.permute.xlu2 %302 }
  0x87   : > { %v301_v34 = vpop.permute.xlu2 %300 }
  0x88   : > { %v346_v35 = vsel %vm340_vm2, %v301_v34, %v303_v30 }
  0x89   : > { %v392_v40 = vand.u32 %v8328_v37, %v346_v35 }
  0x8d   : > { %v299_v36 = vpop.permute.xlu1 %298 }
  0x8e   : > { %v295_v38 = vpop.permute.xlu0 %294  ;;  %v345_v46 = vsel %vm340_vm2, %v299_v36, %v301_v34 }
  0x8f   : > { %v342_v39 = vsel %vm340_vm2, %v293_v29, %v295_v38  ;;  %v389_v52 = vand.u32 %v8328_v37, %v345_v46  ;;  %v315_v62 = vpop.permute.xlu2 %314 }
  0x90   : > { %v380_v41 = vand.u32 %v8328_v37, %v342_v39  ;;  %v937_v39 = vld.sshfl [vmem:[#allocation1 + $0x8] sm:$0xff pattern:$0x73625140] }
  0x92   : > { %474 = vmatpush.bf16.msra.mxu1 %v380_v41 }
  0x95   : > { %7646 = vmatmul.msk.bf16.vlgmr.msra.gmra.mxu1 %vm365_vm3, %v8336_v42  ;;  %v291_v43 = vpop.permute.xlu1 %290 }
  0x96   : > { %550 = vmatpush.bf16.msrb.mxu1 %v392_v40  ;;  %v297_v44 = vpop.permute.xlu0 %296  ;;  %v341_v45 = vsel %vm340_vm2, %v291_v43, %v293_v29 }
  0x97   : > { %v377_v47 = vand.u32 %v8328_v37, %v341_v45  ;;  %v343_v48 = vsel %vm340_vm2, %v295_v38, %v297_v44  ;;  %v344_v49 = vsel %vm340_vm2, %v297_v44, %v299_v36  ;;  %v321_v26 = vpop.permute.xlu2 %320  ;;  %v939_v38 = vld.sshfl [vmem:[#allocation1 + $0x10] sm:$0xff pattern:$0x73625140] }
  0x98   : > { %v383_v50 = vand.u32 %v8328_v37, %v343_v48  ;;  %v386_v51 = vand.u32 %v8328_v37, %v344_v49  ;;  %992 = vrot.lane.b32.xlu1 %v939_v38, %s8228_s25 }
  0x99   : > { %455 = vmatpush.bf16.msra.mxu0 %v377_v47 }
  0x9a   : > { %493 = vmatpush.bf16.msra.mxu2 %v383_v50  ;;  %512 = vmatpush.bf16.msra.mxu3 %v386_v51  ;;  %v935_v51 = vld.sshfl [vmem:[#allocation1] sm:$0xff pattern:$0x73625140] }
  0x9b   : > { %988 = vrot.lane.b32.xlu2 %v935_v51, %s8228_s25 }
  0x9c   : > { %7644 = vmatmul.msk.bf16.vlgmr.msra.gmra.mxu0 %vm365_vm3, %v8336_v42 }
  0x9d   : > { %531 = vmatpush.bf16.msrb.mxu0 %v389_v52  ;;  %7648 = vmatmul.msk.bf16.vlgmr.msra.gmra.mxu2 %vm365_vm3, %v8336_v42  ;;  %v307_v53 = vpop.permute.xlu1 %306 }
  0x9e   : > { %7650 = vmatmul.msk.bf16.vlgmr.msra.gmra.mxu3 %vm365_vm3, %v8336_v42  ;;  %v305_v55 = vpop.permute.xlu0 %304 }
  0x9f   : > { %v347_v57 = vsel %vm340_vm2, %v303_v30, %v305_v55  ;;  %v348_v58 = vsel %vm340_vm2, %v305_v55, %v307_v53  ;;  %v327_v36 = vpop.permute.xlu2 %326 }
  0xa0   : > { %v395_v59 = vand.u32 %v8328_v37, %v347_v57  ;;  %v398_v60 = vand.u32 %v8328_v37, %v348_v58  ;;  %990 = vrot.lane.b32.xlu1 %v937_v39, %s8228_s25 }
  0xa2   : > { %569 = vmatpush.bf16.msrb.mxu2 %v395_v59  ;;  %588 = vmatpush.bf16.msrb.mxu3 %v398_v60  ;;  %v941_v60 = vld.sshfl [vmem:[#allocation1 + $0x18] sm:$0xff pattern:$0x73625140] }
  0xa3   : > { %994 = vrot.lane.b32.xlu2 %v941_v60, %s8228_s25  ;;  %951 = vst [vmem:[#allocation1] ss:$4 sm:$0xff] %v8300_v12  ;;  %v947_v12 = vld.sshfl [vmem:[#allocation1 + $0x30] sm:$0xff pattern:$0x73625140] }
  0xa5   : > { %7647 = vmatmul.msk.bf16.gmra.mxu1 %vm365_vm3, %v8366_v61  ;;  %v313_v63 = vpop.permute.xlu1 %312 }
  0xa6   : > { %v311_v4 = vpop.permute.xlu0 %310  ;;  %v352_v5 = vsel %vm340_vm2, %v313_v63, %v315_v62 }
  0xa7   : > { %v351_v7 = vsel %vm340_vm2, %v311_v4, %v313_v63  ;;  %v410_v8 = vand.u32 %v8328_v37, %v352_v5  ;;  %v325_v40 = vpop.permute.xlu2 %324  ;;  %v949_v5 = vld.sshfl [vmem:[#allocation1 + $0x38] sm:$0xff pattern:$0x73625140] }
  0xa8   : > { %v407_v10 = vand.u32 %v8328_v37, %v351_v7  ;;  %v358_v41 = vsel %vm340_vm2, %v325_v40, %v327_v36  ;;  %1002 = vrot.lane.b32.xlu0 %v949_v5, %s8228_s25 }
  0xa9   : > { %664 = vmatpush.bf16.msra.mxu3 %v410_v8  ;;  %v428_v43 = vand.u32 %v8328_v37, %v358_v41 }
  0xaa   : > { %645 = vmatpush.bf16.msra.mxu2 %v407_v10  ;;  %v945_v10 = vld.sshfl [vmem:[#allocation1 + $0x28] sm:$0xff pattern:$0x73625140]  ;;  %v953_v13 = vld.sshfl [vmem:[#allocation1] sm:$0xff pattern:$0x73625140] }
  0xab   : > { %1000 = vrot.lane.b32.xlu2 %v947_v12, %s8228_s25  ;;  %952 = vst [vmem:[#allocation1 + $0x20] ss:$4 sm:$0xff] %v8318_v25  ;;  %1004 = vrot.lane.b32.xlu1 %v953_v13, %s8228_s25  ;;  %v959_v21 = vld.sshfl [vmem:[#allocation1 + $0x18] sm:$0xff pattern:$0x73625140] }
  0xac   : > { %7645 = vmatmul.msk.bf16.gmra.mxu0 %vm365_vm3, %v8366_v61 }
  0xad   : > { %7649 = vmatmul.msk.bf16.gmra.mxu2 %vm365_vm3, %v8366_v61  ;;  %v319_v11 = vpop.permute.xlu1 %318 }
  0xae   : > { %7651 = vmatmul.msk.bf16.gmra.mxu3 %vm365_vm3, %v8366_v61  ;;  %v309_v14 = vpop.permute.xlu0 %308  ;;  %v355_v29 = vsel %vm340_vm2, %v319_v11, %v321_v26 }
  0xaf   : > { %v349_v16 = vsel %vm340_vm2, %v307_v53, %v309_v14  ;;  %v350_v17 = vsel %vm340_vm2, %v309_v14, %v311_v4  ;;  %v419_v31 = vand.u32 %v8328_v37, %v355_v29  ;;  %v339_v6 = vpop.permute.xlu2 %338  ;;  %v955_v14 = vld.sshfl [vmem:[#allocation1 + $0x8] sm:$0xff pattern:$0x73625140] }
  0xb0   : > { %v401_v19 = vand.u32 %v8328_v37, %v349_v16  ;;  %v404_v20 = vand.u32 %v8328_v37, %v350_v17 }
  0xb2   : > { %607 = vmatpush.bf16.msra.mxu0 %v401_v19  ;;  %626 = vmatpush.bf16.msra.mxu1 %v404_v20 }
  0xb3   : > { %998 = vrot.lane.b32.xlu2 %v945_v10, %s8228_s25  ;;  %1010 = vrot.lane.b32.xlu1 %v959_v21, %s8228_s25 }
  0xb5   : > { %7654 = vmatmul.msk.bf16.vlgmr.msrb.gmra.mxu1 %vm365_vm3, %v8336_v42  ;;  %v317_v22 = vpop.permute.xlu1 %316 }
  0xb6   : > { %v354_v24 = vsel %vm340_vm2, %v317_v22, %v319_v11  ;;  %v353_v27 = vsel %vm340_vm2, %v315_v62, %v317_v22  ;;  %v323_v32 = vpop.permute.xlu0 %322  ;;  %v957_v11 = vld.sshfl [vmem:[#allocation1 + $0x10] sm:$0xff pattern:$0x73625140] }
  0xb7   : > { %v416_v28 = vand.u32 %v8328_v37, %v354_v24  ;;  %v413_v30 = vand.u32 %v8328_v37, %v353_v27  ;;  %v356_v34 = vsel %vm340_vm2, %v321_v26, %v323_v32  ;;  %v357_v45 = vsel %vm340_vm2, %v323_v32, %v325_v40  ;;  %1008 = vrot.lane.b32.xlu0 %v957_v11, %s8228_s25  ;;  %v979_v15 = vpop.permute.xlu2 %978 }
  0xb8   : > { %v422_v35 = vand.u32 %v8328_v37, %v356_v34  ;;  %v425_v47 = vand.u32 %v8328_v37, %v357_v45  ;;  %969 = vst [vmem:[#allocation1] ss:$4 sm:$0xff] %v8356_v56  ;;  %v965_v56 = vld.sshfl [vmem:[#allocation1 + $0x30] sm:$0xff pattern:$0x73625140] }
  0xb9   : > { %702 = vmatpush.bf16.msrb.mxu1 %v416_v28 }
  0xbb   : > { %1016 = vrot.lane.b32.xlu1 %v965_v56, %s8228_s25 }
  0xbc   : > { %7652 = vmatmul.msk.bf16.vlgmr.msrb.gmra.mxu0 %vm365_vm3, %v8336_v42 }
  0xbd   : > { %7656 = vmatmul.msk.bf16.vlgmr.msrb.gmra.mxu2 %vm365_vm3, %v8336_v42  ;;  %683 = vmatpush.bf16.msrb.mxu0 %v413_v30  ;;  %v331_v49 = vpop.permute.xlu1 %330 }
  0xbe   : > { %7658 = vmatmul.msk.bf16.vlgmr.msrb.gmra.mxu3 %vm365_vm3, %v8336_v42  ;;  %721 = vmatpush.bf16.msrb.mxu2 %v419_v31  ;;  %v329_v44 = vpop.permute.xlu0 %328 }
  0xbf   : > { %740 = vmatpush.bf16.msrb.mxu3 %v422_v35  ;;  %v359_v46 = vsel %vm340_vm2, %v327_v36, %v329_v44  ;;  %v360_v50 = vsel %vm340_vm2, %v329_v44, %v331_v49  ;;  %1006 = vrot.lane.b32.xlu0 %v955_v14, %s8228_s25  ;;  %v975_v22 = vpop.permute.xlu2 %974  ;;  %v970_v14 = vld.sshfl [vmem:[#allocation1] sm:$0xff pattern:$0x73625140] }
  0xc0   : > { %v431_v48 = vand.u32 %v8328_v37, %v359_v46  ;;  %v434_v52 = vand.u32 %v8328_v37, %v360_v50  ;;  %1604 = vst [vmem:[#allocation1] ss:$4 sm:$0xff] %v8282_v1  ;;  %v8599_v1 = vld [vmem:[%s12629_s1] sm:$0xff] }
  0xc5   : > { %7655 = vmatmul.msk.bf16.gmra.mxu1 %vm365_vm3, %v8366_v61  ;;  %v337_v59 = vpop.permute.xlu1 %336 }
  0xc6   : > { %v335_v53 = vpop.permute.xlu0 %334  ;;  %v364_v7 = vsel %vm340_vm2, %v337_v59, %v339_v6 }
  0xc7   : > { %v363_v63 = vsel %vm340_vm2, %v335_v53, %v337_v59  ;;  %v446_v8 = vand.u32 %v8328_v37, %v364_v7  ;;  %v961_v7 = vld.sshfl [vmem:[#allocation1 + $0x20] sm:$0xff pattern:$0x73625140]  ;;  %1020 = vrot.lane.b32.xlu0 %v970_v14, %s8228_s25 }
  0xc8   : > { %v443_v4 = vand.u32 %v8328_v37, %v363_v63  ;;  %1012 = vrot.lane.b32.xlu2 %v961_v7, %s8228_s25 }
  0xcc   : > { %7653 = vmatmul.msk.bf16.gmra.mxu0 %vm365_vm3, %v8366_v61 }
  0xcd   : > { %7657 = vmatmul.msk.bf16.gmra.mxu2 %vm365_vm3, %v8366_v61  ;;  %v977_v27 = vpop.permute.xlu1 %976 }
  0xce   : > { %7659 = vmatmul.msk.bf16.gmra.mxu3 %vm365_vm3, %v8366_v61  ;;  %v333_v55 = vpop.permute.xlu0 %332  ;;  %v1025_v29 = vsel %vm1022_vm4, %v977_v27, %v979_v15  ;;  %v1024_v30 = vsel %vm1022_vm4, %v975_v22, %v977_v27 }
  0xcf   : > { %v362_v57 = vsel %vm340_vm2, %v333_v55, %v335_v53  ;;  %v361_v62 = vsel %vm340_vm2, %v331_v49, %v333_v55  ;;  %v1060_v31 = vand.u32 %v1025_v29, %v8328_v37  ;;  %v1057_v32 = vand.u32 %v1024_v30, %v8328_v37 }
  0xd0   : > { %v440_v58 = vand.u32 %v8328_v37, %v362_v57  ;;  %v437_v2 = vand.u32 %v8328_v37, %v361_v62 }
  0xd5   : > { %7662 = vmatmul.msk.bf16.vlgmr.msra.gmra.mxu1 %vm365_vm3, %v8336_v42  ;;  %v973_v38 = vpop.permute.xlu1 %972 }
  0xd6   : > { %778 = vmatpush.bf16.msra.mxu1 %v428_v43  ;;  %v981_v16 = vpop.permute.xlu0 %980  ;;  %v1023_v40 = vsel %vm1022_vm4, %v973_v38, %v975_v22  ;;  %v963_v43 = vld.sshfl [vmem:[#allocation1 + $0x28] sm:$0xff pattern:$0x73625140] }
  0xd7   : > { %v1026_v17 = vsel %vm1022_vm4, %v979_v15, %v981_v16  ;;  %v1054_v41 = vand.u32 %v1023_v40, %v8328_v37  ;;  %1014 = vrot.lane.b32.xlu1 %v963_v43, %s8228_s25  ;;  %v1614_v43 = vld.sshfl [vmem:[#allocation1 + $0x18] sm:$0xff pattern:$0x73625140] }
  0xd8   : > { %v1063_v20 = vand.u32 %v1026_v17, %v8328_v37  ;;  %1674 = vrot.lane.b32.xlu0 %v1614_v43, %s8229_s30 }
  0xdc   : > { %7660 = vmatmul.msk.bf16.vlgmr.msra.gmra.mxu0 %vm365_vm3, %v8336_v42 }
  0xdd   : > { %7664 = vmatmul.msk.bf16.vlgmr.msra.gmra.mxu2 %vm365_vm3, %v8336_v42  ;;  %759 = vmatpush.bf16.msra.mxu0 %v425_v47  ;;  %v987_v51 = vpop.permute.xlu1 %986 }
  0xde   : > { %7666 = vmatmul.msk.bf16.vlgmr.msra.gmra.mxu3 %vm365_vm3, %v8336_v42  ;;  %797 = vmatpush.bf16.msra.mxu2 %v431_v48  ;;  %v985_v33 = vpop.permute.xlu0 %984 }
  0xdf   : > { %816 = vmatpush.bf16.msra.mxu3 %v434_v52  ;;  %v1029_v53 = vsel %vm1022_vm4, %v985_v33, %v987_v51 }
  0xe0   : > { %v1072_v60 = vand.u32 %v1029_v53, %v8328_v37  ;;  %v8638_v53 = vld [vmem:[%s12629_s1 + $0x8] sm:$0xff] }
  0xe5   : > { %7663 = vmatmul.msk.bf16.gmra.mxu1 %vm365_vm3, %v8366_v61 }
  0xe6   : > { %v983_v44 = vpop.permute.xlu0 %982 }
  0xe7   : > { %v1028_v45 = vsel %vm1022_vm4, %v983_v44, %v985_v33  ;;  %v1027_v52 = vsel %vm1022_vm4, %v981_v16, %v983_v44 }
  0xe8   : > { %v1069_v50 = vand.u32 %v1028_v45, %v8328_v37  ;;  %v1066_v59 = vand.u32 %v1027_v52, %v8328_v37 }
  0xec   : > { %7661 = vmatmul.msk.bf16.gmra.mxu0 %vm365_vm3, %v8366_v61 }
  0xed   : > { %7665 = vmatmul.msk.bf16.gmra.mxu2 %vm365_vm3, %v8366_v61 }
  0xee   : > { %7667 = vmatmul.msk.bf16.gmra.mxu3 %vm365_vm3, %v8366_v61  ;;  %v997_v44 = vpop.permute.xlu0 %996 }
  0xf5   : > { %7670 = vmatmul.msk.bf16.vlgmr.msrb.gmra.mxu1 %vm365_vm3, %v8336_v42  ;;  %v989_v62 = vpop.permute.xlu2 %988 }
  0xf6   : > { %854 = vmatpush.bf16.msrb.mxu1 %v440_v58  ;;  %v1030_v63 = vsel %vm1022_vm4, %v987_v51, %v989_v62 }
  0xfc   : > { %7668 = vmatmul.msk.bf16.vlgmr.msrb.gmra.mxu0 %vm365_vm3, %v8336_v42 }
  0xfd   : > { %7672 = vmatmul.msk.bf16.vlgmr.msrb.gmra.mxu2 %vm365_vm3, %v8336_v42  ;;  %835 = vmatpush.bf16.msrb.mxu0 %v437_v2  ;;  %v1075_v2 = vand.u32 %v1030_v63, %v8328_v37 }
  0xfe   : > { %7674 = vmatmul.msk.bf16.vlgmr.msrb.gmra.mxu3 %vm365_vm3, %v8336_v42  ;;  %873 = vmatpush.bf16.msrb.mxu2 %v443_v4 }
  0xff   : > { %892 = vmatpush.bf16.msrb.mxu3 %v446_v8 }
 0x105   : > { %7671 = vmatmul.msk.bf16.gmra.mxu1 %vm365_vm3, %v8366_v61 }
 0x10c   : > { %7669 = vmatmul.msk.bf16.gmra.mxu0 %vm365_vm3, %v8366_v61 }
 0x10d   : > { %7673 = vmatmul.msk.bf16.gmra.mxu2 %vm365_vm3, %v8366_v61 }
 0x10e   : > { %7675 = vmatmul.msk.bf16.gmra.mxu3 %vm365_vm3, %v8366_v61 }
 0x112   : > { %v8480_v25 = vpop.f32.mrf.mxu1 }
 0x115   : > { %7678 = vmatmul.msk.bf16.vlgmr.msra.gmra.mxu1 %vm365_vm3, %v8336_v42 }
 0x116   : > { %1151 = vmatpush.bf16.msra.mxu1 %v1057_v32 }
 0x119   : > { %v8485_v18 = vpop.f32.mrf.mxu0 }
 0x11a   : > { %v8487_v19 = vpop.f32.mrf.mxu1  ;;  %v1003_v43 = vpop.permute.xlu0 %1002 }
 0x11c   : > { %7676 = vmatmul.msk.bf16.vlgmr.msra.gmra.mxu0 %vm365_vm3, %v8336_v42 }
 0x11d   : > { %7680 = vmatmul.msk.bf16.vlgmr.msra.gmra.mxu2 %vm365_vm3, %v8336_v42  ;;  %1132 = vmatpush.bf16.msra.mxu0 %v1054_v41  ;;  %v967_v41 = vld.sshfl [vmem:[#allocation1 + $0x38] sm:$0xff pattern:$0x73625140] }
 0x11e   : > { %7682 = vmatmul.msk.bf16.vlgmr.msra.gmra.mxu3 %vm365_vm3, %v8336_v42  ;;  %1170 = vmatpush.bf16.msra.mxu2 %v1060_v31  ;;  %1607 = vst [vmem:[#allocation1 + $0x20] ss:$4 sm:$0xff] %v8279_v0 }
 0x11f   : > { %1189 = vmatpush.bf16.msra.mxu3 %v1063_v20  ;;  %1018 = vrot.lane.b32.xlu2 %v967_v41, %s8228_s25 }
 0x120   : > { %v8498_v23 = vpop.f32.mrf.mxu2 }
 0x121   : > { %v8500_v24 = vpop.f32.mrf.mxu3  ;;  %v8502_v26 = vpop.f32.mrf.mxu0 }
 0x122   : > { %v8504_v28 = vpop.f32.mrf.mxu1 }
 0x125   : > { %7679 = vmatmul.msk.bf16.gmra.mxu1 %vm365_vm3, %v8366_v61 }
 0x128   : > { %v8513_v34 = vpop.f32.mrf.mxu2 }
 0x129   : > { %v8515_v35 = vpop.f32.mrf.mxu3  ;;  %v8517_v36 = vpop.f32.mrf.mxu0 }
 0x12a   : > { %v8519_v39 = vpop.f32.mrf.mxu1 }
 0x12c   : > { %7677 = vmatmul.msk.bf16.gmra.mxu0 %vm365_vm3, %v8366_v61 }
 0x12d   : > { %7681 = vmatmul.msk.bf16.gmra.mxu2 %vm365_vm3, %v8366_v61 }
 0x12e   : > { %7683 = vmatmul.msk.bf16.gmra.mxu3 %vm365_vm3, %v8366_v61 }
 0x130   : > { %v8531_v46 = vpop.f32.mrf.mxu2 }
 0x131   : > { %v8533_v47 = vpop.f32.mrf.mxu3  ;;  %v8535_v48 = vpop.f32.mrf.mxu0 }
 0x132   : > { %v8537_v49 = vpop.f32.mrf.mxu1 }
 0x135   : > { %7686 = vmatmul.msk.bf16.vlgmr.msrb.gmra.mxu1 %vm365_vm3, %v8336_v42 }
 0x136   : > { %1227 = vmatpush.bf16.msrb.mxu1 %v1069_v50 }
 0x138   : > { %v8544_v54 = vpop.f32.mrf.mxu2 }
 0x139   : > { %v8546_v55 = vpop.f32.mrf.mxu3  ;;  %v8548_v57 = vpop.f32.mrf.mxu0 }
 0x13a   : > { %v8550_v58 = vpop.f32.mrf.mxu1 }
 0x13c   : > { %7684 = vmatmul.msk.bf16.vlgmr.msrb.gmra.mxu0 %vm365_vm3, %v8336_v42 }
 0x13d   : > { %7688 = vmatmul.msk.bf16.vlgmr.msrb.gmra.mxu2 %vm365_vm3, %v8336_v42  ;;  %1208 = vmatpush.bf16.msrb.mxu0 %v1066_v59 }
 0x13e   : > { %7690 = vmatmul.msk.bf16.vlgmr.msrb.gmra.mxu3 %vm365_vm3, %v8336_v42  ;;  %1246 = vmatpush.bf16.msrb.mxu2 %v1072_v60  ;;  %v993_v42 = vpop.permute.xlu1 %992  ;;  %v1616_v60 = vld.sshfl [vmem:[#allocation1 + $0x20] sm:$0xff pattern:$0x73625140] }
 0x13f   : > { %1265 = vmatpush.bf16.msrb.mxu3 %v1075_v2  ;;  %1676 = vrot.lane.b32.xlu1 %v1616_v60, %s8229_s30 }
 0x140   : > { %v8562_v4 = vpop.f32.mrf.mxu2 }
 0x141   : > { %v8564_v5 = vpop.f32.mrf.mxu3  ;;  %v8566_v12 = vpop.f32.mrf.mxu0 }
 0x142   : > { %v8568_v6 = vpop.f32.mrf.mxu1 }
 0x145   : > { %7687 = vmatmul.msk.bf16.gmra.mxu1 %vm365_vm3, %v8366_v61 }
 0x146   : > { %v991_v15 = vpop.permute.xlu1 %990 }
 0x147   : > { %v1032_v16 = vsel %vm1022_vm4, %v991_v15, %v993_v42  ;;  %v1031_v29 = vsel %vm1022_vm4, %v989_v62, %v991_v15  ;;  %v1610_v62 = vld.sshfl [vmem:[#allocation1 + $0x8] sm:$0xff pattern:$0x73625140] }
 0x148   : > { %v8573_v8 = vpop.f32.mrf.mxu2  ;;  %v1081_v27 = vand.u32 %v1032_v16, %v8328_v37  ;;  %v1078_v38 = vand.u32 %v1031_v29, %v8328_v37  ;;  %1670 = vrot.lane.b32.xlu0 %v1610_v62, %s8229_s30 }
 0x149   : > { %12637 = vst [vmem:[#allocation2_spill] sm:$0xff] %v8573_v8  ;;  %v8575_v10 = vpop.f32.mrf.mxu3  ;;  %v8577_v11 = vpop.f32.mrf.mxu0  ;;  %v2373_v8 = vld [vmem:[%s8276_s21] sm:$0xff] }
 0x14a   : > { %12638 = vst [vmem:[#allocation3_spill] sm:$0xff] %v8575_v10  ;;  %v8579_v13 = vpop.f32.mrf.mxu1 }
 0x14b   : > { %12639 = vst [vmem:[#allocation4_spill] sm:$0xff] %v8577_v11 }
 0x14c   : > { %12640 = vst [vmem:[#allocation5_spill] sm:$0xff] %v8579_v13  ;;  %7685 = vmatmul.msk.bf16.gmra.mxu0 %vm365_vm3, %v8366_v61 }
 0x14d   : > { %7689 = vmatmul.msk.bf16.gmra.mxu2 %vm365_vm3, %v8366_v61 }
 0x14e   : > { %7691 = vmatmul.msk.bf16.gmra.mxu3 %vm365_vm3, %v8366_v61  ;;  %v995_v61 = vpop.permute.xlu2 %994 }
 0x14f   : > { %v1033_v30 = vsel %vm1022_vm4, %v993_v42, %v995_v61  ;;  %v1034_v45 = vsel %vm1022_vm4, %v995_v61, %v997_v44  ;;  %v1620_v42 = vld.sshfl [vmem:[#allocation1 + $0x30] sm:$0xff pattern:$0x73625140] }
 0x150   : > { %v8590_v17 = vpop.f32.mrf.mxu2  ;;  %v1084_v40 = vand.u32 %v1033_v30, %v8328_v37  ;;  %v1087_v50 = vand.u32 %v1034_v45, %v8328_v37  ;;  %1680 = vrot.lane.b32.xlu1 %v1620_v42, %s8229_s30  ;;  %v1618_v30 = vld.sshfl [vmem:[#allocation1 + $0x28] sm:$0xff pattern:$0x73625140] }
 0x151   : > { %12641 = vst [vmem:[#allocation6_spill] sm:$0xff] %v8590_v17  ;;  %v8592_v20 = vpop.f32.mrf.mxu3  ;;  %v8594_v21 = vpop.f32.mrf.mxu0 }
 0x152   : > { %12642 = vst [vmem:[#allocation7_spill] sm:$0xff] %v8592_v20  ;;  %v8601_v22 = vpop.f32.mrf.mxu1 }
 0x153   : > { %12643 = vst [vmem:[#allocation8_spill] sm:$0xff] %v8594_v21 }
 0x154   : > { %12644 = vst [vmem:[#allocation9_spill] sm:$0xff] %v8601_v22 }
 0x155   : > { %7702 = vmatmul.msk.bf16.vlgmr.msra.gmra.mxu1 %vm365_vm3, %v8599_v1 }
 0x156   : > { %1303 = vmatpush.bf16.msra.mxu1 %v1081_v27  ;;  %v1001_v63 = vpop.permute.xlu2 %1000 }
 0x158   : > { %v8608_v31 = vpop.f32.mrf.mxu2  ;;  %1678 = vrot.lane.b32.xlu1 %v1618_v30, %s8229_s30 }
 0x159   : > { %12645 = vst [vmem:[#allocation10_spill] sm:$0xff] %v8608_v31  ;;  %v8610_v32 = vpop.f32.mrf.mxu3  ;;  %v8612_v33 = vpop.f32.mrf.mxu0 }
 0x15a   : > { %12646 = vst [vmem:[#allocation11_spill] sm:$0xff] %v8610_v32  ;;  %v8614_v56 = vpop.f32.mrf.mxu1 }
 0x15b   : > { %12647 = vst [vmem:[#allocation12_spill] sm:$0xff] %v8612_v33 }
 0x15c   : > { %12648 = vst [vmem:[#allocation13_spill] sm:$0xff] %v8614_v56  ;;  %7700 = vmatmul.msk.bf16.vlgmr.msra.gmra.mxu0 %vm365_vm3, %v8599_v1 }
 0x15d   : > { %7704 = vmatmul.msk.bf16.vlgmr.msra.gmra.mxu2 %vm365_vm3, %v8599_v1  ;;  %1284 = vmatpush.bf16.msra.mxu0 %v1078_v38 }
 0x15e   : > { %7706 = vmatmul.msk.bf16.vlgmr.msra.gmra.mxu3 %vm365_vm3, %v8599_v1  ;;  %1322 = vmatpush.bf16.msra.mxu2 %v1084_v40  ;;  %v999_v16 = vpop.permute.xlu2 %998 }
 0x15f   : > { %1341 = vmatpush.bf16.msra.mxu3 %v1087_v50  ;;  %v1036_v27 = vsel %vm1022_vm4, %v999_v16, %v1001_v63  ;;  %v1035_v45 = vsel %vm1022_vm4, %v997_v44, %v999_v16  ;;  %v1037_v50 = vsel %vm1022_vm4, %v1001_v63, %v1003_v43  ;;  %v1005_v44 = vpop.permute.xlu1 %1004 }
 0x160   : > { %v8629_v51 = vpop.f32.mrf.mxu2  ;;  %v1093_v41 = vand.u32 %v1036_v27, %v8328_v37  ;;  %v1090_v27 = vand.u32 %v1035_v45, %v8328_v37  ;;  %v1096_v30 = vand.u32 %v1037_v50, %v8328_v37  ;;  %v1038_v63 = vsel %vm1022_vm4, %v1003_v43, %v1005_v44 }
 0x161   : > { %12649 = vst [vmem:[#allocation14_spill] sm:$0xff] %v8629_v51  ;;  %v8631_v52 = vpop.f32.mrf.mxu3  ;;  %v8633_v0 = vpop.f32.mrf.mxu0  ;;  %v1099_v16 = vand.u32 %v1038_v63, %v8328_v37 }
 0x162   : > { %12650 = vst [vmem:[#allocation15_spill] sm:$0xff] %v8631_v52  ;;  %v8640_v59 = vpop.f32.mrf.mxu1 }
 0x163   : > { %12651 = vst [vmem:[#allocation16_spill] sm:$0xff] %v8633_v0 }
 0x164   : > { %12652 = vst [vmem:[#allocation17_spill] sm:$0xff] %v8640_v59 }
 0x165   : > { %7703 = vmatmul.msk.bf16.gmra.mxu1 %vm365_vm3, %v8638_v53 }
 0x168   : > { %v8646_v2 = vpop.f32.mrf.mxu2 }
 0x169   : > { %12653 = vst [vmem:[#allocation18_spill] sm:$0xff] %v8646_v2  ;;  %v8648_v7 = vpop.f32.mrf.mxu3  ;;  %v8650_v14 = vpop.f32.mrf.mxu0 }
 0x16a   : > { %12654 = vst [vmem:[#allocation19_spill] sm:$0xff] %v8648_v7  ;;  %v8652_v15 = vpop.f32.mrf.mxu1 }
 0x16b   : > { %12655 = vst [vmem:[#allocation20_spill] sm:$0xff] %v8650_v14 }
 0x16c   : > { %12656 = vst [vmem:[#allocation21_spill] sm:$0xff] %v8652_v15  ;;  %7701 = vmatmul.msk.bf16.gmra.mxu0 %vm365_vm3, %v8638_v53 }
 0x16d   : > { %7705 = vmatmul.msk.bf16.gmra.mxu2 %vm365_vm3, %v8638_v53 }
 0x16e   : > { %7707 = vmatmul.msk.bf16.gmra.mxu3 %vm365_vm3, %v8638_v53 }
 0x170   : > { %v8662_v61 = vpop.f32.mrf.mxu2 }
 0x171   : > { %12657 = vst [vmem:[#allocation22_spill] sm:$0xff] %v8662_v61  ;;  %v8664_v29 = vpop.f32.mrf.mxu3  ;;  %v8666_v38 = vpop.f32.mrf.mxu0 }
 0x172   : > { %12658 = vst [vmem:[#allocation23_spill] sm:$0xff] %v8664_v29  ;;  %v8668_v40 = vpop.f32.mrf.mxu1 }
 0x173   : > { %12659 = vst [vmem:[#allocation24_spill] sm:$0xff] %v8666_v38  ;;  %v1612_v38 = vld.sshfl [vmem:[#allocation1 + $0x10] sm:$0xff pattern:$0x73625140] }
 0x174   : > { %12660 = vst [vmem:[#allocation25_spill] sm:$0xff] %v8668_v40  ;;  %1672 = vrot.lane.b32.xlu2 %v1612_v38, %s8229_s30 }
 0x175   : > { %7710 = vmatmul.msk.bf16.vlgmr.msrb.gmra.mxu1 %vm365_vm3, %v8599_v1 }
 0x176   : > { %1379 = vmatpush.bf16.msrb.mxu1 %v1093_v41 }
 0x178   : > { %v8676_v60 = vpop.f32.mrf.mxu2 }
 0x179   : > { %12661 = vst [vmem:[#allocation26_spill] sm:$0xff] %v8676_v60  ;;  %v8678_v62 = vpop.f32.mrf.mxu3  ;;  %v8680_v42 = vpop.f32.mrf.mxu0 }
 0x17a   : > { %12662 = vst [vmem:[#allocation27_spill] sm:$0xff] %v8678_v62  ;;  %v8682_v40 = vpop.f32.mrf.mxu1 }
 0x17b   : > { %12663 = vst [vmem:[#allocation28_spill] sm:$0xff] %v8680_v42 }
 0x17c   : > { %12664 = vst [vmem:[#allocation29_spill] sm:$0xff] %v8682_v40  ;;  %7708 = vmatmul.msk.bf16.vlgmr.msrb.gmra.mxu0 %vm365_vm3, %v8599_v1  ;;  %v1608_v40 = vld.sshfl [vmem:[#allocation1] sm:$0xff pattern:$0x73625140] }
 0x17d   : > { %7712 = vmatmul.msk.bf16.vlgmr.msrb.gmra.mxu2 %vm365_vm3, %v8599_v1  ;;  %1360 = vmatpush.bf16.msrb.mxu0 %v1090_v27  ;;  %1625 = vst [vmem:[#allocation1] ss:$4 sm:$0xff] %v8287_v3  ;;  %v1009_v27 = vpop.permute.xlu0 %1008 }
 0x17e   : > { %7714 = vmatmul.msk.bf16.vlgmr.msrb.gmra.mxu3 %vm365_vm3, %v8599_v1  ;;  %1398 = vmatpush.bf16.msrb.mxu2 %v1096_v30 }
 0x17f   : > { %1417 = vmatpush.bf16.msrb.mxu3 %v1099_v16  ;;  %1668 = vrot.lane.b32.xlu2 %v1608_v40, %s8229_s30 }
 0x180   : > { %v8695_v41 = vpop.f32.mrf.mxu2 }
 0x181   : > { %12665 = vst [vmem:[#allocation30_spill] sm:$0xff] %v8695_v41  ;;  %v8697_v45 = vpop.f32.mrf.mxu3  ;;  %v8699_v38 = vpop.f32.mrf.mxu0 }
 0x182   : > { %12666 = vst [vmem:[#allocation31_spill] sm:$0xff] %v8697_v45  ;;  %v8701_v50 = vpop.f32.mrf.mxu1 }
 0x183   : > { %12667 = vst [vmem:[#allocation32_spill] sm:$0xff] %v8699_v38  ;;  %v1011_v38 = vpop.permute.xlu1 %1010 }
 0x184   : > { %12668 = vst [vmem:[#allocation33_spill] sm:$0xff] %v8701_v50  ;;  %v1628_v16 = vld.sshfl [vmem:[#allocation1] sm:$0xff pattern:$0x73625140] }
 0x185   : > { %7711 = vmatmul.msk.bf16.gmra.mxu1 %vm365_vm3, %v8638_v53  ;;  %1684 = vrot.lane.b32.xlu0 %v1628_v16, %s8229_s30  ;;  %v1007_v3 = vpop.permute.xlu0 %1006  ;;  %v1622_v50 = vld.sshfl [vmem:[#allocation1 + $0x38] sm:$0xff pattern:$0x73625140] }
 0x186   : > { %v1040_v40 = vsel %vm1022_vm4, %v1007_v3, %v1009_v27  ;;  %1627 = vst [vmem:[#allocation1 + $0x20] ss:$4 sm:$0xff] %v8294_v9  ;;  %v1013_v9 = vpop.permute.xlu2 %1012 }
 0x187   : > { %v1105_v16 = vand.u32 %v1040_v40, %v8328_v37  ;;  %1682 = vrot.lane.b32.xlu2 %v1622_v50, %s8229_s30  ;;  %v1634_v50 = vld.sshfl [vmem:[#allocation1 + $0x18] sm:$0xff pattern:$0x73625140] }
 0x188   : > { %v8707_v43 = vpop.f32.mrf.mxu2 }
 0x189   : > { %12669 = vst [vmem:[#allocation34_spill] sm:$0xff] %v8707_v43  ;;  %v8709_v30 = vpop.f32.mrf.mxu3  ;;  %v8711_v63 = vpop.f32.mrf.mxu0 }
 0x18a   : > { %12670 = vst [vmem:[#allocation35_spill] sm:$0xff] %v8709_v30  ;;  %v8713_v45 = vpop.f32.mrf.mxu1 }
 0x18b   : > { %12671 = vst [vmem:[#allocation36_spill] sm:$0xff] %v8711_v63 }
 0x18c   : > { %12672 = vst [vmem:[#allocation37_spill] sm:$0xff] %v8713_v45  ;;  %7709 = vmatmul.msk.bf16.gmra.mxu0 %vm365_vm3, %v8638_v53 }
 0x18d   : > { %7713 = vmatmul.msk.bf16.gmra.mxu2 %vm365_vm3, %v8638_v53  ;;  %1690 = vrot.lane.b32.xlu0 %v1634_v50, %s8229_s30 }
 0x18e   : > { %7715 = vmatmul.msk.bf16.gmra.mxu3 %vm365_vm3, %v8638_v53 }
 0x190   : > { %v8723_v30 = vpop.f32.mrf.mxu2 }
 0x191   : > { %12673 = vst [vmem:[#allocation38_spill] sm:$0xff] %v8723_v30  ;;  %v8725_v63 = vpop.f32.mrf.mxu3  ;;  %v8727_v45 = vpop.f32.mrf.mxu0  ;;  %v1039_v30 = vsel %vm1022_vm4, %v1005_v44, %v1007_v3  ;;  %v1632_v44 = vld.sshfl [vmem:[#allocation1 + $0x10] sm:$0xff pattern:$0x73625140] }
 0x192   : > { %12674 = vst [vmem:[#allocation39_spill] sm:$0xff] %v8725_v63  ;;  %v8729_v43 = vpop.f32.mrf.mxu1  ;;  %v1041_v63 = vsel %vm1022_vm4, %v1009_v27, %v1011_v38  ;;  %v1102_v42 = vand.u32 %v1039_v30, %v8328_v37  ;;  %v1042_v27 = vsel %vm1022_vm4, %v1011_v38, %v1013_v9  ;;  %1688 = vrot.lane.b32.xlu2 %v1632_v44, %s8229_s30 }
 0x193   : > { %12675 = vst [vmem:[#allocation40_spill] sm:$0xff] %v8727_v45  ;;  %v1108_v62 = vand.u32 %v1041_v63, %v8328_v37  ;;  %v1111_v30 = vand.u32 %v1042_v27, %v8328_v37 }
 0x194   : > { %12676 = vst [vmem:[#allocation41_spill] sm:$0xff] %v8729_v43 }
 0x195   : > { %7718 = vmatmul.msk.bf16.vlgmr.msra.gmra.mxu1 %vm365_vm3, %v8599_v1 }
 0x196   : > { %1455 = vmatpush.bf16.msra.mxu1 %v1105_v16 }
 0x198   : > { %v8738_v41 = vpop.f32.mrf.mxu2 }
 0x199   : > { %12677 = vst [vmem:[#allocation42_spill] sm:$0xff] %v8738_v41  ;;  %v8740_v45 = vpop.f32.mrf.mxu3  ;;  %v8742_v43 = vpop.f32.mrf.mxu0 }
 0x19a   : > { %12678 = vst [vmem:[#allocation43_spill] sm:$0xff] %v8740_v45  ;;  %v8744_v40 = vpop.f32.mrf.mxu1 }
 0x19b   : > { %12679 = vst [vmem:[#allocation44_spill] sm:$0xff] %v8742_v43  ;;  %v1017_v43 = vpop.permute.xlu1 %1016 }
 0x19c   : > { %12680 = vst [vmem:[#allocation45_spill] sm:$0xff] %v8744_v40  ;;  %7716 = vmatmul.msk.bf16.vlgmr.msra.gmra.mxu0 %vm365_vm3, %v8599_v1 }
 0x19d   : > { %7720 = vmatmul.msk.bf16.vlgmr.msra.gmra.mxu2 %vm365_vm3, %v8599_v1  ;;  %1436 = vmatpush.bf16.msra.mxu0 %v1102_v42  ;;  %v1640_v42 = vld.sshfl [vmem:[#allocation1 + $0x30] sm:$0xff pattern:$0x73625140] }
 0x19e   : > { %7722 = vmatmul.msk.bf16.vlgmr.msra.gmra.mxu3 %vm365_vm3, %v8599_v1  ;;  %1474 = vmatpush.bf16.msra.mxu2 %v1108_v62  ;;  %v1630_v62 = vld.sshfl [vmem:[#allocation1 + $0x8] sm:$0xff pattern:$0x73625140] }
 0x19f   : > { %1493 = vmatpush.bf16.msra.mxu3 %v1111_v30  ;;  %1686 = vrot.lane.b32.xlu2 %v1630_v62, %s8229_s30  ;;  %v1636_v30 = vld.sshfl [vmem:[#allocation1 + $0x20] sm:$0xff pattern:$0x73625140]  ;;  %v1638_v62 = vld.sshfl [vmem:[#allocation1 + $0x28] sm:$0xff pattern:$0x73625140] }
 0x1a0   : > { %v8758_v63 = vpop.f32.mrf.mxu2  ;;  %1696 = vrot.lane.b32.xlu0 %v1640_v42, %s8229_s30  ;;  %1692 = vrot.lane.b32.xlu1 %v1636_v30, %s8229_s30 }
 0x1a1   : > { %12681 = vst [vmem:[#allocation46_spill] sm:$0xff] %v8758_v63  ;;  %v8760_v3 = vpop.f32.mrf.mxu3  ;;  %v8762_v16 = vpop.f32.mrf.mxu0 }
 0x1a2   : > { %12682 = vst [vmem:[#allocation47_spill] sm:$0xff] %v8760_v3  ;;  %v8764_v40 = vpop.f32.mrf.mxu1 }
 0x1a3   : > { %12683 = vst [vmem:[#allocation48_spill] sm:$0xff] %v8762_v16  ;;  %v1015_v42 = vpop.permute.xlu1 %1014  ;;  %v1019_v16 = vpop.permute.xlu2 %1018 }
 0x1a4   : > { %12684 = vst [vmem:[#allocation49_spill] sm:$0xff] %v8764_v40  ;;  %v1043_v3 = vsel %vm1022_vm4, %v1013_v9, %v1015_v42  ;;  %v1045_v63 = vsel %vm1022_vm4, %v1017_v43, %v1019_v16 }
 0x1a5   : > { %7719 = vmatmul.msk.bf16.gmra.mxu1 %vm365_vm3, %v8638_v53 }
 0x1a8   : > { %v8770_v38 = vpop.f32.mrf.mxu2  ;;  %1694 = vrot.lane.b32.xlu0 %v1638_v62, %s8229_s30 }
 0x1a9   : > { %12685 = vst [vmem:[#allocation50_spill] sm:$0xff] %v8770_v38  ;;  %v8772_v44 = vpop.f32.mrf.mxu3  ;;  %v8774_v50 = vpop.f32.mrf.mxu0 }
 0x1aa   : > { %12686 = vst [vmem:[#allocation51_spill] sm:$0xff] %v8772_v44  ;;  %v8776_v27 = vpop.f32.mrf.mxu1  ;;  %v1044_v44 = vsel %vm1022_vm4, %v1015_v42, %v1017_v43  ;;  %v1642_v43 = vld.sshfl [vmem:[#allocation1 + $0x38] sm:$0xff pattern:$0x73625140] }
 0x1ab   : > { %12687 = vst [vmem:[#allocation52_spill] sm:$0xff] %v8774_v50  ;;  %v1117_v40 = vand.u32 %v1044_v44, %v8328_v37  ;;  %v1120_v44 = vand.u32 %v1045_v63, %v8328_v37  ;;  %1698 = vrot.lane.b32.xlu1 %v1642_v43, %s8229_s30 }
 0x1ac   : > { %12688 = vst [vmem:[#allocation53_spill] sm:$0xff] %v8776_v27  ;;  %7717 = vmatmul.msk.bf16.gmra.mxu0 %vm365_vm3, %v8638_v53 }
 0x1ad   : > { %7721 = vmatmul.msk.bf16.gmra.mxu2 %vm365_vm3, %v8638_v53 }
 0x1ae   : > { %7723 = vmatmul.msk.bf16.gmra.mxu3 %vm365_vm3, %v8638_v53 }
 0x1b0   : > { %v8787_v50 = vpop.f32.mrf.mxu2 }
 0x1b1   : > { %12689 = vst [vmem:[#allocation54_spill] sm:$0xff] %v8787_v50  ;;  %v8789_v27 = vpop.f32.mrf.mxu3  ;;  %v8791_v30 = vpop.f32.mrf.mxu0 }
 0x1b2   : > { %12690 = vst [vmem:[#allocation55_spill] sm:$0xff] %v8789_v27  ;;  %v8793_v38 = vpop.f32.mrf.mxu1 }
 0x1b3   : > { %12691 = vst [vmem:[#allocation56_spill] sm:$0xff] %v8791_v30 }
 0x1b4   : > { %12692 = vst [vmem:[#allocation57_spill] sm:$0xff] %v8793_v38  ;;  %v1114_v38 = vand.u32 %v1043_v3, %v8328_v37 }
 0x1b5   : > { %7726 = vmatmul.msk.bf16.vlgmr.msrb.gmra.mxu1 %vm365_vm3, %v8599_v1 }
 0x1b6   : > { %1531 = vmatpush.bf16.msrb.mxu1 %v1117_v40  ;;  %v1021_v40 = vpop.permute.xlu0 %1020 }
 0x1b7   : > { %v1046_v9 = vsel %vm1022_vm4, %v1019_v16, %v1021_v40 }
 0x1b8   : > { %v8800_v62 = vpop.f32.mrf.mxu2  ;;  %v1123_v63 = vand.u32 %v1046_v9, %v8328_v37 }
 0x1b9   : > { %12693 = vst [vmem:[#allocation58_spill] sm:$0xff] %v8800_v62  ;;  %v8802_v50 = vpop.f32.mrf.mxu3  ;;  %v8804_v27 = vpop.f32.mrf.mxu0 }
 0x1ba   : > { %12694 = vst [vmem:[#allocation59_spill] sm:$0xff] %v8802_v50  ;;  %v8806_v30 = vpop.f32.mrf.mxu1 }
 0x1bb   : > { %12695 = vst [vmem:[#allocation60_spill] sm:$0xff] %v8804_v27 }
 0x1bc   : > { %12696 = vst [vmem:[#allocation61_spill] sm:$0xff] %v8806_v30  ;;  %7724 = vmatmul.msk.bf16.vlgmr.msrb.gmra.mxu0 %vm365_vm3, %v8599_v1 }
 0x1bd   : > { %7728 = vmatmul.msk.bf16.vlgmr.msrb.gmra.mxu2 %vm365_vm3, %v8599_v1  ;;  %1512 = vmatpush.bf16.msrb.mxu0 %v1114_v38  ;;  %v8830_v38 = vld [vmem:[%s8276_s21 + $0x20] sm:$0xff] }
 0x1be   : > { %7730 = vmatmul.msk.bf16.vlgmr.msrb.gmra.mxu3 %vm365_vm3, %v8599_v1  ;;  %1550 = vmatpush.bf16.msrb.mxu2 %v1120_v44  ;;  %1645 = vst [vmem:[#allocation1] ss:$4 sm:$0xff] %v8830_v38 }
 0x1bf   : > { %1569 = vmatpush.bf16.msrb.mxu3 %v1123_v63  ;;  %v1675_v63 = vpop.permute.xlu0 %1674 }
 0x1c0   : > { %v8819_v3 = vpop.f32.mrf.mxu2 }
 0x1c1   : > { %12697 = vst [vmem:[#allocation62_spill] sm:$0xff] %v8819_v3  ;;  %v8821_v42 = vpop.f32.mrf.mxu3  ;;  %v8823_v30 = vpop.f32.mrf.mxu0 }
 0x1c2   : > { %12698 = vst [vmem:[#allocation63_spill] sm:$0xff] %v8821_v42  ;;  %v8825_v27 = vpop.f32.mrf.mxu1  ;;  %v1677_v42 = vpop.permute.xlu1 %1676 }
 0x1c3   : > { %12699 = vst [vmem:[#allocation64_spill] sm:$0xff] %v8823_v30 }
 0x1c4   : > { %12700 = vst [vmem:[#allocation65_spill] sm:$0xff] %v8825_v27 }
 0x1c5   : > { %7727 = vmatmul.msk.bf16.gmra.mxu1 %vm365_vm3, %v8638_v53  ;;  %v1652_v9 = vld.sshfl [vmem:[#allocation1 + $0x10] sm:$0xff pattern:$0x73625140]  ;;  %v1650_v27 = vld.sshfl [vmem:[#allocation1 + $0x8] sm:$0xff pattern:$0x73625140] }
 0x1c6   : > { %1704 = vrot.lane.b32.xlu1 %v1652_v9, %s8229_s30  ;;  %v1722_v9 = vsel %vm1718_vm5, %v1675_v63, %v1677_v42  ;;  %v1654_v0 = vld.sshfl [vmem:[#allocation1 + $0x18] sm:$0xff pattern:$0x73625140] }
 0x1c7   : > { %v1671_v3 = vpop.permute.xlu0 %1670 }
 0x1c8   : > { %v8833_v16 = vpop.f32.mrf.mxu2 }
 0x1c9   : > { %12701 = vst [vmem:[#allocation66_spill] sm:$0xff] %v8833_v16  ;;  %v8835_v44 = vpop.f32.mrf.mxu3  ;;  %v8837_v43 = vpop.f32.mrf.mxu0 }
 0x1ca   : > { %12702 = vst [vmem:[#allocation67_spill] sm:$0xff] %v8835_v44  ;;  %v8839_v40 = vpop.f32.mrf.mxu1  ;;  %v1681_v29 = vpop.permute.xlu1 %1680 }
 0x1cb   : > { %12703 = vst [vmem:[#allocation68_spill] sm:$0xff] %v8837_v43 }
 0x1cc   : > { %12704 = vst [vmem:[#allocation69_spill] sm:$0xff] %v8839_v40  ;;  %7725 = vmatmul.msk.bf16.gmra.mxu0 %vm365_vm3, %v8638_v53 }
 0x1cd   : > { %7729 = vmatmul.msk.bf16.gmra.mxu2 %vm365_vm3, %v8638_v53 }
 0x1ce   : > { %7731 = vmatmul.msk.bf16.gmra.mxu3 %vm365_vm3, %v8638_v53  ;;  %v1673_v30 = vpop.permute.xlu2 %1672  ;;  %1702 = vrot.lane.b32.xlu1 %v1650_v27, %s8229_s30  ;;  %v1759_v27 = vand.u32 %v1722_v9, %v8328_v37 }
 0x1d0   : > { %v8848_v16 = vpop.f32.mrf.mxu2 }
 0x1d1   : > { %12705 = vst [vmem:[#allocation70_spill] sm:$0xff] %v8848_v16  ;;  %v8850_v44 = vpop.f32.mrf.mxu3  ;;  %v8852_v43 = vpop.f32.mrf.mxu0  ;;  %v1721_v16 = vsel %vm1718_vm5, %v1673_v30, %v1675_v63 }
 0x1d2   : > { %12706 = vst [vmem:[#allocation71_spill] sm:$0xff] %v8850_v44  ;;  %v8854_v40 = vpop.f32.mrf.mxu1  ;;  %v1720_v44 = vsel %vm1718_vm5, %v1671_v3, %v1673_v30  ;;  %v1756_v60 = vand.u32 %v1721_v16, %v8328_v37 }
 0x1d3   : > { %12707 = vst [vmem:[#allocation72_spill] sm:$0xff] %v8852_v43  ;;  %v1753_v62 = vand.u32 %v1720_v44, %v8328_v37 }
 0x1d5   : > { %7734 = vmatmul.msk.bf16.vlgmr.msra.gmra.mxu1 %vm365_vm3, %v8599_v1 }
 0x1d6   : > { %1847 = vmatpush.bf16.msra.mxu1 %v1753_v62 }
 0x1d8   : > { %v8862_v50 = vpop.f32.mrf.mxu2 }
 0x1d9   : > { %12708 = vst [vmem:[#allocation73_spill] sm:$0xff] %v8862_v50  ;;  %v8864_v43 = vpop.f32.mrf.mxu3  ;;  %v8867_v45 = vpop.f32.mrf.mxu0  ;;  %v1648_v50 = vld.sshfl [vmem:[#allocation1] sm:$0xff pattern:$0x73625140] }
 0x1da   : > { %12709 = vst [vmem:[#allocation74_spill] sm:$0xff] %v8864_v43  ;;  %v8869_v41 = vpop.f32.mrf.mxu1  ;;  %v1669_v30 = vpop.permute.xlu2 %1668  ;;  %1700 = vrot.lane.b32.xlu2 %v1648_v50, %s8229_s30 }
 0x1db   : > { %v1719_v44 = vsel %vm1718_vm5, %v1669_v30, %v1671_v3  ;;  %v1679_v50 = vpop.permute.xlu1 %1678 }
 0x1dc   : > { %7732 = vmatmul.msk.bf16.vlgmr.msra.gmra.mxu0 %vm365_vm3, %v8599_v1  ;;  %v1750_v63 = vand.u32 %v1719_v44, %v8328_v37  ;;  %v8901_v44 = vld [vmem:[%s8276_s21 + $0x28] sm:$0xff]  ;;  %v1723_v51 = vsel %vm1718_vm5, %v1677_v42, %v1679_v50 }
 0x1dd   : > { %7736 = vmatmul.msk.bf16.vlgmr.msra.gmra.mxu2 %vm365_vm3, %v8599_v1  ;;  %1647 = vst [vmem:[#allocation1 + $0x20] ss:$4 sm:$0xff] %v8901_v44 }
 0x1de   : > { %7738 = vmatmul.msk.bf16.vlgmr.msra.gmra.mxu3 %vm365_vm3, %v8599_v1  ;;  %1866 = vmatpush.bf16.msra.mxu2 %v1756_v60 }
 0x1df   : > { %1885 = vmatpush.bf16.msra.mxu3 %v1759_v27  ;;  %1828 = vmatpush.bf16.msra.mxu0 %v1750_v63  ;;  %v1724_v63 = vsel %vm1718_vm5, %v1679_v50, %v1681_v29 }
 0x1e0   : > { %v8881_v9 = vpop.f32.mrf.mxu2  ;;  %v1765_v2 = vand.u32 %v1724_v63, %v8328_v37 }
 0x1e1   : > { %v8883_v62 = vpop.f32.mrf.mxu3  ;;  %v8885_v16 = vpop.f32.mrf.mxu0 }
 0x1e2   : > { %v8887_v43 = vpop.f32.mrf.mxu1  ;;  %v1683_v52 = vpop.permute.xlu2 %1682  ;;  %1706 = vrot.lane.b32.xlu2 %v1654_v0, %s8229_s30 }
 0x1e3   : > { %v1725_v56 = vsel %vm1718_vm5, %v1681_v29, %v1683_v52 }
 0x1e4   : > { %v1656_v59 = vld.sshfl [vmem:[#allocation1 + $0x20] sm:$0xff pattern:$0x73625140]  ;;  %v1768_v22 = vand.u32 %v1725_v56, %v8328_v37 }
 0x1e5   : > { %7735 = vmatmul.msk.bf16.gmra.mxu1 %vm365_vm3, %v8638_v53  ;;  %1708 = vrot.lane.b32.xlu0 %v1656_v59, %s8229_s30  ;;  %v1762_v59 = vand.u32 %v1723_v51, %v8328_v37 }
 0x1e8   : > { %v8892_v60 = vpop.f32.mrf.mxu2 }
 0x1e9   : > { %v8894_v3 = vpop.f32.mrf.mxu3  ;;  %v8896_v27 = vpop.f32.mrf.mxu0 }
 0x1ea   : > { %v8898_v30 = vpop.f32.mrf.mxu1 }
 0x1ec   : > { %7733 = vmatmul.msk.bf16.gmra.mxu0 %vm365_vm3, %v8638_v53  ;;  %v1689_v20 = vpop.permute.xlu2 %1688 }
 0x1ed   : > { %7737 = vmatmul.msk.bf16.gmra.mxu2 %vm365_vm3, %v8638_v53 }
 0x1ee   : > { %7739 = vmatmul.msk.bf16.gmra.mxu3 %vm365_vm3, %v8638_v53 }
 0x1f0   : > { %v8911_v61 = vpop.f32.mrf.mxu2 }
 0x1f1   : > { %v8913_v15 = vpop.f32.mrf.mxu3  ;;  %v8915_v14 = vpop.f32.mrf.mxu0 }
 0x1f2   : > { %v8917_v7 = vpop.f32.mrf.mxu1 }
 0x1f5   : > { %7742 = vmatmul.msk.bf16.vlgmr.msrb.gmra.mxu1 %vm365_vm3, %v8599_v1 }
 0x1f6   : > { %1923 = vmatpush.bf16.msrb.mxu1 %v1765_v2  ;;  %v1660_v2 = vld.sshfl [vmem:[#allocation1 + $0x30] sm:$0xff pattern:$0x73625140] }
 0x1f7   : > { %v1685_v0 = vpop.permute.xlu0 %1684  ;;  %1712 = vrot.lane.b32.xlu2 %v1660_v2, %s8229_s30 }
 0x1f8   : > { %v8926_v33 = vpop.f32.mrf.mxu2  ;;  %v1726_v29 = vsel %vm1718_vm5, %v1683_v52, %v1685_v0 }
 0x1f9   : > { %v8928_v32 = vpop.f32.mrf.mxu3  ;;  %v8930_v63 = vpop.f32.mrf.mxu0  ;;  %v1771_v42 = vand.u32 %v1726_v29, %v8328_v37 }
 0x1fa   : > { %v8932_v31 = vpop.f32.mrf.mxu1 }
 0x1fc   : > { %7740 = vmatmul.msk.bf16.vlgmr.msrb.gmra.mxu0 %vm365_vm3, %v8599_v1 }
 0x1fd   : > { %7744 = vmatmul.msk.bf16.vlgmr.msrb.gmra.mxu2 %vm365_vm3, %v8599_v1  ;;  %1904 = vmatpush.bf16.msrb.mxu0 %v1762_v59 }
 0x1fe   : > { %7746 = vmatmul.msk.bf16.vlgmr.msrb.gmra.mxu3 %vm365_vm3, %v8599_v1  ;;  %1942 = vmatpush.bf16.msrb.mxu2 %v1768_v22  ;;  %v1662_v1 = vld.sshfl [vmem:[#allocation1 + $0x38] sm:$0xff pattern:$0x73625140]  ;;  %v1658_v22 = vld.sshfl [vmem:[#allocation1 + $0x28] sm:$0xff pattern:$0x73625140] }
 0x1ff   : > { %1961 = vmatpush.bf16.msrb.mxu3 %v1771_v42  ;;  %1714 = vrot.lane.b32.xlu0 %v1662_v1, %s8229_s30  ;;  %v1587_v42 = vld [vmem:[%s8276_s21 + $0x30] sm:$0x3]  ;;  %v1687_v1 = vpop.permute.xlu2 %1686 }
 0x200   : > { %v8945_v56 = vpop.f32.mrf.mxu2  ;;  %1710 = vrot.lane.b32.xlu2 %v1658_v22, %s8229_s30  ;;  %1665 = vst [vmem:[#allocation1] ss:$4 sm:$0xff] %v1587_v42  ;;  %v1728_v22 = vsel %vm1718_vm5, %v1687_v1, %v1689_v20 }
 0x201   : > { %v8947_v51 = vpop.f32.mrf.mxu3  ;;  %v8949_v50 = vpop.f32.mrf.mxu0  ;;  %v1777_v11 = vand.u32 %v1728_v22, %v8328_v37 }
 0x202   : > { %v8951_v21 = vpop.f32.mrf.mxu1 }
 0x203   : > { %12710 = vst [vmem:[#allocation75_spill] sm:$0xff] %v8951_v21 }
 0x205   : > { %7743 = vmatmul.msk.bf16.gmra.mxu1 %vm365_vm3, %v8638_v53 }
 0x208   : > { %v8957_v52 = vpop.f32.mrf.mxu2 }
 0x209   : > { %12711 = vst [vmem:[#allocation76_spill] sm:$0xff] %v8957_v52  ;;  %v8959_v59 = vpop.f32.mrf.mxu3  ;;  %v8961_v2 = vpop.f32.mrf.mxu0 }
 0x20a   : > { %12712 = vst [vmem:[#allocation77_spill] sm:$0xff] %v8959_v59  ;;  %v8963_v29 = vpop.f32.mrf.mxu1 }
 0x20b   : > { %12713 = vst [vmem:[#allocation78_spill] sm:$0xff] %v8961_v2 }
 0x20c   : > { %12714 = vst [vmem:[#allocation79_spill] sm:$0xff] %v8963_v29  ;;  %7741 = vmatmul.msk.bf16.gmra.mxu0 %vm365_vm3, %v8638_v53  ;;  %v8982_v29 = vld [vmem:[%s12629_s1 + $0x20] sm:$0xff] }
 0x20d   : > { %7745 = vmatmul.msk.bf16.gmra.mxu2 %vm365_vm3, %v8638_v53 }
 0x20e   : > { %7747 = vmatmul.msk.bf16.gmra.mxu3 %vm365_vm3, %v8638_v53  ;;  %v1666_v53 = vld.sshfl [vmem:[#allocation1] sm:$0xff pattern:$0x73625140] }
 0x20f   : > { %1716 = vrot.lane.b32.xlu1 %v1666_v53, %s8229_s30  ;;  %2396 = vst [vmem:[#allocation1] ss:$4 sm:$0xff] %v2373_v8  ;;  %v9020_v8 = vld [vmem:[%s12629_s1 + $0x28] sm:$0xff] }
 0x210   : > { %v8973_v17 = vpop.f32.mrf.mxu2 }
 0x211   : > { %12715 = vst [vmem:[#allocation80_spill] sm:$0xff] %v8973_v17  ;;  %v8975_v13 = vpop.f32.mrf.mxu3  ;;  %v8977_v2 = vpop.f32.mrf.mxu0 }
 0x212   : > { %12716 = vst [vmem:[#allocation81_spill] sm:$0xff] %v8975_v13  ;;  %v8984_v42 = vpop.f32.mrf.mxu1  ;;  %v1691_v17 = vpop.permute.xlu0 %1690 }
 0x213   : > { %12717 = vst [vmem:[#allocation82_spill] sm:$0xff] %v8977_v2  ;;  %v1727_v2 = vsel %vm1718_vm5, %v1685_v0, %v1687_v1  ;;  %v1729_v13 = vsel %vm1718_vm5, %v1689_v20, %v1691_v17 }
 0x214   : > { %12718 = vst [vmem:[#allocation83_spill] sm:$0xff] %v8984_v42  ;;  %v1774_v22 = vand.u32 %v1727_v2, %v8328_v37  ;;  %v1780_v53 = vand.u32 %v1729_v13, %v8328_v37 }
 0x215   : > { %7762 = vmatmul.msk.bf16.vlgmr.msra.gmra.mxu1 %vm365_vm3, %v8982_v29 }
 0x216   : > { %1999 = vmatpush.bf16.msra.mxu1 %v1777_v11  ;;  %v1693_v11 = vpop.permute.xlu1 %1692 }
 0x217   : > { %v1730_v20 = vsel %vm1718_vm5, %v1691_v17, %v1693_v11 }
 0x218   : > { %v8992_v59 = vpop.f32.mrf.mxu2  ;;  %v1783_v0 = vand.u32 %v1730_v20, %v8328_v37 }
 0x219   : > { %12719 = vst [vmem:[#allocation84_spill] sm:$0xff] %v8992_v59  ;;  %v8994_v10 = vpop.f32.mrf.mxu3  ;;  %v8996_v52 = vpop.f32.mrf.mxu0 }
 0x21a   : > { %12720 = vst [vmem:[#allocation85_spill] sm:$0xff] %v8994_v10  ;;  %v8998_v42 = vpop.f32.mrf.mxu1 }
 0x21b   : > { %12721 = vst [vmem:[#allocation86_spill] sm:$0xff] %v8996_v52  ;;  %v1697_v52 = vpop.permute.xlu0 %1696 }
 0x21c   : > { %12722 = vst [vmem:[#allocation87_spill] sm:$0xff] %v8998_v42  ;;  %7760 = vmatmul.msk.bf16.vlgmr.msra.gmra.mxu0 %vm365_vm3, %v8982_v29 }
 0x21d   : > { %7764 = vmatmul.msk.bf16.vlgmr.msra.gmra.mxu2 %vm365_vm3, %v8982_v29  ;;  %1980 = vmatpush.bf16.msra.mxu0 %v1774_v22  ;;  %v2406_v22 = vld.sshfl [vmem:[#allocation1 + $0x18] sm:$0xff pattern:$0x73625140] }
 0x21e   : > { %7766 = vmatmul.msk.bf16.vlgmr.msra.gmra.mxu3 %vm365_vm3, %v8982_v29  ;;  %2018 = vmatpush.bf16.msra.mxu2 %v1780_v53  ;;  %v2404_v53 = vld.sshfl [vmem:[#allocation1 + $0x10] sm:$0xff pattern:$0x73625140]  ;;  %v1699_v10 = vpop.permute.xlu1 %1698 }
 0x21f   : > { %2037 = vmatpush.bf16.msra.mxu3 %v1783_v0  ;;  %2466 = vrot.lane.b32.xlu1 %v2406_v22, %s8230_s11  ;;  %v2402_v0 = vld.sshfl [vmem:[#allocation1 + $0x8] sm:$0xff pattern:$0x73625140] }
 0x220   : > { %v9011_v2 = vpop.f32.mrf.mxu2  ;;  %2464 = vrot.lane.b32.xlu0 %v2404_v53, %s8230_s11 }
 0x221   : > { %12723 = vst [vmem:[#allocation88_spill] sm:$0xff] %v9011_v2  ;;  %v9013_v13 = vpop.f32.mrf.mxu3  ;;  %v9015_v1 = vpop.f32.mrf.mxu0  ;;  %v2374_v2 = vld [vmem:[%s8276_s21 + $0x8] sm:$0xff] }
 0x222   : > { %12724 = vst [vmem:[#allocation89_spill] sm:$0xff] %v9013_v13  ;;  %v9022_v42 = vpop.f32.mrf.mxu1  ;;  %v2400_v13 = vld.sshfl [vmem:[#allocation1] sm:$0xff pattern:$0x73625140] }
 0x223   : > { %12725 = vst [vmem:[#allocation90_spill] sm:$0xff] %v9015_v1  ;;  %v1695_v22 = vpop.permute.xlu0 %1694 }
 0x224   : > { %12726 = vst [vmem:[#allocation91_spill] sm:$0xff] %v9022_v42  ;;  %v1732_v53 = vsel %vm1718_vm5, %v1695_v22, %v1697_v52 }
 0x225   : > { %7763 = vmatmul.msk.bf16.gmra.mxu1 %vm365_vm3, %v9020_v8  ;;  %2399 = vst [vmem:[#allocation1 + $0x20] ss:$4 sm:$0xff] %v2374_v2 }
 0x227   : > { %2462 = vrot.lane.b32.xlu1 %v2402_v0, %s8230_s11  ;;  %v1789_v0 = vand.u32 %v1732_v53, %v8328_v37 }
 0x228   : > { %v9028_v17 = vpop.f32.mrf.mxu2  ;;  %2460 = vrot.lane.b32.xlu0 %v2400_v13, %s8230_s11  ;;  %v1731_v13 = vsel %vm1718_vm5, %v1693_v11, %v1695_v22 }
 0x229   : > { %12727 = vst [vmem:[#allocation92_spill] sm:$0xff] %v9028_v17  ;;  %v9030_v20 = vpop.f32.mrf.mxu3  ;;  %v9032_v1 = vpop.f32.mrf.mxu0  ;;  %v1786_v53 = vand.u32 %v1731_v13, %v8328_v37 }
 0x22a   : > { %12728 = vst [vmem:[#allocation93_spill] sm:$0xff] %v9030_v20  ;;  %v9034_v42 = vpop.f32.mrf.mxu1 }
 0x22b   : > { %12729 = vst [vmem:[#allocation94_spill] sm:$0xff] %v9032_v1 }
 0x22c   : > { %12730 = vst [vmem:[#allocation95_spill] sm:$0xff] %v9034_v42  ;;  %7761 = vmatmul.msk.bf16.gmra.mxu0 %vm365_vm3, %v9020_v8  ;;  %v2408_v11 = vld.sshfl [vmem:[#allocation1 + $0x20] sm:$0xff pattern:$0x73625140] }
 0x22d   : > { %7765 = vmatmul.msk.bf16.gmra.mxu2 %vm365_vm3, %v9020_v8  ;;  %2468 = vrot.lane.b32.xlu2 %v2408_v11, %s8230_s11  ;;  %v2414_v2 = vld.sshfl [vmem:[#allocation1 + $0x38] sm:$0xff pattern:$0x73625140] }
 0x22e   : > { %7767 = vmatmul.msk.bf16.gmra.mxu3 %vm365_vm3, %v9020_v8 }
 0x230   : > { %v9045_v1 = vpop.f32.mrf.mxu2  ;;  %2474 = vrot.lane.b32.xlu0 %v2414_v2, %s8230_s11 }
 0x231   : > { %12731 = vst [vmem:[#allocation96_spill] sm:$0xff] %v9045_v1  ;;  %v9047_v42 = vpop.f32.mrf.mxu3  ;;  %v9049_v20 = vpop.f32.mrf.mxu0 }
 0x232   : > { %12732 = vst [vmem:[#allocation97_spill] sm:$0xff] %v9047_v42  ;;  %v9051_v17 = vpop.f32.mrf.mxu1  ;;  %v1733_v42 = vsel %vm1718_vm5, %v1697_v52, %v1699_v10 }
 0x233   : > { %12733 = vst [vmem:[#allocation98_spill] sm:$0xff] %v9049_v20  ;;  %v1792_v21 = vand.u32 %v1733_v42, %v8328_v37 }
 0x234   : > { %12734 = vst [vmem:[#allocation99_spill] sm:$0xff] %v9051_v17  ;;  %v1701_v52 = vpop.permute.xlu2 %1700 }
 0x235   : > { %7770 = vmatmul.msk.bf16.vlgmr.msrb.gmra.mxu1 %vm365_vm3, %v8982_v29  ;;  %v1734_v22 = vsel %vm1718_vm5, %v1699_v10, %v1701_v52 }
 0x236   : > { %2075 = vmatpush.bf16.msrb.mxu1 %v1789_v0  ;;  %v1795_v13 = vand.u32 %v1734_v22, %v8328_v37 }
 0x238   : > { %v9058_v59 = vpop.f32.mrf.mxu2  ;;  %v1705_v11 = vpop.permute.xlu1 %1704 }
 0x239   : > { %12735 = vst [vmem:[#allocation100_spill] sm:$0xff] %v9058_v59  ;;  %v9060_v1 = vpop.f32.mrf.mxu3  ;;  %v9063_v20 = vpop.f32.mrf.mxu0 }
 0x23a   : > { %12736 = vst [vmem:[#allocation101_spill] sm:$0xff] %v9060_v1  ;;  %v9065_v17 = vpop.f32.mrf.mxu1 }
 0x23b   : > { %12737 = vst [vmem:[#allocation102_spill] sm:$0xff] %v9063_v20 }
 0x23c   : > { %12738 = vst [vmem:[#allocation103_spill] sm:$0xff] %v9065_v17  ;;  %7768 = vmatmul.msk.bf16.vlgmr.msrb.gmra.mxu0 %vm365_vm3, %v8982_v29 }
 0x23d   : > { %7772 = vmatmul.msk.bf16.vlgmr.msrb.gmra.mxu2 %vm365_vm3, %v8982_v29  ;;  %2056 = vmatpush.bf16.msrb.mxu0 %v1786_v53  ;;  %v2412_v53 = vld.sshfl [vmem:[#allocation1 + $0x30] sm:$0xff pattern:$0x73625140] }
 0x23e   : > { %7774 = vmatmul.msk.bf16.vlgmr.msrb.gmra.mxu3 %vm365_vm3, %v8982_v29  ;;  %2094 = vmatpush.bf16.msrb.mxu2 %v1792_v21  ;;  %v2375_v21 = vld [vmem:[%s8276_s21 + $0x10] sm:$0xff] }
 0x23f   : > { %2113 = vmatpush.bf16.msrb.mxu3 %v1795_v13  ;;  %2472 = vrot.lane.b32.xlu2 %v2412_v53, %s8230_s11  ;;  %2417 = vst [vmem:[#allocation1] ss:$4 sm:$0xff] %v2375_v21 }
 0x240   : > { %v9078_v42 = vpop.f32.mrf.mxu2  ;;  %v1703_v21 = vpop.permute.xlu1 %1702 }
 0x241   : > { %12739 = vst [vmem:[#allocation104_spill] sm:$0xff] %v9078_v42  ;;  %v9080_v0 = vpop.f32.mrf.mxu3  ;;  %v9083_v17 = vpop.f32.mrf.mxu0 }
 0x242   : > { %12740 = vst [vmem:[#allocation105_spill] sm:$0xff] %v9080_v0  ;;  %v9085_v20 = vpop.f32.mrf.mxu1 }
 0x243   : > { %12741 = vst [vmem:[#allocation106_spill] sm:$0xff] %v9083_v17  ;;  %v2410_v17 = vld.sshfl [vmem:[#allocation1 + $0x28] sm:$0xff pattern:$0x73625140] }
 0x244   : > { %12742 = vst [vmem:[#allocation107_spill] sm:$0xff] %v9085_v20 }
 0x245   : > { %7771 = vmatmul.msk.bf16.gmra.mxu1 %vm365_vm3, %v9020_v8 }
 0x246   : > { %v2424_v13 = vld.sshfl [vmem:[#allocation1 + $0x10] sm:$0xff pattern:$0x73625140]  ;;  %v2420_v53 = vld.sshfl [vmem:[#allocation1] sm:$0xff pattern:$0x73625140] }
 0x247   : > { %2470 = vrot.lane.b32.xlu2 %v2410_v17, %s8230_s11  ;;  %2480 = vrot.lane.b32.xlu0 %v2424_v13, %s8230_s11  ;;  %v2422_v1 = vld.sshfl [vmem:[#allocation1 + $0x8] sm:$0xff pattern:$0x73625140]  ;;  %v1707_v17 = vpop.permute.xlu2 %1706  ;;  %v1735_v13 = vsel %vm1718_vm5, %v1701_v52, %v1703_v21 }
 0x248   : > { %v9091_v10 = vpop.f32.mrf.mxu2  ;;  %2476 = vrot.lane.b32.xlu1 %v2420_v53, %s8230_s11  ;;  %v1737_v53 = vsel %vm1718_vm5, %v1705_v11, %v1707_v17 }
 0x249   : > { %12743 = vst [vmem:[#allocation108_spill] sm:$0xff] %v9091_v10  ;;  %v9093_v2 = vpop.f32.mrf.mxu3  ;;  %v9095_v0 = vpop.f32.mrf.mxu0  ;;  %v1804_v59 = vand.u32 %v1737_v53, %v8328_v37  ;;  %v2376_v53 = vld [vmem:[%s8276_s21 + $0x18] sm:$0xff] }
 0x24a   : > { %12744 = vst [vmem:[#allocation109_spill] sm:$0xff] %v9093_v2  ;;  %v9097_v22 = vpop.f32.mrf.mxu1 }
 0x24b   : > { %12745 = vst [vmem:[#allocation110_spill] sm:$0xff] %v9095_v0  ;;  %v1736_v0 = vsel %vm1718_vm5, %v1703_v21, %v1705_v11 }
 0x24c   : > { %12746 = vst [vmem:[#allocation111_spill] sm:$0xff] %v9097_v22  ;;  %7769 = vmatmul.msk.bf16.gmra.mxu0 %vm365_vm3, %v9020_v8  ;;  %v1801_v42 = vand.u32 %v1736_v0, %v8328_v37  ;;  %v1798_v0 = vand.u32 %v1735_v13, %v8328_v37 }
 0x24d   : > { %7773 = vmatmul.msk.bf16.gmra.mxu2 %vm365_vm3, %v9020_v8  ;;  %2419 = vst [vmem:[#allocation1 + $0x20] ss:$4 sm:$0xff] %v2376_v53 }
 0x24e   : > { %7775 = vmatmul.msk.bf16.gmra.mxu3 %vm365_vm3, %v9020_v8 }
 0x24f   : > { %2478 = vrot.lane.b32.xlu0 %v2422_v1, %s8230_s11  ;;  %v2426_v1 = vld.sshfl [vmem:[#allocation1 + $0x18] sm:$0xff pattern:$0x73625140] }
 0x250   : > { %v9109_v22 = vpop.f32.mrf.mxu2  ;;  %2437 = vst [vmem:[#allocation1] ss:$4 sm:$0xff] %v8830_v38  ;;  %2482 = vrot.lane.b32.xlu1 %v2426_v1, %s8230_s11 }
 0x251   : > { %12747 = vst [vmem:[#allocation112_spill] sm:$0xff] %v9109_v22  ;;  %v9111_v2 = vpop.f32.mrf.mxu3  ;;  %v9113_v10 = vpop.f32.mrf.mxu0 }
 0x252   : > { %12748 = vst [vmem:[#allocation113_spill] sm:$0xff] %v9111_v2  ;;  %v9115_v20 = vpop.f32.mrf.mxu1  ;;  %v1713_v13 = vpop.permute.xlu2 %1712 }
 0x253   : > { %12749 = vst [vmem:[#allocation114_spill] sm:$0xff] %v9113_v10 }
 0x254   : > { %12750 = vst [vmem:[#allocation115_spill] sm:$0xff] %v9115_v20 }
 0x255   : > { %7778 = vmatmul.msk.bf16.vlgmr.msra.gmra.mxu1 %vm365_vm3, %v8982_v29 }
 0x256   : > { %2151 = vmatpush.bf16.msra.mxu1 %v1801_v42 }
 0x258   : > { %v9123_v22 = vpop.f32.mrf.mxu2 }
 0x259   : > { %v9125_v2 = vpop.f32.mrf.mxu3  ;;  %v9127_v10 = vpop.f32.mrf.mxu0 }
 0x25a   : > { %12751 = vst [vmem:[#allocation116_spill] sm:$0xff] %v9125_v2  ;;  %v9129_v20 = vpop.f32.mrf.mxu1  ;;  %v1711_v53 = vpop.permute.xlu2 %1710 }
 0x25b   : > { %12752 = vst [vmem:[#allocation117_spill] sm:$0xff] %v9127_v10 }
 0x25c   : > { %12753 = vst [vmem:[#allocation118_spill] sm:$0xff] %v9129_v20  ;;  %7776 = vmatmul.msk.bf16.vlgmr.msra.gmra.mxu0 %vm365_vm3, %v8982_v29  ;;  %v1709_v20 = vpop.permute.xlu0 %1708 }
 0x25d   : > { %7780 = vmatmul.msk.bf16.vlgmr.msra.gmra.mxu2 %vm365_vm3, %v8982_v29  ;;  %2132 = vmatpush.bf16.msra.mxu0 %v1798_v0 }
 0x25e   : > { %7782 = vmatmul.msk.bf16.vlgmr.msra.gmra.mxu3 %vm365_vm3, %v8982_v29  ;;  %2170 = vmatpush.bf16.msra.mxu2 %v1804_v59  ;;  %v1738_v59 = vsel %vm1718_vm5, %v1707_v17, %v1709_v20  ;;  %v2432_v17 = vld.sshfl [vmem:[#allocation1 + $0x30] sm:$0xff pattern:$0x73625140] }
 0x25f   : > { %v1807_v1 = vand.u32 %v1738_v59, %v8328_v37  ;;  %2488 = vrot.lane.b32.xlu1 %v2432_v17, %s8230_s11  ;;  %v1740_v59 = vsel %vm1718_vm5, %v1711_v53, %v1713_v13  ;;  %v1739_v17 = vsel %vm1718_vm5, %v1709_v20, %v1711_v53 }
 0x260   : > { %v9141_v52 = vpop.f32.mrf.mxu2 }
 0x261   : > { %12754 = vst [vmem:[#allocation119_spill] sm:$0xff] %v9141_v52  ;;  %v9143_v42 = vpop.f32.mrf.mxu3  ;;  %v9145_v11 = vpop.f32.mrf.mxu0  ;;  %2189 = vmatpush.bf16.msra.mxu3 %v1807_v1 }
 0x262   : > { %12755 = vst [vmem:[#allocation120_spill] sm:$0xff] %v9143_v42  ;;  %v9147_v21 = vpop.f32.mrf.mxu1 }
 0x263   : > { %12756 = vst [vmem:[#allocation121_spill] sm:$0xff] %v9145_v11 }
 0x264   : > { %12757 = vst [vmem:[#allocation122_spill] sm:$0xff] %v9147_v21  ;;  %v2430_v21 = vld.sshfl [vmem:[#allocation1 + $0x28] sm:$0xff pattern:$0x73625140] }
 0x265   : > { %7779 = vmatmul.msk.bf16.gmra.mxu1 %vm365_vm3, %v9020_v8 }
 0x267   : > { %2486 = vrot.lane.b32.xlu1 %v2430_v21, %s8230_s11 }
 0x268   : > { %v9153_v38 = vpop.f32.mrf.mxu2 }
 0x269   : > { %12758 = vst [vmem:[#allocation123_spill] sm:$0xff] %v9153_v38  ;;  %v9155_v0 = vpop.f32.mrf.mxu3  ;;  %v9158_v42 = vpop.f32.mrf.mxu0  ;;  %v1813_v38 = vand.u32 %v1740_v59, %v8328_v37  ;;  %v1810_v59 = vand.u32 %v1739_v17, %v8328_v37 }
 0x26a   : > { %12759 = vst [vmem:[#allocation124_spill] sm:$0xff] %v9155_v0  ;;  %v9160_v11 = vpop.f32.mrf.mxu1 }
 0x26b   : > { %12760 = vst [vmem:[#allocation125_spill] sm:$0xff] %v9158_v42 }
 0x26c   : > { %12761 = vst [vmem:[#allocation126_spill] sm:$0xff] %v9160_v11  ;;  %7777 = vmatmul.msk.bf16.gmra.mxu0 %vm365_vm3, %v9020_v8 }
 0x26d   : > { %7781 = vmatmul.msk.bf16.gmra.mxu2 %vm365_vm3, %v9020_v8 }
 0x26e   : > { %7783 = vmatmul.msk.bf16.gmra.mxu3 %vm365_vm3, %v9020_v8 }
 0x270   : > { %v9170_v0 = vpop.f32.mrf.mxu2 }
 0x271   : > { %12762 = vst [vmem:[#allocation127_spill] sm:$0xff] %v9170_v0  ;;  %v9172_v42 = vpop.f32.mrf.mxu3  ;;  %v9174_v1 = vpop.f32.mrf.mxu0 }
 0x272   : > { %12763 = vst [vmem:[#allocation128_spill] sm:$0xff] %v9172_v42  ;;  %v9176_v11 = vpop.f32.mrf.mxu1  ;;  %v1715_v52 = vpop.permute.xlu0 %1714 }
 0x273   : > { %12764 = vst [vmem:[#allocation129_spill] sm:$0xff] %v9174_v1  ;;  %v1741_v0 = vsel %vm1718_vm5, %v1713_v13, %v1715_v52 }
 0x274   : > { %12765 = vst [vmem:[#allocation130_spill] sm:$0xff] %v9176_v11  ;;  %v1816_v2 = vand.u32 %v1741_v0, %v8328_v37  ;;  %v2428_v0 = vld.sshfl [vmem:[#allocation1 + $0x20] sm:$0xff pattern:$0x73625140] }
 0x275   : > { %7786 = vmatmul.msk.bf16.vlgmr.msrb.gmra.mxu1 %vm365_vm3, %v8982_v29  ;;  %2484 = vrot.lane.b32.xlu2 %v2428_v0, %s8230_s11 }
 0x276   : > { %2227 = vmatpush.bf16.msrb.mxu1 %v1813_v38 }
 0x278   : > { %v9184_v10 = vpop.f32.mrf.mxu2 }
 0x279   : > { %v9186_v42 = vpop.f32.mrf.mxu3  ;;  %v9188_v1 = vpop.f32.mrf.mxu0 }
 0x27a   : > { %v9190_v11 = vpop.f32.mrf.mxu1 }
 0x27b   : > { %12766 = vst [vmem:[#allocation131_spill] sm:$0xff] %v9190_v11 }
 0x27c   : > { %7784 = vmatmul.msk.bf16.vlgmr.msrb.gmra.mxu0 %vm365_vm3, %v8982_v29 }
 0x27d   : > { %7788 = vmatmul.msk.bf16.vlgmr.msrb.gmra.mxu2 %vm365_vm3, %v8982_v29  ;;  %2208 = vmatpush.bf16.msrb.mxu0 %v1810_v59 }
 0x27e   : > { %7790 = vmatmul.msk.bf16.vlgmr.msrb.gmra.mxu3 %vm365_vm3, %v8982_v29  ;;  %2246 = vmatpush.bf16.msrb.mxu2 %v1816_v2 }
 0x280   : > { %v9200_v20 = vpop.f32.mrf.mxu2 }
 0x281   : > { %12767 = vst [vmem:[#allocation132_spill] sm:$0xff] %v9200_v20  ;;  %v9202_v21 = vpop.f32.mrf.mxu3  ;;  %v9204_v13 = vpop.f32.mrf.mxu0 }
 0x282   : > { %12768 = vst [vmem:[#allocation133_spill] sm:$0xff] %v9202_v21  ;;  %v9206_v38 = vpop.f32.mrf.mxu1  ;;  %v1717_v53 = vpop.permute.xlu1 %1716 }
 0x283   : > { %12769 = vst [vmem:[#allocation134_spill] sm:$0xff] %v9204_v13  ;;  %v1742_v17 = vsel %vm1718_vm5, %v1715_v52, %v1717_v53  ;;  %v1154_v53 = vadd.f32 %v8854_v40, %v8480_v25  ;;  %v1135_v25 = vadd.f32 %v8867_v45, %v8485_v18 }
 0x284   : > { %12770 = vst [vmem:[#allocation135_spill] sm:$0xff] %v9206_v38  ;;  %v1819_v59 = vand.u32 %v1742_v17, %v8328_v37  ;;  %v2440_v38 = vld.sshfl [vmem:[#allocation1] sm:$0xff pattern:$0x73625140] }
 0x285   : > { %7787 = vmatmul.msk.bf16.gmra.mxu1 %vm365_vm3, %v9020_v8  ;;  %2492 = vrot.lane.b32.xlu0 %v2440_v38, %s8230_s11  ;;  %v2434_v38 = vld.sshfl [vmem:[#allocation1 + $0x38] sm:$0xff pattern:$0x73625140] }
 0x286   : > { %2265 = vmatpush.bf16.msrb.mxu3 %v1819_v59  ;;  %2490 = vrot.lane.b32.xlu2 %v2434_v38, %s8230_s11  ;;  %2439 = vst [vmem:[#allocation1 + $0x20] ss:$4 sm:$0xff] %v8901_v44 }
 0x288   : > { %v9212_v11 = vpop.f32.mrf.mxu2 }
 0x289   : > { %12771 = vst [vmem:[#allocation136_spill] sm:$0xff] %v9212_v11  ;;  %v9214_v2 = vpop.f32.mrf.mxu3  ;;  %v9217_v21 = vpop.f32.mrf.mxu0 }
 0x28a   : > { %12772 = vst [vmem:[#allocation137_spill] sm:$0xff] %v9214_v2  ;;  %v9219_v13 = vpop.f32.mrf.mxu1 }
 0x28b   : > { %12773 = vst [vmem:[#allocation138_spill] sm:$0xff] %v9217_v21 }
 0x28c   : > { %12774 = vst [vmem:[#allocation139_spill] sm:$0xff] %v9219_v13  ;;  %7785 = vmatmul.msk.bf16.gmra.mxu0 %vm365_vm3, %v9020_v8 }
 0x28d   : > { %7789 = vmatmul.msk.bf16.gmra.mxu2 %vm365_vm3, %v9020_v8 }
 0x28e   : > { %7791 = vmatmul.msk.bf16.gmra.mxu3 %vm365_vm3, %v9020_v8 }
 0x290   : > { %v9228_v52 = vpop.f32.mrf.mxu2 }
 0x291   : > { %12775 = vst [vmem:[#allocation140_spill] sm:$0xff] %v9228_v52  ;;  %v9230_v0 = vpop.f32.mrf.mxu3  ;;  %v9234_v17 = vpop.f32.mrf.mxu0 }
 0x292   : > { %12776 = vst [vmem:[#allocation141_spill] sm:$0xff] %v9230_v0  ;;  %v1849_v59 = vpop.f32.mrf.mxu1  ;;  %v2467_v21 = vpop.permute.xlu1 %2466 }
 0x293   : > { %12777 = vst [vmem:[#allocation142_spill] sm:$0xff] %v9234_v17  ;;  %v9236_v13 = vadd.f32 %v1849_v59, %v1154_v53  ;;  %v2465_v2 = vpop.permute.xlu0 %2464  ;;  %v1156_v59 = vadd.f32 %v8869_v41, %v8487_v19  ;;  %v9251_v17 = vpop.permute.xlu2 %2468  ;;  %v2444_v19 = vld.sshfl [vmem:[#allocation1 + $0x10] sm:$0xff pattern:$0x73625140] }
 0x294   : > { %v2513_v0 = vsel %vm2510_vm6, %v2465_v2, %v2467_v21  ;;  %v2514_v44 = vsel %vm2510_vm6, %v2467_v21, %v9251_v17  ;;  %v2446_v41 = vld.sshfl [vmem:[#allocation1 + $0x18] sm:$0xff pattern:$0x73625140]  ;;  %v1173_v21 = vadd.f32 %v8881_v9, %v8498_v23  ;;  %2496 = vrot.lane.b32.xlu2 %v2444_v19, %s8230_s11 }
 0x295   : > { %12778 = vst [vmem:[#allocation143_spill] sm:$0xff] %v9236_v13  ;;  %7794 = vmatmul.msk.bf16.vlgmr.msra.gmra.mxu1 %vm365_vm3, %v8982_v29  ;;  %v2548_v11 = vand.u32 %v2513_v0, %v8328_v37  ;;  %v2551_v18 = vand.u32 %v2514_v44, %v8328_v37  ;;  %2498 = vrot.lane.b32.xlu0 %v2446_v41, %s8230_s11 }
 0x296   : > { %v1159_v44 = vadd.f32 %v8887_v43, %v8504_v28  ;;  %v2442_v28 = vld.sshfl [vmem:[#allocation1 + $0x8] sm:$0xff pattern:$0x73625140]  ;;  %v2452_v43 = vld.sshfl [vmem:[#allocation1 + $0x30] sm:$0xff pattern:$0x73625140] }
 0x298   : > { %v9245_v40 = vpop.f32.mrf.mxu2 }
 0x299   : > { %v9247_v53 = vpop.f32.mrf.mxu3  ;;  %v1830_v13 = vpop.f32.mrf.mxu0 }
 0x29a   : > { %v9253_v52 = vadd.f32 %v1830_v13, %v1135_v25  ;;  %v1851_v38 = vpop.f32.mrf.mxu1  ;;  %v2463_v45 = vpop.permute.xlu1 %2462  ;;  %v1192_v13 = vadd.f32 %v8883_v62, %v8500_v24  ;;  %v1137_v25 = vadd.f32 %v8885_v16, %v8502_v26 }
 0x29b   : > { %v9258_v20 = vadd.f32 %v1851_v38, %v1156_v59  ;;  %v2512_v0 = vsel %vm2510_vm6, %v2463_v45, %v2465_v2  ;;  %v2473_v16 = vpop.permute.xlu2 %2472 }
 0x29c   : > { %7792 = vmatmul.msk.bf16.vlgmr.msra.gmra.mxu0 %vm365_vm3, %v8982_v29  ;;  %2494 = vrot.lane.b32.xlu2 %v2442_v28, %s8230_s11 }
 0x29d   : > { %7796 = vmatmul.msk.bf16.vlgmr.msra.gmra.mxu2 %vm365_vm3, %v8982_v29  ;;  %2504 = vrot.lane.b32.xlu0 %v2452_v43, %s8230_s11 }
 0x29e   : > { %7798 = vmatmul.msk.bf16.vlgmr.msra.gmra.mxu3 %vm365_vm3, %v8982_v29  ;;  %2658 = vmatpush.bf16.msra.mxu2 %v2548_v11  ;;  %v2545_v11 = vand.u32 %v2512_v0, %v8328_v37 }
 0x29f   : > { %2677 = vmatpush.bf16.msra.mxu3 %v2551_v18  ;;  %v2461_v18 = vpop.permute.xlu0 %2460 }
 0x2a0   : > { %v1868_v59 = vpop.f32.mrf.mxu2  ;;  %2639 = vmatpush.bf16.msra.mxu1 %v2545_v11  ;;  %v2511_v26 = vsel %vm2510_vm6, %v2461_v18, %v2463_v45  ;;  %v1140_v45 = vadd.f32 %v8896_v27, %v8517_v36  ;;  %v2450_v36 = vld.sshfl [vmem:[#allocation1 + $0x28] sm:$0xff pattern:$0x73625140]  ;;  %v1178_v27 = vadd.f32 %v8911_v61, %v8531_v46 }
 0x2a1   : > { %v1887_v38 = vpop.f32.mrf.mxu3  ;;  %v9279_v23 = vadd.f32 %v1868_v59, %v1173_v21  ;;  %v1832_v24 = vpop.f32.mrf.mxu0  ;;  %v2542_v41 = vand.u32 %v2511_v26, %v8328_v37  ;;  %v1175_v21 = vadd.f32 %v8892_v60, %v8513_v34  ;;  %v1161_v59 = vadd.f32 %v8898_v30, %v8519_v39 }
 0x2a2   : > { %v9281_v9 = vadd.f32 %v1887_v38, %v1192_v13  ;;  %v9283_v62 = vadd.f32 %v1832_v24, %v1137_v25  ;;  %v1854_v2 = vpop.f32.mrf.mxu1  ;;  %v1194_v13 = vadd.f32 %v8894_v3, %v8515_v35  ;;  %v1197_v30 = vadd.f32 %v8913_v15, %v8533_v47 }
 0x2a3   : > { %v9285_v19 = vadd.f32 %v1854_v2, %v1159_v44  ;;  %2620 = vmatpush.bf16.msra.mxu0 %v2542_v41  ;;  %v2448_v44 = vld.sshfl [vmem:[#allocation1 + $0x20] sm:$0xff pattern:$0x73625140]  ;;  %v2471_v39 = vpop.permute.xlu2 %2470  ;;  %v1142_v2 = vadd.f32 %v8915_v14, %v8535_v48  ;;  %v1230_v41 = vadd.f32 %v8917_v7, %v8537_v49  ;;  %v1180_v49 = vadd.f32 %v8926_v33, %v8544_v54 }
 0x2a4   : > { %2500 = vrot.lane.b32.xlu1 %v2448_v44, %s8230_s11  ;;  %v2516_v24 = vsel %vm2510_vm6, %v2471_v39, %v2473_v16  ;;  %v1199_v7 = vadd.f32 %v8928_v32, %v8546_v55  ;;  %v2515_v14 = vsel %vm2510_vm6, %v9251_v17, %v2471_v39 }
 0x2a5   : > { %7795 = vmatmul.msk.bf16.gmra.mxu1 %vm365_vm3, %v9020_v8  ;;  %2502 = vrot.lane.b32.xlu0 %v2450_v36, %s8230_s11  ;;  %v2557_v15 = vand.u32 %v2516_v24, %v8328_v37  ;;  %v2554_v32 = vand.u32 %v2515_v14, %v8328_v37  ;;  %v12779_v36 = vld [vmem:[#allocation75_spill] sm:$0xff] }
 0x2a6   : > { %v1235_v39 = vadd.f32 %v12779_v36, %v8568_v6  ;;  %v12780_v6 = vld [vmem:[#allocation2_spill] sm:$0xff]  ;;  %v12791_v36 = vld [vmem:[#allocation81_spill] sm:$0xff] }
 0x2a7   : > { %v2475_v48 = vpop.permute.xlu0 %2474 }
 0x2a8   : > { %v1870_v0 = vpop.f32.mrf.mxu2 }
 0x2a9   : > { %v1889_v25 = vpop.f32.mrf.mxu3  ;;  %v9301_v38 = vadd.f32 %v1870_v0, %v1175_v21  ;;  %v1835_v34 = vpop.f32.mrf.mxu0 }
 0x2aa   : > { %v9303_v11 = vadd.f32 %v1889_v25, %v1194_v13  ;;  %v9305_v60 = vadd.f32 %v1835_v34, %v1140_v45  ;;  %v1856_v35 = vpop.f32.mrf.mxu1  ;;  %v2517_v13 = vsel %vm2510_vm6, %v2473_v16, %v2475_v48  ;;  %v1211_v45 = vadd.f32 %v8930_v63, %v8548_v57 }
 0x2ab   : > { %v9307_v3 = vadd.f32 %v1856_v35, %v1161_v59  ;;  %v1232_v59 = vadd.f32 %v8932_v31, %v8550_v58  ;;  %v2560_v17 = vand.u32 %v2517_v13, %v8328_v37  ;;  %v1249_v57 = vadd.f32 %v8945_v56, %v8562_v4  ;;  %v12786_v13 = vld [vmem:[#allocation5_spill] sm:$0xff] }
 0x2ac   : > { %7793 = vmatmul.msk.bf16.gmra.mxu0 %vm365_vm3, %v9020_v8  ;;  %v1268_v58 = vadd.f32 %v8947_v51, %v8564_v5  ;;  %v1213_v31 = vadd.f32 %v8949_v50, %v8566_v12  ;;  %v2454_v51 = vld.sshfl [vmem:[#allocation1 + $0x38] sm:$0xff pattern:$0x73625140] }
 0x2ad   : > { %7797 = vmatmul.msk.bf16.gmra.mxu2 %vm365_vm3, %v9020_v8  ;;  %2506 = vrot.lane.b32.xlu1 %v2454_v51, %s8230_s11 }
 0x2ae   : > { %7799 = vmatmul.msk.bf16.gmra.mxu3 %vm365_vm3, %v9020_v8 }
 0x2b0   : > { %v1873_v18 = vpop.f32.mrf.mxu2 }
 0x2b1   : > { %v1892_v26 = vpop.f32.mrf.mxu3  ;;  %v9326_v28 = vadd.f32 %v1873_v18, %v1178_v27  ;;  %v1837_v46 = vpop.f32.mrf.mxu0  ;;  %v12781_v18 = vld [vmem:[#allocation76_spill] sm:$0xff] }
 0x2b2   : > { %v9328_v43 = vadd.f32 %v1892_v26, %v1197_v30  ;;  %v9330_v61 = vadd.f32 %v1837_v46, %v1142_v2  ;;  %v1925_v47 = vpop.f32.mrf.mxu1  ;;  %v1251_v26 = vadd.f32 %v12781_v18, %v12780_v6  ;;  %v12783_v46 = vld [vmem:[#allocation77_spill] sm:$0xff] }
 0x2b3   : > { %v9333_v21 = vadd.f32 %v1925_v47, %v1230_v41  ;;  %v12782_v41 = vld [vmem:[#allocation3_spill] sm:$0xff]  ;;  %v12794_v18 = vld [vmem:[#allocation9_spill] sm:$0xff] }
 0x2b4   : > { %v1270_v47 = vadd.f32 %v12783_v46, %v12782_v41 }
 0x2b5   : > { %7802 = vmatmul.msk.bf16.vlgmr.msrb.gmra.mxu1 %vm365_vm3, %v8982_v29 }
 0x2b6   : > { %2715 = vmatpush.bf16.msrb.mxu1 %v2557_v15  ;;  %v12784_v15 = vld [vmem:[#allocation4_spill] sm:$0xff] }
 0x2b8   : > { %v1875_v0 = vpop.f32.mrf.mxu2 }
 0x2b9   : > { %v1894_v25 = vpop.f32.mrf.mxu3  ;;  %v9348_v34 = vadd.f32 %v1875_v0, %v1180_v49  ;;  %v1906_v54 = vpop.f32.mrf.mxu0  ;;  %v12785_v49 = vld [vmem:[#allocation78_spill] sm:$0xff] }
 0x2ba   : > { %v9350_v35 = vadd.f32 %v1894_v25, %v1199_v7  ;;  %v9352_v33 = vadd.f32 %v1906_v54, %v1211_v45  ;;  %v1927_v55 = vpop.f32.mrf.mxu1  ;;  %v2477_v4 = vpop.permute.xlu1 %2476  ;;  %v1216_v7 = vadd.f32 %v12785_v49, %v12784_v15  ;;  %v12787_v45 = vld [vmem:[#allocation79_spill] sm:$0xff] }
 0x2bb   : > { %v9356_v16 = vadd.f32 %v1927_v55, %v1232_v59  ;;  %v2518_v5 = vsel %vm2510_vm6, %v2475_v48, %v2477_v4  ;;  %v2481_v12 = vpop.permute.xlu0 %2480  ;;  %v1237_v0 = vadd.f32 %v12787_v45, %v12786_v13  ;;  %v9423_v15 = vld [vmem:[%s12629_s1 + $0x30] sm:$0xff]  ;;  %v12796_v45 = vld [vmem:[#allocation10_spill] sm:$0xff] }
 0x2bc   : > { %7800 = vmatmul.msk.bf16.vlgmr.msrb.gmra.mxu0 %vm365_vm3, %v8982_v29  ;;  %v2563_v50 = vand.u32 %v2518_v5, %v8328_v37  ;;  %v12793_v5 = vld [vmem:[#allocation82_spill] sm:$0xff] }
 0x2bd   : > { %7804 = vmatmul.msk.bf16.vlgmr.msrb.gmra.mxu2 %vm365_vm3, %v8982_v29  ;;  %2696 = vmatpush.bf16.msrb.mxu0 %v2554_v32 }
 0x2be   : > { %7806 = vmatmul.msk.bf16.vlgmr.msrb.gmra.mxu3 %vm365_vm3, %v8982_v29  ;;  %2734 = vmatpush.bf16.msrb.mxu2 %v2560_v17 }
 0x2bf   : > { %2753 = vmatpush.bf16.msrb.mxu3 %v2563_v50 }
 0x2c0   : > { %v1944_v63 = vpop.f32.mrf.mxu2 }
 0x2c1   : > { %v1963_v44 = vpop.f32.mrf.mxu3  ;;  %v9372_v27 = vadd.f32 %v1944_v63, %v1249_v57  ;;  %v1908_v29 = vpop.f32.mrf.mxu0 }
 0x2c2   : > { %v9374_v30 = vadd.f32 %v1963_v44, %v1268_v58  ;;  %v9376_v24 = vadd.f32 %v1908_v29, %v1213_v31  ;;  %v1930_v2 = vpop.f32.mrf.mxu1  ;;  %v12788_v58 = vld [vmem:[#allocation6_spill] sm:$0xff]  ;;  %v12789_v31 = vld [vmem:[#allocation80_spill] sm:$0xff]  ;;  %v12790_v44 = vld [vmem:[#allocation7_spill] sm:$0xff]  ;;  %v2483_v13 = vpop.permute.xlu1 %2482 }
 0x2c3   : > { %v9378_v56 = vadd.f32 %v1930_v2, %v1235_v39  ;;  %v2479_v57 = vpop.permute.xlu0 %2478  ;;  %v1254_v63 = vadd.f32 %v12789_v31, %v12788_v58  ;;  %v1273_v39 = vadd.f32 %v12791_v36, %v12790_v44  ;;  %v12792_v2 = vld [vmem:[#allocation8_spill] sm:$0xff]  ;;  %v12799_v58 = vld [vmem:[#allocation85_spill] sm:$0xff]  ;;  %v2521_v44 = vsel %vm2510_vm6, %v2481_v12, %v2483_v13 }
 0x2c4   : > { %v2520_v29 = vsel %vm2510_vm6, %v2479_v57, %v2481_v12  ;;  %v1218_v51 = vadd.f32 %v12793_v5, %v12792_v2  ;;  %v12800_v36 = vld [vmem:[#allocation12_spill] sm:$0xff]  ;;  %v2572_v12 = vand.u32 %v2521_v44, %v8328_v37 }
 0x2c5   : > { %7803 = vmatmul.msk.bf16.gmra.mxu1 %vm365_vm3, %v9020_v8  ;;  %v12809_v44 = vld [vmem:[#allocation16_spill] sm:$0xff] }
 0x2c8   : > { %v1946_v48 = vpop.f32.mrf.mxu2 }
 0x2c9   : > { %v1965_v14 = vpop.f32.mrf.mxu3  ;;  %v9393_v25 = vadd.f32 %v1946_v48, %v1251_v26  ;;  %v1911_v54 = vpop.f32.mrf.mxu0  ;;  %v12795_v26 = vld [vmem:[#allocation83_spill] sm:$0xff]  ;;  %v2569_v48 = vand.u32 %v2520_v29, %v8328_v37 }
 0x2ca   : > { %v9395_v59 = vadd.f32 %v1965_v14, %v1270_v47  ;;  %v9397_v55 = vadd.f32 %v1911_v54, %v1216_v7  ;;  %v1932_v32 = vpop.f32.mrf.mxu1  ;;  %v1306_v41 = vadd.f32 %v12795_v26, %v12794_v18 }
 0x2cb   : > { %v9399_v17 = vadd.f32 %v1932_v32, %v1237_v0  ;;  %v12797_v0 = vld [vmem:[#allocation84_spill] sm:$0xff]  ;;  %v12798_v32 = vld [vmem:[#allocation11_spill] sm:$0xff] }
 0x2cc   : > { %7801 = vmatmul.msk.bf16.gmra.mxu0 %vm365_vm3, %v9020_v8  ;;  %v1256_v54 = vadd.f32 %v12797_v0, %v12796_v45  ;;  %v1275_v31 = vadd.f32 %v12799_v58, %v12798_v32  ;;  %v12805_v45 = vld [vmem:[#allocation14_spill] sm:$0xff]  ;;  %v12806_v0 = vld [vmem:[#allocation88_spill] sm:$0xff]  ;;  %v12807_v32 = vld [vmem:[#allocation15_spill] sm:$0xff] }
 0x2cd   : > { %7805 = vmatmul.msk.bf16.gmra.mxu2 %vm365_vm3, %v9020_v8  ;;  %v12808_v58 = vld [vmem:[#allocation89_spill] sm:$0xff] }
 0x2ce   : > { %7807 = vmatmul.msk.bf16.gmra.mxu3 %vm365_vm3, %v9020_v8 }
 0x2d0   : > { %v1949_v50 = vpop.f32.mrf.mxu2 }
 0x2d1   : > { %v1968_v6 = vpop.f32.mrf.mxu3  ;;  %v9416_v46 = vadd.f32 %v1949_v50, %v1254_v63  ;;  %v1913_v47 = vpop.f32.mrf.mxu0  ;;  %v2519_v63 = vsel %vm2510_vm6, %v2477_v4, %v2479_v57  ;;  %v12803_v50 = vld [vmem:[#allocation87_spill] sm:$0xff] }
 0x2d2   : > { %v9418_v8 = vadd.f32 %v1968_v6, %v1273_v39  ;;  %v9425_v49 = vadd.f32 %v1913_v47, %v1218_v51  ;;  %v2001_v7 = vpop.f32.mrf.mxu1  ;;  %v12801_v39 = vld [vmem:[#allocation86_spill] sm:$0xff]  ;;  %v12802_v51 = vld [vmem:[#allocation13_spill] sm:$0xff]  ;;  %v2566_v4 = vand.u32 %v2519_v63, %v8328_v37 }
 0x2d3   : > { %v9428_v14 = vadd.f32 %v2001_v7, %v1306_v41  ;;  %v1287_v29 = vadd.f32 %v12801_v39, %v12800_v36  ;;  %v1308_v6 = vadd.f32 %v12803_v50, %v12802_v51  ;;  %v12810_v36 = vld [vmem:[#allocation90_spill] sm:$0xff]  ;;  %v12811_v51 = vld [vmem:[#allocation17_spill] sm:$0xff]  ;;  %v12812_v50 = vld [vmem:[#allocation91_spill] sm:$0xff] }
 0x2d4   : > { %v1289_v39 = vadd.f32 %v12810_v36, %v12809_v44  ;;  %v12819_v44 = vld [vmem:[#allocation19_spill] sm:$0xff]  ;;  %v12820_v36 = vld [vmem:[#allocation93_spill] sm:$0xff] }
 0x2d5   : > { %7822 = vmatmul.msk.bf16.vlgmr.msra.gmra.mxu1 %vm365_vm3, %v9423_v15 }
 0x2d6   : > { %2791 = vmatpush.bf16.msra.mxu1 %v2569_v48  ;;  %v2485_v48 = vpop.permute.xlu2 %2484 }
 0x2d7   : > { %v2522_v63 = vsel %vm2510_vm6, %v2483_v13, %v2485_v48 }
 0x2d8   : > { %v1951_v2 = vpop.f32.mrf.mxu2 }
 0x2d9   : > { %v1970_v5 = vpop.f32.mrf.mxu3  ;;  %v9442_v18 = vadd.f32 %v1951_v2, %v1256_v54  ;;  %v1982_v41 = vpop.f32.mrf.mxu0  ;;  %v1325_v54 = vadd.f32 %v12806_v0, %v12805_v45 }
 0x2da   : > { %v9444_v26 = vadd.f32 %v1970_v5, %v1275_v31  ;;  %v9446_v47 = vadd.f32 %v1982_v41, %v1287_v29  ;;  %v2003_v7 = vpop.f32.mrf.mxu1  ;;  %v1344_v31 = vadd.f32 %v12808_v58, %v12807_v32  ;;  %v2575_v5 = vand.u32 %v2522_v63, %v8328_v37  ;;  %v2379_v32 = vld [vmem:[%s8276_s21 + $0x30] sm:$0x3]  ;;  %v2489_v58 = vpop.permute.xlu1 %2488 }
 0x2db   : > { %v9450_v57 = vadd.f32 %v2003_v7, %v1308_v6  ;;  %v1311_v6 = vadd.f32 %v12812_v50, %v12811_v51  ;;  %2457 = vst [vmem:[#allocation1] ss:$4 sm:$0xff] %v2379_v32  ;;  %v12822_v51 = vld [vmem:[#allocation94_spill] sm:$0xff] }
 0x2dc   : > { %7820 = vmatmul.msk.bf16.vlgmr.msra.gmra.mxu0 %vm365_vm3, %v9423_v15 }
 0x2dd   : > { %12804 = vst [vmem:[#allocation75_spill] sm:$0xff] %v9450_v57  ;;  %7824 = vmatmul.msk.bf16.vlgmr.msra.gmra.mxu2 %vm365_vm3, %v9423_v15  ;;  %2772 = vmatpush.bf16.msra.mxu0 %v2566_v4 }
 0x2de   : > { %7826 = vmatmul.msk.bf16.vlgmr.msra.gmra.mxu3 %vm365_vm3, %v9423_v15  ;;  %2810 = vmatpush.bf16.msra.mxu2 %v2572_v12  ;;  %v9475_v12 = vld [vmem:[%s12629_s1 + $0x38] sm:$0xff] }
 0x2df   : > { %2829 = vmatpush.bf16.msra.mxu3 %v2575_v5  ;;  %v12823_v5 = vld [vmem:[#allocation21_spill] sm:$0xff] }
 0x2e0   : > { %v2020_v29 = vpop.f32.mrf.mxu2 }
 0x2e1   : > { %v2039_v2 = vpop.f32.mrf.mxu3  ;;  %v9468_v41 = vadd.f32 %v2020_v29, %v1325_v54  ;;  %v1984_v4 = vpop.f32.mrf.mxu0  ;;  %v12817_v54 = vld [vmem:[#allocation18_spill] sm:$0xff]  ;;  %v1346_v29 = vadd.f32 %v12820_v36, %v12819_v44  ;;  %v12830_v36 = vld [vmem:[#allocation96_spill] sm:$0xff] }
 0x2e2   : > { %v9470_v7 = vadd.f32 %v2039_v2, %v1344_v31  ;;  %v9477_v13 = vadd.f32 %v1984_v4, %v1289_v39  ;;  %v2006_v45 = vpop.f32.mrf.mxu1  ;;  %v12818_v31 = vld [vmem:[#allocation92_spill] sm:$0xff]  ;;  %v12829_v44 = vld [vmem:[#allocation22_spill] sm:$0xff] }
 0x2e3   : > { %12813 = vst [vmem:[#allocation2_spill] sm:$0xff] %v9468_v41  ;;  %v9479_v0 = vadd.f32 %v2006_v45, %v1311_v6  ;;  %v1327_v63 = vadd.f32 %v12818_v31, %v12817_v54  ;;  %v12821_v2 = vld [vmem:[#allocation20_spill] sm:$0xff]  ;;  %v12824_v6 = vld [vmem:[#allocation95_spill] sm:$0xff]  ;;  %v2458_v31 = vld.sshfl [vmem:[#allocation1] sm:$0xff pattern:$0x73625140] }
 0x2e4   : > { %12814 = vst [vmem:[#allocation76_spill] sm:$0xff] %v9470_v7  ;;  %v1292_v39 = vadd.f32 %v12822_v51, %v12821_v2  ;;  %v1313_v45 = vadd.f32 %v12824_v6, %v12823_v5  ;;  %2508 = vrot.lane.b32.xlu2 %v2458_v31, %s8230_s11  ;;  %v12832_v2 = vld [vmem:[#allocation97_spill] sm:$0xff]  ;;  %v12836_v31 = vld [vmem:[#allocation99_spill] sm:$0xff] }
 0x2e5   : > { %12815 = vst [vmem:[#allocation3_spill] sm:$0xff] %v9477_v13  ;;  %7823 = vmatmul.msk.bf16.gmra.mxu1 %vm365_vm3, %v9475_v12 }
 0x2e6   : > { %12816 = vst [vmem:[#allocation77_spill] sm:$0xff] %v9479_v0 }
 0x2e8   : > { %v2022_v50 = vpop.f32.mrf.mxu2 }
 0x2e9   : > { %v2041_v4 = vpop.f32.mrf.mxu3  ;;  %v9492_v0 = vadd.f32 %v2022_v50, %v1327_v63  ;;  %v1987_v13 = vpop.f32.mrf.mxu0  ;;  %v12834_v50 = vld [vmem:[#allocation98_spill] sm:$0xff] }
 0x2ea   : > { %v9494_v32 = vadd.f32 %v2041_v4, %v1346_v29  ;;  %v9496_v7 = vadd.f32 %v1987_v13, %v1292_v39  ;;  %v2008_v41 = vpop.f32.mrf.mxu1  ;;  %v2487_v63 = vpop.permute.xlu1 %2486  ;;  %v1330_v13 = vadd.f32 %v12830_v36, %v12829_v44  ;;  %v12831_v29 = vld [vmem:[#allocation23_spill] sm:$0xff]  ;;  %v12833_v39 = vld [vmem:[#allocation24_spill] sm:$0xff] }
 0x2eb   : > { %12825 = vst [vmem:[#allocation4_spill] sm:$0xff] %v9492_v0  ;;  %v9498_v54 = vadd.f32 %v2008_v41, %v1313_v45  ;;  %v1349_v41 = vadd.f32 %v12832_v2, %v12831_v29  ;;  %v2524_v51 = vsel %vm2510_vm6, %v2487_v63, %v2489_v58  ;;  %v1294_v4 = vadd.f32 %v12834_v50, %v12833_v39  ;;  %v12835_v45 = vld [vmem:[#allocation25_spill] sm:$0xff]  ;;  %v2491_v2 = vpop.permute.xlu2 %2490  ;;  %v12841_v39 = vld [vmem:[#allocation26_spill] sm:$0xff]  ;;  %v12842_v50 = vld [vmem:[#allocation100_spill] sm:$0xff] }
 0x2ec   : > { %12826 = vst [vmem:[#allocation78_spill] sm:$0xff] %v9494_v32  ;;  %7821 = vmatmul.msk.bf16.gmra.mxu0 %vm365_vm3, %v9475_v12  ;;  %v2581_v36 = vand.u32 %v2524_v51, %v8328_v37 }
 0x2ed   : > { %12827 = vst [vmem:[#allocation5_spill] sm:$0xff] %v9496_v7  ;;  %7825 = vmatmul.msk.bf16.gmra.mxu2 %vm365_vm3, %v9475_v12 }
 0x2ee   : > { %12828 = vst [vmem:[#allocation79_spill] sm:$0xff] %v9498_v54  ;;  %7827 = vmatmul.msk.bf16.gmra.mxu3 %vm365_vm3, %v9475_v12  ;;  %v1382_v54 = vadd.f32 %v12836_v31, %v12835_v45  ;;  %v1332_v45 = vadd.f32 %v12842_v50, %v12841_v39  ;;  %v12846_v31 = vld [vmem:[#allocation102_spill] sm:$0xff] }
 0x2f0   : > { %v2025_v5 = vpop.f32.mrf.mxu2 }
 0x2f1   : > { %v2044_v6 = vpop.f32.mrf.mxu3  ;;  %v9516_v7 = vadd.f32 %v2025_v5, %v1330_v13  ;;  %v1989_v0 = vpop.f32.mrf.mxu0  ;;  %v12843_v13 = vld [vmem:[#allocation27_spill] sm:$0xff]  ;;  %v12844_v5 = vld [vmem:[#allocation101_spill] sm:$0xff] }
 0x2f2   : > { %v9518_v32 = vadd.f32 %v2044_v6, %v1349_v41  ;;  %v9520_v57 = vadd.f32 %v1989_v0, %v1294_v4  ;;  %v2077_v44 = vpop.f32.mrf.mxu1  ;;  %v1351_v41 = vadd.f32 %v12844_v5, %v12843_v13  ;;  %v2523_v6 = vsel %vm2510_vm6, %v2485_v48, %v2487_v63  ;;  %v12845_v4 = vld [vmem:[#allocation28_spill] sm:$0xff] }
 0x2f3   : > { %12837 = vst [vmem:[#allocation6_spill] sm:$0xff] %v9516_v7  ;;  %v9523_v29 = vadd.f32 %v2077_v44, %v1382_v54  ;;  %v2525_v0 = vsel %vm2510_vm6, %v2489_v58, %v2491_v2  ;;  %v1363_v51 = vadd.f32 %v12846_v31, %v12845_v4  ;;  %v2578_v48 = vand.u32 %v2523_v6, %v8328_v37  ;;  %v12856_v6 = vld [vmem:[#allocation105_spill] sm:$0xff]  ;;  %v12857_v4 = vld [vmem:[#allocation32_spill] sm:$0xff]  ;;  %v12858_v31 = vld [vmem:[#allocation106_spill] sm:$0xff] }
 0x2f4   : > { %12838 = vst [vmem:[#allocation80_spill] sm:$0xff] %v9518_v32  ;;  %v2584_v58 = vand.u32 %v2525_v0, %v8328_v37 }
 0x2f5   : > { %12839 = vst [vmem:[#allocation7_spill] sm:$0xff] %v9520_v57  ;;  %7830 = vmatmul.msk.bf16.vlgmr.msrb.gmra.mxu1 %vm365_vm3, %v9423_v15  ;;  %v12848_v57 = vld [vmem:[#allocation103_spill] sm:$0xff] }
 0x2f6   : > { %12840 = vst [vmem:[#allocation81_spill] sm:$0xff] %v9523_v29  ;;  %2867 = vmatpush.bf16.msrb.mxu1 %v2581_v36  ;;  %v12847_v29 = vld [vmem:[#allocation29_spill] sm:$0xff] }
 0x2f7   : > { %v1384_v32 = vadd.f32 %v12848_v57, %v12847_v29  ;;  %v2493_v57 = vpop.permute.xlu0 %2492  ;;  %v12853_v29 = vld [vmem:[#allocation30_spill] sm:$0xff] }
 0x2f8   : > { %v2027_v54 = vpop.f32.mrf.mxu2 }
 0x2f9   : > { %v2046_v44 = vpop.f32.mrf.mxu3  ;;  %v9537_v7 = vadd.f32 %v2027_v54, %v1332_v45  ;;  %v2058_v39 = vpop.f32.mrf.mxu0  ;;  %v12854_v45 = vld [vmem:[#allocation104_spill] sm:$0xff] }
 0x2fa   : > { %v9539_v36 = vadd.f32 %v2046_v44, %v1351_v41  ;;  %v9541_v50 = vadd.f32 %v2058_v39, %v1363_v51  ;;  %v2079_v13 = vpop.f32.mrf.mxu1  ;;  %v1401_v5 = vadd.f32 %v12854_v45, %v12853_v29  ;;  %v12855_v41 = vld [vmem:[#allocation31_spill] sm:$0xff]  ;;  %v1365_v51 = vadd.f32 %v12858_v31, %v12857_v4  ;;  %v12865_v4 = vld [vmem:[#allocation34_spill] sm:$0xff] }
 0x2fb   : > { %12849 = vst [vmem:[#allocation8_spill] sm:$0xff] %v9537_v7  ;;  %v9545_v63 = vadd.f32 %v2079_v13, %v1384_v32  ;;  %v1420_v0 = vadd.f32 %v12856_v6, %v12855_v41  ;;  %v2526_v32 = vsel %vm2510_vm6, %v2491_v2, %v2493_v57  ;;  %v12859_v13 = vld [vmem:[#allocation33_spill] sm:$0xff]  ;;  %v2497_v6 = vpop.permute.xlu2 %2496 }
 0x2fc   : > { %12850 = vst [vmem:[#allocation82_spill] sm:$0xff] %v9539_v36  ;;  %7828 = vmatmul.msk.bf16.vlgmr.msrb.gmra.mxu0 %vm365_vm3, %v9423_v15  ;;  %v2587_v39 = vand.u32 %v2526_v32, %v8328_v37  ;;  %v12866_v32 = vld [vmem:[#allocation108_spill] sm:$0xff]  ;;  %v12867_v36 = vld [vmem:[#allocation35_spill] sm:$0xff] }
 0x2fd   : > { %12851 = vst [vmem:[#allocation9_spill] sm:$0xff] %v9541_v50  ;;  %7832 = vmatmul.msk.bf16.vlgmr.msrb.gmra.mxu2 %vm365_vm3, %v9423_v15  ;;  %2848 = vmatpush.bf16.msrb.mxu0 %v2578_v48  ;;  %v1403_v31 = vadd.f32 %v12866_v32, %v12865_v4  ;;  %v12878_v32 = vld [vmem:[#allocation112_spill] sm:$0xff] }
 0x2fe   : > { %12852 = vst [vmem:[#allocation83_spill] sm:$0xff] %v9545_v63  ;;  %7834 = vmatmul.msk.bf16.vlgmr.msrb.gmra.mxu3 %vm365_vm3, %v9423_v15  ;;  %2886 = vmatpush.bf16.msrb.mxu2 %v2584_v58  ;;  %v12860_v63 = vld [vmem:[#allocation107_spill] sm:$0xff] }
 0x2ff   : > { %v1387_v48 = vadd.f32 %v12860_v63, %v12859_v13  ;;  %2905 = vmatpush.bf16.msrb.mxu3 %v2587_v39  ;;  %v12868_v63 = vld [vmem:[#allocation109_spill] sm:$0xff] }
 0x300   : > { %v2096_v54 = vpop.f32.mrf.mxu2 }
 0x301   : > { %v2115_v44 = vpop.f32.mrf.mxu3  ;;  %v9563_v58 = vadd.f32 %v2096_v54, %v1401_v5  ;;  %v2060_v29 = vpop.f32.mrf.mxu0  ;;  %v1422_v5 = vadd.f32 %v12868_v63, %v12867_v36  ;;  %v12869_v54 = vld [vmem:[#allocation36_spill] sm:$0xff]  ;;  %v12879_v63 = vld [vmem:[#allocation39_spill] sm:$0xff] }
 0x302   : > { %v9565_v50 = vadd.f32 %v2115_v44, %v1420_v0  ;;  %v9567_v45 = vadd.f32 %v2060_v29, %v1365_v51  ;;  %v2082_v41 = vpop.f32.mrf.mxu1  ;;  %v12870_v0 = vld [vmem:[#allocation110_spill] sm:$0xff]  ;;  %v12871_v29 = vld [vmem:[#allocation37_spill] sm:$0xff] }
 0x303   : > { %12861 = vst [vmem:[#allocation10_spill] sm:$0xff] %v9563_v58  ;;  %v9569_v2 = vadd.f32 %v2082_v41, %v1387_v48  ;;  %v1368_v44 = vadd.f32 %v12870_v0, %v12869_v54  ;;  %v2495_v36 = vpop.permute.xlu2 %2494  ;;  %v12882_v0 = vld [vmem:[#allocation114_spill] sm:$0xff] }
 0x304   : > { %12862 = vst [vmem:[#allocation84_spill] sm:$0xff] %v9565_v50  ;;  %v2528_v54 = vsel %vm2510_vm6, %v2495_v36, %v2497_v6 }
 0x305   : > { %12863 = vst [vmem:[#allocation11_spill] sm:$0xff] %v9567_v45  ;;  %7831 = vmatmul.msk.bf16.gmra.mxu1 %vm365_vm3, %v9475_v12  ;;  %v12872_v45 = vld [vmem:[#allocation111_spill] sm:$0xff] }
 0x306   : > { %12864 = vst [vmem:[#allocation85_spill] sm:$0xff] %v9569_v2  ;;  %v1389_v39 = vadd.f32 %v12872_v45, %v12871_v29  ;;  %v12877_v45 = vld [vmem:[#allocation38_spill] sm:$0xff]  ;;  %v12883_v29 = vld [vmem:[#allocation41_spill] sm:$0xff] }
 0x308   : > { %v2098_v13 = vpop.f32.mrf.mxu2 }
 0x309   : > { %v2117_v51 = vpop.f32.mrf.mxu3  ;;  %v9581_v48 = vadd.f32 %v2098_v13, %v1403_v31  ;;  %v2063_v2 = vpop.f32.mrf.mxu0  ;;  %v1406_v31 = vadd.f32 %v12878_v32, %v12877_v45  ;;  %v2593_v32 = vand.u32 %v2528_v54, %v8328_v37 }
 0x30a   : > { %v9583_v41 = vadd.f32 %v2117_v51, %v1422_v5  ;;  %v9585_v50 = vadd.f32 %v2063_v2, %v1368_v44  ;;  %v2084_v58 = vpop.f32.mrf.mxu1  ;;  %v12880_v5 = vld [vmem:[#allocation113_spill] sm:$0xff] }
 0x30b   : > { %12873 = vst [vmem:[#allocation12_spill] sm:$0xff] %v9581_v48  ;;  %v9587_v4 = vadd.f32 %v2084_v58, %v1389_v39  ;;  %v1425_v2 = vadd.f32 %v12880_v5, %v12879_v63  ;;  %v12881_v58 = vld [vmem:[#allocation40_spill] sm:$0xff]  ;;  %v12884_v39 = vld [vmem:[#allocation115_spill] sm:$0xff]  ;;  %v2499_v5 = vpop.permute.xlu0 %2498 }
 0x30c   : > { %12874 = vst [vmem:[#allocation86_spill] sm:$0xff] %v9583_v41  ;;  %7829 = vmatmul.msk.bf16.gmra.mxu0 %vm365_vm3, %v9475_v12  ;;  %v1370_v44 = vadd.f32 %v12882_v0, %v12881_v58  ;;  %v12888_v58 = vld [vmem:[#allocation42_spill] sm:$0xff] }
 0x30d   : > { %12875 = vst [vmem:[#allocation13_spill] sm:$0xff] %v9585_v50  ;;  %7833 = vmatmul.msk.bf16.gmra.mxu2 %vm365_vm3, %v9475_v12  ;;  %v1408_v0 = vadd.f32 %v9123_v22, %v12888_v58 }
 0x30e   : > { %12876 = vst [vmem:[#allocation87_spill] sm:$0xff] %v9587_v4  ;;  %7835 = vmatmul.msk.bf16.gmra.mxu3 %vm365_vm3, %v9475_v12  ;;  %v1458_v4 = vadd.f32 %v12884_v39, %v12883_v29  ;;  %v12892_v29 = vld [vmem:[#allocation117_spill] sm:$0xff] }
 0x310   : > { %v2101_v13 = vpop.f32.mrf.mxu2 }
 0x311   : > { %v2120_v51 = vpop.f32.mrf.mxu3  ;;  %v9604_v50 = vadd.f32 %v2101_v13, %v1406_v31  ;;  %v2065_v48 = vpop.f32.mrf.mxu0  ;;  %v12889_v31 = vld [vmem:[#allocation43_spill] sm:$0xff]  ;;  %v12890_v13 = vld [vmem:[#allocation116_spill] sm:$0xff] }
 0x312   : > { %v9606_v41 = vadd.f32 %v2120_v51, %v1425_v2  ;;  %v9608_v7 = vadd.f32 %v2065_v48, %v1370_v44  ;;  %v2153_v45 = vpop.f32.mrf.mxu1  ;;  %v1427_v2 = vadd.f32 %v12890_v13, %v12889_v31  ;;  %v2527_v51 = vsel %vm2510_vm6, %v2493_v57, %v2495_v36  ;;  %v12891_v44 = vld [vmem:[#allocation44_spill] sm:$0xff]  ;;  %v12900_v13 = vld [vmem:[#allocation119_spill] sm:$0xff] }
 0x313   : > { %v9611_v63 = vadd.f32 %v2153_v45, %v1458_v4  ;;  %v2529_v48 = vsel %vm2510_vm6, %v2497_v6, %v2499_v5  ;;  %v1439_v54 = vadd.f32 %v12892_v29, %v12891_v44  ;;  %v12893_v45 = vld [vmem:[#allocation45_spill] sm:$0xff]  ;;  %v2590_v57 = vand.u32 %v2527_v51, %v8328_v37  ;;  %v12901_v51 = vld [vmem:[#allocation47_spill] sm:$0xff]  ;;  %v12902_v44 = vld [vmem:[#allocation120_spill] sm:$0xff] }
 0x314   : > { %12885 = vst [vmem:[#allocation14_spill] sm:$0xff] %v9606_v41  ;;  %v2596_v6 = vand.u32 %v2529_v48, %v8328_v37  ;;  %v1496_v48 = vadd.f32 %v12902_v44, %v12901_v51  ;;  %v12903_v29 = vld [vmem:[#allocation48_spill] sm:$0xff]  ;;  %v2505_v44 = vpop.permute.xlu0 %2504 }
 0x315   : > { %12886 = vst [vmem:[#allocation88_spill] sm:$0xff] %v9608_v7  ;;  %7838 = vmatmul.msk.bf16.vlgmr.msra.gmra.mxu1 %vm365_vm3, %v9423_v15 }
 0x316   : > { %12887 = vst [vmem:[#allocation15_spill] sm:$0xff] %v9611_v63  ;;  %2943 = vmatpush.bf16.msra.mxu1 %v2593_v32  ;;  %v12894_v63 = vld [vmem:[#allocation118_spill] sm:$0xff] }
 0x317   : > { %v1460_v7 = vadd.f32 %v12894_v63, %v12893_v45  ;;  %v2501_v63 = vpop.permute.xlu1 %2500 }
 0x318   : > { %v2103_v4 = vpop.f32.mrf.mxu2 }
 0x319   : > { %v2122_v39 = vpop.f32.mrf.mxu3  ;;  %v9625_v41 = vadd.f32 %v2103_v4, %v1408_v0  ;;  %v2134_v22 = vpop.f32.mrf.mxu0  ;;  %v12899_v0 = vld [vmem:[#allocation46_spill] sm:$0xff] }
 0x31a   : > { %v9627_v32 = vadd.f32 %v2122_v39, %v1427_v2  ;;  %v9629_v58 = vadd.f32 %v2134_v22, %v1439_v54  ;;  %v2155_v31 = vpop.f32.mrf.mxu1  ;;  %v1477_v2 = vadd.f32 %v12900_v13, %v12899_v0  ;;  %v12904_v54 = vld [vmem:[#allocation121_spill] sm:$0xff] }
 0x31b   : > { %12895 = vst [vmem:[#allocation89_spill] sm:$0xff] %v9625_v41  ;;  %v9633_v36 = vadd.f32 %v2155_v31, %v1460_v7  ;;  %v2530_v7 = vsel %vm2510_vm6, %v2499_v5, %v2501_v63  ;;  %v1441_v4 = vadd.f32 %v12904_v54, %v12903_v29  ;;  %v12905_v31 = vld [vmem:[#allocation49_spill] sm:$0xff]  ;;  %v12911_v29 = vld [vmem:[#allocation50_spill] sm:$0xff] }
 0x31c   : > { %12896 = vst [vmem:[#allocation16_spill] sm:$0xff] %v9627_v32  ;;  %7836 = vmatmul.msk.bf16.vlgmr.msra.gmra.mxu0 %vm365_vm3, %v9423_v15  ;;  %v2599_v22 = vand.u32 %v2530_v7, %v8328_v37  ;;  %v12912_v7 = vld [vmem:[#allocation123_spill] sm:$0xff] }
 0x31d   : > { %12897 = vst [vmem:[#allocation90_spill] sm:$0xff] %v9629_v58  ;;  %7840 = vmatmul.msk.bf16.vlgmr.msra.gmra.mxu2 %vm365_vm3, %v9423_v15  ;;  %2924 = vmatpush.bf16.msra.mxu0 %v2590_v57  ;;  %v1479_v54 = vadd.f32 %v12912_v7, %v12911_v29  ;;  %v12913_v32 = vld [vmem:[#allocation51_spill] sm:$0xff] }
 0x31e   : > { %12898 = vst [vmem:[#allocation17_spill] sm:$0xff] %v9633_v36  ;;  %7842 = vmatmul.msk.bf16.vlgmr.msra.gmra.mxu3 %vm365_vm3, %v9423_v15  ;;  %2962 = vmatpush.bf16.msra.mxu2 %v2596_v6  ;;  %v12906_v36 = vld [vmem:[#allocation122_spill] sm:$0xff]  ;;  %v12924_v7 = vld [vmem:[#allocation127_spill] sm:$0xff] }
 0x31f   : > { %v1463_v57 = vadd.f32 %v12906_v36, %v12905_v31  ;;  %2981 = vmatpush.bf16.msra.mxu3 %v2599_v22  ;;  %v12914_v36 = vld [vmem:[#allocation124_spill] sm:$0xff] }
 0x320   : > { %v2172_v39 = vpop.f32.mrf.mxu2 }
 0x321   : > { %v2191_v45 = vpop.f32.mrf.mxu3  ;;  %v9651_v6 = vadd.f32 %v2172_v39, %v1477_v2  ;;  %v2136_v0 = vpop.f32.mrf.mxu0  ;;  %v1498_v2 = vadd.f32 %v12914_v36, %v12913_v32  ;;  %v12915_v39 = vld [vmem:[#allocation52_spill] sm:$0xff]  ;;  %v12925_v36 = vld [vmem:[#allocation55_spill] sm:$0xff] }
 0x322   : > { %v9653_v58 = vadd.f32 %v2191_v45, %v1496_v48  ;;  %v9655_v13 = vadd.f32 %v2136_v0, %v1441_v4  ;;  %v2158_v51 = vpop.f32.mrf.mxu1  ;;  %v12916_v48 = vld [vmem:[#allocation125_spill] sm:$0xff]  ;;  %v2503_v32 = vpop.permute.xlu0 %2502 }
 0x323   : > { %12907 = vst [vmem:[#allocation91_spill] sm:$0xff] %v9651_v6  ;;  %v9657_v5 = vadd.f32 %v2158_v51, %v1463_v57  ;;  %v1444_v45 = vadd.f32 %v12916_v48, %v12915_v39  ;;  %v12917_v0 = vld [vmem:[#allocation53_spill] sm:$0xff]  ;;  %v2532_v39 = vsel %vm2510_vm6, %v2503_v32, %v2505_v44 }
 0x324   : > { %12908 = vst [vmem:[#allocation18_spill] sm:$0xff] %v9653_v58  ;;  %v12928_v48 = vld [vmem:[#allocation129_spill] sm:$0xff] }
 0x325   : > { %12909 = vst [vmem:[#allocation92_spill] sm:$0xff] %v9655_v13  ;;  %7839 = vmatmul.msk.bf16.gmra.mxu1 %vm365_vm3, %v9475_v12  ;;  %v12918_v13 = vld [vmem:[#allocation126_spill] sm:$0xff] }
 0x326   : > { %12910 = vst [vmem:[#allocation19_spill] sm:$0xff] %v9657_v5  ;;  %v1465_v22 = vadd.f32 %v12918_v13, %v12917_v0  ;;  %v12923_v13 = vld [vmem:[#allocation54_spill] sm:$0xff]  ;;  %v12929_v0 = vld [vmem:[#allocation57_spill] sm:$0xff] }
 0x328   : > { %v2174_v31 = vpop.f32.mrf.mxu2 }
 0x329   : > { %v2193_v4 = vpop.f32.mrf.mxu3  ;;  %v9669_v57 = vadd.f32 %v2174_v31, %v1479_v54  ;;  %v2139_v5 = vpop.f32.mrf.mxu0  ;;  %v1482_v54 = vadd.f32 %v12924_v7, %v12923_v13  ;;  %v2605_v7 = vand.u32 %v2532_v39, %v8328_v37 }
 0x32a   : > { %v9671_v51 = vadd.f32 %v2193_v4, %v1498_v2  ;;  %v9673_v58 = vadd.f32 %v2139_v5, %v1444_v45  ;;  %v2160_v6 = vpop.f32.mrf.mxu1  ;;  %v12926_v2 = vld [vmem:[#allocation128_spill] sm:$0xff] }
 0x32b   : > { %12919 = vst [vmem:[#allocation93_spill] sm:$0xff] %v9669_v57  ;;  %v9675_v29 = vadd.f32 %v2160_v6, %v1465_v22  ;;  %v1501_v5 = vadd.f32 %v12926_v2, %v12925_v36  ;;  %v12927_v6 = vld [vmem:[#allocation56_spill] sm:$0xff]  ;;  %v12930_v22 = vld [vmem:[#allocation130_spill] sm:$0xff]  ;;  %v2507_v2 = vpop.permute.xlu1 %2506 }
 0x32c   : > { %12920 = vst [vmem:[#allocation20_spill] sm:$0xff] %v9671_v51  ;;  %7837 = vmatmul.msk.bf16.gmra.mxu0 %vm365_vm3, %v9475_v12  ;;  %v1446_v45 = vadd.f32 %v12928_v48, %v12927_v6  ;;  %v12932_v6 = vld [vmem:[#allocation58_spill] sm:$0xff] }
 0x32d   : > { %12921 = vst [vmem:[#allocation94_spill] sm:$0xff] %v9673_v58  ;;  %7841 = vmatmul.msk.bf16.gmra.mxu2 %vm365_vm3, %v9475_v12  ;;  %v1484_v48 = vadd.f32 %v9184_v10, %v12932_v6 }
 0x32e   : > { %12922 = vst [vmem:[#allocation21_spill] sm:$0xff] %v9675_v29  ;;  %7843 = vmatmul.msk.bf16.gmra.mxu3 %vm365_vm3, %v9475_v12  ;;  %v1534_v29 = vadd.f32 %v12930_v22, %v12929_v0  ;;  %v12935_v0 = vld [vmem:[#allocation61_spill] sm:$0xff]  ;;  %v12936_v22 = vld [vmem:[#allocation131_spill] sm:$0xff] }
 0x330   : > { %v2177_v31 = vpop.f32.mrf.mxu2 }
 0x331   : > { %v2196_v4 = vpop.f32.mrf.mxu3  ;;  %v9692_v58 = vadd.f32 %v2177_v31, %v1482_v54  ;;  %v2141_v57 = vpop.f32.mrf.mxu0  ;;  %v12933_v54 = vld [vmem:[#allocation59_spill] sm:$0xff]  ;;  %v2531_v31 = vsel %vm2510_vm6, %v2501_v63, %v2503_v32 }
 0x332   : > { %v9694_v51 = vadd.f32 %v2196_v4, %v1501_v5  ;;  %v9696_v41 = vadd.f32 %v2141_v57, %v1446_v45  ;;  %v2229_v13 = vpop.f32.mrf.mxu1  ;;  %v1503_v5 = vadd.f32 %v9186_v42, %v12933_v54  ;;  %v2533_v57 = vsel %vm2510_vm6, %v2505_v44, %v2507_v2  ;;  %v12934_v45 = vld [vmem:[#allocation60_spill] sm:$0xff] }
 0x333   : > { %v9699_v36 = vadd.f32 %v2229_v13, %v1534_v29  ;;  %v1515_v39 = vadd.f32 %v9188_v1, %v12934_v45  ;;  %v1536_v13 = vadd.f32 %v12936_v22, %v12935_v0  ;;  %v2602_v63 = vand.u32 %v2531_v31, %v8328_v37  ;;  %v12940_v1 = vld [vmem:[#allocation62_spill] sm:$0xff]  ;;  %v12943_v31 = vld [vmem:[#allocation133_spill] sm:$0xff] }
 0x334   : > { %v2608_v44 = vand.u32 %v2533_v57, %v8328_v37  ;;  %v12944_v57 = vld [vmem:[#allocation64_spill] sm:$0xff]  ;;  %v12946_v22 = vld [vmem:[#allocation65_spill] sm:$0xff] }
 0x335   : > { %12931 = vst [vmem:[#allocation95_spill] sm:$0xff] %v9699_v36  ;;  %7846 = vmatmul.msk.bf16.vlgmr.msrb.gmra.mxu1 %vm365_vm3, %v9423_v15 }
 0x336   : > { %3019 = vmatpush.bf16.msrb.mxu1 %v2605_v7 }
 0x338   : > { %v2179_v29 = vpop.f32.mrf.mxu2 }
 0x339   : > { %v2198_v4 = vpop.f32.mrf.mxu3  ;;  %v9713_v36 = vadd.f32 %v2179_v29, %v1484_v48  ;;  %v2210_v10 = vpop.f32.mrf.mxu0  ;;  %v12941_v48 = vld [vmem:[#allocation132_spill] sm:$0xff] }
 0x33a   : > { %v9715_v7 = vadd.f32 %v2198_v4, %v1503_v5  ;;  %v9717_v6 = vadd.f32 %v2210_v10, %v1515_v39  ;;  %v2231_v42 = vpop.f32.mrf.mxu1  ;;  %v1553_v54 = vadd.f32 %v12941_v48, %v12940_v1  ;;  %v12942_v5 = vld [vmem:[#allocation63_spill] sm:$0xff]  ;;  %v12945_v39 = vld [vmem:[#allocation134_spill] sm:$0xff] }
 0x33b   : > { %v9721_v32 = vadd.f32 %v2231_v42, %v1536_v13  ;;  %v1572_v45 = vadd.f32 %v12943_v31, %v12942_v5  ;;  %v1517_v29 = vadd.f32 %v12945_v39, %v12944_v57  ;;  %v12947_v13 = vld [vmem:[#allocation135_spill] sm:$0xff]  ;;  %v12951_v5 = vld [vmem:[#allocation66_spill] sm:$0xff]  ;;  %v12952_v31 = vld [vmem:[#allocation136_spill] sm:$0xff] }
 0x33c   : > { %12937 = vst [vmem:[#allocation22_spill] sm:$0xff] %v9715_v7  ;;  %7844 = vmatmul.msk.bf16.vlgmr.msrb.gmra.mxu0 %vm365_vm3, %v9423_v15  ;;  %v1539_v10 = vadd.f32 %v12947_v13, %v12946_v22  ;;  %v1555_v57 = vadd.f32 %v12952_v31, %v12951_v5  ;;  %v12953_v39 = vld [vmem:[#allocation67_spill] sm:$0xff]  ;;  %v12954_v7 = vld [vmem:[#allocation137_spill] sm:$0xff] }
 0x33d   : > { %12938 = vst [vmem:[#allocation96_spill] sm:$0xff] %v9717_v6  ;;  %7848 = vmatmul.msk.bf16.vlgmr.msrb.gmra.mxu2 %vm365_vm3, %v9423_v15  ;;  %3000 = vmatpush.bf16.msrb.mxu0 %v2602_v63  ;;  %v1574_v22 = vadd.f32 %v12954_v7, %v12953_v39 }
 0x33e   : > { %12939 = vst [vmem:[#allocation23_spill] sm:$0xff] %v9721_v32  ;;  %7850 = vmatmul.msk.bf16.vlgmr.msrb.gmra.mxu3 %vm365_vm3, %v9423_v15  ;;  %3038 = vmatpush.bf16.msrb.mxu2 %v2608_v44  ;;  %v2509_v48 = vpop.permute.xlu2 %2508 }
 0x340   : > { %v2248_v4 = vpop.f32.mrf.mxu2 }
 0x341   : > { %v2267_v0 = vpop.f32.mrf.mxu3  ;;  %v9737_v42 = vadd.f32 %v2248_v4, %v1553_v54  ;;  %v2212_v63 = vpop.f32.mrf.mxu0  ;;  %v2534_v54 = vsel %vm2510_vm6, %v2507_v2, %v2509_v48  ;;  %v12956_v4 = vld [vmem:[#allocation138_spill] sm:$0xff] }
 0x342   : > { %v9739_v32 = vadd.f32 %v2267_v0, %v1572_v45  ;;  %v9741_v44 = vadd.f32 %v2212_v63, %v1517_v29  ;;  %v2234_v6 = vpop.f32.mrf.mxu1  ;;  %v12955_v45 = vld [vmem:[#allocation68_spill] sm:$0xff]  ;;  %v12958_v63 = vld [vmem:[#allocation139_spill] sm:$0xff]  ;;  %v12961_v48 = vld [vmem:[#allocation70_spill] sm:$0xff] }
 0x343   : > { %v9743_v1 = vadd.f32 %v2234_v6, %v1539_v10  ;;  %v1520_v0 = vadd.f32 %v12956_v4, %v12955_v45  ;;  %v2611_v6 = vand.u32 %v2534_v54, %v8328_v37  ;;  %v12957_v10 = vld [vmem:[#allocation69_spill] sm:$0xff]  ;;  %v12965_v4 = vld [vmem:[#allocation72_spill] sm:$0xff] }
 0x344   : > { %12948 = vst [vmem:[#allocation97_spill] sm:$0xff] %v9739_v32  ;;  %v12964_v54 = vld [vmem:[#allocation141_spill] sm:$0xff] }
 0x345   : > { %12949 = vst [vmem:[#allocation24_spill] sm:$0xff] %v9741_v44  ;;  %7847 = vmatmul.msk.bf16.gmra.mxu1 %vm365_vm3, %v9475_v12  ;;  %3057 = vmatpush.bf16.msrb.mxu3 %v2611_v6 }
 0x346   : > { %12950 = vst [vmem:[#allocation98_spill] sm:$0xff] %v9743_v1  ;;  %v1541_v1 = vadd.f32 %v12958_v63, %v12957_v10 }
 0x348   : > { %v2250_v29 = vpop.f32.mrf.mxu2 }
 0x349   : > { %v2269_v13 = vpop.f32.mrf.mxu3  ;;  %v9757_v44 = vadd.f32 %v2250_v29, %v1555_v57  ;;  %v2215_v5 = vpop.f32.mrf.mxu0  ;;  %v12962_v57 = vld [vmem:[#allocation140_spill] sm:$0xff] }
 0x34a   : > { %v9759_v32 = vadd.f32 %v2269_v13, %v1574_v22  ;;  %v9761_v31 = vadd.f32 %v2215_v5, %v1520_v0  ;;  %v2236_v7 = vpop.f32.mrf.mxu1  ;;  %v1558_v39 = vadd.f32 %v12962_v57, %v12961_v48  ;;  %v12963_v22 = vld [vmem:[#allocation71_spill] sm:$0xff]  ;;  %v12966_v0 = vld [vmem:[#allocation142_spill] sm:$0xff]  ;;  %v12968_v48 = vld [vmem:[#allocation73_spill] sm:$0xff] }
 0x34b   : > { %v9763_v2 = vadd.f32 %v2236_v7, %v1541_v1  ;;  %v1577_v45 = vadd.f32 %v12964_v54, %v12963_v22  ;;  %v1522_v29 = vadd.f32 %v12966_v0, %v12965_v4  ;;  %v1560_v57 = vadd.f32 %v9245_v40, %v12968_v48  ;;  %v12969_v22 = vld [vmem:[#allocation74_spill] sm:$0xff] }
 0x34c   : > { %12959 = vst [vmem:[#allocation25_spill] sm:$0xff] %v9761_v31  ;;  %7845 = vmatmul.msk.bf16.gmra.mxu0 %vm365_vm3, %v9475_v12  ;;  %v1579_v54 = vadd.f32 %v9247_v53, %v12969_v22  ;;  %v9821_v22 = vld [vmem:[%s8276_s21 + $0x2] sm:$0xff] }
 0x34d   : > { %12960 = vst [vmem:[#allocation99_spill] sm:$0xff] %v9763_v2  ;;  %7849 = vmatmul.msk.bf16.gmra.mxu2 %vm365_vm3, %v9475_v12  ;;  %v12967_v2 = vld [vmem:[#allocation143_spill] sm:$0xff] }
 0x34e   : > { %7851 = vmatmul.msk.bf16.gmra.mxu3 %vm365_vm3, %v9475_v12  ;;  %3187 = vst [vmem:[#allocation1] ss:$4 sm:$0xff] %v9821_v22 }
 0x350   : > { %v2253_v1 = vpop.f32.mrf.mxu2 }
 0x351   : > { %v2272_v13 = vpop.f32.mrf.mxu3  ;;  %v9777_v6 = vadd.f32 %v2253_v1, %v1558_v39  ;;  %v2217_v63 = vpop.f32.mrf.mxu0 }
 0x352   : > { %v9779_v10 = vadd.f32 %v2272_v13, %v1577_v45  ;;  %v9781_v5 = vadd.f32 %v2217_v63, %v1522_v29  ;;  %v2641_v7 = vpop.f32.mrf.mxu1 }
 0x353   : > { %v9784_v31 = vadd.f32 %v2641_v7, %v12967_v2 }
 0x355   : > { %7854 = vmatmul.msk.bf16.vlgmr.msra.gmra.mxu1 %vm365_vm3, %v9423_v15 }
 0x358   : > { %v2255_v39 = vpop.f32.mrf.mxu2 }
 0x359   : > { %v2274_v4 = vpop.f32.mrf.mxu3  ;;  %v9792_v45 = vadd.f32 %v2255_v39, %v1560_v57  ;;  %v2622_v29 = vpop.f32.mrf.mxu0 }
 0x35a   : > { %v9794_v0 = vadd.f32 %v2274_v4, %v1579_v54  ;;  %v9797_v2 = vadd.f32 %v2622_v29, %v9253_v52  ;;  %v2643_v1 = vpop.f32.mrf.mxu1 }
 0x35b   : > { %v9800_v13 = vadd.f32 %v2643_v1, %v9258_v20  ;;  %v3191_v1 = vld.sshfl [vmem:[#allocation1] sm:$0xff pattern:$0x73625140] }
 0x35c   : > { %7852 = vmatmul.msk.bf16.vlgmr.msra.gmra.mxu0 %vm365_vm3, %v9423_v15 }
 0x35d   : > { %7856 = vmatmul.msk.bf16.vlgmr.msra.gmra.mxu2 %vm365_vm3, %v9423_v15 }
 0x35e   : > { %7858 = vmatmul.msk.bf16.vlgmr.msra.gmra.mxu3 %vm365_vm3, %v9423_v15 }
 0x360   : > { %v2660_v40 = vpop.f32.mrf.mxu2 }
 0x361   : > { %v2679_v53 = vpop.f32.mrf.mxu3  ;;  %v9809_v63 = vadd.f32 %v2660_v40, %v9279_v23  ;;  %v2624_v7 = vpop.f32.mrf.mxu0  ;;  %v3193_v40 = vld.sshfl [vmem:[#allocation1 + $0x10] sm:$0xff pattern:$0x73625140] }
 0x362   : > { %v9812_v52 = vadd.f32 %v2679_v53, %v9281_v9  ;;  %v9815_v20 = vadd.f32 %v2624_v7, %v9283_v62  ;;  %v2646_v48 = vpop.f32.mrf.mxu1  ;;  %v3229_v53 = vand.u32 %v3191_v1, %v8328_v37  ;;  %v3194_v7 = vld.sshfl [vmem:[#allocation1 + $0x18] sm:$0xff pattern:$0x73625140] }
 0x363   : > { %v9818_v57 = vadd.f32 %v2646_v48, %v9285_v19 }
 0x364   : > { %3284 = vmatpush.bf16.msra.mxu0 %v3229_v53 }
 0x365   : > { %7855 = vmatmul.msk.bf16.gmra.mxu1 %vm365_vm3, %v9475_v12 }
 0x368   : > { %v2662_v23 = vpop.f32.mrf.mxu2 }
 0x369   : > { %v2681_v54 = vpop.f32.mrf.mxu3  ;;  %v9827_v9 = vadd.f32 %v2662_v23, %v9301_v38  ;;  %v2627_v62 = vpop.f32.mrf.mxu0  ;;  %v3233_v38 = vand.u32 %v3193_v40, %v8328_v37 }
 0x36a   : > { %v9830_v39 = vadd.f32 %v2681_v54, %v9303_v11  ;;  %v9833_v4 = vadd.f32 %v2627_v62, %v9305_v60  ;;  %v2648_v19 = vpop.f32.mrf.mxu1  ;;  %v3192_v11 = vld.sshfl [vmem:[#allocation1 + $0x8] sm:$0xff pattern:$0x73625140]  ;;  %v3235_v60 = vand.u32 %v3194_v7, %v8328_v37 }
 0x36b   : > { %v9836_v29 = vadd.f32 %v2648_v19, %v9307_v3  ;;  %v3231_v3 = vand.u32 %v3192_v11, %v8328_v37  ;;  %3322 = vmatpush.bf16.msra.mxu2 %v3233_v38 }
 0x36c   : > { %7853 = vmatmul.msk.bf16.gmra.mxu0 %vm365_vm3, %v9475_v12  ;;  %3341 = vmatpush.bf16.msra.mxu3 %v3235_v60 }
 0x36d   : > { %7857 = vmatmul.msk.bf16.gmra.mxu2 %vm365_vm3, %v9475_v12  ;;  %3303 = vmatpush.bf16.msra.mxu1 %v3231_v3 }
 0x36e   : > { %7859 = vmatmul.msk.bf16.gmra.mxu3 %vm365_vm3, %v9475_v12 }
 0x370   : > { %v2665_v48 = vpop.f32.mrf.mxu2 }
 0x371   : > { %v2684_v23 = vpop.f32.mrf.mxu3  ;;  %v9849_v54 = vadd.f32 %v2665_v48, %v9326_v28  ;;  %v2629_v19 = vpop.f32.mrf.mxu0 }
 0x372   : > { %v9852_v62 = vadd.f32 %v2684_v23, %v9328_v43  ;;  %v9855_v1 = vadd.f32 %v2629_v19, %v9330_v61  ;;  %v2717_v40 = vpop.f32.mrf.mxu1 }
 0x373   : > { %v9858_v7 = vadd.f32 %v2717_v40, %v9333_v21  ;;  %v9893_v40 = vld [vmem:[%s8276_s21 + $0xa] sm:$0xff] }
 0x374   : > { %12976 = vst [vmem:[#allocation29_spill] sm:$0xff] %v9893_v40 }
 0x375   : > { %7862 = vmatmul.msk.bf16.vlgmr.msrb.gmra.mxu1 %vm365_vm3, %v9423_v15  ;;  %3190 = vst [vmem:[#allocation1 + $0x20] ss:$4 sm:$0xff] %v9893_v40 }
 0x378   : > { %v2667_v53 = vpop.f32.mrf.mxu2 }
 0x379   : > { %v2686_v38 = vpop.f32.mrf.mxu3  ;;  %v9863_v11 = vadd.f32 %v2667_v53, %v9348_v34  ;;  %v2698_v43 = vpop.f32.mrf.mxu0 }
 0x37a   : > { %v9866_v28 = vadd.f32 %v2686_v38, %v9350_v35  ;;  %v9869_v61 = vadd.f32 %v2698_v43, %v9352_v33  ;;  %v2719_v60 = vpop.f32.mrf.mxu1  ;;  %v9908_v43 = vld [vmem:[%s8276_s21 + $0x1a] sm:$0xff] }
 0x37b   : > { %v9872_v21 = vadd.f32 %v2719_v60, %v9356_v16 }
 0x37c   : > { %12970 = vst [vmem:[#allocation26_spill] sm:$0xff] %v9869_v61  ;;  %7860 = vmatmul.msk.bf16.vlgmr.msrb.gmra.mxu0 %vm365_vm3, %v9423_v15  ;;  %v13026_v61 = vld [vmem:[#allocation85_spill] sm:$0xff] }
 0x37d   : > { %12971 = vst [vmem:[#allocation100_spill] sm:$0xff] %v9872_v21  ;;  %7864 = vmatmul.msk.bf16.vlgmr.msrb.gmra.mxu2 %vm365_vm3, %v9423_v15 }
 0x37e   : > { %7866 = vmatmul.msk.bf16.vlgmr.msrb.gmra.mxu3 %vm365_vm3, %v9423_v15 }
 0x380   : > { %v2736_v34 = vpop.f32.mrf.mxu2 }
 0x381   : > { %v2755_v35 = vpop.f32.mrf.mxu3  ;;  %v9881_v3 = vadd.f32 %v2736_v34, %v9372_v27  ;;  %v2700_v16 = vpop.f32.mrf.mxu0  ;;  %v3195_v34 = vld.sshfl [vmem:[#allocation1 + $0x20] sm:$0xff pattern:$0x73625140] }
 0x382   : > { %v9884_v33 = vadd.f32 %v2755_v35, %v9374_v30  ;;  %v9887_v48 = vadd.f32 %v2700_v16, %v9376_v24  ;;  %v2722_v23 = vpop.f32.mrf.mxu1  ;;  %v3197_v35 = vld.sshfl [vmem:[#allocation1 + $0x30] sm:$0xff pattern:$0x73625140]  ;;  %v3198_v16 = vld.sshfl [vmem:[#allocation1 + $0x38] sm:$0xff pattern:$0x73625140] }
 0x383   : > { %12972 = vst [vmem:[#allocation27_spill] sm:$0xff] %v9881_v3  ;;  %v9890_v19 = vadd.f32 %v2722_v23, %v9378_v56  ;;  %v3196_v23 = vld.sshfl [vmem:[#allocation1 + $0x28] sm:$0xff pattern:$0x73625140]  ;;  %v13013_v3 = vld [vmem:[#allocation81_spill] sm:$0xff] }
 0x384   : > { %12973 = vst [vmem:[#allocation101_spill] sm:$0xff] %v9884_v33 }
 0x385   : > { %12974 = vst [vmem:[#allocation28_spill] sm:$0xff] %v9887_v48  ;;  %7863 = vmatmul.msk.bf16.gmra.mxu1 %vm365_vm3, %v9475_v12 }
 0x386   : > { %12975 = vst [vmem:[#allocation102_spill] sm:$0xff] %v9890_v19 }
 0x387   : > { %3202 = vst [vmem:[#allocation1 + $0x20] ss:$4 sm:$0xff] %v9908_v43 }
 0x388   : > { %v2738_v27 = vpop.f32.mrf.mxu2 }
 0x389   : > { %v2757_v15 = vpop.f32.mrf.mxu3  ;;  %v9899_v30 = vadd.f32 %v2738_v27, %v9393_v25  ;;  %v2703_v24 = vpop.f32.mrf.mxu0  ;;  %v3237_v25 = vand.u32 %v3195_v34, %v8328_v37  ;;  %v9933_v34 = vld [vmem:[%s12629_s1 + $0x40] sm:$0xff] }
 0x38a   : > { %v9902_v53 = vadd.f32 %v2757_v15, %v9395_v59  ;;  %v9905_v38 = vadd.f32 %v2703_v24, %v9397_v55  ;;  %v2724_v56 = vpop.f32.mrf.mxu1  ;;  %v3241_v59 = vand.u32 %v3197_v35, %v8328_v37  ;;  %v3243_v55 = vand.u32 %v3198_v16, %v8328_v37  ;;  %v9942_v16 = vld [vmem:[%s8276_s21 + $0x2a] sm:$0xff] }
 0x38b   : > { %12977 = vst [vmem:[#allocation103_spill] sm:$0xff] %v9899_v30  ;;  %v9911_v60 = vadd.f32 %v2724_v56, %v9399_v17  ;;  %v3239_v17 = vand.u32 %v3196_v23, %v8328_v37  ;;  %3360 = vmatpush.bf16.msrb.mxu0 %v3237_v25  ;;  %v13005_v30 = vld [vmem:[#allocation79_spill] sm:$0xff] }
 0x38c   : > { %12978 = vst [vmem:[#allocation30_spill] sm:$0xff] %v9902_v53  ;;  %7861 = vmatmul.msk.bf16.gmra.mxu0 %vm365_vm3, %v9475_v12  ;;  %3398 = vmatpush.bf16.msrb.mxu2 %v3241_v59  ;;  %v10000_v53 = vld [vmem:[%s8276_s21 + $0x12] sm:$0xff] }
 0x38d   : > { %12979 = vst [vmem:[#allocation104_spill] sm:$0xff] %v9905_v38  ;;  %7865 = vmatmul.msk.bf16.gmra.mxu2 %vm365_vm3, %v9475_v12  ;;  %3417 = vmatpush.bf16.msrb.mxu3 %v3243_v55 }
 0x38e   : > { %12980 = vst [vmem:[#allocation31_spill] sm:$0xff] %v9911_v60  ;;  %7867 = vmatmul.msk.bf16.gmra.mxu3 %vm365_vm3, %v9475_v12  ;;  %3379 = vmatpush.bf16.msrb.mxu1 %v3239_v17  ;;  %v9946_v23 = vld.sshfl [vmem:[#allocation1 + $0x28] sm:$0xff pattern:$0x73625140] }
 0x38f   : > { %v9952_v55 = vld.sshfl [vmem:[#allocation1 + $0x38] sm:$0xff pattern:$0x73625140]  ;;  %12998 = vst [vmem:[#allocation111_spill] sm:$0xff] %v10000_v53 }
 0x390   : > { %v2741_v27 = vpop.f32.mrf.mxu2  ;;  %3200 = vst [vmem:[#allocation1] ss:$4 sm:$0xff] %v10000_v53 }
 0x391   : > { %v2760_v15 = vpop.f32.mrf.mxu3  ;;  %v9925_v24 = vadd.f32 %v2741_v27, %v9416_v46  ;;  %v2705_v12 = vpop.f32.mrf.mxu0  ;;  %v9944_v46 = vld.sshfl [vmem:[#allocation1 + $0x20] sm:$0xff pattern:$0x73625140] }
 0x392   : > { %v9928_v56 = vadd.f32 %v2760_v15, %v9418_v8  ;;  %v9936_v35 = vadd.f32 %v2705_v12, %v9425_v49  ;;  %v2793_v25 = vpop.f32.mrf.mxu1  ;;  %v9950_v8 = vld.sshfl [vmem:[#allocation1 + $0x30] sm:$0xff pattern:$0x73625140] }
 0x393   : > { %12981 = vst [vmem:[#allocation105_spill] sm:$0xff] %v9925_v24  ;;  %v9939_v59 = vadd.f32 %v2793_v25, %v9428_v14 }
 0x394   : > { %12982 = vst [vmem:[#allocation32_spill] sm:$0xff] %v9928_v56  ;;  %v12994_v56 = vld [vmem:[#allocation3_spill] sm:$0xff] }
 0x395   : > { %12983 = vst [vmem:[#allocation106_spill] sm:$0xff] %v9936_v35  ;;  %7882 = vmatmul.msk.bf16.vlgmr.msra.gmra.mxu1 %vm365_vm3, %v9933_v34 }
 0x396   : > { %12984 = vst [vmem:[#allocation33_spill] sm:$0xff] %v9939_v59  ;;  %v12988_v59 = vld [vmem:[#allocation75_spill] sm:$0xff] }
 0x397   : > { %3214 = vst [vmem:[#allocation1 + $0x20] ss:$4 sm:$0xff] %v9942_v16  ;;  %v3203_v48 = vld.sshfl [vmem:[#allocation1] sm:$0xff pattern:$0x73625140] }
 0x398   : > { %v2743_v49 = vpop.f32.mrf.mxu2 }
 0x399   : > { %v2762_v17 = vpop.f32.mrf.mxu3  ;;  %v9956_v14 = vadd.f32 %v2743_v49, %v9442_v18  ;;  %v2774_v15 = vpop.f32.mrf.mxu0 }
 0x39a   : > { %v9959_v27 = vadd.f32 %v2762_v17, %v9444_v26  ;;  %v9962_v12 = vadd.f32 %v2774_v15, %v9446_v47  ;;  %v2795_v25 = vpop.f32.mrf.mxu1  ;;  %v12990_v15 = vld [vmem:[#allocation2_spill] sm:$0xff] }
 0x39b   : > { %12985 = vst [vmem:[#allocation107_spill] sm:$0xff] %v9956_v14  ;;  %v9965_v35 = vadd.f32 %v2795_v25, %v12988_v59  ;;  %v9991_v14 = vld [vmem:[%s12629_s1 + $0x48] sm:$0xff] }
 0x39c   : > { %12986 = vst [vmem:[#allocation34_spill] sm:$0xff] %v9959_v27  ;;  %7880 = vmatmul.msk.bf16.vlgmr.msra.gmra.mxu0 %vm365_vm3, %v9933_v34 }
 0x39d   : > { %12987 = vst [vmem:[#allocation108_spill] sm:$0xff] %v9962_v12  ;;  %7884 = vmatmul.msk.bf16.vlgmr.msra.gmra.mxu2 %vm365_vm3, %v9933_v34 }
 0x39e   : > { %12989 = vst [vmem:[#allocation35_spill] sm:$0xff] %v9965_v35  ;;  %7886 = vmatmul.msk.bf16.vlgmr.msra.gmra.mxu3 %vm365_vm3, %v9933_v34  ;;  %v9973_v18 = vld.sshfl [vmem:[#allocation1 + $0x20] sm:$0xff pattern:$0x73625140]  ;;  %v12992_v35 = vld [vmem:[#allocation76_spill] sm:$0xff] }
 0x39f   : > { %v9975_v26 = vld.sshfl [vmem:[#allocation1 + $0x28] sm:$0xff pattern:$0x73625140]  ;;  %v9977_v47 = vld.sshfl [vmem:[#allocation1 + $0x30] sm:$0xff pattern:$0x73625140] }
 0x3a0   : > { %v9979_v49 = vld.sshfl [vmem:[#allocation1 + $0x38] sm:$0xff pattern:$0x73625140]  ;;  %v2812_v59 = vpop.f32.mrf.mxu2 }
 0x3a1   : > { %3855 = vst [vmem:[#allocation1 + $0x20] ss:$4 sm:$0xff] %v9893_v40  ;;  %v2831_v17 = vpop.f32.mrf.mxu3  ;;  %v9983_v25 = vadd.f32 %v2812_v59, %v12990_v15  ;;  %v2776_v27 = vpop.f32.mrf.mxu0  ;;  %v12996_v40 = vld [vmem:[#allocation77_spill] sm:$0xff]  ;;  %v13001_v15 = vld [vmem:[#allocation78_spill] sm:$0xff] }
 0x3a2   : > { %v9986_v12 = vadd.f32 %v2831_v17, %v12992_v35  ;;  %v9994_v24 = vadd.f32 %v2776_v27, %v12994_v56  ;;  %v2798_v60 = vpop.f32.mrf.mxu1  ;;  %v12999_v56 = vld [vmem:[#allocation4_spill] sm:$0xff] }
 0x3a3   : > { %12991 = vst [vmem:[#allocation109_spill] sm:$0xff] %v9983_v25  ;;  %v9997_v38 = vadd.f32 %v2798_v60, %v12996_v40  ;;  %v13003_v60 = vld [vmem:[#allocation5_spill] sm:$0xff] }
 0x3a4   : > { %12993 = vst [vmem:[#allocation36_spill] sm:$0xff] %v9986_v12  ;;  %v10016_v25 = vld [vmem:[%s8276_s21 + $0x22] sm:$0xff] }
 0x3a5   : > { %12995 = vst [vmem:[#allocation110_spill] sm:$0xff] %v9994_v24  ;;  %7883 = vmatmul.msk.bf16.gmra.mxu1 %vm365_vm3, %v9991_v14 }
 0x3a6   : > { %12997 = vst [vmem:[#allocation37_spill] sm:$0xff] %v9997_v38 }
 0x3a8   : > { %v3864_v35 = vld.sshfl [vmem:[#allocation1 + $0x20] sm:$0xff pattern:$0x73625140]  ;;  %v2814_v59 = vpop.f32.mrf.mxu2 }
 0x3a9   : > { %3924 = vrot.lane.b32.xlu0 %v3864_v35, %s8231_s23  ;;  %v2833_v17 = vpop.f32.mrf.mxu3  ;;  %v10007_v27 = vadd.f32 %v2814_v59, %v12999_v56  ;;  %v2779_v40 = vpop.f32.mrf.mxu0  ;;  %v3204_v35 = vld.sshfl [vmem:[#allocation1 + $0x8] sm:$0xff pattern:$0x73625140]  ;;  %v3245_v59 = vand.u32 %v3203_v48, %v8328_v37  ;;  %v3205_v56 = vld.sshfl [vmem:[#allocation1 + $0x10] sm:$0xff pattern:$0x73625140] }
 0x3aa   : > { %v10010_v24 = vadd.f32 %v2833_v17, %v13001_v15  ;;  %v10013_v38 = vadd.f32 %v2779_v40, %v13003_v60  ;;  %v2800_v12 = vpop.f32.mrf.mxu1  ;;  %v3206_v17 = vld.sshfl [vmem:[#allocation1 + $0x18] sm:$0xff pattern:$0x73625140]  ;;  %v3247_v15 = vand.u32 %v3204_v35, %v8328_v37  ;;  %v3868_v40 = vld.sshfl [vmem:[#allocation1 + $0x30] sm:$0xff pattern:$0x73625140] }
 0x3ab   : > { %13000 = vst [vmem:[#allocation38_spill] sm:$0xff] %v10007_v27  ;;  %v10019_v19 = vadd.f32 %v2800_v12, %v13005_v30  ;;  %v3249_v30 = vand.u32 %v3205_v56, %v8328_v37  ;;  %v3251_v12 = vand.u32 %v3206_v17, %v8328_v37  ;;  %3436 = vmatpush.bf16.msra.mxu0 %v3245_v59  ;;  %v13007_v35 = vld [vmem:[#allocation6_spill] sm:$0xff]  ;;  %v13011_v27 = vld [vmem:[#allocation7_spill] sm:$0xff] }
 0x3ac   : > { %13002 = vst [vmem:[#allocation112_spill] sm:$0xff] %v10010_v24  ;;  %7881 = vmatmul.msk.bf16.gmra.mxu0 %vm365_vm3, %v9991_v14  ;;  %3455 = vmatpush.bf16.msra.mxu1 %v3247_v15  ;;  %v3866_v15 = vld.sshfl [vmem:[#allocation1 + $0x28] sm:$0xff pattern:$0x73625140] }
 0x3ad   : > { %13004 = vst [vmem:[#allocation39_spill] sm:$0xff] %v10013_v38  ;;  %7885 = vmatmul.msk.bf16.gmra.mxu2 %vm365_vm3, %v9991_v14  ;;  %3493 = vmatpush.bf16.msra.mxu3 %v3251_v12  ;;  %v13009_v38 = vld [vmem:[#allocation80_spill] sm:$0xff] }
 0x3ae   : > { %13006 = vst [vmem:[#allocation113_spill] sm:$0xff] %v10019_v19  ;;  %7887 = vmatmul.msk.bf16.gmra.mxu3 %vm365_vm3, %v9991_v14  ;;  %3474 = vmatpush.bf16.msra.mxu2 %v3249_v30 }
 0x3af   : > { %3212 = vst [vmem:[#allocation1] ss:$4 sm:$0xff] %v10016_v25 }
 0x3b0   : > { %v2817_v48 = vpop.f32.mrf.mxu2 }
 0x3b1   : > { %v2836_v60 = vpop.f32.mrf.mxu3  ;;  %3928 = vrot.lane.b32.xlu0 %v3868_v40, %s8231_s23  ;;  %v10034_v19 = vadd.f32 %v2817_v48, %v13007_v35  ;;  %v2781_v56 = vpop.f32.mrf.mxu0  ;;  %v13017_v35 = vld [vmem:[#allocation82_spill] sm:$0xff] }
 0x3b2   : > { %v10037_v24 = vadd.f32 %v2836_v60, %v13009_v38  ;;  %v10040_v33 = vadd.f32 %v2781_v56, %v13011_v27  ;;  %v2869_v17 = vpop.f32.mrf.mxu1 }
 0x3b3   : > { %13008 = vst [vmem:[#allocation40_spill] sm:$0xff] %v10034_v19  ;;  %v10043_v59 = vadd.f32 %v2869_v17, %v13013_v3  ;;  %v13015_v3 = vld [vmem:[#allocation8_spill] sm:$0xff]  ;;  %v13021_v19 = vld [vmem:[#allocation83_spill] sm:$0xff] }
 0x3b4   : > { %13010 = vst [vmem:[#allocation114_spill] sm:$0xff] %v10037_v24 }
 0x3b5   : > { %13012 = vst [vmem:[#allocation41_spill] sm:$0xff] %v10040_v33  ;;  %7890 = vmatmul.msk.bf16.vlgmr.msrb.gmra.mxu1 %vm365_vm3, %v9933_v34 }
 0x3b6   : > { %13014 = vst [vmem:[#allocation115_spill] sm:$0xff] %v10043_v59  ;;  %v10045_v30 = vld.sshfl [vmem:[#allocation1] sm:$0xff pattern:$0x73625140] }
 0x3b7   : > { %v10047_v12 = vld.sshfl [vmem:[#allocation1 + $0x8] sm:$0xff pattern:$0x73625140]  ;;  %v10051_v40 = vld.sshfl [vmem:[#allocation1 + $0x10] sm:$0xff pattern:$0x73625140] }
 0x3b8   : > { %v10053_v38 = vld.sshfl [vmem:[#allocation1 + $0x18] sm:$0xff pattern:$0x73625140]  ;;  %v2819_v27 = vpop.f32.mrf.mxu2  ;;  %v13019_v59 = vld [vmem:[#allocation9_spill] sm:$0xff] }
 0x3b9   : > { %3852 = vst [vmem:[#allocation1] ss:$4 sm:$0xff] %v9821_v22  ;;  %v2838_v48 = vpop.f32.mrf.mxu3  ;;  %3926 = vrot.lane.b32.xlu0 %v3866_v15, %s8231_s23  ;;  %v10058_v60 = vadd.f32 %v2819_v27, %v13015_v3  ;;  %v2850_v17 = vpop.f32.mrf.mxu0  ;;  %v13023_v3 = vld [vmem:[#allocation10_spill] sm:$0xff] }
 0x3ba   : > { %v10061_v56 = vadd.f32 %v2838_v48, %v13017_v35  ;;  %v10064_v33 = vadd.f32 %v2850_v17, %v13019_v59  ;;  %v2871_v24 = vpop.f32.mrf.mxu1  ;;  %v3870_v48 = vld.sshfl [vmem:[#allocation1 + $0x38] sm:$0xff pattern:$0x73625140] }
 0x3bb   : > { %13016 = vst [vmem:[#allocation42_spill] sm:$0xff] %v10058_v60  ;;  %v10067_v21 = vadd.f32 %v2871_v24, %v13021_v19  ;;  %v13024_v17 = vld [vmem:[#allocation84_spill] sm:$0xff] }
 0x3bc   : > { %13018 = vst [vmem:[#allocation43_spill] sm:$0xff] %v10061_v56  ;;  %7888 = vmatmul.msk.bf16.vlgmr.msrb.gmra.mxu0 %vm365_vm3, %v9933_v34  ;;  %v13025_v56 = vld [vmem:[#allocation11_spill] sm:$0xff] }
 0x3bd   : > { %13020 = vst [vmem:[#allocation116_spill] sm:$0xff] %v10064_v33  ;;  %7892 = vmatmul.msk.bf16.vlgmr.msrb.gmra.mxu2 %vm365_vm3, %v9933_v34 }
 0x3be   : > { %13022 = vst [vmem:[#allocation44_spill] sm:$0xff] %v10067_v21  ;;  %7894 = vmatmul.msk.bf16.vlgmr.msrb.gmra.mxu3 %vm365_vm3, %v9933_v34 }
 0x3bf   : > { %3875 = vst [vmem:[#allocation1 + $0x20] ss:$4 sm:$0xff] %v9908_v43  ;;  %v3257_v43 = vand.u32 %v9950_v8, %v8328_v37 }
 0x3c0   : > { %v3860_v22 = vld.sshfl [vmem:[#allocation1 + $0x10] sm:$0xff pattern:$0x73625140]  ;;  %v3856_v15 = vld.sshfl [vmem:[#allocation1] sm:$0xff pattern:$0x73625140]  ;;  %v2888_v19 = vpop.f32.mrf.mxu2 }
 0x3c1   : > { %3920 = vrot.lane.b32.xlu1 %v3860_v22, %s8231_s23  ;;  %v3862_v27 = vld.sshfl [vmem:[#allocation1 + $0x18] sm:$0xff pattern:$0x73625140]  ;;  %v3858_v59 = vld.sshfl [vmem:[#allocation1 + $0x8] sm:$0xff pattern:$0x73625140]  ;;  %v2907_v24 = vpop.f32.mrf.mxu3  ;;  %v10080_v35 = vadd.f32 %v2888_v19, %v13023_v3  ;;  %v2852_v33 = vpop.f32.mrf.mxu0  ;;  %v3259_v19 = vand.u32 %v9952_v55, %v8328_v37  ;;  %3550 = vmatpush.bf16.msrb.mxu2 %v3257_v43  ;;  %v3255_v55 = vand.u32 %v9946_v23, %v8328_v37 }
 0x3c2   : > { %3922 = vrot.lane.b32.xlu2 %v3862_v27, %s8231_s23  ;;  %3873 = vst [vmem:[#allocation1] ss:$4 sm:$0xff] %v10000_v53  ;;  %v10083_v21 = vadd.f32 %v2907_v24, %v13024_v17  ;;  %v10086_v22 = vadd.f32 %v2852_v33, %v13025_v56  ;;  %v2874_v60 = vpop.f32.mrf.mxu1  ;;  %v3253_v53 = vand.u32 %v9944_v46, %v8328_v37  ;;  %v13028_v56 = vld [vmem:[#allocation86_spill] sm:$0xff]  ;;  %v13029_v3 = vld [vmem:[#allocation13_spill] sm:$0xff]  ;;  %v13030_v17 = vld [vmem:[#allocation87_spill] sm:$0xff] }
 0x3c3   : > { %v10089_v27 = vadd.f32 %v2874_v60, %v13026_v61  ;;  %3569 = vmatpush.bf16.msrb.mxu3 %v3259_v19  ;;  %v13027_v60 = vld [vmem:[#allocation12_spill] sm:$0xff]  ;;  %3531 = vmatpush.bf16.msrb.mxu1 %v3255_v55 }
 0x3c4   : > { %3512 = vmatpush.bf16.msrb.mxu0 %v3253_v53 }
 0x3c5   : > { %7891 = vmatmul.msk.bf16.gmra.mxu1 %vm365_vm3, %v9991_v14 }
 0x3c8   : > { %v2890_v61 = vpop.f32.mrf.mxu2 }
 0x3c9   : > { %3916 = vrot.lane.b32.xlu1 %v3856_v15, %s8231_s23  ;;  %v2909_v33 = vpop.f32.mrf.mxu3  ;;  %v10102_v46 = vadd.f32 %v2890_v61, %v13027_v60  ;;  %v2855_v24 = vpop.f32.mrf.mxu0  ;;  %v13032_v61 = vld [vmem:[#allocation14_spill] sm:$0xff] }
 0x3ca   : > { %3918 = vrot.lane.b32.xlu2 %v3858_v59, %s8231_s23  ;;  %v10105_v8 = vadd.f32 %v2909_v33, %v13028_v56  ;;  %v10110_v53 = vadd.f32 %v2855_v24, %v13029_v3  ;;  %v2876_v15 = vpop.f32.mrf.mxu1  ;;  %v13034_v56 = vld [vmem:[#allocation88_spill] sm:$0xff]  ;;  %v13036_v3 = vld [vmem:[#allocation15_spill] sm:$0xff] }
 0x3cb   : > { %v10113_v43 = vadd.f32 %v2876_v15, %v13030_v17  ;;  %v3880_v17 = vld.sshfl [vmem:[#allocation1 + $0x10] sm:$0xff pattern:$0x73625140] }
 0x3cc   : > { %7889 = vmatmul.msk.bf16.gmra.mxu0 %vm365_vm3, %v9991_v14 }
 0x3cd   : > { %7893 = vmatmul.msk.bf16.gmra.mxu2 %vm365_vm3, %v9991_v14 }
 0x3ce   : > { %7895 = vmatmul.msk.bf16.gmra.mxu3 %vm365_vm3, %v9991_v14 }
 0x3d0   : > { %v2893_v23 = vpop.f32.mrf.mxu2 }
 0x3d1   : > { %3930 = vrot.lane.b32.xlu1 %v3870_v48, %s8231_s23  ;;  %v2912_v59 = vpop.f32.mrf.mxu3  ;;  %v10123_v19 = vadd.f32 %v2893_v23, %v9604_v50  ;;  %v2857_v60 = vpop.f32.mrf.mxu0  ;;  %v13038_v23 = vld [vmem:[#allocation89_spill] sm:$0xff] }
 0x3d2   : > { %v10126_v33 = vadd.f32 %v2912_v59, %v13032_v61  ;;  %v10129_v24 = vadd.f32 %v2857_v60, %v13034_v56  ;;  %v2945_v55 = vpop.f32.mrf.mxu1  ;;  %v13040_v59 = vld [vmem:[#allocation16_spill] sm:$0xff]  ;;  %v13042_v56 = vld [vmem:[#allocation90_spill] sm:$0xff] }
 0x3d3   : > { %13031 = vst [vmem:[#allocation117_spill] sm:$0xff] %v10123_v19  ;;  %v10132_v15 = vadd.f32 %v2945_v55, %v13036_v3  ;;  %v13044_v3 = vld [vmem:[#allocation17_spill] sm:$0xff] }
 0x3d4   : > { %13033 = vst [vmem:[#allocation45_spill] sm:$0xff] %v10126_v33  ;;  %v3878_v33 = vld.sshfl [vmem:[#allocation1 + $0x8] sm:$0xff pattern:$0x73625140] }
 0x3d5   : > { %13035 = vst [vmem:[#allocation118_spill] sm:$0xff] %v10129_v24  ;;  %7898 = vmatmul.msk.bf16.vlgmr.msra.gmra.mxu1 %vm365_vm3, %v9933_v34 }
 0x3d6   : > { %13037 = vst [vmem:[#allocation46_spill] sm:$0xff] %v10132_v15 }
 0x3d8   : > { %v2895_v48 = vpop.f32.mrf.mxu2 }
 0x3d9   : > { %3936 = vrot.lane.b32.xlu1 %v3880_v17, %s8231_s23  ;;  %v2914_v50 = vpop.f32.mrf.mxu3  ;;  %v10138_v19 = vadd.f32 %v2895_v48, %v13038_v23  ;;  %v2926_v60 = vpop.f32.mrf.mxu0 }
 0x3da   : > { %v10141_v61 = vadd.f32 %v2914_v50, %v13040_v59  ;;  %v10144_v24 = vadd.f32 %v2926_v60, %v13042_v56  ;;  %v2947_v55 = vpop.f32.mrf.mxu1  ;;  %v13046_v50 = vld [vmem:[#allocation91_spill] sm:$0xff]  ;;  %v13047_v59 = vld [vmem:[#allocation18_spill] sm:$0xff] }
 0x3db   : > { %13039 = vst [vmem:[#allocation119_spill] sm:$0xff] %v10138_v19  ;;  %v10147_v15 = vadd.f32 %v2947_v55, %v13044_v3  ;;  %v13048_v55 = vld [vmem:[#allocation92_spill] sm:$0xff]  ;;  %v3261_v19 = vand.u32 %v10045_v30, %v8328_v37 }
 0x3dc   : > { %13041 = vst [vmem:[#allocation47_spill] sm:$0xff] %v10141_v61  ;;  %7896 = vmatmul.msk.bf16.vlgmr.msra.gmra.mxu0 %vm365_vm3, %v9933_v34  ;;  %v13053_v30 = vld [vmem:[#allocation20_spill] sm:$0xff] }
 0x3dd   : > { %13043 = vst [vmem:[#allocation120_spill] sm:$0xff] %v10144_v24  ;;  %7900 = vmatmul.msk.bf16.vlgmr.msra.gmra.mxu2 %vm365_vm3, %v9933_v34  ;;  %v13050_v24 = vld [vmem:[#allocation19_spill] sm:$0xff]  ;;  %3588 = vmatpush.bf16.msra.mxu0 %v3261_v19 }
 0x3de   : > { %13045 = vst [vmem:[#allocation48_spill] sm:$0xff] %v10147_v15  ;;  %7902 = vmatmul.msk.bf16.vlgmr.msra.gmra.mxu3 %vm365_vm3, %v9933_v34 }
 0x3e0   : > { %v2964_v17 = vpop.f32.mrf.mxu2 }
 0x3e1   : > { %3934 = vrot.lane.b32.xlu1 %v3878_v33, %s8231_s23  ;;  %v2983_v48 = vpop.f32.mrf.mxu3  ;;  %v10157_v23 = vadd.f32 %v2964_v17, %v13046_v50  ;;  %v2928_v56 = vpop.f32.mrf.mxu0  ;;  %v3265_v33 = vand.u32 %v10051_v40, %v8328_v37  ;;  %v3267_v17 = vand.u32 %v10053_v38, %v8328_v37  ;;  %v3876_v50 = vld.sshfl [vmem:[#allocation1] sm:$0xff pattern:$0x73625140]  ;;  %v3263_v38 = vand.u32 %v10047_v12, %v8328_v37 }
 0x3e2   : > { %v10160_v60 = vadd.f32 %v2983_v48, %v13047_v59  ;;  %v10163_v3 = vadd.f32 %v2928_v56, %v13048_v55  ;;  %v2950_v15 = vpop.f32.mrf.mxu1  ;;  %3932 = vrot.lane.b32.xlu2 %v3876_v50, %s8231_s23  ;;  %v13052_v48 = vld [vmem:[#allocation93_spill] sm:$0xff]  ;;  %v13054_v55 = vld [vmem:[#allocation94_spill] sm:$0xff] }
 0x3e3   : > { %v10166_v61 = vadd.f32 %v2950_v15, %v13050_v24  ;;  %3626 = vmatpush.bf16.msra.mxu2 %v3265_v33  ;;  %3645 = vmatpush.bf16.msra.mxu3 %v3267_v17  ;;  %v3884_v33 = vld.sshfl [vmem:[#allocation1 + $0x20] sm:$0xff pattern:$0x73625140] }
 0x3e4   : > { %13049 = vst [vmem:[#allocation121_spill] sm:$0xff] %v10163_v3  ;;  %v13055_v3 = vld [vmem:[#allocation21_spill] sm:$0xff]  ;;  %3607 = vmatpush.bf16.msra.mxu1 %v3263_v38  ;;  %3940 = vrot.lane.b32.xlu0 %v3884_v33, %s8231_s23  ;;  %v3882_v38 = vld.sshfl [vmem:[#allocation1 + $0x18] sm:$0xff pattern:$0x73625140]  ;;  %v13058_v33 = vld [vmem:[#allocation22_spill] sm:$0xff] }
 0x3e5   : > { %13051 = vst [vmem:[#allocation49_spill] sm:$0xff] %v10166_v61  ;;  %7899 = vmatmul.msk.bf16.gmra.mxu1 %vm365_vm3, %v9991_v14 }
 0x3e6   : > { %3893 = vst [vmem:[#allocation1] ss:$4 sm:$0xff] %v10016_v25  ;;  %v3888_v25 = vld.sshfl [vmem:[#allocation1 + $0x30] sm:$0xff pattern:$0x73625140] }
 0x3e8   : > { %v2966_v24 = vpop.f32.mrf.mxu2 }
 0x3e9   : > { %v2985_v15 = vpop.f32.mrf.mxu3  ;;  %v10178_v59 = vadd.f32 %v2966_v24, %v13052_v48  ;;  %v2931_v40 = vpop.f32.mrf.mxu0 }
 0x3ea   : > { %v10181_v56 = vadd.f32 %v2985_v15, %v13053_v30  ;;  %v10186_v50 = vadd.f32 %v2931_v40, %v13054_v55  ;;  %v2952_v61 = vpop.f32.mrf.mxu1  ;;  %v13056_v30 = vld [vmem:[#allocation95_spill] sm:$0xff]  ;;  %3938 = vrot.lane.b32.xlu2 %v3882_v38, %s8231_s23 }
 0x3eb   : > { %v10189_v19 = vadd.f32 %v2952_v61, %v13055_v3 }
 0x3ec   : > { %7897 = vmatmul.msk.bf16.gmra.mxu0 %vm365_vm3, %v9991_v14 }
 0x3ed   : > { %7901 = vmatmul.msk.bf16.gmra.mxu2 %vm365_vm3, %v9991_v14 }
 0x3ee   : > { %7903 = vmatmul.msk.bf16.gmra.mxu3 %vm365_vm3, %v9991_v14 }
 0x3f0   : > { %v2969_v12 = vpop.f32.mrf.mxu2 }
 0x3f1   : > { %v2988_v17 = vpop.f32.mrf.mxu3  ;;  %v10199_v24 = vadd.f32 %v2969_v12, %v9692_v58  ;;  %v2933_v3 = vpop.f32.mrf.mxu0 }
 0x3f2   : > { %v10202_v61 = vadd.f32 %v2988_v17, %v9694_v51  ;;  %v10205_v15 = vadd.f32 %v2933_v3, %v9696_v41  ;;  %v3021_v48 = vpop.f32.mrf.mxu1  ;;  %v13060_v17 = vld [vmem:[#allocation96_spill] sm:$0xff]  ;;  %3944 = vrot.lane.b32.xlu2 %v3888_v25, %s8231_s23  ;;  %v3273_v25 = vand.u32 %v9977_v47, %v8328_v37 }
 0x3f3   : > { %v10208_v40 = vadd.f32 %v3021_v48, %v13056_v30  ;;  %v13062_v30 = vld [vmem:[#allocation23_spill] sm:$0xff] }
 0x3f5   : > { %13057 = vst [vmem:[#allocation122_spill] sm:$0xff] %v10208_v40  ;;  %7906 = vmatmul.msk.bf16.vlgmr.msrb.gmra.mxu1 %vm365_vm3, %v9933_v34 }
 0x3f8   : > { %v2971_v58 = vpop.f32.mrf.mxu2 }
 0x3f9   : > { %v2990_v55 = vpop.f32.mrf.mxu3  ;;  %v10215_v51 = vadd.f32 %v2971_v58, %v9713_v36  ;;  %v3002_v12 = vpop.f32.mrf.mxu0  ;;  %v3890_v36 = vld.sshfl [vmem:[#allocation1 + $0x38] sm:$0xff pattern:$0x73625140] }
 0x3fa   : > { %v10218_v41 = vadd.f32 %v2990_v55, %v13058_v33  ;;  %v10221_v3 = vadd.f32 %v3002_v12, %v13060_v17  ;;  %v3023_v48 = vpop.f32.mrf.mxu1  ;;  %3946 = vrot.lane.b32.xlu0 %v3890_v36, %s8231_s23  ;;  %v13064_v33 = vld [vmem:[#allocation97_spill] sm:$0xff]  ;;  %v3269_v36 = vand.u32 %v9973_v18, %v8328_v37 }
 0x3fb   : > { %v10224_v40 = vadd.f32 %v3023_v48, %v13062_v30  ;;  %v13065_v48 = vld [vmem:[#allocation24_spill] sm:$0xff] }
 0x3fc   : > { %13059 = vst [vmem:[#allocation50_spill] sm:$0xff] %v10218_v41  ;;  %7904 = vmatmul.msk.bf16.vlgmr.msrb.gmra.mxu0 %vm365_vm3, %v9933_v34 }
 0x3fd   : > { %13061 = vst [vmem:[#allocation123_spill] sm:$0xff] %v10221_v3  ;;  %7908 = vmatmul.msk.bf16.vlgmr.msrb.gmra.mxu2 %vm365_vm3, %v9933_v34  ;;  %v13066_v3 = vld [vmem:[#allocation98_spill] sm:$0xff]  ;;  %3664 = vmatpush.bf16.msrb.mxu0 %v3269_v36  ;;  %v13068_v36 = vld [vmem:[#allocation99_spill] sm:$0xff] }
 0x3fe   : > { %13063 = vst [vmem:[#allocation51_spill] sm:$0xff] %v10224_v40  ;;  %7910 = vmatmul.msk.bf16.vlgmr.msrb.gmra.mxu3 %vm365_vm3, %v9933_v34  ;;  %3702 = vmatpush.bf16.msrb.mxu2 %v3273_v25 }
 0x400   : > { %v3040_v38 = vpop.f32.mrf.mxu2 }
 0x401   : > { %v3059_v58 = vpop.f32.mrf.mxu3  ;;  %v10235_v55 = vadd.f32 %v3040_v38, %v9737_v42  ;;  %v3004_v17 = vpop.f32.mrf.mxu0  ;;  %v3275_v42 = vand.u32 %v9979_v49, %v8328_v37  ;;  %v3886_v38 = vld.sshfl [vmem:[#allocation1 + $0x28] sm:$0xff pattern:$0x73625140] }
 0x402   : > { %v10238_v12 = vadd.f32 %v3059_v58, %v13064_v33  ;;  %v10241_v30 = vadd.f32 %v3004_v17, %v13065_v48  ;;  %v3026_v40 = vpop.f32.mrf.mxu1  ;;  %v3900_v58 = vld.sshfl [vmem:[#allocation1 + $0x10] sm:$0xff pattern:$0x73625140]  ;;  %3895 = vst [vmem:[#allocation1 + $0x20] ss:$4 sm:$0xff] %v9942_v16  ;;  %3942 = vrot.lane.b32.xlu2 %v3886_v38, %s8231_s23  ;;  %v3271_v33 = vand.u32 %v9975_v26, %v8328_v37  ;;  %v13067_v17 = vld [vmem:[#allocation25_spill] sm:$0xff] }
 0x403   : > { %v10244_v41 = vadd.f32 %v3026_v40, %v13066_v3  ;;  %3721 = vmatpush.bf16.msrb.mxu3 %v3275_v42  ;;  %3952 = vrot.lane.b32.xlu0 %v3900_v58, %s8231_s23  ;;  %v3896_v42 = vld.sshfl [vmem:[#allocation1] sm:$0xff pattern:$0x73625140] }
 0x404   : > { %3683 = vmatpush.bf16.msrb.mxu1 %v3271_v33  ;;  %3948 = vrot.lane.b32.xlu1 %v3896_v42, %s8231_s23 }
 0x405   : > { %7907 = vmatmul.msk.bf16.gmra.mxu1 %vm365_vm3, %v9991_v14 }
 0x408   : > { %v3042_v18 = vpop.f32.mrf.mxu2 }
 0x409   : > { %v3061_v40 = vpop.f32.mrf.mxu3  ;;  %v10258_v47 = vadd.f32 %v3042_v18, %v9757_v44  ;;  %v3007_v3 = vpop.f32.mrf.mxu0 }
 0x40a   : > { %v10261_v49 = vadd.f32 %v3061_v40, %v9759_v32  ;;  %v10266_v48 = vadd.f32 %v3007_v3, %v13067_v17  ;;  %v3028_v16 = vpop.f32.mrf.mxu1  ;;  %v3898_v32 = vld.sshfl [vmem:[#allocation1 + $0x8] sm:$0xff pattern:$0x73625140] }
 0x40b   : > { %v10269_v25 = vadd.f32 %v3028_v16, %v13068_v36  ;;  %3950 = vrot.lane.b32.xlu0 %v3898_v32, %s8231_s23 }
 0x40c   : > { %7905 = vmatmul.msk.bf16.gmra.mxu0 %vm365_vm3, %v9991_v14 }
 0x40d   : > { %7909 = vmatmul.msk.bf16.gmra.mxu2 %vm365_vm3, %v9991_v14 }
 0x40e   : > { %7911 = vmatmul.msk.bf16.gmra.mxu3 %vm365_vm3, %v9991_v14 }
 0x410   : > { %v3045_v44 = vpop.f32.mrf.mxu2 }
 0x411   : > { %v3064_v26 = vpop.f32.mrf.mxu3  ;;  %v10280_v38 = vadd.f32 %v3045_v44, %v9777_v6  ;;  %v3009_v18 = vpop.f32.mrf.mxu0 }
 0x412   : > { %v10283_v58 = vadd.f32 %v3064_v26, %v9779_v10  ;;  %v10286_v40 = vadd.f32 %v3009_v18, %v9781_v5  ;;  %v3305_v3 = vpop.f32.mrf.mxu1 }
 0x413   : > { %v10289_v33 = vadd.f32 %v3305_v3, %v9784_v31 }
 0x415   : > { %7914 = vmatmul.msk.bf16.vlgmr.msra.gmra.mxu1 %vm365_vm3, %v9933_v34 }
 0x418   : > { %v3047_v17 = vpop.f32.mrf.mxu2 }
 0x419   : > { %v3066_v16 = vpop.f32.mrf.mxu3  ;;  %v10294_v6 = vadd.f32 %v3047_v17, %v9792_v45  ;;  %v3286_v36 = vpop.f32.mrf.mxu0 }
 0x41a   : > { %v10297_v10 = vadd.f32 %v3066_v16, %v9794_v0  ;;  %v10300_v5 = vadd.f32 %v3286_v36, %v9797_v2  ;;  %v3307_v32 = vpop.f32.mrf.mxu1  ;;  %v3902_v0 = vld.sshfl [vmem:[#allocation1 + $0x18] sm:$0xff pattern:$0x73625140] }
 0x41b   : > { %v3925_v31 = vpop.permute.xlu0 %3924  ;;  %v10303_v44 = vadd.f32 %v3307_v32, %v9800_v13  ;;  %3954 = vrot.lane.b32.xlu1 %v3902_v0, %s8231_s23 }
 0x41c   : > { %v3923_v42 = vpop.permute.xlu2 %3922  ;;  %7912 = vmatmul.msk.bf16.vlgmr.msra.gmra.mxu0 %vm365_vm3, %v9933_v34 }
 0x41d   : > { %v3970_v26 = vsel %vm3966_vm7, %v3923_v42, %v3925_v31  ;;  %7916 = vmatmul.msk.bf16.vlgmr.msra.gmra.mxu2 %vm365_vm3, %v9933_v34 }
 0x41e   : > { %v4007_v45 = vand.u32 %v3970_v26, %v8328_v37  ;;  %7918 = vmatmul.msk.bf16.vlgmr.msra.gmra.mxu3 %vm365_vm3, %v9933_v34 }
 0x420   : > { %4133 = vmatpush.bf16.msra.mxu3 %v4007_v45  ;;  %v3324_v2 = vpop.f32.mrf.mxu2  ;;  %v3908_v45 = vld.sshfl [vmem:[#allocation1 + $0x30] sm:$0xff pattern:$0x73625140] }
 0x421   : > { %v3343_v13 = vpop.f32.mrf.mxu3  ;;  %v10315_v18 = vadd.f32 %v3324_v2, %v9809_v63  ;;  %v3288_v17 = vpop.f32.mrf.mxu0 }
 0x422   : > { %v10318_v3 = vadd.f32 %v3343_v13, %v9812_v52  ;;  %v10321_v16 = vadd.f32 %v3288_v17, %v9815_v20  ;;  %v3310_v36 = vpop.f32.mrf.mxu1 }
 0x423   : > { %v10324_v32 = vadd.f32 %v3310_v36, %v9818_v57  ;;  %v10328_v26 = vpop.permute.xlu0 %3928  ;;  %3960 = vrot.lane.b32.xlu1 %v3908_v45, %s8231_s23 }
 0x425   : > { %13069 = vst [vmem:[#allocation124_spill] sm:$0xff] %v10324_v32  ;;  %7915 = vmatmul.msk.bf16.gmra.mxu1 %vm365_vm3, %v9991_v14 }
 0x428   : > { %v3326_v63 = vpop.f32.mrf.mxu2 }
 0x429   : > { %v3345_v0 = vpop.f32.mrf.mxu3  ;;  %v10332_v52 = vadd.f32 %v3326_v63, %v9827_v9  ;;  %v3291_v2 = vpop.f32.mrf.mxu0  ;;  %v3906_v9 = vld.sshfl [vmem:[#allocation1 + $0x28] sm:$0xff pattern:$0x73625140] }
 0x42a   : > { %v10335_v20 = vadd.f32 %v3345_v0, %v9830_v39  ;;  %v10338_v57 = vadd.f32 %v3291_v2, %v9833_v4  ;;  %v3312_v13 = vpop.f32.mrf.mxu1  ;;  %v3919_v39 = vpop.permute.xlu2 %3918 }
 0x42b   : > { %13070 = vst [vmem:[#allocation52_spill] sm:$0xff] %v10332_v52  ;;  %v10341_v17 = vadd.f32 %v3312_v13, %v9836_v29  ;;  %3958 = vrot.lane.b32.xlu1 %v3906_v9, %s8231_s23  ;;  %v3927_v36 = vpop.permute.xlu0 %3926 }
 0x42c   : > { %13071 = vst [vmem:[#allocation125_spill] sm:$0xff] %v10335_v20  ;;  %7913 = vmatmul.msk.bf16.gmra.mxu0 %vm365_vm3, %v9991_v14  ;;  %v3972_v29 = vsel %vm3966_vm7, %v3927_v36, %v10328_v26 }
 0x42d   : > { %13072 = vst [vmem:[#allocation53_spill] sm:$0xff] %v10338_v57  ;;  %7917 = vmatmul.msk.bf16.gmra.mxu2 %vm365_vm3, %v9991_v14 }
 0x42e   : > { %13073 = vst [vmem:[#allocation126_spill] sm:$0xff] %v10341_v17  ;;  %7919 = vmatmul.msk.bf16.gmra.mxu3 %vm365_vm3, %v9991_v14 }
 0x430   : > { %v3329_v4 = vpop.f32.mrf.mxu2 }
 0x431   : > { %v3348_v45 = vpop.f32.mrf.mxu3  ;;  %v10353_v63 = vadd.f32 %v3329_v4, %v9849_v54  ;;  %v3293_v2 = vpop.f32.mrf.mxu0 }
 0x432   : > { %v10356_v0 = vadd.f32 %v3348_v45, %v9852_v62  ;;  %v10359_v17 = vadd.f32 %v3293_v2, %v9855_v1  ;;  %v3381_v57 = vpop.f32.mrf.mxu1  ;;  %v4013_v62 = vand.u32 %v3972_v29, %v8328_v37  ;;  %v13074_v2 = vld [vmem:[#allocation26_spill] sm:$0xff] }
 0x433   : > { %v3921_v13 = vpop.permute.xlu1 %3920  ;;  %v10364_v52 = vadd.f32 %v3381_v57, %v9858_v7 }
 0x434   : > { %v3969_v9 = vsel %vm3966_vm7, %v3921_v13, %v3923_v42  ;;  %v3968_v20 = vsel %vm3966_vm7, %v3919_v39, %v3921_v13  ;;  %v3971_v42 = vsel %vm3966_vm7, %v3925_v31, %v3927_v36  ;;  %v13078_v36 = vld [vmem:[#allocation27_spill] sm:$0xff] }
 0x435   : > { %v4004_v32 = vand.u32 %v3969_v9, %v8328_v37  ;;  %v4001_v54 = vand.u32 %v3968_v20, %v8328_v37  ;;  %7922 = vmatmul.msk.bf16.vlgmr.msrb.gmra.mxu1 %vm365_vm3, %v9933_v34  ;;  %v13076_v9 = vld [vmem:[#allocation100_spill] sm:$0xff]  ;;  %v4010_v31 = vand.u32 %v3971_v42, %v8328_v37 }
 0x437   : > { %4114 = vmatpush.bf16.msra.mxu2 %v4004_v32  ;;  %4095 = vmatpush.bf16.msra.mxu1 %v4001_v54 }
 0x438   : > { %v3331_v1 = vpop.f32.mrf.mxu2 }
 0x439   : > { %v3350_v4 = vpop.f32.mrf.mxu3  ;;  %v10373_v45 = vadd.f32 %v3331_v1, %v9863_v11  ;;  %v3362_v57 = vpop.f32.mrf.mxu0 }
 0x43a   : > { %v10376_v7 = vadd.f32 %v3350_v4, %v9866_v28  ;;  %v10379_v29 = vadd.f32 %v3362_v57, %v13074_v2  ;;  %v3383_v13 = vpop.f32.mrf.mxu1  ;;  %v13080_v4 = vld [vmem:[#allocation101_spill] sm:$0xff]  ;;  %v13082_v2 = vld [vmem:[#allocation28_spill] sm:$0xff] }
 0x43b   : > { %4171 = vmatpush.bf16.msrb.mxu1 %v4013_v62  ;;  %v3917_v20 = vpop.permute.xlu1 %3916  ;;  %v10383_v54 = vadd.f32 %v3383_v13, %v13076_v9 }
 0x43c   : > { %13075 = vst [vmem:[#allocation54_spill] sm:$0xff] %v10379_v29  ;;  %v3967_v32 = vsel %vm3966_vm7, %v3917_v20, %v3919_v39  ;;  %7920 = vmatmul.msk.bf16.vlgmr.msrb.gmra.mxu0 %vm365_vm3, %v9933_v34  ;;  %v3933_v11 = vpop.permute.xlu2 %3932  ;;  %v10471_v29 = vld [vmem:[%s8276_s21 + $0x2] sm:$0xff] }
 0x43d   : > { %13077 = vst [vmem:[#allocation127_spill] sm:$0xff] %v10383_v54  ;;  %v3998_v62 = vand.u32 %v3967_v32, %v8328_v37  ;;  %7924 = vmatmul.msk.bf16.vlgmr.msrb.gmra.mxu2 %vm365_vm3, %v9933_v34 }
 0x43e   : > { %7926 = vmatmul.msk.bf16.vlgmr.msrb.gmra.mxu3 %vm365_vm3, %v9933_v34  ;;  %13110 = vst [vmem:[#allocation134_spill] sm:$0xff] %v10471_v29 }
 0x43f   : > { %4076 = vmatpush.bf16.msra.mxu0 %v3998_v62  ;;  %v13084_v62 = vld [vmem:[#allocation102_spill] sm:$0xff] }
 0x440   : > { %v3400_v28 = vpop.f32.mrf.mxu2 }
 0x441   : > { %v3419_v39 = vpop.f32.mrf.mxu3  ;;  %v10394_v1 = vadd.f32 %v3400_v28, %v13078_v36  ;;  %v3364_v42 = vpop.f32.mrf.mxu0  ;;  %v3904_v36 = vld.sshfl [vmem:[#allocation1 + $0x20] sm:$0xff pattern:$0x73625140] }
 0x442   : > { %v10397_v57 = vadd.f32 %v3419_v39, %v13080_v4  ;;  %v10400_v13 = vadd.f32 %v3364_v42, %v13082_v2  ;;  %v3386_v32 = vpop.f32.mrf.mxu1  ;;  %3956 = vrot.lane.b32.xlu2 %v3904_v36, %s8231_s23  ;;  %v13086_v42 = vld [vmem:[#allocation103_spill] sm:$0xff]  ;;  %v13088_v2 = vld [vmem:[#allocation30_spill] sm:$0xff] }
 0x443   : > { %4152 = vmatpush.bf16.msrb.mxu0 %v4010_v31  ;;  %13079 = vst [vmem:[#allocation55_spill] sm:$0xff] %v10394_v1  ;;  %v3931_v20 = vpop.permute.xlu1 %3930  ;;  %v10406_v31 = vadd.f32 %v3386_v32, %v13084_v62  ;;  %v13092_v36 = vld [vmem:[#allocation31_spill] sm:$0xff] }
 0x444   : > { %13081 = vst [vmem:[#allocation128_spill] sm:$0xff] %v10397_v57  ;;  %v3973_v34 = vsel %vm3966_vm7, %v10328_v26, %v3931_v20  ;;  %v3974_v9 = vsel %vm3966_vm7, %v3931_v20, %v3933_v11  ;;  %v3835_v1 = vld [vmem:[%s8276_s21 + $0x32] sm:$0x3] }
 0x445   : > { %13083 = vst [vmem:[#allocation56_spill] sm:$0xff] %v10400_v13  ;;  %v4016_v28 = vand.u32 %v3973_v34, %v8328_v37  ;;  %v4019_v39 = vand.u32 %v3974_v9, %v8328_v37  ;;  %7923 = vmatmul.msk.bf16.gmra.mxu1 %vm365_vm3, %v9991_v14 }
 0x446   : > { %13085 = vst [vmem:[#allocation129_spill] sm:$0xff] %v10406_v31  ;;  %v13090_v31 = vld [vmem:[#allocation104_spill] sm:$0xff] }
 0x447   : > { %4190 = vmatpush.bf16.msrb.mxu2 %v4016_v28  ;;  %4209 = vmatpush.bf16.msrb.mxu3 %v4019_v39  ;;  %3913 = vst [vmem:[#allocation1] ss:$4 sm:$0xff] %v3835_v1 }
 0x448   : > { %v3402_v4 = vpop.f32.mrf.mxu2 }
 0x449   : > { %v3421_v26 = vpop.f32.mrf.mxu3  ;;  %v10414_v20 = vadd.f32 %v3402_v4, %v13086_v42  ;;  %v3367_v34 = vpop.f32.mrf.mxu0  ;;  %v13094_v4 = vld [vmem:[#allocation105_spill] sm:$0xff] }
 0x44a   : > { %v10417_v32 = vadd.f32 %v3421_v26, %v13088_v2  ;;  %v10420_v9 = vadd.f32 %v3367_v34, %v13090_v31  ;;  %v3388_v13 = vpop.f32.mrf.mxu1  ;;  %v13096_v26 = vld [vmem:[#allocation32_spill] sm:$0xff]  ;;  %v10441_v2 = vld [vmem:[%s12629_s1 + $0x50] sm:$0xff]  ;;  %v13098_v34 = vld [vmem:[#allocation106_spill] sm:$0xff] }
 0x44b   : > { %13087 = vst [vmem:[#allocation57_spill] sm:$0xff] %v10414_v20  ;;  %v3937_v62 = vpop.permute.xlu1 %3936  ;;  %v10423_v57 = vadd.f32 %v3388_v13, %v13092_v36 }
 0x44c   : > { %13089 = vst [vmem:[#allocation130_spill] sm:$0xff] %v10417_v32  ;;  %7921 = vmatmul.msk.bf16.gmra.mxu0 %vm365_vm3, %v9991_v14 }
 0x44d   : > { %13091 = vst [vmem:[#allocation58_spill] sm:$0xff] %v10420_v9  ;;  %7925 = vmatmul.msk.bf16.gmra.mxu2 %vm365_vm3, %v9991_v14  ;;  %v13100_v9 = vld [vmem:[#allocation33_spill] sm:$0xff] }
 0x44e   : > { %13093 = vst [vmem:[#allocation59_spill] sm:$0xff] %v10423_v57  ;;  %7927 = vmatmul.msk.bf16.gmra.mxu3 %vm365_vm3, %v9991_v14 }
 0x450   : > { %v3405_v28 = vpop.f32.mrf.mxu2 }
 0x451   : > { %v3424_v39 = vpop.f32.mrf.mxu3  ;;  %v10433_v31 = vadd.f32 %v3405_v28, %v13094_v4  ;;  %v3369_v13 = vpop.f32.mrf.mxu0 }
 0x452   : > { %v10436_v42 = vadd.f32 %v3424_v39, %v13096_v26  ;;  %v10444_v36 = vadd.f32 %v3369_v13, %v13098_v34  ;;  %v3457_v57 = vpop.f32.mrf.mxu1  ;;  %v3914_v39 = vld.sshfl [vmem:[#allocation1] sm:$0xff pattern:$0x73625140]  ;;  %v3939_v4 = vpop.permute.xlu2 %3938 }
 0x453   : > { %13095 = vst [vmem:[#allocation60_spill] sm:$0xff] %v10433_v31  ;;  %v3935_v1 = vpop.permute.xlu1 %3934  ;;  %v10448_v32 = vadd.f32 %v3457_v57, %v13100_v9  ;;  %3964 = vrot.lane.b32.xlu0 %v3914_v39, %s8231_s23  ;;  %v3977_v13 = vsel %vm3966_vm7, %v3937_v62, %v3939_v4  ;;  %v13104_v9 = vld [vmem:[#allocation34_spill] sm:$0xff]  ;;  %v13106_v39 = vld [vmem:[#allocation108_spill] sm:$0xff] }
 0x454   : > { %13097 = vst [vmem:[#allocation61_spill] sm:$0xff] %v10436_v42  ;;  %v3976_v14 = vsel %vm3966_vm7, %v3935_v1, %v3937_v62  ;;  %v3975_v26 = vsel %vm3966_vm7, %v3933_v11, %v3935_v1  ;;  %v13102_v42 = vld [vmem:[#allocation107_spill] sm:$0xff]  ;;  %v3910_v62 = vld.sshfl [vmem:[#allocation1 + $0x38] sm:$0xff pattern:$0x73625140] }
 0x455   : > { %13099 = vst [vmem:[#allocation131_spill] sm:$0xff] %v10444_v36  ;;  %v4025_v28 = vand.u32 %v3976_v14, %v8328_v37  ;;  %7942 = vmatmul.msk.bf16.vlgmr.msra.gmra.mxu1 %vm365_vm3, %v10441_v2  ;;  %v4022_v54 = vand.u32 %v3975_v26, %v8328_v37  ;;  %v13108_v11 = vld [vmem:[#allocation35_spill] sm:$0xff]  ;;  %3962 = vrot.lane.b32.xlu2 %v3910_v62, %s8231_s23 }
 0x456   : > { %13101 = vst [vmem:[#allocation62_spill] sm:$0xff] %v10448_v32 }
 0x457   : > { %4247 = vmatpush.bf16.msra.mxu1 %v4025_v28  ;;  %v4028_v28 = vand.u32 %v3977_v13, %v8328_v37  ;;  %4644 = vst [vmem:[#allocation1] ss:$4 sm:$0xff] %v10471_v29 }
 0x458   : > { %v3407_v34 = vpop.f32.mrf.mxu2 }
 0x459   : > { %v3426_v36 = vpop.f32.mrf.mxu3  ;;  %v10457_v57 = vadd.f32 %v3407_v34, %v13102_v42  ;;  %v3438_v32 = vpop.f32.mrf.mxu0  ;;  %v13112_v34 = vld [vmem:[#allocation109_spill] sm:$0xff] }
 0x45a   : > { %v10460_v14 = vadd.f32 %v3426_v36, %v13104_v9  ;;  %v10463_v31 = vadd.f32 %v3438_v32, %v13106_v39  ;;  %v3459_v20 = vpop.f32.mrf.mxu1  ;;  %v13111_v32 = vld [vmem:[#allocation29_spill] sm:$0xff]  ;;  %v13114_v39 = vld [vmem:[#allocation36_spill] sm:$0xff] }
 0x45b   : > { %13103 = vst [vmem:[#allocation132_spill] sm:$0xff] %v10457_v57  ;;  %v10468_v1 = vadd.f32 %v3459_v20, %v13108_v11  ;;  %v3941_v20 = vpop.permute.xlu0 %3940 }
 0x45c   : > { %13105 = vst [vmem:[#allocation63_spill] sm:$0xff] %v10460_v14  ;;  %7940 = vmatmul.msk.bf16.vlgmr.msra.gmra.mxu0 %vm365_vm3, %v10441_v2  ;;  %v3978_v42 = vsel %vm3966_vm7, %v3939_v4, %v3941_v20 }
 0x45d   : > { %13107 = vst [vmem:[#allocation133_spill] sm:$0xff] %v10463_v31  ;;  %7944 = vmatmul.msk.bf16.vlgmr.msra.gmra.mxu2 %vm365_vm3, %v10441_v2  ;;  %4228 = vmatpush.bf16.msra.mxu0 %v4022_v54  ;;  %v4031_v13 = vand.u32 %v3978_v42, %v8328_v37  ;;  %v13116_v54 = vld [vmem:[#allocation110_spill] sm:$0xff] }
 0x45e   : > { %13109 = vst [vmem:[#allocation64_spill] sm:$0xff] %v10468_v1  ;;  %7946 = vmatmul.msk.bf16.vlgmr.msra.gmra.mxu3 %vm365_vm3, %v10441_v2  ;;  %4266 = vmatpush.bf16.msra.mxu2 %v4028_v28  ;;  %v13118_v1 = vld [vmem:[#allocation37_spill] sm:$0xff]  ;;  %v4654_v42 = vld.sshfl [vmem:[#allocation1 + $0x18] sm:$0xff pattern:$0x73625140] }
 0x45f   : > { %4647 = vst [vmem:[#allocation1 + $0x20] ss:$4 sm:$0xff] %v13111_v32  ;;  %v10493_v32 = vld [vmem:[%s12629_s1 + $0x58] sm:$0xff]  ;;  %4285 = vmatpush.bf16.msra.mxu3 %v4031_v13  ;;  %4714 = vrot.lane.b32.xlu0 %v4654_v42, %s8232_s28 }
 0x460   : > { %v3476_v36 = vpop.f32.mrf.mxu2  ;;  %v13122_v13 = vld [vmem:[#allocation112_spill] sm:$0xff] }
 0x461   : > { %v3495_v26 = vpop.f32.mrf.mxu3  ;;  %v10485_v9 = vadd.f32 %v3476_v36, %v13112_v34  ;;  %v3440_v62 = vpop.f32.mrf.mxu0 }
 0x462   : > { %v10488_v11 = vadd.f32 %v3495_v26, %v13114_v39  ;;  %v10496_v28 = vadd.f32 %v3440_v62, %v13116_v54  ;;  %v3462_v4 = vpop.f32.mrf.mxu1  ;;  %v3945_v36 = vpop.permute.xlu2 %3944  ;;  %v13120_v62 = vld [vmem:[#allocation38_spill] sm:$0xff] }
 0x463   : > { %13113 = vst [vmem:[#allocation65_spill] sm:$0xff] %v10485_v9  ;;  %v10499_v31 = vadd.f32 %v3462_v4, %v13118_v1  ;;  %v4650_v4 = vld.sshfl [vmem:[#allocation1 + $0x8] sm:$0xff pattern:$0x73625140]  ;;  %v13126_v9 = vld [vmem:[#allocation113_spill] sm:$0xff] }
 0x464   : > { %13115 = vst [vmem:[#allocation135_spill] sm:$0xff] %v10488_v11 }
 0x465   : > { %13117 = vst [vmem:[#allocation66_spill] sm:$0xff] %v10496_v28  ;;  %7943 = vmatmul.msk.bf16.gmra.mxu1 %vm365_vm3, %v10493_v32 }
 0x466   : > { %13119 = vst [vmem:[#allocation136_spill] sm:$0xff] %v10499_v31  ;;  %v4656_v26 = vld.sshfl [vmem:[#allocation1 + $0x20] sm:$0xff pattern:$0x73625140]  ;;  %v13124_v31 = vld [vmem:[#allocation39_spill] sm:$0xff] }
 0x467   : > { %4716 = vrot.lane.b32.xlu1 %v4656_v26, %s8232_s28  ;;  %v4660_v57 = vld.sshfl [vmem:[#allocation1 + $0x30] sm:$0xff pattern:$0x73625140]  ;;  %4710 = vrot.lane.b32.xlu0 %v4650_v4, %s8232_s28 }
 0x468   : > { %v3478_v34 = vpop.f32.mrf.mxu2 }
 0x469   : > { %v3497_v39 = vpop.f32.mrf.mxu3  ;;  %v10506_v54 = vadd.f32 %v3478_v34, %v13120_v62  ;;  %v3443_v1 = vpop.f32.mrf.mxu0 }
 0x46a   : > { %v10509_v28 = vadd.f32 %v3497_v39, %v13122_v13  ;;  %v10512_v11 = vadd.f32 %v3443_v1, %v13124_v31  ;;  %v3464_v42 = vpop.f32.mrf.mxu1  ;;  %v3943_v26 = vpop.permute.xlu2 %3942  ;;  %v13128_v39 = vld [vmem:[#allocation40_spill] sm:$0xff]  ;;  %v13130_v13 = vld [vmem:[#allocation114_spill] sm:$0xff] }
 0x46b   : > { %13121 = vst [vmem:[#allocation67_spill] sm:$0xff] %v10506_v54  ;;  %v10515_v14 = vadd.f32 %v3464_v42, %v13126_v9  ;;  %v3980_v31 = vsel %vm3966_vm7, %v3943_v26, %v3945_v36  ;;  %v13132_v42 = vld [vmem:[#allocation41_spill] sm:$0xff]  ;;  %v13134_v54 = vld [vmem:[#allocation115_spill] sm:$0xff] }
 0x46c   : > { %13123 = vst [vmem:[#allocation137_spill] sm:$0xff] %v10509_v28  ;;  %7941 = vmatmul.msk.bf16.gmra.mxu0 %vm365_vm3, %v10493_v32  ;;  %v4037_v28 = vand.u32 %v3980_v31, %v8328_v37  ;;  %v13137_v31 = vld [vmem:[#allocation43_spill] sm:$0xff] }
 0x46d   : > { %13125 = vst [vmem:[#allocation68_spill] sm:$0xff] %v10512_v11  ;;  %7945 = vmatmul.msk.bf16.gmra.mxu2 %vm365_vm3, %v10493_v32 }
 0x46e   : > { %13127 = vst [vmem:[#allocation138_spill] sm:$0xff] %v10515_v14  ;;  %7947 = vmatmul.msk.bf16.gmra.mxu3 %vm365_vm3, %v10493_v32 }
 0x46f   : > { %4720 = vrot.lane.b32.xlu1 %v4660_v57, %s8232_s28  ;;  %v4658_v57 = vld.sshfl [vmem:[#allocation1 + $0x28] sm:$0xff pattern:$0x73625140] }
 0x470   : > { %v3481_v34 = vpop.f32.mrf.mxu2 }
 0x471   : > { %v3500_v9 = vpop.f32.mrf.mxu3  ;;  %v10527_v62 = vadd.f32 %v3481_v34, %v13128_v39  ;;  %v3445_v4 = vpop.f32.mrf.mxu0 }
 0x472   : > { %v10530_v1 = vadd.f32 %v3500_v9, %v13130_v13  ;;  %v10533_v14 = vadd.f32 %v3445_v4, %v13132_v42  ;;  %v3533_v11 = vpop.f32.mrf.mxu1  ;;  %v3947_v34 = vpop.permute.xlu0 %3946  ;;  %v3979_v9 = vsel %vm3966_vm7, %v3941_v20, %v3943_v26  ;;  %v13136_v42 = vld [vmem:[#allocation42_spill] sm:$0xff]  ;;  %v13139_v20 = vld [vmem:[#allocation44_spill] sm:$0xff] }
 0x473   : > { %13129 = vst [vmem:[#allocation69_spill] sm:$0xff] %v10527_v62  ;;  %v10537_v29 = vadd.f32 %v3533_v11, %v13134_v54  ;;  %v3981_v39 = vsel %vm3966_vm7, %v3945_v36, %v3947_v34  ;;  %v4652_v36 = vld.sshfl [vmem:[#allocation1 + $0x10] sm:$0xff pattern:$0x73625140] }
 0x474   : > { %13131 = vst [vmem:[#allocation139_spill] sm:$0xff] %v10530_v1  ;;  %4712 = vrot.lane.b32.xlu2 %v4652_v36, %s8232_s28  ;;  %v13141_v36 = vld [vmem:[#allocation111_spill] sm:$0xff] }
 0x475   : > { %13133 = vst [vmem:[#allocation70_spill] sm:$0xff] %v10533_v14  ;;  %7950 = vmatmul.msk.bf16.vlgmr.msrb.gmra.mxu1 %vm365_vm3, %v10441_v2 }
 0x476   : > { %13135 = vst [vmem:[#allocation140_spill] sm:$0xff] %v10537_v29  ;;  %4323 = vmatpush.bf16.msrb.mxu1 %v4037_v28  ;;  %v13138_v29 = vld [vmem:[#allocation116_spill] sm:$0xff]  ;;  %v4040_v28 = vand.u32 %v3981_v39, %v8328_v37 }
 0x477   : > { %4718 = vrot.lane.b32.xlu1 %v4658_v57, %s8232_s28  ;;  %v4034_v57 = vand.u32 %v3979_v9, %v8328_v37 }
 0x478   : > { %v3483_v13 = vpop.f32.mrf.mxu2 }
 0x479   : > { %v3502_v4 = vpop.f32.mrf.mxu3  ;;  %v10545_v14 = vadd.f32 %v3483_v13, %v13136_v42  ;;  %v3514_v54 = vpop.f32.mrf.mxu0 }
 0x47a   : > { %v10548_v11 = vadd.f32 %v3502_v4, %v13137_v31  ;;  %v10551_v1 = vadd.f32 %v3514_v54, %v13138_v29  ;;  %v3535_v62 = vpop.f32.mrf.mxu1  ;;  %v3949_v29 = vpop.permute.xlu1 %3948 }
 0x47b   : > { %v10556_v26 = vadd.f32 %v3535_v62, %v13139_v20  ;;  %v3982_v9 = vsel %vm3966_vm7, %v3947_v34, %v3949_v29  ;;  %v4648_v34 = vld.sshfl [vmem:[#allocation1] sm:$0xff pattern:$0x73625140] }
 0x47c   : > { %7948 = vmatmul.msk.bf16.vlgmr.msrb.gmra.mxu0 %vm365_vm3, %v10441_v2  ;;  %v4043_v13 = vand.u32 %v3982_v9, %v8328_v37  ;;  %4708 = vrot.lane.b32.xlu2 %v4648_v34, %s8232_s28  ;;  %4665 = vst [vmem:[#allocation1] ss:$4 sm:$0xff] %v13141_v36  ;;  %v13146_v34 = vld [vmem:[#allocation117_spill] sm:$0xff] }
 0x47d   : > { %7952 = vmatmul.msk.bf16.vlgmr.msrb.gmra.mxu2 %vm365_vm3, %v10441_v2  ;;  %4304 = vmatpush.bf16.msrb.mxu0 %v4034_v57  ;;  %v13147_v36 = vld [vmem:[#allocation45_spill] sm:$0xff] }
 0x47e   : > { %7954 = vmatmul.msk.bf16.vlgmr.msrb.gmra.mxu3 %vm365_vm3, %v10441_v2  ;;  %4342 = vmatpush.bf16.msrb.mxu2 %v4040_v28  ;;  %v3953_v28 = vpop.permute.xlu0 %3952 }
 0x47f   : > { %4361 = vmatpush.bf16.msrb.mxu3 %v4043_v13 }
 0x480   : > { %v3552_v39 = vpop.f32.mrf.mxu2 }
 0x481   : > { %v3571_v62 = vpop.f32.mrf.mxu3  ;;  %v10568_v4 = vadd.f32 %v3552_v39, %v10080_v35  ;;  %v3516_v31 = vpop.f32.mrf.mxu0 }
 0x482   : > { %v10571_v42 = vadd.f32 %v3571_v62, %v10083_v21  ;;  %v10574_v54 = vadd.f32 %v3516_v31, %v10086_v22  ;;  %v3538_v20 = vpop.f32.mrf.mxu1 }
 0x483   : > { %v10577_v57 = vadd.f32 %v3538_v20, %v10089_v27  ;;  %v4668_v31 = vld.sshfl [vmem:[#allocation1] sm:$0xff pattern:$0x73625140] }
 0x484   : > { %4724 = vrot.lane.b32.xlu0 %v4668_v31, %s8232_s28 }
 0x485   : > { %13140 = vst [vmem:[#allocation71_spill] sm:$0xff] %v10577_v57  ;;  %7951 = vmatmul.msk.bf16.gmra.mxu1 %vm365_vm3, %v10493_v32 }
 0x488   : > { %v3554_v21 = vpop.f32.mrf.mxu2 }
 0x489   : > { %v3573_v35 = vpop.f32.mrf.mxu3  ;;  %v10584_v9 = vadd.f32 %v3554_v21, %v10102_v46  ;;  %v3519_v39 = vpop.f32.mrf.mxu0 }
 0x48a   : > { %v10587_v22 = vadd.f32 %v3573_v35, %v10105_v8  ;;  %v10590_v27 = vadd.f32 %v3519_v39, %v10110_v53  ;;  %v3540_v62 = vpop.f32.mrf.mxu1  ;;  %v3951_v46 = vpop.permute.xlu0 %3950  ;;  %v13149_v39 = vld [vmem:[#allocation118_spill] sm:$0xff] }
 0x48b   : > { %13142 = vst [vmem:[#allocation141_spill] sm:$0xff] %v10584_v9  ;;  %v10593_v13 = vadd.f32 %v3540_v62, %v10113_v43  ;;  %v3984_v8 = vsel %vm3966_vm7, %v3951_v46, %v3953_v28  ;;  %v4662_v9 = vld.sshfl [vmem:[#allocation1 + $0x38] sm:$0xff pattern:$0x73625140] }
 0x48c   : > { %13143 = vst [vmem:[#allocation72_spill] sm:$0xff] %v10587_v22  ;;  %7949 = vmatmul.msk.bf16.gmra.mxu0 %vm365_vm3, %v10493_v32  ;;  %4722 = vrot.lane.b32.xlu2 %v4662_v9, %s8232_s28 }
 0x48d   : > { %13144 = vst [vmem:[#allocation142_spill] sm:$0xff] %v10590_v27  ;;  %7953 = vmatmul.msk.bf16.gmra.mxu2 %vm365_vm3, %v10493_v32  ;;  %v13151_v27 = vld [vmem:[#allocation46_spill] sm:$0xff]  ;;  %v3955_v57 = vpop.permute.xlu1 %3954 }
 0x48e   : > { %13145 = vst [vmem:[#allocation143_spill] sm:$0xff] %v10593_v13  ;;  %7955 = vmatmul.msk.bf16.gmra.mxu3 %vm365_vm3, %v10493_v32  ;;  %v4049_v13 = vand.u32 %v3984_v8, %v8328_v37  ;;  %v13154_v8 = vld [vmem:[#allocation47_spill] sm:$0xff] }
 0x490   : > { %v3557_v53 = vpop.f32.mrf.mxu2 }
 0x491   : > { %v3576_v20 = vpop.f32.mrf.mxu3  ;;  %v10604_v43 = vadd.f32 %v3557_v53, %v13146_v34  ;;  %v3521_v35 = vpop.f32.mrf.mxu0  ;;  %v3983_v53 = vsel %vm3966_vm7, %v3949_v29, %v3951_v46  ;;  %v13156_v29 = vld [vmem:[#allocation48_spill] sm:$0xff] }
 0x492   : > { %v10607_v21 = vadd.f32 %v3576_v20, %v13147_v36  ;;  %v10610_v62 = vadd.f32 %v3521_v35, %v13149_v39  ;;  %v3609_v31 = vpop.f32.mrf.mxu1  ;;  %v3985_v20 = vsel %vm3966_vm7, %v3953_v28, %v3955_v57  ;;  %v13153_v35 = vld [vmem:[#allocation119_spill] sm:$0xff]  ;;  %v4046_v9 = vand.u32 %v3983_v53, %v8328_v37 }
 0x493   : > { %v10614_v22 = vadd.f32 %v3609_v31, %v13151_v27  ;;  %v4672_v28 = vld.sshfl [vmem:[#allocation1 + $0x10] sm:$0xff pattern:$0x73625140] }
 0x494   : > { %13148 = vst [vmem:[#allocation73_spill] sm:$0xff] %v10607_v21  ;;  %4728 = vrot.lane.b32.xlu2 %v4672_v28, %s8232_s28 }
 0x495   : > { %13150 = vst [vmem:[#allocation74_spill] sm:$0xff] %v10610_v62  ;;  %7958 = vmatmul.msk.bf16.vlgmr.msra.gmra.mxu1 %vm365_vm3, %v10441_v2 }
 0x496   : > { %13152 = vst [vmem:[#allocation75_spill] sm:$0xff] %v10614_v22  ;;  %4399 = vmatpush.bf16.msra.mxu1 %v4049_v13  ;;  %v13155_v22 = vld [vmem:[#allocation120_spill] sm:$0xff]  ;;  %v4052_v13 = vand.u32 %v3985_v20, %v8328_v37 }
 0x498   : > { %v3559_v34 = vpop.f32.mrf.mxu2 }
 0x499   : > { %v3578_v36 = vpop.f32.mrf.mxu3  ;;  %v10622_v39 = vadd.f32 %v3559_v34, %v13153_v35  ;;  %v3590_v31 = vpop.f32.mrf.mxu0 }
 0x49a   : > { %v10625_v27 = vadd.f32 %v3578_v36, %v13154_v8  ;;  %v10628_v62 = vadd.f32 %v3590_v31, %v13155_v22  ;;  %v3611_v21 = vpop.f32.mrf.mxu1  ;;  %v4674_v22 = vld.sshfl [vmem:[#allocation1 + $0x18] sm:$0xff pattern:$0x73625140] }
 0x49b   : > { %v10633_v46 = vadd.f32 %v3611_v21, %v13156_v29  ;;  %4730 = vrot.lane.b32.xlu0 %v4674_v22, %s8232_s28  ;;  %v13159_v29 = vld [vmem:[#allocation49_spill] sm:$0xff]  ;;  %v3961_v22 = vpop.permute.xlu1 %3960 }
 0x49c   : > { %7956 = vmatmul.msk.bf16.vlgmr.msra.gmra.mxu0 %vm365_vm3, %v10441_v2  ;;  %v3957_v34 = vpop.permute.xlu2 %3956 }
 0x49d   : > { %13157 = vst [vmem:[#allocation2_spill] sm:$0xff] %v10633_v46  ;;  %7960 = vmatmul.msk.bf16.vlgmr.msra.gmra.mxu2 %vm365_vm3, %v10441_v2  ;;  %4380 = vmatpush.bf16.msra.mxu0 %v4046_v9  ;;  %v3986_v53 = vsel %vm3966_vm7, %v3955_v57, %v3957_v34  ;;  %v13158_v9 = vld [vmem:[#allocation121_spill] sm:$0xff] }
 0x49e   : > { %7962 = vmatmul.msk.bf16.vlgmr.msra.gmra.mxu3 %vm365_vm3, %v10441_v2  ;;  %4418 = vmatpush.bf16.msra.mxu2 %v4052_v13  ;;  %v4055_v36 = vand.u32 %v3986_v53, %v8328_v37  ;;  %v4670_v53 = vld.sshfl [vmem:[#allocation1 + $0x8] sm:$0xff pattern:$0x73625140]  ;;  %v10660_v46 = vld [vmem:[%s8276_s21 + $0x1a] sm:$0xff] }
 0x49f   : > { %4667 = vst [vmem:[#allocation1 + $0x20] ss:$4 sm:$0xff] %v10660_v46  ;;  %4726 = vrot.lane.b32.xlu2 %v4670_v53, %s8232_s28 }
 0x4a0   : > { %v3628_v21 = vpop.f32.mrf.mxu2  ;;  %4437 = vmatpush.bf16.msra.mxu3 %v4055_v36 }
 0x4a1   : > { %v3647_v20 = vpop.f32.mrf.mxu3  ;;  %v10646_v35 = vadd.f32 %v3628_v21, %v10157_v23  ;;  %v3592_v31 = vpop.f32.mrf.mxu0 }
 0x4a2   : > { %v10649_v8 = vadd.f32 %v3647_v20, %v10160_v60  ;;  %v10652_v13 = vadd.f32 %v3592_v31, %v13158_v9  ;;  %v3614_v57 = vpop.f32.mrf.mxu1 }
 0x4a3   : > { %v10655_v28 = vadd.f32 %v3614_v57, %v13159_v29  ;;  %v3959_v29 = vpop.permute.xlu1 %3958 }
 0x4a5   : > { %7959 = vmatmul.msk.bf16.gmra.mxu1 %vm365_vm3, %v10493_v32 }
 0x4a8   : > { %v3630_v23 = vpop.f32.mrf.mxu2 }
 0x4a9   : > { %v3649_v60 = vpop.f32.mrf.mxu3  ;;  %v10665_v21 = vadd.f32 %v3630_v23, %v10178_v59  ;;  %v3595_v36 = vpop.f32.mrf.mxu0  ;;  %v4680_v59 = vld.sshfl [vmem:[#allocation1 + $0x30] sm:$0xff pattern:$0x73625140] }
 0x4aa   : > { %v10668_v20 = vadd.f32 %v3649_v60, %v10181_v56  ;;  %v10671_v31 = vadd.f32 %v3595_v36, %v10186_v50  ;;  %v3616_v9 = vpop.f32.mrf.mxu1  ;;  %v4676_v56 = vld.sshfl [vmem:[#allocation1 + $0x20] sm:$0xff pattern:$0x73625140]  ;;  %4736 = vrot.lane.b32.xlu0 %v4680_v59, %s8232_s28  ;;  %v3988_v50 = vsel %vm3966_vm7, %v3959_v29, %v3961_v22  ;;  %v13165_v59 = vld [vmem:[#allocation122_spill] sm:$0xff] }
 0x4ab   : > { %v10674_v57 = vadd.f32 %v3616_v9, %v10189_v19  ;;  %4732 = vrot.lane.b32.xlu1 %v4676_v56, %s8232_s28  ;;  %v4678_v56 = vld.sshfl [vmem:[#allocation1 + $0x28] sm:$0xff pattern:$0x73625140] }
 0x4ac   : > { %13160 = vst [vmem:[#allocation76_spill] sm:$0xff] %v10668_v20  ;;  %7957 = vmatmul.msk.bf16.gmra.mxu0 %vm365_vm3, %v10493_v32 }
 0x4ad   : > { %13161 = vst [vmem:[#allocation3_spill] sm:$0xff] %v10671_v31  ;;  %7961 = vmatmul.msk.bf16.gmra.mxu2 %vm365_vm3, %v10493_v32  ;;  %v4061_v31 = vand.u32 %v3988_v50, %v8328_v37  ;;  %v13167_v50 = vld [vmem:[#allocation50_spill] sm:$0xff] }
 0x4ae   : > { %13162 = vst [vmem:[#allocation77_spill] sm:$0xff] %v10674_v57  ;;  %7963 = vmatmul.msk.bf16.gmra.mxu3 %vm365_vm3, %v10493_v32 }
 0x4b0   : > { %v3633_v19 = vpop.f32.mrf.mxu2 }
 0x4b1   : > { %v3652_v53 = vpop.f32.mrf.mxu3  ;;  %v10686_v23 = vadd.f32 %v3633_v19, %v10199_v24  ;;  %v3597_v36 = vpop.f32.mrf.mxu0 }
 0x4b2   : > { %v10689_v60 = vadd.f32 %v3652_v53, %v10202_v61  ;;  %v10692_v9 = vadd.f32 %v3597_v36, %v10205_v15  ;;  %v3685_v57 = vpop.f32.mrf.mxu1  ;;  %4734 = vrot.lane.b32.xlu0 %v4678_v56, %s8232_s28  ;;  %v3963_v24 = vpop.permute.xlu2 %3962  ;;  %v3987_v61 = vsel %vm3966_vm7, %v3957_v34, %v3959_v29  ;;  %v13169_v34 = vld [vmem:[#allocation51_spill] sm:$0xff] }
 0x4b3   : > { %v10696_v20 = vadd.f32 %v3685_v57, %v13165_v59  ;;  %v3989_v19 = vsel %vm3966_vm7, %v3961_v22, %v3963_v24  ;;  %v4058_v56 = vand.u32 %v3987_v61, %v8328_v37 }
 0x4b4   : > { %13163 = vst [vmem:[#allocation4_spill] sm:$0xff] %v10689_v60 }
 0x4b5   : > { %13164 = vst [vmem:[#allocation78_spill] sm:$0xff] %v10692_v9  ;;  %7966 = vmatmul.msk.bf16.vlgmr.msrb.gmra.mxu1 %vm365_vm3, %v10441_v2 }
 0x4b6   : > { %13166 = vst [vmem:[#allocation5_spill] sm:$0xff] %v10696_v20  ;;  %4475 = vmatpush.bf16.msrb.mxu1 %v4061_v31  ;;  %v13168_v20 = vld [vmem:[#allocation123_spill] sm:$0xff]  ;;  %v4064_v31 = vand.u32 %v3989_v19, %v8328_v37 }
 0x4b8   : > { %v3635_v15 = vpop.f32.mrf.mxu2 }
 0x4b9   : > { %v3654_v53 = vpop.f32.mrf.mxu3  ;;  %v10704_v36 = vadd.f32 %v3635_v15, %v10215_v51  ;;  %v3666_v59 = vpop.f32.mrf.mxu0  ;;  %v4682_v51 = vld.sshfl [vmem:[#allocation1 + $0x38] sm:$0xff pattern:$0x73625140] }
 0x4ba   : > { %v10707_v57 = vadd.f32 %v3654_v53, %v13167_v50  ;;  %v10710_v9 = vadd.f32 %v3666_v59, %v13168_v20  ;;  %v3687_v60 = vpop.f32.mrf.mxu1  ;;  %4738 = vrot.lane.b32.xlu1 %v4682_v51, %s8232_s28  ;;  %v10739_v59 = vld [vmem:[%s8276_s21 + $0x22] sm:$0xff] }
 0x4bb   : > { %v10715_v29 = vadd.f32 %v3687_v60, %v13169_v34  ;;  %4685 = vst [vmem:[#allocation1] ss:$4 sm:$0xff] %v10739_v59 }
 0x4bc   : > { %7964 = vmatmul.msk.bf16.vlgmr.msrb.gmra.mxu0 %vm365_vm3, %v10441_v2 }
 0x4bd   : > { %7968 = vmatmul.msk.bf16.vlgmr.msrb.gmra.mxu2 %vm365_vm3, %v10441_v2  ;;  %4456 = vmatpush.bf16.msrb.mxu0 %v4058_v56 }
 0x4be   : > { %7970 = vmatmul.msk.bf16.vlgmr.msrb.gmra.mxu3 %vm365_vm3, %v10441_v2  ;;  %4494 = vmatpush.bf16.msrb.mxu2 %v4064_v31 }
 0x4c0   : > { %v3704_v22 = vpop.f32.mrf.mxu2 }
 0x4c1   : > { %v3723_v20 = vpop.f32.mrf.mxu3  ;;  %v10725_v60 = vadd.f32 %v3704_v22, %v10235_v55  ;;  %v3668_v19 = vpop.f32.mrf.mxu0 }
 0x4c2   : > { %v10728_v61 = vadd.f32 %v3723_v20, %v10238_v12  ;;  %v10731_v15 = vadd.f32 %v3668_v19, %v10241_v30  ;;  %v3690_v53 = vpop.f32.mrf.mxu1 }
 0x4c3   : > { %v10734_v50 = vadd.f32 %v3690_v53, %v10244_v41 }
 0x4c5   : > { %7967 = vmatmul.msk.bf16.gmra.mxu1 %vm365_vm3, %v10493_v32  ;;  %v3965_v56 = vpop.permute.xlu0 %3964 }
 0x4c6   : > { %v3990_v55 = vsel %vm3966_vm7, %v3963_v24, %v3965_v56 }
 0x4c7   : > { %v4067_v34 = vand.u32 %v3990_v55, %v8328_v37 }
 0x4c8   : > { %v3706_v12 = vpop.f32.mrf.mxu2 }
 0x4c9   : > { %v3725_v31 = vpop.f32.mrf.mxu3  ;;  %v10745_v30 = vadd.f32 %v3706_v12, %v10258_v47  ;;  %v3671_v51 = vpop.f32.mrf.mxu0  ;;  %4513 = vmatpush.bf16.msrb.mxu3 %v4067_v34  ;;  %v4692_v47 = vld.sshfl [vmem:[#allocation1 + $0x10] sm:$0xff pattern:$0x73625140] }
 0x4ca   : > { %v10748_v41 = vadd.f32 %v3725_v31, %v10261_v49  ;;  %v10751_v22 = vadd.f32 %v3671_v51, %v10266_v48  ;;  %v3692_v20 = vpop.f32.mrf.mxu1  ;;  %4744 = vrot.lane.b32.xlu1 %v4692_v47, %s8232_s28  ;;  %v4690_v31 = vld.sshfl [vmem:[#allocation1 + $0x8] sm:$0xff pattern:$0x73625140] }
 0x4cb   : > { %v10754_v19 = vadd.f32 %v3692_v20, %v10269_v25 }
 0x4cc   : > { %7965 = vmatmul.msk.bf16.gmra.mxu0 %vm365_vm3, %v10493_v32 }
 0x4cd   : > { %7969 = vmatmul.msk.bf16.gmra.mxu2 %vm365_vm3, %v10493_v32 }
 0x4ce   : > { %7971 = vmatmul.msk.bf16.gmra.mxu3 %vm365_vm3, %v10493_v32 }
 0x4d0   : > { %v3709_v49 = vpop.f32.mrf.mxu2 }
 0x4d1   : > { %v3728_v48 = vpop.f32.mrf.mxu3  ;;  %v10764_v24 = vadd.f32 %v3709_v49, %v10280_v38  ;;  %v3673_v53 = vpop.f32.mrf.mxu0 }
 0x4d2   : > { %v10767_v25 = vadd.f32 %v3728_v48, %v10283_v58  ;;  %v10770_v56 = vadd.f32 %v3673_v53, %v10286_v40  ;;  %v4097_v55 = vpop.f32.mrf.mxu1  ;;  %v4715_v34 = vpop.permute.xlu0 %4714  ;;  %4742 = vrot.lane.b32.xlu1 %v4690_v31, %s8232_s28 }
 0x4d3   : > { %v10773_v12 = vadd.f32 %v4097_v55, %v10289_v33  ;;  %v4713_v38 = vpop.permute.xlu2 %4712 }
 0x4d4   : > { %13170 = vst [vmem:[#allocation79_spill] sm:$0xff] %v10770_v56  ;;  %v4761_v58 = vsel %vm4758_vm8, %v4713_v38, %v4715_v34 }
 0x4d5   : > { %13171 = vst [vmem:[#allocation6_spill] sm:$0xff] %v10773_v12  ;;  %7974 = vmatmul.msk.bf16.vlgmr.msra.gmra.mxu1 %vm365_vm3, %v10441_v2  ;;  %v4796_v12 = vand.u32 %v4761_v58, %v8328_v37 }
 0x4d8   : > { %v3711_v20 = vpop.f32.mrf.mxu2 }
 0x4d9   : > { %v10778_v51 = vpop.permute.xlu1 %4716  ;;  %v3730_v40 = vpop.f32.mrf.mxu3  ;;  %v10784_v33 = vadd.f32 %v3711_v20, %v10294_v6 }
 0x4da   : > { %v4762_v47 = vsel %vm4758_vm8, %v4715_v34, %v10778_v51  ;;  %v10787_v49 = vadd.f32 %v3730_v40, %v10297_v10  ;;  %v4078_v48 = vpop.f32.mrf.mxu0  ;;  %v4099_v55 = vpop.f32.mrf.mxu1 }
 0x4db   : > { %v10790_v53 = vadd.f32 %v4078_v48, %v10300_v5  ;;  %v4799_v31 = vand.u32 %v4762_v47, %v8328_v37  ;;  %v10795_v56 = vadd.f32 %v4099_v55, %v10303_v44  ;;  %v4711_v6 = vpop.permute.xlu0 %4710  ;;  %v4709_v10 = vpop.permute.xlu2 %4708 }
 0x4dc   : > { %7972 = vmatmul.msk.bf16.vlgmr.msra.gmra.mxu0 %vm365_vm3, %v10441_v2  ;;  %v4760_v5 = vsel %vm4758_vm8, %v4711_v6, %v4713_v38  ;;  %v4759_v34 = vsel %vm4758_vm8, %v4709_v10, %v4711_v6  ;;  %v13172_v38 = vld [vmem:[#allocation124_spill] sm:$0xff]  ;;  %v4688_v10 = vld.sshfl [vmem:[#allocation1] sm:$0xff pattern:$0x73625140] }
 0x4dd   : > { %7976 = vmatmul.msk.bf16.vlgmr.msra.gmra.mxu2 %vm365_vm3, %v10441_v2  ;;  %v4793_v20 = vand.u32 %v4760_v5, %v8328_v37  ;;  %v4790_v40 = vand.u32 %v4759_v34, %v8328_v37  ;;  %4740 = vrot.lane.b32.xlu2 %v4688_v10, %s8232_s28  ;;  %v13174_v34 = vld [vmem:[#allocation52_spill] sm:$0xff]  ;;  %v10835_v10 = vld [vmem:[%s8276_s21 + $0x2a] sm:$0xff] }
 0x4de   : > { %7978 = vmatmul.msk.bf16.vlgmr.msra.gmra.mxu3 %vm365_vm3, %v10441_v2  ;;  %4906 = vmatpush.bf16.msra.mxu2 %v4796_v12  ;;  %4687 = vst [vmem:[#allocation1 + $0x20] ss:$4 sm:$0xff] %v10835_v10 }
 0x4df   : > { %4925 = vmatpush.bf16.msra.mxu3 %v4799_v31  ;;  %4887 = vmatpush.bf16.msra.mxu1 %v4793_v20 }
 0x4e0   : > { %v4116_v58 = vpop.f32.mrf.mxu2  ;;  %4868 = vmatpush.bf16.msra.mxu0 %v4790_v40  ;;  %v13178_v40 = vld [vmem:[#allocation53_spill] sm:$0xff] }
 0x4e1   : > { %v4135_v44 = vpop.f32.mrf.mxu3  ;;  %v10808_v47 = vadd.f32 %v4116_v58, %v10315_v18  ;;  %v4721_v5 = vpop.permute.xlu1 %4720 }
 0x4e2   : > { %v10811_v48 = vadd.f32 %v4135_v44, %v10318_v3  ;;  %v4080_v55 = vpop.f32.mrf.mxu0  ;;  %v4102_v31 = vpop.f32.mrf.mxu1 }
 0x4e3   : > { %v10814_v12 = vadd.f32 %v4080_v55, %v10321_v16  ;;  %v10817_v6 = vadd.f32 %v4102_v31, %v13172_v38  ;;  %v13176_v16 = vld [vmem:[#allocation125_spill] sm:$0xff]  ;;  %v13180_v38 = vld [vmem:[#allocation126_spill] sm:$0xff] }
 0x4e5   : > { %13173 = vst [vmem:[#allocation80_spill] sm:$0xff] %v10817_v6  ;;  %7975 = vmatmul.msk.bf16.gmra.mxu1 %vm365_vm3, %v10493_v32 }
 0x4e8   : > { %v4118_v18 = vpop.f32.mrf.mxu2 }
 0x4e9   : > { %v4137_v3 = vpop.f32.mrf.mxu3  ;;  %v10823_v58 = vadd.f32 %v4118_v18, %v13174_v34  ;;  %v4719_v18 = vpop.permute.xlu1 %4718 }
 0x4ea   : > { %v10826_v44 = vadd.f32 %v4137_v3, %v13176_v16  ;;  %v4083_v20 = vpop.f32.mrf.mxu0  ;;  %v4104_v31 = vpop.f32.mrf.mxu1  ;;  %v4764_v3 = vsel %vm4758_vm8, %v4719_v18, %v4721_v5 }
 0x4eb   : > { %13175 = vst [vmem:[#allocation7_spill] sm:$0xff] %v10823_v58  ;;  %v10829_v55 = vadd.f32 %v4083_v20, %v13178_v40  ;;  %v10832_v6 = vadd.f32 %v4104_v31, %v13180_v38  ;;  %v4696_v58 = vld.sshfl [vmem:[#allocation1 + $0x20] sm:$0xff pattern:$0x73625140] }
 0x4ec   : > { %13177 = vst [vmem:[#allocation81_spill] sm:$0xff] %v10826_v44  ;;  %7973 = vmatmul.msk.bf16.gmra.mxu0 %vm365_vm3, %v10493_v32  ;;  %4748 = vrot.lane.b32.xlu0 %v4696_v58, %s8232_s28 }
 0x4ed   : > { %13179 = vst [vmem:[#allocation8_spill] sm:$0xff] %v10829_v55  ;;  %7977 = vmatmul.msk.bf16.gmra.mxu2 %vm365_vm3, %v10493_v32  ;;  %v4805_v55 = vand.u32 %v4764_v3, %v8328_v37 }
 0x4ee   : > { %13181 = vst [vmem:[#allocation82_spill] sm:$0xff] %v10832_v6  ;;  %7979 = vmatmul.msk.bf16.gmra.mxu3 %vm365_vm3, %v10493_v32 }
 0x4f0   : > { %v4121_v34 = vpop.f32.mrf.mxu2 }
 0x4f1   : > { %v4140_v16 = vpop.f32.mrf.mxu3  ;;  %v10846_v20 = vadd.f32 %v4121_v34, %v10353_v63  ;;  %v4694_v63 = vld.sshfl [vmem:[#allocation1 + $0x18] sm:$0xff pattern:$0x73625140]  ;;  %v4723_v34 = vpop.permute.xlu2 %4722 }
 0x4f2   : > { %v10849_v40 = vadd.f32 %v4140_v16, %v10356_v0  ;;  %v4085_v31 = vpop.f32.mrf.mxu0  ;;  %v4173_v6 = vpop.f32.mrf.mxu1  ;;  %4746 = vrot.lane.b32.xlu2 %v4694_v63, %s8232_s28  ;;  %v4765_v0 = vsel %vm4758_vm8, %v4721_v5, %v4723_v34 }
 0x4f3   : > { %v10852_v38 = vadd.f32 %v4085_v31, %v10359_v17  ;;  %v10856_v44 = vadd.f32 %v4173_v6, %v10364_v52  ;;  %v4763_v17 = vsel %vm4758_vm8, %v10778_v51, %v4719_v18  ;;  %v13186_v31 = vld [vmem:[#allocation54_spill] sm:$0xff]  ;;  %v4808_v63 = vand.u32 %v4765_v0, %v8328_v37  ;;  %v13188_v51 = vld [vmem:[#allocation127_spill] sm:$0xff] }
 0x4f5   : > { %13182 = vst [vmem:[#allocation9_spill] sm:$0xff] %v10852_v38  ;;  %7982 = vmatmul.msk.bf16.vlgmr.msrb.gmra.mxu1 %vm365_vm3, %v10441_v2 }
 0x4f6   : > { %13183 = vst [vmem:[#allocation83_spill] sm:$0xff] %v10856_v44  ;;  %4963 = vmatpush.bf16.msrb.mxu1 %v4805_v55  ;;  %v4802_v55 = vand.u32 %v4763_v17, %v8328_v37 }
 0x4f8   : > { %v4123_v3 = vpop.f32.mrf.mxu2 }
 0x4f9   : > { %v4142_v16 = vpop.f32.mrf.mxu3  ;;  %v10866_v52 = vadd.f32 %v4123_v3, %v10373_v45  ;;  %v4700_v45 = vld.sshfl [vmem:[#allocation1 + $0x30] sm:$0xff pattern:$0x73625140] }
 0x4fa   : > { %v10869_v6 = vadd.f32 %v4142_v16, %v10376_v7  ;;  %v4154_v58 = vpop.f32.mrf.mxu0  ;;  %v4175_v38 = vpop.f32.mrf.mxu1  ;;  %4752 = vrot.lane.b32.xlu2 %v4700_v45, %s8232_s28  ;;  %v13190_v3 = vld [vmem:[#allocation55_spill] sm:$0xff]  ;;  %v4702_v45 = vld.sshfl [vmem:[#allocation1 + $0x38] sm:$0xff pattern:$0x73625140] }
 0x4fb   : > { %13184 = vst [vmem:[#allocation10_spill] sm:$0xff] %v10866_v52  ;;  %v10872_v44 = vadd.f32 %v4154_v58, %v13186_v31  ;;  %v10877_v18 = vadd.f32 %v4175_v38, %v13188_v51  ;;  %v4725_v7 = vpop.permute.xlu0 %4724  ;;  %v13192_v58 = vld [vmem:[#allocation128_spill] sm:$0xff]  ;;  %4754 = vrot.lane.b32.xlu0 %v4702_v45, %s8232_s28  ;;  %v13204_v45 = vld [vmem:[#allocation59_spill] sm:$0xff] }
 0x4fc   : > { %13185 = vst [vmem:[#allocation84_spill] sm:$0xff] %v10869_v6  ;;  %7980 = vmatmul.msk.bf16.vlgmr.msrb.gmra.mxu0 %vm365_vm3, %v10441_v2  ;;  %v4766_v5 = vsel %vm4758_vm8, %v4723_v34, %v4725_v7  ;;  %v11028_v52 = vld [vmem:[%s8276_s21 + $0xa] sm:$0xff] }
 0x4fd   : > { %13187 = vst [vmem:[#allocation11_spill] sm:$0xff] %v10872_v44  ;;  %7984 = vmatmul.msk.bf16.vlgmr.msrb.gmra.mxu2 %vm365_vm3, %v10441_v2  ;;  %4944 = vmatpush.bf16.msrb.mxu0 %v4802_v55  ;;  %v4811_v0 = vand.u32 %v4766_v5, %v8328_v37  ;;  %v4729_v44 = vpop.permute.xlu2 %4728  ;;  %v4698_v5 = vld.sshfl [vmem:[#allocation1 + $0x28] sm:$0xff pattern:$0x73625140] }
 0x4fe   : > { %13189 = vst [vmem:[#allocation85_spill] sm:$0xff] %v10877_v18  ;;  %7986 = vmatmul.msk.bf16.vlgmr.msrb.gmra.mxu3 %vm365_vm3, %v10441_v2  ;;  %4982 = vmatpush.bf16.msrb.mxu2 %v4808_v63  ;;  %v13194_v2 = vld [vmem:[#allocation56_spill] sm:$0xff]  ;;  %v13196_v63 = vld [vmem:[#allocation129_spill] sm:$0xff] }
 0x4ff   : > { %5001 = vmatpush.bf16.msrb.mxu3 %v4811_v0  ;;  %v13200_v0 = vld [vmem:[#allocation130_spill] sm:$0xff]  ;;  %5439 = vst [vmem:[#allocation1 + $0x20] ss:$4 sm:$0xff] %v11028_v52 }
 0x500   : > { %v4192_v17 = vpop.f32.mrf.mxu2 }
 0x501   : > { %v4211_v38 = vpop.f32.mrf.mxu3  ;;  %v10889_v16 = vadd.f32 %v4192_v17, %v13190_v3  ;;  %v13198_v3 = vld [vmem:[#allocation57_spill] sm:$0xff] }
 0x502   : > { %v10892_v31 = vadd.f32 %v4211_v38, %v13192_v58  ;;  %v4156_v51 = vpop.f32.mrf.mxu0  ;;  %v4178_v55 = vpop.f32.mrf.mxu1  ;;  %4750 = vrot.lane.b32.xlu2 %v4698_v5, %s8232_s28 }
 0x503   : > { %13191 = vst [vmem:[#allocation12_spill] sm:$0xff] %v10889_v16  ;;  %v10895_v18 = vadd.f32 %v4156_v51, %v13194_v2  ;;  %v10898_v34 = vadd.f32 %v4178_v55, %v13196_v63  ;;  %v13202_v55 = vld [vmem:[#allocation58_spill] sm:$0xff] }
 0x504   : > { %13193 = vst [vmem:[#allocation86_spill] sm:$0xff] %v10892_v31  ;;  %v4627_v31 = vld [vmem:[%s8276_s21 + $0x32] sm:$0x3] }
 0x505   : > { %13195 = vst [vmem:[#allocation13_spill] sm:$0xff] %v10895_v18  ;;  %7983 = vmatmul.msk.bf16.gmra.mxu1 %vm365_vm3, %v10493_v32  ;;  %v4727_v5 = vpop.permute.xlu2 %4726 }
 0x506   : > { %13197 = vst [vmem:[#allocation87_spill] sm:$0xff] %v10898_v34 }
 0x507   : > { %4705 = vst [vmem:[#allocation1] ss:$4 sm:$0xff] %v4627_v31  ;;  %v10933_v31 = vld [vmem:[%s12629_s1 + $0x60] sm:$0xff] }
 0x508   : > { %v4194_v17 = vpop.f32.mrf.mxu2 }
 0x509   : > { %v4213_v38 = vpop.f32.mrf.mxu3  ;;  %v10905_v58 = vadd.f32 %v4194_v17, %v13198_v3  ;;  %v4768_v17 = vsel %vm4758_vm8, %v4727_v5, %v4729_v44 }
 0x50a   : > { %v10908_v51 = vadd.f32 %v4213_v38, %v13200_v0  ;;  %v4159_v2 = vpop.f32.mrf.mxu0  ;;  %v4180_v34 = vpop.f32.mrf.mxu1  ;;  %v13206_v0 = vld [vmem:[#allocation60_spill] sm:$0xff] }
 0x50b   : > { %13199 = vst [vmem:[#allocation14_spill] sm:$0xff] %v10905_v58  ;;  %v10911_v63 = vadd.f32 %v4159_v2, %v13202_v55  ;;  %v10914_v18 = vadd.f32 %v4180_v34, %v13204_v45  ;;  %v13208_v34 = vld [vmem:[#allocation61_spill] sm:$0xff]  ;;  %v13212_v58 = vld [vmem:[#allocation62_spill] sm:$0xff] }
 0x50c   : > { %13201 = vst [vmem:[#allocation88_spill] sm:$0xff] %v10908_v51  ;;  %7981 = vmatmul.msk.bf16.gmra.mxu0 %vm365_vm3, %v10493_v32  ;;  %v4817_v51 = vand.u32 %v4768_v17, %v8328_v37  ;;  %v13215_v17 = vld [vmem:[#allocation132_spill] sm:$0xff] }
 0x50d   : > { %13203 = vst [vmem:[#allocation15_spill] sm:$0xff] %v10911_v63  ;;  %7985 = vmatmul.msk.bf16.gmra.mxu2 %vm365_vm3, %v10493_v32 }
 0x50e   : > { %13205 = vst [vmem:[#allocation89_spill] sm:$0xff] %v10914_v18  ;;  %7987 = vmatmul.msk.bf16.gmra.mxu3 %vm365_vm3, %v10493_v32  ;;  %v13210_v18 = vld [vmem:[#allocation131_spill] sm:$0xff] }
 0x510   : > { %v4197_v38 = vpop.f32.mrf.mxu2 }
 0x511   : > { %v4216_v3 = vpop.f32.mrf.mxu3  ;;  %v10925_v2 = vadd.f32 %v4197_v38, %v13206_v0  ;;  %v4706_v38 = vld.sshfl [vmem:[#allocation1] sm:$0xff pattern:$0x73625140]  ;;  %v4731_v0 = vpop.permute.xlu0 %4730 }
 0x512   : > { %v10928_v55 = vadd.f32 %v4216_v3, %v13208_v34  ;;  %v4161_v45 = vpop.f32.mrf.mxu0  ;;  %v4249_v32 = vpop.f32.mrf.mxu1  ;;  %4756 = vrot.lane.b32.xlu1 %v4706_v38, %s8232_s28  ;;  %v13214_v3 = vld [vmem:[#allocation134_spill] sm:$0xff]  ;;  %v4767_v34 = vsel %vm4758_vm8, %v4725_v7, %v4727_v5  ;;  %v13221_v7 = vld [vmem:[#allocation64_spill] sm:$0xff] }
 0x513   : > { %13207 = vst [vmem:[#allocation16_spill] sm:$0xff] %v10925_v2  ;;  %v10936_v63 = vadd.f32 %v4161_v45, %v13210_v18  ;;  %v10940_v16 = vadd.f32 %v4249_v32, %v13212_v58  ;;  %v4769_v18 = vsel %vm4758_vm8, %v4729_v44, %v4731_v0  ;;  %v13217_v58 = vld [vmem:[#allocation63_spill] sm:$0xff]  ;;  %v4814_v6 = vand.u32 %v4767_v34, %v8328_v37  ;;  %v13223_v34 = vld [vmem:[#allocation65_spill] sm:$0xff] }
 0x514   : > { %13209 = vst [vmem:[#allocation90_spill] sm:$0xff] %v10928_v55 }
 0x515   : > { %13211 = vst [vmem:[#allocation17_spill] sm:$0xff] %v10936_v63  ;;  %8002 = vmatmul.msk.bf16.vlgmr.msra.gmra.mxu1 %vm365_vm3, %v10933_v31 }
 0x516   : > { %13213 = vst [vmem:[#allocation91_spill] sm:$0xff] %v10940_v16  ;;  %5039 = vmatpush.bf16.msra.mxu1 %v4817_v51  ;;  %v13219_v16 = vld [vmem:[#allocation133_spill] sm:$0xff]  ;;  %v4820_v51 = vand.u32 %v4769_v18, %v8328_v37  ;;  %v13225_v18 = vld [vmem:[#allocation135_spill] sm:$0xff] }
 0x517   : > { %5436 = vst [vmem:[#allocation1] ss:$4 sm:$0xff] %v13214_v3 }
 0x518   : > { %v4199_v45 = vpop.f32.mrf.mxu2 }
 0x519   : > { %v4218_v63 = vpop.f32.mrf.mxu3  ;;  %v10949_v55 = vadd.f32 %v4199_v45, %v13215_v17 }
 0x51a   : > { %v10952_v32 = vadd.f32 %v4218_v63, %v13217_v58  ;;  %v4230_v38 = vpop.f32.mrf.mxu0  ;;  %v4251_v2 = vpop.f32.mrf.mxu1  ;;  %v10978_v58 = vld [vmem:[%s12629_s1 + $0x68] sm:$0xff] }
 0x51b   : > { %13216 = vst [vmem:[#allocation18_spill] sm:$0xff] %v10949_v55  ;;  %v10955_v3 = vadd.f32 %v4230_v38, %v13219_v16  ;;  %v10960_v5 = vadd.f32 %v4251_v2, %v13221_v7  ;;  %v13227_v38 = vld [vmem:[#allocation66_spill] sm:$0xff] }
 0x51c   : > { %13218 = vst [vmem:[#allocation92_spill] sm:$0xff] %v10952_v32  ;;  %8000 = vmatmul.msk.bf16.vlgmr.msra.gmra.mxu0 %vm365_vm3, %v10933_v31 }
 0x51d   : > { %13220 = vst [vmem:[#allocation19_spill] sm:$0xff] %v10955_v3  ;;  %8004 = vmatmul.msk.bf16.vlgmr.msra.gmra.mxu2 %vm365_vm3, %v10933_v31  ;;  %5020 = vmatpush.bf16.msra.mxu0 %v4814_v6  ;;  %v4733_v6 = vpop.permute.xlu1 %4732 }
 0x51e   : > { %13222 = vst [vmem:[#allocation93_spill] sm:$0xff] %v10960_v5  ;;  %v5446_v44 = vld.sshfl [vmem:[#allocation1 + $0x18] sm:$0xff pattern:$0x73625140]  ;;  %8006 = vmatmul.msk.bf16.vlgmr.msra.gmra.mxu3 %vm365_vm3, %v10933_v31  ;;  %5058 = vmatpush.bf16.msra.mxu2 %v4820_v51 }
 0x51f   : > { %5506 = vrot.lane.b32.xlu1 %v5446_v44, %s8233_s5  ;;  %v13229_v51 = vld [vmem:[#allocation136_spill] sm:$0xff] }
 0x520   : > { %v4268_v16 = vpop.f32.mrf.mxu2 }
 0x521   : > { %v4287_v63 = vpop.f32.mrf.mxu3  ;;  %v10970_v2 = vadd.f32 %v4268_v16, %v13223_v34  ;;  %v4770_v16 = vsel %vm4758_vm8, %v4731_v0, %v4733_v6  ;;  %v5444_v34 = vld.sshfl [vmem:[#allocation1 + $0x10] sm:$0xff pattern:$0x73625140] }
 0x522   : > { %v10973_v45 = vadd.f32 %v4287_v63, %v13225_v18  ;;  %v4232_v17 = vpop.f32.mrf.mxu0  ;;  %v4254_v44 = vpop.f32.mrf.mxu1  ;;  %v4823_v18 = vand.u32 %v4770_v16, %v8328_v37  ;;  %5504 = vrot.lane.b32.xlu0 %v5444_v34, %s8233_s5  ;;  %v13237_v34 = vld [vmem:[#allocation138_spill] sm:$0xff] }
 0x523   : > { %13224 = vst [vmem:[#allocation20_spill] sm:$0xff] %v10970_v2  ;;  %v10981_v7 = vadd.f32 %v4232_v17, %v13227_v38  ;;  %v10984_v5 = vadd.f32 %v4254_v44, %v13229_v51  ;;  %v5442_v2 = vld.sshfl [vmem:[#allocation1 + $0x8] sm:$0xff pattern:$0x73625140]  ;;  %v4737_v63 = vpop.permute.xlu0 %4736  ;;  %v13233_v51 = vld [vmem:[#allocation137_spill] sm:$0xff] }
 0x524   : > { %13226 = vst [vmem:[#allocation94_spill] sm:$0xff] %v10973_v45  ;;  %5077 = vmatpush.bf16.msra.mxu3 %v4823_v18  ;;  %v13235_v45 = vld [vmem:[#allocation68_spill] sm:$0xff] }
 0x525   : > { %13228 = vst [vmem:[#allocation21_spill] sm:$0xff] %v10981_v7  ;;  %8003 = vmatmul.msk.bf16.gmra.mxu1 %vm365_vm3, %v10978_v58  ;;  %v13231_v7 = vld [vmem:[#allocation67_spill] sm:$0xff] }
 0x526   : > { %13230 = vst [vmem:[#allocation95_spill] sm:$0xff] %v10984_v5 }
 0x527   : > { %5502 = vrot.lane.b32.xlu1 %v5442_v2, %s8233_s5  ;;  %v5440_v2 = vld.sshfl [vmem:[#allocation1] sm:$0xff pattern:$0x73625140] }
 0x528   : > { %v4270_v17 = vpop.f32.mrf.mxu2 }
 0x529   : > { %v4289_v38 = vpop.f32.mrf.mxu3  ;;  %v10993_v44 = vadd.f32 %v4270_v17, %v13231_v7  ;;  %v13239_v17 = vld [vmem:[#allocation69_spill] sm:$0xff] }
 0x52a   : > { %v10996_v0 = vadd.f32 %v4289_v38, %v13233_v51  ;;  %v4235_v5 = vpop.f32.mrf.mxu0  ;;  %v4256_v16 = vpop.f32.mrf.mxu1  ;;  %5500 = vrot.lane.b32.xlu0 %v5440_v2, %s8233_s5  ;;  %v13240_v51 = vld [vmem:[#allocation139_spill] sm:$0xff] }
 0x52b   : > { %13232 = vst [vmem:[#allocation22_spill] sm:$0xff] %v10993_v44  ;;  %v10999_v3 = vadd.f32 %v4235_v5, %v13235_v45  ;;  %v11002_v32 = vadd.f32 %v4256_v16, %v13237_v34  ;;  %v4735_v7 = vpop.permute.xlu0 %4734  ;;  %v13242_v44 = vld [vmem:[#allocation140_spill] sm:$0xff] }
 0x52c   : > { %13234 = vst [vmem:[#allocation96_spill] sm:$0xff] %v10996_v0  ;;  %8001 = vmatmul.msk.bf16.gmra.mxu0 %vm365_vm3, %v10978_v58  ;;  %v4772_v5 = vsel %vm4758_vm8, %v4735_v7, %v4737_v63 }
 0x52d   : > { %13236 = vst [vmem:[#allocation23_spill] sm:$0xff] %v10999_v3  ;;  %8005 = vmatmul.msk.bf16.gmra.mxu2 %vm365_vm3, %v10978_v58  ;;  %v4829_v0 = vand.u32 %v4772_v5, %v8328_v37 }
 0x52e   : > { %13238 = vst [vmem:[#allocation97_spill] sm:$0xff] %v11002_v32  ;;  %8007 = vmatmul.msk.bf16.gmra.mxu3 %vm365_vm3, %v10978_v58  ;;  %v13241_v32 = vld [vmem:[#allocation70_spill] sm:$0xff] }
 0x530   : > { %v4273_v45 = vpop.f32.mrf.mxu2 }
 0x531   : > { %v4292_v18 = vpop.f32.mrf.mxu3  ;;  %v11013_v38 = vadd.f32 %v4273_v45, %v13239_v17  ;;  %v4771_v45 = vsel %vm4758_vm8, %v4733_v6, %v4735_v7 }
 0x532   : > { %v11016_v16 = vadd.f32 %v4292_v18, %v13240_v51  ;;  %v4237_v34 = vpop.f32.mrf.mxu0  ;;  %v4325_v3 = vpop.f32.mrf.mxu1 }
 0x533   : > { %v11019_v2 = vadd.f32 %v4237_v34, %v13241_v32  ;;  %v11023_v55 = vadd.f32 %v4325_v3, %v13242_v44  ;;  %v4739_v18 = vpop.permute.xlu1 %4738 }
 0x534   : > { %v4773_v51 = vsel %vm4758_vm8, %v4737_v63, %v4739_v18 }
 0x535   : > { %13243 = vst [vmem:[#allocation24_spill] sm:$0xff] %v11023_v55  ;;  %8010 = vmatmul.msk.bf16.vlgmr.msrb.gmra.mxu1 %vm365_vm3, %v10933_v31  ;;  %v4832_v7 = vand.u32 %v4773_v51, %v8328_v37 }
 0x536   : > { %5115 = vmatpush.bf16.msrb.mxu1 %v4829_v0  ;;  %v4826_v0 = vand.u32 %v4771_v45, %v8328_v37 }
 0x538   : > { %v4275_v17 = vpop.f32.mrf.mxu2 }
 0x539   : > { %v4294_v32 = vpop.f32.mrf.mxu3  ;;  %v11034_v5 = vadd.f32 %v4275_v17, %v10545_v14  ;;  %v5448_v14 = vld.sshfl [vmem:[#allocation1 + $0x20] sm:$0xff pattern:$0x73625140] }
 0x53a   : > { %v11037_v3 = vadd.f32 %v4294_v32, %v10548_v11  ;;  %v4306_v44 = vpop.f32.mrf.mxu0  ;;  %v4327_v55 = vpop.f32.mrf.mxu1  ;;  %5508 = vrot.lane.b32.xlu2 %v5448_v14, %s8233_s5  ;;  %v5454_v11 = vld.sshfl [vmem:[#allocation1 + $0x38] sm:$0xff pattern:$0x73625140]  ;;  %v5452_v14 = vld.sshfl [vmem:[#allocation1 + $0x30] sm:$0xff pattern:$0x73625140] }
 0x53b   : > { %v11040_v34 = vadd.f32 %v4306_v44, %v10551_v1  ;;  %v11044_v6 = vadd.f32 %v4327_v55, %v10556_v26  ;;  %v4741_v1 = vpop.permute.xlu2 %4740  ;;  %5514 = vrot.lane.b32.xlu0 %v5454_v11, %s8233_s5 }
 0x53c   : > { %8008 = vmatmul.msk.bf16.vlgmr.msrb.gmra.mxu0 %vm365_vm3, %v10933_v31  ;;  %v4774_v26 = vsel %vm4758_vm8, %v4739_v18, %v4741_v1  ;;  %v4745_v11 = vpop.permute.xlu1 %4744 }
 0x53d   : > { %8012 = vmatmul.msk.bf16.vlgmr.msrb.gmra.mxu2 %vm365_vm3, %v10933_v31  ;;  %5096 = vmatpush.bf16.msrb.mxu0 %v4826_v0  ;;  %v4835_v45 = vand.u32 %v4774_v26, %v8328_v37  ;;  %v11072_v26 = vld [vmem:[%s8276_s21 + $0x12] sm:$0xff] }
 0x53e   : > { %8014 = vmatmul.msk.bf16.vlgmr.msrb.gmra.mxu3 %vm365_vm3, %v10933_v31  ;;  %5134 = vmatpush.bf16.msrb.mxu2 %v4832_v7  ;;  %v13247_v7 = vld [vmem:[#allocation71_spill] sm:$0xff]  ;;  %13249 = vst [vmem:[#allocation100_spill] sm:$0xff] %v11072_v26 }
 0x53f   : > { %5153 = vmatpush.bf16.msrb.mxu3 %v4835_v45  ;;  %5457 = vst [vmem:[#allocation1] ss:$4 sm:$0xff] %v11072_v26  ;;  %v13252_v45 = vld [vmem:[#allocation72_spill] sm:$0xff] }
 0x540   : > { %v4344_v55 = vpop.f32.mrf.mxu2 }
 0x541   : > { %v4363_v63 = vpop.f32.mrf.mxu3  ;;  %v11058_v17 = vadd.f32 %v4344_v55, %v10568_v4  ;;  %v5450_v4 = vld.sshfl [vmem:[#allocation1 + $0x28] sm:$0xff pattern:$0x73625140]  ;;  %v13250_v55 = vld [vmem:[#allocation141_spill] sm:$0xff] }
 0x542   : > { %v11061_v32 = vadd.f32 %v4363_v63, %v10571_v42  ;;  %v4308_v51 = vpop.f32.mrf.mxu0  ;;  %v4330_v0 = vpop.f32.mrf.mxu1  ;;  %5512 = vrot.lane.b32.xlu2 %v5452_v14, %s8233_s5  ;;  %5459 = vst [vmem:[#allocation1 + $0x20] ss:$4 sm:$0xff] %v10660_v46 }
 0x543   : > { %13244 = vst [vmem:[#allocation98_spill] sm:$0xff] %v11058_v17  ;;  %v11064_v44 = vadd.f32 %v4308_v51, %v10574_v54  ;;  %v11067_v18 = vadd.f32 %v4330_v0, %v13247_v7  ;;  %v13254_v7 = vld [vmem:[#allocation142_spill] sm:$0xff] }
 0x544   : > { %13245 = vst [vmem:[#allocation25_spill] sm:$0xff] %v11061_v32  ;;  %v13256_v32 = vld [vmem:[#allocation143_spill] sm:$0xff] }
 0x545   : > { %13246 = vst [vmem:[#allocation99_spill] sm:$0xff] %v11064_v44  ;;  %8011 = vmatmul.msk.bf16.gmra.mxu1 %vm365_vm3, %v10978_v58 }
 0x546   : > { %13248 = vst [vmem:[#allocation26_spill] sm:$0xff] %v11067_v18  ;;  %v5464_v46 = vld.sshfl [vmem:[#allocation1 + $0x10] sm:$0xff pattern:$0x73625140] }
 0x547   : > { %5520 = vrot.lane.b32.xlu0 %v5464_v46, %s8233_s5  ;;  %v13260_v46 = vld [vmem:[#allocation75_spill] sm:$0xff]  ;;  %v5462_v26 = vld.sshfl [vmem:[#allocation1 + $0x8] sm:$0xff pattern:$0x73625140] }
 0x548   : > { %v4346_v42 = vpop.f32.mrf.mxu2 }
 0x549   : > { %v4365_v54 = vpop.f32.mrf.mxu3  ;;  %v11078_v63 = vadd.f32 %v4346_v42, %v13250_v55  ;;  %v5460_v42 = vld.sshfl [vmem:[#allocation1] sm:$0xff pattern:$0x73625140] }
 0x54a   : > { %v11081_v51 = vadd.f32 %v4365_v54, %v13252_v45  ;;  %v4311_v0 = vpop.f32.mrf.mxu0  ;;  %v4332_v44 = vpop.f32.mrf.mxu1  ;;  %5510 = vrot.lane.b32.xlu2 %v5450_v4, %s8233_s5  ;;  %5516 = vrot.lane.b32.xlu1 %v5460_v42, %s8233_s5 }
 0x54b   : > { %13251 = vst [vmem:[#allocation27_spill] sm:$0xff] %v11078_v63  ;;  %v11084_v18 = vadd.f32 %v4311_v0, %v13254_v7  ;;  %v11087_v14 = vadd.f32 %v4332_v44, %v13256_v32  ;;  %v4743_v54 = vpop.permute.xlu1 %4742  ;;  %v13258_v0 = vld [vmem:[#allocation73_spill] sm:$0xff] }
 0x54c   : > { %13253 = vst [vmem:[#allocation101_spill] sm:$0xff] %v11081_v51  ;;  %8009 = vmatmul.msk.bf16.gmra.mxu0 %vm365_vm3, %v10978_v58  ;;  %v4776_v55 = vsel %vm4758_vm8, %v4743_v54, %v4745_v11  ;;  %v4775_v42 = vsel %vm4758_vm8, %v4741_v1, %v4743_v54  ;;  %v13261_v1 = vld [vmem:[#allocation2_spill] sm:$0xff] }
 0x54d   : > { %13255 = vst [vmem:[#allocation28_spill] sm:$0xff] %v11084_v18  ;;  %8013 = vmatmul.msk.bf16.gmra.mxu2 %vm365_vm3, %v10978_v58  ;;  %v13259_v18 = vld [vmem:[#allocation74_spill] sm:$0xff]  ;;  %v4841_v4 = vand.u32 %v4776_v55, %v8328_v37 }
 0x54e   : > { %13257 = vst [vmem:[#allocation102_spill] sm:$0xff] %v11087_v14  ;;  %8015 = vmatmul.msk.bf16.gmra.mxu3 %vm365_vm3, %v10978_v58 }
 0x54f   : > { %5518 = vrot.lane.b32.xlu0 %v5462_v26, %s8233_s5  ;;  %v4838_v26 = vand.u32 %v4775_v42, %v8328_v37 }
 0x550   : > { %v4349_v32 = vpop.f32.mrf.mxu2 }
 0x551   : > { %v4368_v44 = vpop.f32.mrf.mxu3  ;;  %v11100_v45 = vadd.f32 %v4349_v32, %v10604_v43  ;;  %v4747_v43 = vpop.permute.xlu2 %4746 }
 0x552   : > { %v11103_v7 = vadd.f32 %v4368_v44, %v13258_v0  ;;  %v4313_v14 = vpop.f32.mrf.mxu0  ;;  %v4401_v63 = vpop.f32.mrf.mxu1  ;;  %v4777_v32 = vsel %vm4758_vm8, %v4745_v11, %v4747_v43 }
 0x553   : > { %v11106_v51 = vadd.f32 %v4313_v14, %v13259_v18  ;;  %v11110_v17 = vadd.f32 %v4401_v63, %v13260_v46 }
 0x555   : > { %8018 = vmatmul.msk.bf16.vlgmr.msra.gmra.mxu1 %vm365_vm3, %v10933_v31 }
 0x556   : > { %5191 = vmatpush.bf16.msra.mxu1 %v4841_v4  ;;  %v4844_v4 = vand.u32 %v4777_v32, %v8328_v37 }
 0x558   : > { %v4351_v18 = vpop.f32.mrf.mxu2 }
 0x559   : > { %v4370_v14 = vpop.f32.mrf.mxu3  ;;  %v11118_v44 = vadd.f32 %v4351_v18, %v10622_v39  ;;  %v5466_v39 = vld.sshfl [vmem:[#allocation1 + $0x18] sm:$0xff pattern:$0x73625140] }
 0x55a   : > { %v11121_v63 = vadd.f32 %v4370_v14, %v10625_v27  ;;  %v4382_v55 = vpop.f32.mrf.mxu0  ;;  %v4403_v46 = vpop.f32.mrf.mxu1  ;;  %5477 = vst [vmem:[#allocation1] ss:$4 sm:$0xff] %v10739_v59  ;;  %5522 = vrot.lane.b32.xlu1 %v5466_v39, %s8233_s5  ;;  %v5472_v59 = vld.sshfl [vmem:[#allocation1 + $0x30] sm:$0xff pattern:$0x73625140]  ;;  %v13264_v39 = vld [vmem:[#allocation76_spill] sm:$0xff] }
 0x55b   : > { %v11124_v0 = vadd.f32 %v4382_v55, %v10628_v62  ;;  %v11129_v54 = vadd.f32 %v4403_v46, %v13261_v1  ;;  %v4753_v46 = vpop.permute.xlu2 %4752 }
 0x55c   : > { %8016 = vmatmul.msk.bf16.vlgmr.msra.gmra.mxu0 %vm365_vm3, %v10933_v31 }
 0x55d   : > { %8020 = vmatmul.msk.bf16.vlgmr.msra.gmra.mxu2 %vm365_vm3, %v10933_v31  ;;  %5172 = vmatpush.bf16.msra.mxu0 %v4838_v26 }
 0x55e   : > { %8022 = vmatmul.msk.bf16.vlgmr.msra.gmra.mxu3 %vm365_vm3, %v10933_v31  ;;  %5210 = vmatpush.bf16.msra.mxu2 %v4844_v4  ;;  %v4749_v26 = vpop.permute.xlu0 %4748 }
 0x560   : > { %v4420_v62 = vpop.f32.mrf.mxu2 }
 0x561   : > { %v4439_v27 = vpop.f32.mrf.mxu3  ;;  %v11140_v11 = vadd.f32 %v4420_v62, %v10646_v35  ;;  %v4778_v35 = vsel %vm4758_vm8, %v4747_v43, %v4749_v26 }
 0x562   : > { %v11143_v42 = vadd.f32 %v4439_v27, %v10649_v8  ;;  %v4384_v32 = vpop.f32.mrf.mxu0  ;;  %v4406_v14 = vpop.f32.mrf.mxu1  ;;  %5528 = vrot.lane.b32.xlu1 %v5472_v59, %s8233_s5  ;;  %v4847_v1 = vand.u32 %v4778_v35, %v8328_v37  ;;  %v13266_v27 = vld [vmem:[#allocation3_spill] sm:$0xff] }
 0x563   : > { %v11146_v18 = vadd.f32 %v4384_v32, %v10652_v13  ;;  %v11149_v55 = vadd.f32 %v4406_v14, %v10655_v28  ;;  %v4751_v59 = vpop.permute.xlu2 %4750 }
 0x564   : > { %5229 = vmatpush.bf16.msra.mxu3 %v4847_v1  ;;  %v4780_v35 = vsel %vm4758_vm8, %v4751_v59, %v4753_v46  ;;  %v13270_v1 = vld [vmem:[#allocation4_spill] sm:$0xff] }
 0x565   : > { %13262 = vst [vmem:[#allocation103_spill] sm:$0xff] %v11149_v55  ;;  %8019 = vmatmul.msk.bf16.gmra.mxu1 %vm365_vm3, %v10978_v58  ;;  %v13268_v55 = vld [vmem:[#allocation77_spill] sm:$0xff] }
 0x568   : > { %v4422_v8 = vpop.f32.mrf.mxu2 }
 0x569   : > { %v4441_v4 = vpop.f32.mrf.mxu3  ;;  %v11157_v13 = vadd.f32 %v4422_v8, %v10665_v21  ;;  %v5470_v21 = vld.sshfl [vmem:[#allocation1 + $0x28] sm:$0xff pattern:$0x73625140] }
 0x56a   : > { %v11160_v28 = vadd.f32 %v4441_v4, %v13264_v39  ;;  %v4387_v62 = vpop.f32.mrf.mxu0  ;;  %v4408_v14 = vpop.f32.mrf.mxu1  ;;  %5526 = vrot.lane.b32.xlu1 %v5470_v21, %s8233_s5 }
 0x56b   : > { %13263 = vst [vmem:[#allocation30_spill] sm:$0xff] %v11157_v13  ;;  %v11163_v32 = vadd.f32 %v4387_v62, %v13266_v27  ;;  %v11166_v43 = vadd.f32 %v4408_v14, %v13268_v55  ;;  %v13271_v27 = vld [vmem:[#allocation78_spill] sm:$0xff] }
 0x56c   : > { %13265 = vst [vmem:[#allocation104_spill] sm:$0xff] %v11160_v28  ;;  %8017 = vmatmul.msk.bf16.gmra.mxu0 %vm365_vm3, %v10978_v58  ;;  %v13272_v28 = vld [vmem:[#allocation5_spill] sm:$0xff] }
 0x56d   : > { %13267 = vst [vmem:[#allocation31_spill] sm:$0xff] %v11163_v32  ;;  %8021 = vmatmul.msk.bf16.gmra.mxu2 %vm365_vm3, %v10978_v58  ;;  %v4853_v32 = vand.u32 %v4780_v35, %v8328_v37  ;;  %v4755_v21 = vpop.permute.xlu0 %4754 }
 0x56e   : > { %13269 = vst [vmem:[#allocation105_spill] sm:$0xff] %v11166_v43  ;;  %8023 = vmatmul.msk.bf16.gmra.mxu3 %vm365_vm3, %v10978_v58 }
 0x570   : > { %v4425_v8 = vpop.f32.mrf.mxu2 }
 0x571   : > { %v4444_v4 = vpop.f32.mrf.mxu3  ;;  %v11177_v55 = vadd.f32 %v4425_v8, %v10686_v23  ;;  %v4779_v23 = vsel %vm4758_vm8, %v4749_v26, %v4751_v59  ;;  %v4781_v8 = vsel %vm4758_vm8, %v4753_v46, %v4755_v21 }
 0x572   : > { %v11180_v39 = vadd.f32 %v4444_v4, %v13270_v1  ;;  %v4389_v62 = vpop.f32.mrf.mxu0  ;;  %v4477_v43 = vpop.f32.mrf.mxu1 }
 0x573   : > { %v11183_v14 = vadd.f32 %v4389_v62, %v13271_v27  ;;  %v11187_v13 = vadd.f32 %v4477_v43, %v13272_v28 }
 0x575   : > { %13273 = vst [vmem:[#allocation32_spill] sm:$0xff] %v11187_v13  ;;  %8026 = vmatmul.msk.bf16.vlgmr.msrb.gmra.mxu1 %vm365_vm3, %v10933_v31  ;;  %v4850_v13 = vand.u32 %v4779_v23, %v8328_v37 }
 0x576   : > { %5267 = vmatpush.bf16.msrb.mxu1 %v4853_v32  ;;  %v4856_v32 = vand.u32 %v4781_v8, %v8328_v37 }
 0x578   : > { %v4427_v4 = vpop.f32.mrf.mxu2 }
 0x579   : > { %v4446_v1 = vpop.f32.mrf.mxu3  ;;  %v11194_v62 = vadd.f32 %v4427_v4, %v10704_v36  ;;  %v5468_v4 = vld.sshfl [vmem:[#allocation1 + $0x20] sm:$0xff pattern:$0x73625140] }
 0x57a   : > { %v11197_v27 = vadd.f32 %v4446_v1, %v10707_v57  ;;  %v4458_v35 = vpop.f32.mrf.mxu0  ;;  %v4479_v43 = vpop.f32.mrf.mxu1  ;;  %5524 = vrot.lane.b32.xlu2 %v5468_v4, %s8233_s5  ;;  %v13274_v4 = vld [vmem:[#allocation79_spill] sm:$0xff] }
 0x57b   : > { %v11200_v28 = vadd.f32 %v4458_v35, %v10710_v9  ;;  %v11205_v26 = vadd.f32 %v4479_v43, %v10715_v29 }
 0x57c   : > { %8024 = vmatmul.msk.bf16.vlgmr.msrb.gmra.mxu0 %vm365_vm3, %v10933_v31 }
 0x57d   : > { %8028 = vmatmul.msk.bf16.vlgmr.msrb.gmra.mxu2 %vm365_vm3, %v10933_v31  ;;  %5248 = vmatpush.bf16.msrb.mxu0 %v4850_v13 }
 0x57e   : > { %8030 = vmatmul.msk.bf16.vlgmr.msrb.gmra.mxu3 %vm365_vm3, %v10933_v31  ;;  %5286 = vmatpush.bf16.msrb.mxu2 %v4856_v32 }
 0x580   : > { %v4496_v9 = vpop.f32.mrf.mxu2 }
 0x581   : > { %v4515_v36 = vpop.f32.mrf.mxu3  ;;  %v11214_v57 = vadd.f32 %v4496_v9, %v10725_v60 }
 0x582   : > { %v11217_v46 = vadd.f32 %v4515_v36, %v10728_v61  ;;  %v4460_v29 = vpop.f32.mrf.mxu0  ;;  %v4482_v23 = vpop.f32.mrf.mxu1 }
 0x583   : > { %v11220_v59 = vadd.f32 %v4460_v29, %v10731_v15  ;;  %v11223_v8 = vadd.f32 %v4482_v23, %v10734_v50 }
 0x584   : > { %v4757_v13 = vpop.permute.xlu1 %4756 }
 0x585   : > { %8027 = vmatmul.msk.bf16.gmra.mxu1 %vm365_vm3, %v10978_v58  ;;  %v4782_v60 = vsel %vm4758_vm8, %v4755_v21, %v4757_v13  ;;  %v5480_v21 = vld.sshfl [vmem:[#allocation1] sm:$0xff pattern:$0x73625140] }
 0x586   : > { %v4859_v35 = vand.u32 %v4782_v60, %v8328_v37  ;;  %5532 = vrot.lane.b32.xlu0 %v5480_v21, %s8233_s5 }
 0x588   : > { %v4498_v1 = vpop.f32.mrf.mxu2  ;;  %5305 = vmatpush.bf16.msrb.mxu3 %v4859_v35  ;;  %v5474_v35 = vld.sshfl [vmem:[#allocation1 + $0x38] sm:$0xff pattern:$0x73625140] }
 0x589   : > { %v4517_v61 = vpop.f32.mrf.mxu3  ;;  %v11231_v15 = vadd.f32 %v4498_v1, %v10745_v30  ;;  %v13275_v1 = vld [vmem:[#allocation6_spill] sm:$0xff]  ;;  %5530 = vrot.lane.b32.xlu2 %v5474_v35, %s8233_s5  ;;  %5479 = vst [vmem:[#allocation1 + $0x20] ss:$4 sm:$0xff] %v10835_v10 }
 0x58a   : > { %v11234_v43 = vadd.f32 %v4517_v61, %v10748_v41  ;;  %v4463_v50 = vpop.f32.mrf.mxu0  ;;  %v4484_v9 = vpop.f32.mrf.mxu1 }
 0x58b   : > { %v11237_v32 = vadd.f32 %v4463_v50, %v10751_v22  ;;  %v11240_v36 = vadd.f32 %v4484_v9, %v10754_v19 }
 0x58c   : > { %8025 = vmatmul.msk.bf16.gmra.mxu0 %vm365_vm3, %v10978_v58 }
 0x58d   : > { %8029 = vmatmul.msk.bf16.gmra.mxu2 %vm365_vm3, %v10978_v58 }
 0x58e   : > { %8031 = vmatmul.msk.bf16.gmra.mxu3 %vm365_vm3, %v10978_v58 }
 0x590   : > { %v4501_v41 = vpop.f32.mrf.mxu2 }
 0x591   : > { %v5507_v30 = vpop.permute.xlu1 %5506  ;;  %v4520_v22 = vpop.f32.mrf.mxu3  ;;  %v11250_v29 = vadd.f32 %v4501_v41, %v10764_v24 }
 0x592   : > { %v11253_v19 = vadd.f32 %v4520_v22, %v10767_v25  ;;  %v4465_v23 = vpop.f32.mrf.mxu0  ;;  %v4889_v60 = vpop.f32.mrf.mxu1 }
 0x593   : > { %v11256_v13 = vadd.f32 %v4465_v23, %v13274_v4  ;;  %v11259_v61 = vadd.f32 %v4889_v60, %v13275_v1 }
 0x594   : > { %v5505_v24 = vpop.permute.xlu0 %5504  ;;  %v11274_v1 = vpop.permute.xlu2 %5508 }
 0x595   : > { %13276 = vst [vmem:[#allocation106_spill] sm:$0xff] %v11259_v61  ;;  %8034 = vmatmul.msk.bf16.vlgmr.msra.gmra.mxu1 %vm365_vm3, %v10933_v31  ;;  %v5553_v25 = vsel %vm5550_vm9, %v5505_v24, %v5507_v30 }
 0x596   : > { %v5588_v61 = vand.u32 %v5553_v25, %v8328_v37 }
 0x598   : > { %v4503_v21 = vpop.f32.mrf.mxu2 }
 0x599   : > { %v5503_v50 = vpop.permute.xlu1 %5502  ;;  %v4522_v41 = vpop.f32.mrf.mxu3  ;;  %v11269_v23 = vadd.f32 %v4503_v21, %v10784_v33 }
 0x59a   : > { %v5552_v9 = vsel %vm5550_vm9, %v5503_v50, %v5505_v24  ;;  %v11272_v4 = vadd.f32 %v4522_v41, %v10787_v49  ;;  %v4870_v60 = vpop.f32.mrf.mxu0  ;;  %v4891_v10 = vpop.f32.mrf.mxu1  ;;  %v5554_v24 = vsel %vm5550_vm9, %v5507_v30, %v11274_v1  ;;  %v5484_v49 = vld.sshfl [vmem:[#allocation1 + $0x10] sm:$0xff pattern:$0x73625140] }
 0x59b   : > { %v5585_v22 = vand.u32 %v5552_v9, %v8328_v37  ;;  %v11277_v35 = vadd.f32 %v4870_v60, %v10790_v53  ;;  %v11283_v9 = vadd.f32 %v4891_v10, %v10795_v56  ;;  %v5591_v33 = vand.u32 %v5554_v24, %v8328_v37  ;;  %v5486_v53 = vld.sshfl [vmem:[#allocation1 + $0x18] sm:$0xff pattern:$0x73625140]  ;;  %5536 = vrot.lane.b32.xlu2 %v5484_v49, %s8233_s5 }
 0x59c   : > { %8032 = vmatmul.msk.bf16.vlgmr.msra.gmra.mxu0 %vm365_vm3, %v10933_v31  ;;  %v5501_v30 = vpop.permute.xlu0 %5500  ;;  %5538 = vrot.lane.b32.xlu0 %v5486_v53, %s8233_s5  ;;  %v5513_v49 = vpop.permute.xlu2 %5512  ;;  %v5482_v53 = vld.sshfl [vmem:[#allocation1 + $0x8] sm:$0xff pattern:$0x73625140] }
 0x59d   : > { %5679 = vmatpush.bf16.msra.mxu1 %v5585_v22  ;;  %8036 = vmatmul.msk.bf16.vlgmr.msra.gmra.mxu2 %vm365_vm3, %v10933_v31  ;;  %v5551_v25 = vsel %vm5550_vm9, %v5501_v30, %v5503_v50  ;;  %v13279_v50 = vld [vmem:[#allocation80_spill] sm:$0xff]  ;;  %v5492_v30 = vld.sshfl [vmem:[#allocation1 + $0x30] sm:$0xff pattern:$0x73625140] }
 0x59e   : > { %8038 = vmatmul.msk.bf16.vlgmr.msra.gmra.mxu3 %vm365_vm3, %v10933_v31  ;;  %5698 = vmatpush.bf16.msra.mxu2 %v5588_v61  ;;  %v5582_v41 = vand.u32 %v5551_v25, %v8328_v37  ;;  %v13281_v25 = vld [vmem:[#allocation7_spill] sm:$0xff] }
 0x59f   : > { %5717 = vmatpush.bf16.msra.mxu3 %v5591_v33 }
 0x5a0   : > { %v4908_v56 = vpop.f32.mrf.mxu2  ;;  %5660 = vmatpush.bf16.msra.mxu0 %v5582_v41 }
 0x5a1   : > { %v4927_v21 = vpop.f32.mrf.mxu3  ;;  %v11297_v22 = vadd.f32 %v4908_v56, %v10808_v47  ;;  %v13282_v56 = vld [vmem:[#allocation81_spill] sm:$0xff] }
 0x5a2   : > { %v11300_v60 = vadd.f32 %v4927_v21, %v10811_v48  ;;  %v4872_v10 = vpop.f32.mrf.mxu0  ;;  %v4894_v24 = vpop.f32.mrf.mxu1 }
 0x5a3   : > { %v11303_v61 = vadd.f32 %v4872_v10, %v10814_v12  ;;  %v11306_v33 = vadd.f32 %v4894_v24, %v13279_v50  ;;  %5534 = vrot.lane.b32.xlu2 %v5482_v53, %s8233_s5  ;;  %v13284_v10 = vld [vmem:[#allocation8_spill] sm:$0xff]  ;;  %v5490_v53 = vld.sshfl [vmem:[#allocation1 + $0x28] sm:$0xff pattern:$0x73625140] }
 0x5a4   : > { %13277 = vst [vmem:[#allocation33_spill] sm:$0xff] %v11300_v60  ;;  %5544 = vrot.lane.b32.xlu0 %v5492_v30, %s8233_s5  ;;  %v5488_v60 = vld.sshfl [vmem:[#allocation1 + $0x20] sm:$0xff pattern:$0x73625140]  ;;  %v5511_v30 = vpop.permute.xlu2 %5510 }
 0x5a5   : > { %13278 = vst [vmem:[#allocation107_spill] sm:$0xff] %v11303_v61  ;;  %8035 = vmatmul.msk.bf16.gmra.mxu1 %vm365_vm3, %v10978_v58  ;;  %5540 = vrot.lane.b32.xlu1 %v5488_v60, %s8233_s5 }
 0x5a6   : > { %13280 = vst [vmem:[#allocation34_spill] sm:$0xff] %v11306_v33  ;;  %v13286_v33 = vld [vmem:[#allocation82_spill] sm:$0xff] }
 0x5a8   : > { %v4910_v47 = vpop.f32.mrf.mxu2 }
 0x5a9   : > { %v4929_v48 = vpop.f32.mrf.mxu3  ;;  %v11313_v12 = vadd.f32 %v4910_v47, %v13281_v25  ;;  %v5556_v47 = vsel %vm5550_vm9, %v5511_v30, %v5513_v49 }
 0x5aa   : > { %v11316_v21 = vadd.f32 %v4929_v48, %v13282_v56  ;;  %v4875_v41 = vpop.f32.mrf.mxu0  ;;  %v4896_v50 = vpop.f32.mrf.mxu1 }
 0x5ab   : > { %v11319_v24 = vadd.f32 %v4875_v41, %v13284_v10  ;;  %v11322_v61 = vadd.f32 %v4896_v50, %v13286_v33  ;;  %v13290_v41 = vld [vmem:[#allocation9_spill] sm:$0xff] }
 0x5ac   : > { %13283 = vst [vmem:[#allocation108_spill] sm:$0xff] %v11316_v21  ;;  %8033 = vmatmul.msk.bf16.gmra.mxu0 %vm365_vm3, %v10978_v58  ;;  %5542 = vrot.lane.b32.xlu0 %v5490_v53, %s8233_s5 }
 0x5ad   : > { %13285 = vst [vmem:[#allocation35_spill] sm:$0xff] %v11319_v24  ;;  %8037 = vmatmul.msk.bf16.gmra.mxu2 %vm365_vm3, %v10978_v58  ;;  %v13292_v24 = vld [vmem:[#allocation83_spill] sm:$0xff]  ;;  %v5515_v53 = vpop.permute.xlu0 %5514 }
 0x5ae   : > { %13287 = vst [vmem:[#allocation29_spill] sm:$0xff] %v11322_v61  ;;  %8039 = vmatmul.msk.bf16.gmra.mxu3 %vm365_vm3, %v10978_v58  ;;  %v5597_v61 = vand.u32 %v5556_v47, %v8328_v37 }
 0x5b0   : > { %v4913_v33 = vpop.f32.mrf.mxu2 }
 0x5b1   : > { %v4932_v48 = vpop.f32.mrf.mxu3  ;;  %v11334_v25 = vadd.f32 %v4913_v33, %v10846_v20  ;;  %v5555_v20 = vsel %vm5550_vm9, %v11274_v1, %v5511_v30  ;;  %v13299_v1 = vld [vmem:[#allocation85_spill] sm:$0xff] }
 0x5b2   : > { %v11337_v56 = vadd.f32 %v4932_v48, %v10849_v40  ;;  %v4877_v60 = vpop.f32.mrf.mxu0  ;;  %v4965_v50 = vpop.f32.mrf.mxu1  ;;  %v5557_v40 = vsel %vm5550_vm9, %v5513_v49, %v5515_v53 }
 0x5b3   : > { %13288 = vst [vmem:[#allocation109_spill] sm:$0xff] %v11334_v25  ;;  %v11340_v10 = vadd.f32 %v4877_v60, %v13290_v41  ;;  %v11344_v21 = vadd.f32 %v4965_v50, %v13292_v24  ;;  %v13294_v60 = vld [vmem:[#allocation10_spill] sm:$0xff]  ;;  %v13297_v50 = vld [vmem:[#allocation11_spill] sm:$0xff]  ;;  %v5600_v25 = vand.u32 %v5557_v40, %v8328_v37 }
 0x5b4   : > { %13289 = vst [vmem:[#allocation36_spill] sm:$0xff] %v11337_v56  ;;  %v13302_v40 = vld [vmem:[#allocation86_spill] sm:$0xff] }
 0x5b5   : > { %13291 = vst [vmem:[#allocation110_spill] sm:$0xff] %v11340_v10  ;;  %8042 = vmatmul.msk.bf16.vlgmr.msrb.gmra.mxu1 %vm365_vm3, %v10933_v31  ;;  %v13295_v10 = vld [vmem:[#allocation84_spill] sm:$0xff] }
 0x5b6   : > { %13293 = vst [vmem:[#allocation37_spill] sm:$0xff] %v11344_v21  ;;  %5755 = vmatpush.bf16.msrb.mxu1 %v5597_v61  ;;  %v5594_v61 = vand.u32 %v5555_v20, %v8328_v37 }
 0x5b8   : > { %v4915_v33 = vpop.f32.mrf.mxu2 }
 0x5b9   : > { %v4934_v48 = vpop.f32.mrf.mxu3  ;;  %v11352_v41 = vadd.f32 %v4915_v33, %v13294_v60  ;;  %v13301_v33 = vld [vmem:[#allocation12_spill] sm:$0xff]  ;;  %v13304_v60 = vld [vmem:[#allocation13_spill] sm:$0xff] }
 0x5ba   : > { %v11355_v47 = vadd.f32 %v4934_v48, %v13295_v10  ;;  %v4946_v24 = vpop.f32.mrf.mxu0  ;;  %v4967_v56 = vpop.f32.mrf.mxu1 }
 0x5bb   : > { %v11358_v21 = vadd.f32 %v4946_v24, %v13297_v50  ;;  %v11363_v30 = vadd.f32 %v4967_v56, %v13299_v1 }
 0x5bc   : > { %13296 = vst [vmem:[#allocation38_spill] sm:$0xff] %v11355_v47  ;;  %8040 = vmatmul.msk.bf16.vlgmr.msrb.gmra.mxu0 %vm365_vm3, %v10933_v31  ;;  %v5517_v1 = vpop.permute.xlu1 %5516 }
 0x5bd   : > { %13298 = vst [vmem:[#allocation112_spill] sm:$0xff] %v11358_v21  ;;  %8044 = vmatmul.msk.bf16.vlgmr.msrb.gmra.mxu2 %vm365_vm3, %v10933_v31  ;;  %5736 = vmatpush.bf16.msrb.mxu0 %v5594_v61  ;;  %v5521_v61 = vpop.permute.xlu0 %5520 }
 0x5be   : > { %13300 = vst [vmem:[#allocation39_spill] sm:$0xff] %v11363_v30  ;;  %8046 = vmatmul.msk.bf16.vlgmr.msrb.gmra.mxu3 %vm365_vm3, %v10933_v31  ;;  %5774 = vmatpush.bf16.msrb.mxu2 %v5600_v25  ;;  %v13306_v30 = vld [vmem:[#allocation87_spill] sm:$0xff]  ;;  %v5558_v31 = vsel %vm5550_vm9, %v5515_v53, %v5517_v1  ;;  %v5494_v25 = vld.sshfl [vmem:[#allocation1 + $0x38] sm:$0xff pattern:$0x73625140] }
 0x5bf   : > { %v5603_v47 = vand.u32 %v5558_v31, %v8328_v37  ;;  %5546 = vrot.lane.b32.xlu1 %v5494_v25, %s8233_s5  ;;  %6231 = vst [vmem:[#allocation1 + $0x20] ss:$4 sm:$0xff] %v11028_v52  ;;  %v13314_v25 = vld [vmem:[#allocation89_spill] sm:$0xff] }
 0x5c0   : > { %v4984_v49 = vpop.f32.mrf.mxu2 }
 0x5c1   : > { %v5003_v10 = vpop.f32.mrf.mxu3  ;;  %v11372_v20 = vadd.f32 %v4984_v49, %v13301_v33  ;;  %5793 = vmatpush.bf16.msrb.mxu3 %v5603_v47  ;;  %v13308_v33 = vld [vmem:[#allocation14_spill] sm:$0xff] }
 0x5c2   : > { %v11375_v48 = vadd.f32 %v5003_v10, %v13302_v40  ;;  %v4948_v56 = vpop.f32.mrf.mxu0  ;;  %v4970_v50 = vpop.f32.mrf.mxu1 }
 0x5c3   : > { %v11378_v24 = vadd.f32 %v4948_v56, %v13304_v60  ;;  %v11381_v21 = vadd.f32 %v4970_v50, %v13306_v30  ;;  %v13310_v30 = vld [vmem:[#allocation88_spill] sm:$0xff]  ;;  %v13312_v60 = vld [vmem:[#allocation15_spill] sm:$0xff] }
 0x5c4   : > { %13303 = vst [vmem:[#allocation113_spill] sm:$0xff] %v11375_v48 }
 0x5c5   : > { %13305 = vst [vmem:[#allocation40_spill] sm:$0xff] %v11378_v24  ;;  %8043 = vmatmul.msk.bf16.gmra.mxu1 %vm365_vm3, %v10978_v58  ;;  %v5519_v52 = vpop.permute.xlu0 %5518 }
 0x5c6   : > { %13307 = vst [vmem:[#allocation114_spill] sm:$0xff] %v11381_v21  ;;  %v5560_v47 = vsel %vm5550_vm9, %v5519_v52, %v5521_v61 }
 0x5c8   : > { %v4986_v49 = vpop.f32.mrf.mxu2 }
 0x5c9   : > { %v5005_v10 = vpop.f32.mrf.mxu3  ;;  %v11390_v40 = vadd.f32 %v4986_v49, %v13308_v33  ;;  %v13316_v33 = vld [vmem:[#allocation16_spill] sm:$0xff] }
 0x5ca   : > { %v11393_v56 = vadd.f32 %v5005_v10, %v13310_v30  ;;  %v4951_v53 = vpop.f32.mrf.mxu0  ;;  %v4972_v31 = vpop.f32.mrf.mxu1 }
 0x5cb   : > { %13309 = vst [vmem:[#allocation41_spill] sm:$0xff] %v11390_v40  ;;  %v11396_v50 = vadd.f32 %v4951_v53, %v13312_v60  ;;  %v11399_v21 = vadd.f32 %v4972_v31, %v13314_v25  ;;  %v13318_v53 = vld [vmem:[#allocation90_spill] sm:$0xff]  ;;  %v11417_v25 = vld [vmem:[%s12629_s1 + $0x70] sm:$0xff] }
 0x5cc   : > { %13311 = vst [vmem:[#allocation115_spill] sm:$0xff] %v11393_v56  ;;  %8041 = vmatmul.msk.bf16.gmra.mxu0 %vm365_vm3, %v10978_v58  ;;  %v5609_v56 = vand.u32 %v5560_v47, %v8328_v37  ;;  %v13322_v40 = vld [vmem:[#allocation91_spill] sm:$0xff] }
 0x5cd   : > { %13313 = vst [vmem:[#allocation42_spill] sm:$0xff] %v11396_v50  ;;  %8045 = vmatmul.msk.bf16.gmra.mxu2 %vm365_vm3, %v10978_v58 }
 0x5ce   : > { %13315 = vst [vmem:[#allocation43_spill] sm:$0xff] %v11399_v21  ;;  %8047 = vmatmul.msk.bf16.gmra.mxu3 %vm365_vm3, %v10978_v58  ;;  %v13320_v21 = vld [vmem:[#allocation17_spill] sm:$0xff] }
 0x5d0   : > { %v4989_v49 = vpop.f32.mrf.mxu2 }
 0x5d1   : > { %v5008_v10 = vpop.f32.mrf.mxu3  ;;  %v11409_v30 = vadd.f32 %v4989_v49, %v13316_v33  ;;  %v5523_v49 = vpop.permute.xlu1 %5522 }
 0x5d2   : > { %v11412_v60 = vadd.f32 %v5008_v10, %v13318_v53  ;;  %v4953_v31 = vpop.f32.mrf.mxu0  ;;  %v5041_v58 = vpop.f32.mrf.mxu1  ;;  %v5559_v10 = vsel %vm5550_vm9, %v5517_v1, %v5519_v52  ;;  %v5561_v33 = vsel %vm5550_vm9, %v5521_v61, %v5523_v49  ;;  %v13330_v1 = vld [vmem:[#allocation93_spill] sm:$0xff] }
 0x5d3   : > { %13317 = vst [vmem:[#allocation116_spill] sm:$0xff] %v11409_v30  ;;  %v11420_v50 = vadd.f32 %v4953_v31, %v13320_v21  ;;  %v11424_v24 = vadd.f32 %v5041_v58, %v13322_v40  ;;  %v13324_v30 = vld [vmem:[#allocation18_spill] sm:$0xff]  ;;  %v13326_v31 = vld [vmem:[#allocation92_spill] sm:$0xff]  ;;  %v13328_v40 = vld [vmem:[#allocation19_spill] sm:$0xff]  ;;  %v5606_v48 = vand.u32 %v5559_v10, %v8328_v37 }
 0x5d4   : > { %13319 = vst [vmem:[#allocation44_spill] sm:$0xff] %v11412_v60  ;;  %v6240_v61 = vld.sshfl [vmem:[#allocation1 + $0x20] sm:$0xff pattern:$0x73625140] }
 0x5d5   : > { %13321 = vst [vmem:[#allocation111_spill] sm:$0xff] %v11420_v50  ;;  %8062 = vmatmul.msk.bf16.vlgmr.msra.gmra.mxu1 %vm365_vm3, %v11417_v25  ;;  %6300 = vrot.lane.b32.xlu0 %v6240_v61, %s8234_s10 }
 0x5d6   : > { %13323 = vst [vmem:[#allocation117_spill] sm:$0xff] %v11424_v24  ;;  %5831 = vmatpush.bf16.msra.mxu1 %v5609_v56  ;;  %v5612_v56 = vand.u32 %v5561_v33, %v8328_v37 }
 0x5d8   : > { %v4991_v53 = vpop.f32.mrf.mxu2 }
 0x5d9   : > { %v5010_v60 = vpop.f32.mrf.mxu3  ;;  %v11431_v21 = vadd.f32 %v4991_v53, %v13324_v30  ;;  %v5525_v30 = vpop.permute.xlu2 %5524  ;;  %v13332_v53 = vld [vmem:[#allocation20_spill] sm:$0xff] }
 0x5da   : > { %v11434_v50 = vadd.f32 %v5010_v60, %v13326_v31  ;;  %v5022_v47 = vpop.f32.mrf.mxu0  ;;  %v5043_v24 = vpop.f32.mrf.mxu1  ;;  %v5562_v60 = vsel %vm5550_vm9, %v5523_v49, %v5525_v30  ;;  %v13336_v49 = vld [vmem:[#allocation21_spill] sm:$0xff] }
 0x5db   : > { %13325 = vst [vmem:[#allocation45_spill] sm:$0xff] %v11431_v21  ;;  %v11437_v58 = vadd.f32 %v5022_v47, %v13328_v40  ;;  %v11442_v52 = vadd.f32 %v5043_v24, %v13330_v1  ;;  %v5615_v33 = vand.u32 %v5562_v60, %v8328_v37  ;;  %v13334_v47 = vld [vmem:[#allocation94_spill] sm:$0xff] }
 0x5dc   : > { %13327 = vst [vmem:[#allocation118_spill] sm:$0xff] %v11434_v50  ;;  %8060 = vmatmul.msk.bf16.vlgmr.msra.gmra.mxu0 %vm365_vm3, %v11417_v25 }
 0x5dd   : > { %13329 = vst [vmem:[#allocation46_spill] sm:$0xff] %v11437_v58  ;;  %8064 = vmatmul.msk.bf16.vlgmr.msra.gmra.mxu2 %vm365_vm3, %v11417_v25  ;;  %5812 = vmatpush.bf16.msra.mxu0 %v5606_v48  ;;  %v11462_v48 = vld [vmem:[%s12629_s1 + $0x78] sm:$0xff] }
 0x5de   : > { %13331 = vst [vmem:[#allocation119_spill] sm:$0xff] %v11442_v52  ;;  %8066 = vmatmul.msk.bf16.vlgmr.msra.gmra.mxu3 %vm365_vm3, %v11417_v25  ;;  %5850 = vmatpush.bf16.msra.mxu2 %v5612_v56  ;;  %v13338_v52 = vld [vmem:[#allocation95_spill] sm:$0xff] }
 0x5df   : > { %5869 = vmatpush.bf16.msra.mxu3 %v5615_v33 }
 0x5e0   : > { %v5060_v24 = vpop.f32.mrf.mxu2 }
 0x5e1   : > { %v5079_v10 = vpop.f32.mrf.mxu3  ;;  %v11454_v31 = vadd.f32 %v5060_v24, %v13332_v53  ;;  %v5419_v24 = vld [vmem:[%s8276_s21 + $0x32] sm:$0x3]  ;;  %v5529_v53 = vpop.permute.xlu1 %5528 }
 0x5e2   : > { %v11457_v40 = vadd.f32 %v5079_v10, %v13334_v47  ;;  %v5024_v1 = vpop.f32.mrf.mxu0  ;;  %v5046_v61 = vpop.f32.mrf.mxu1  ;;  %5497 = vst [vmem:[#allocation1] ss:$4 sm:$0xff] %v5419_v24  ;;  %v6244_v10 = vld.sshfl [vmem:[#allocation1 + $0x30] sm:$0xff pattern:$0x73625140] }
 0x5e3   : > { %13333 = vst [vmem:[#allocation47_spill] sm:$0xff] %v11454_v31  ;;  %v11465_v56 = vadd.f32 %v5024_v1, %v13336_v49  ;;  %v11468_v60 = vadd.f32 %v5046_v61, %v13338_v52  ;;  %6304 = vrot.lane.b32.xlu0 %v6244_v10, %s8234_s10  ;;  %v13340_v31 = vld [vmem:[#allocation22_spill] sm:$0xff]  ;;  %v13341_v1 = vld [vmem:[#allocation96_spill] sm:$0xff]  ;;  %v13343_v61 = vld [vmem:[#allocation23_spill] sm:$0xff] }
 0x5e4   : > { %13335 = vst [vmem:[#allocation120_spill] sm:$0xff] %v11457_v40  ;;  %v6205_v52 = vld [vmem:[%s8276_s21 + $0x2] sm:$0xff] }
 0x5e5   : > { %13337 = vst [vmem:[#allocation48_spill] sm:$0xff] %v11465_v56  ;;  %8063 = vmatmul.msk.bf16.gmra.mxu1 %vm365_vm3, %v11462_v48  ;;  %v13345_v56 = vld [vmem:[#allocation97_spill] sm:$0xff] }
 0x5e6   : > { %13339 = vst [vmem:[#allocation121_spill] sm:$0xff] %v11468_v60 }
 0x5e8   : > { %v5062_v47 = vpop.f32.mrf.mxu2 }
 0x5e9   : > { %v5081_v40 = vpop.f32.mrf.mxu3  ;;  %v11475_v58 = vadd.f32 %v5062_v47, %v13340_v31  ;;  %v5498_v21 = vld.sshfl [vmem:[#allocation1] sm:$0xff pattern:$0x73625140]  ;;  %v6242_v31 = vld.sshfl [vmem:[#allocation1 + $0x28] sm:$0xff pattern:$0x73625140] }
 0x5ea   : > { %v11478_v49 = vadd.f32 %v5081_v40, %v13341_v1  ;;  %v5027_v33 = vpop.f32.mrf.mxu0  ;;  %v5048_v24 = vpop.f32.mrf.mxu1  ;;  %5548 = vrot.lane.b32.xlu2 %v5498_v21, %s8233_s5  ;;  %6228 = vst [vmem:[#allocation1] ss:$4 sm:$0xff] %v6205_v52 }
 0x5eb   : > { %v11482_v60 = vadd.f32 %v5027_v33, %v13343_v61  ;;  %v11485_v50 = vadd.f32 %v5048_v24, %v13345_v56  ;;  %v5527_v40 = vpop.permute.xlu1 %5526  ;;  %6302 = vrot.lane.b32.xlu0 %v6242_v31, %s8234_s10 }
 0x5ec   : > { %13342 = vst [vmem:[#allocation49_spill] sm:$0xff] %v11478_v49  ;;  %8061 = vmatmul.msk.bf16.gmra.mxu0 %vm365_vm3, %v11462_v48  ;;  %v5564_v10 = vsel %vm5550_vm9, %v5527_v40, %v5529_v53 }
 0x5ed   : > { %13344 = vst [vmem:[#allocation122_spill] sm:$0xff] %v11482_v60  ;;  %8065 = vmatmul.msk.bf16.gmra.mxu2 %vm365_vm3, %v11462_v48  ;;  %v5621_v24 = vand.u32 %v5564_v10, %v8328_v37 }
 0x5ee   : > { %13346 = vst [vmem:[#allocation50_spill] sm:$0xff] %v11485_v50  ;;  %8067 = vmatmul.msk.bf16.gmra.mxu3 %vm365_vm3, %v11462_v48  ;;  %v13347_v50 = vld [vmem:[#allocation24_spill] sm:$0xff] }
 0x5f0   : > { %v5065_v56 = vpop.f32.mrf.mxu2 }
 0x5f1   : > { %v5084_v47 = vpop.f32.mrf.mxu3  ;;  %v11497_v1 = vadd.f32 %v5065_v56, %v11013_v38  ;;  %v6236_v49 = vld.sshfl [vmem:[#allocation1 + $0x10] sm:$0xff pattern:$0x73625140]  ;;  %v6238_v31 = vld.sshfl [vmem:[#allocation1 + $0x18] sm:$0xff pattern:$0x73625140]  ;;  %v5531_v38 = vpop.permute.xlu2 %5530 }
 0x5f2   : > { %v11500_v21 = vadd.f32 %v5084_v47, %v11016_v16  ;;  %v5029_v33 = vpop.f32.mrf.mxu0  ;;  %v5117_v61 = vpop.f32.mrf.mxu1  ;;  %6296 = vrot.lane.b32.xlu1 %v6236_v49, %s8234_s10  ;;  %6298 = vrot.lane.b32.xlu2 %v6238_v31, %s8234_s10  ;;  %v5563_v16 = vsel %vm5550_vm9, %v5525_v30, %v5527_v40  ;;  %v6234_v40 = vld.sshfl [vmem:[#allocation1 + $0x8] sm:$0xff pattern:$0x73625140] }
 0x5f3   : > { %v11503_v52 = vadd.f32 %v5029_v33, %v11019_v2  ;;  %v11507_v60 = vadd.f32 %v5117_v61, %v13347_v50  ;;  %v5565_v2 = vsel %vm5550_vm9, %v5529_v53, %v5531_v38  ;;  %v6232_v33 = vld.sshfl [vmem:[#allocation1] sm:$0xff pattern:$0x73625140] }
 0x5f4   : > { %v5624_v30 = vand.u32 %v5565_v2, %v8328_v37 }
 0x5f5   : > { %8070 = vmatmul.msk.bf16.vlgmr.msrb.gmra.mxu1 %vm365_vm3, %v11417_v25 }
 0x5f6   : > { %5907 = vmatpush.bf16.msrb.mxu1 %v5621_v24  ;;  %v5618_v24 = vand.u32 %v5563_v16, %v8328_v37 }
 0x5f8   : > { %v5067_v56 = vpop.f32.mrf.mxu2 }
 0x5f9   : > { %v5086_v10 = vpop.f32.mrf.mxu3  ;;  %v11516_v50 = vadd.f32 %v5067_v56, %v11034_v5  ;;  %v13350_v5 = vld [vmem:[#allocation100_spill] sm:$0xff]  ;;  %v13351_v56 = vld [vmem:[#allocation98_spill] sm:$0xff] }
 0x5fa   : > { %v11519_v47 = vadd.f32 %v5086_v10, %v11037_v3  ;;  %v5098_v49 = vpop.f32.mrf.mxu0  ;;  %v5119_v31 = vpop.f32.mrf.mxu1  ;;  %6292 = vrot.lane.b32.xlu1 %v6232_v33, %s8234_s10  ;;  %6249 = vst [vmem:[#allocation1] ss:$4 sm:$0xff] %v13350_v5  ;;  %6294 = vrot.lane.b32.xlu2 %v6234_v40, %s8234_s10  ;;  %v6246_v5 = vld.sshfl [vmem:[#allocation1 + $0x38] sm:$0xff pattern:$0x73625140]  ;;  %v13356_v40 = vld [vmem:[#allocation26_spill] sm:$0xff] }
 0x5fb   : > { %v11522_v61 = vadd.f32 %v5098_v49, %v11040_v34  ;;  %v11527_v53 = vadd.f32 %v5119_v31, %v11044_v6  ;;  %v5533_v3 = vpop.permute.xlu0 %5532  ;;  %v13352_v49 = vld [vmem:[#allocation25_spill] sm:$0xff] }
 0x5fc   : > { %8068 = vmatmul.msk.bf16.vlgmr.msrb.gmra.mxu0 %vm365_vm3, %v11417_v25  ;;  %v5566_v34 = vsel %vm5550_vm9, %v5531_v38, %v5533_v3  ;;  %v5537_v38 = vpop.permute.xlu2 %5536 }
 0x5fd   : > { %13348 = vst [vmem:[#allocation123_spill] sm:$0xff] %v11522_v61  ;;  %8072 = vmatmul.msk.bf16.vlgmr.msrb.gmra.mxu2 %vm365_vm3, %v11417_v25  ;;  %5888 = vmatpush.bf16.msrb.mxu0 %v5618_v24  ;;  %v5627_v2 = vand.u32 %v5566_v34, %v8328_v37 }
 0x5fe   : > { %13349 = vst [vmem:[#allocation51_spill] sm:$0xff] %v11527_v53  ;;  %8074 = vmatmul.msk.bf16.vlgmr.msrb.gmra.mxu3 %vm365_vm3, %v11417_v25  ;;  %5926 = vmatpush.bf16.msrb.mxu2 %v5624_v30  ;;  %v13354_v53 = vld [vmem:[#allocation99_spill] sm:$0xff] }
 0x5ff   : > { %5945 = vmatpush.bf16.msrb.mxu3 %v5627_v2  ;;  %v13360_v2 = vld [vmem:[#allocation28_spill] sm:$0xff] }
 0x600   : > { %v5136_v6 = vpop.f32.mrf.mxu2 }
 0x601   : > { %v5155_v16 = vpop.f32.mrf.mxu3  ;;  %v11541_v10 = vadd.f32 %v5136_v6, %v13351_v56 }
 0x602   : > { %v11544_v33 = vadd.f32 %v5155_v16, %v13352_v49  ;;  %v5100_v31 = vpop.f32.mrf.mxu0  ;;  %v5122_v30 = vpop.f32.mrf.mxu1  ;;  %6306 = vrot.lane.b32.xlu1 %v6246_v5, %s8234_s10  ;;  %v13358_v16 = vld [vmem:[#allocation27_spill] sm:$0xff]  ;;  %v13359_v49 = vld [vmem:[#allocation101_spill] sm:$0xff] }
 0x603   : > { %v11547_v24 = vadd.f32 %v5100_v31, %v13354_v53  ;;  %v11550_v61 = vadd.f32 %v5122_v30, %v13356_v40  ;;  %v6256_v31 = vld.sshfl [vmem:[#allocation1 + $0x10] sm:$0xff pattern:$0x73625140]  ;;  %v13362_v40 = vld [vmem:[#allocation102_spill] sm:$0xff] }
 0x604   : > { %13353 = vst [vmem:[#allocation124_spill] sm:$0xff] %v11544_v33  ;;  %v5535_v5 = vpop.permute.xlu2 %5534 }
 0x605   : > { %13355 = vst [vmem:[#allocation52_spill] sm:$0xff] %v11547_v24  ;;  %8071 = vmatmul.msk.bf16.gmra.mxu1 %vm365_vm3, %v11462_v48 }
 0x606   : > { %13357 = vst [vmem:[#allocation125_spill] sm:$0xff] %v11550_v61 }
 0x608   : > { %v5138_v34 = vpop.f32.mrf.mxu2 }
 0x609   : > { %v5157_v6 = vpop.f32.mrf.mxu3  ;;  %v11556_v56 = vadd.f32 %v5138_v34, %v13358_v16  ;;  %v5568_v34 = vsel %vm5550_vm9, %v5535_v5, %v5537_v38 }
 0x60a   : > { %v11559_v33 = vadd.f32 %v5157_v6, %v13359_v49  ;;  %v5103_v53 = vpop.f32.mrf.mxu0  ;;  %v5124_v30 = vpop.f32.mrf.mxu1  ;;  %6312 = vrot.lane.b32.xlu1 %v6256_v31, %s8234_s10 }
 0x60b   : > { %v11562_v24 = vadd.f32 %v5103_v53, %v13360_v2  ;;  %v11565_v61 = vadd.f32 %v5124_v30, %v13362_v40  ;;  %v6254_v30 = vld.sshfl [vmem:[#allocation1 + $0x8] sm:$0xff pattern:$0x73625140] }
 0x60c   : > { %8069 = vmatmul.msk.bf16.gmra.mxu0 %vm365_vm3, %v11462_v48 }
 0x60d   : > { %13361 = vst [vmem:[#allocation53_spill] sm:$0xff] %v11562_v24  ;;  %8073 = vmatmul.msk.bf16.gmra.mxu2 %vm365_vm3, %v11462_v48 }
 0x60e   : > { %13363 = vst [vmem:[#allocation126_spill] sm:$0xff] %v11565_v61  ;;  %8075 = vmatmul.msk.bf16.gmra.mxu3 %vm365_vm3, %v11462_v48  ;;  %v5633_v61 = vand.u32 %v5568_v34, %v8328_v37 }
 0x610   : > { %v5141_v6 = vpop.f32.mrf.mxu2 }
 0x611   : > { %v5160_v16 = vpop.f32.mrf.mxu3  ;;  %v11576_v49 = vadd.f32 %v5141_v6, %v11100_v45  ;;  %v5539_v45 = vpop.permute.xlu0 %5538 }
 0x612   : > { %v11579_v53 = vadd.f32 %v5160_v16, %v11103_v7  ;;  %v5105_v2 = vpop.f32.mrf.mxu0  ;;  %v5193_v40 = vpop.f32.mrf.mxu1  ;;  %6310 = vrot.lane.b32.xlu1 %v6254_v30, %s8234_s10  ;;  %v5567_v7 = vsel %vm5550_vm9, %v5533_v3, %v5535_v5  ;;  %v5569_v6 = vsel %vm5550_vm9, %v5537_v38, %v5539_v45 }
 0x613   : > { %v11582_v31 = vadd.f32 %v5105_v2, %v11106_v51  ;;  %v11586_v24 = vadd.f32 %v5193_v40, %v11110_v17 }
 0x615   : > { %13364 = vst [vmem:[#allocation54_spill] sm:$0xff] %v11586_v24  ;;  %8078 = vmatmul.msk.bf16.vlgmr.msra.gmra.mxu1 %vm365_vm3, %v11417_v25  ;;  %v5630_v24 = vand.u32 %v5567_v7, %v8328_v37 }
 0x616   : > { %5983 = vmatpush.bf16.msra.mxu1 %v5633_v61  ;;  %v5636_v61 = vand.u32 %v5569_v6, %v8328_v37 }
 0x618   : > { %v5143_v16 = vpop.f32.mrf.mxu2 }
 0x619   : > { %v5162_v51 = vpop.f32.mrf.mxu3  ;;  %v11594_v2 = vadd.f32 %v5143_v16, %v11118_v44  ;;  %v5541_v44 = vpop.permute.xlu1 %5540 }
 0x61a   : > { %v11597_v34 = vadd.f32 %v5162_v51, %v11121_v63  ;;  %v5174_v17 = vpop.f32.mrf.mxu0  ;;  %v5195_v40 = vpop.f32.mrf.mxu1  ;;  %v5570_v63 = vsel %vm5550_vm9, %v5539_v45, %v5541_v44  ;;  %v13365_v51 = vld [vmem:[#allocation103_spill] sm:$0xff]  ;;  %v6252_v45 = vld.sshfl [vmem:[#allocation1] sm:$0xff pattern:$0x73625140] }
 0x61b   : > { %v11600_v30 = vadd.f32 %v5174_v17, %v11124_v0  ;;  %v11605_v3 = vadd.f32 %v5195_v40, %v11129_v54  ;;  %v5639_v5 = vand.u32 %v5570_v63, %v8328_v37  ;;  %v5545_v40 = vpop.permute.xlu0 %5544  ;;  %6308 = vrot.lane.b32.xlu2 %v6252_v45, %s8234_s10  ;;  %v6208_v45 = vld [vmem:[%s8276_s21 + $0x1a] sm:$0xff] }
 0x61c   : > { %8076 = vmatmul.msk.bf16.vlgmr.msra.gmra.mxu0 %vm365_vm3, %v11417_v25  ;;  %6251 = vst [vmem:[#allocation1 + $0x20] ss:$4 sm:$0xff] %v6208_v45 }
 0x61d   : > { %8080 = vmatmul.msk.bf16.vlgmr.msra.gmra.mxu2 %vm365_vm3, %v11417_v25  ;;  %5964 = vmatpush.bf16.msra.mxu0 %v5630_v24 }
 0x61e   : > { %8082 = vmatmul.msk.bf16.vlgmr.msra.gmra.mxu3 %vm365_vm3, %v11417_v25  ;;  %6002 = vmatpush.bf16.msra.mxu2 %v5636_v61  ;;  %v13367_v61 = vld [vmem:[#allocation30_spill] sm:$0xff] }
 0x61f   : > { %6021 = vmatpush.bf16.msra.mxu3 %v5639_v5  ;;  %v13371_v5 = vld [vmem:[#allocation31_spill] sm:$0xff] }
 0x620   : > { %v5212_v0 = vpop.f32.mrf.mxu2 }
 0x621   : > { %v5231_v38 = vpop.f32.mrf.mxu3  ;;  %v11616_v54 = vadd.f32 %v5212_v0, %v11140_v11 }
 0x622   : > { %v11619_v7 = vadd.f32 %v5231_v38, %v11143_v42  ;;  %v5176_v6 = vpop.f32.mrf.mxu0  ;;  %v5198_v24 = vpop.f32.mrf.mxu1 }
 0x623   : > { %v11622_v16 = vadd.f32 %v5176_v6, %v11146_v18  ;;  %v11625_v17 = vadd.f32 %v5198_v24, %v13365_v51  ;;  %v13369_v18 = vld [vmem:[#allocation104_spill] sm:$0xff]  ;;  %v13373_v51 = vld [vmem:[#allocation105_spill] sm:$0xff] }
 0x625   : > { %13366 = vst [vmem:[#allocation127_spill] sm:$0xff] %v11625_v17  ;;  %8079 = vmatmul.msk.bf16.gmra.mxu1 %vm365_vm3, %v11462_v48 }
 0x628   : > { %v5214_v11 = vpop.f32.mrf.mxu2 }
 0x629   : > { %v5233_v42 = vpop.f32.mrf.mxu3  ;;  %v11631_v63 = vadd.f32 %v5214_v11, %v13367_v61  ;;  %v5543_v11 = vpop.permute.xlu0 %5542 }
 0x62a   : > { %v11634_v0 = vadd.f32 %v5233_v42, %v13369_v18  ;;  %v5179_v38 = vpop.f32.mrf.mxu0  ;;  %v5200_v24 = vpop.f32.mrf.mxu1  ;;  %v5572_v42 = vsel %vm5550_vm9, %v5543_v11, %v5545_v40 }
 0x62b   : > { %13368 = vst [vmem:[#allocation55_spill] sm:$0xff] %v11631_v63  ;;  %v11637_v6 = vadd.f32 %v5179_v38, %v13371_v5  ;;  %v11640_v17 = vadd.f32 %v5200_v24, %v13373_v51  ;;  %v6260_v63 = vld.sshfl [vmem:[#allocation1 + $0x20] sm:$0xff pattern:$0x73625140] }
 0x62c   : > { %13370 = vst [vmem:[#allocation128_spill] sm:$0xff] %v11634_v0  ;;  %8077 = vmatmul.msk.bf16.gmra.mxu0 %vm365_vm3, %v11462_v48  ;;  %6316 = vrot.lane.b32.xlu0 %v6260_v63, %s8234_s10 }
 0x62d   : > { %13372 = vst [vmem:[#allocation56_spill] sm:$0xff] %v11637_v6  ;;  %8081 = vmatmul.msk.bf16.gmra.mxu2 %vm365_vm3, %v11462_v48  ;;  %v13375_v6 = vld [vmem:[#allocation32_spill] sm:$0xff] }
 0x62e   : > { %13374 = vst [vmem:[#allocation129_spill] sm:$0xff] %v11640_v17  ;;  %8083 = vmatmul.msk.bf16.gmra.mxu3 %vm365_vm3, %v11462_v48  ;;  %v5645_v17 = vand.u32 %v5572_v42, %v8328_v37 }
 0x630   : > { %v5217_v61 = vpop.f32.mrf.mxu2 }
 0x631   : > { %v5236_v18 = vpop.f32.mrf.mxu3  ;;  %v11651_v38 = vadd.f32 %v5217_v61, %v11177_v55  ;;  %v6258_v55 = vld.sshfl [vmem:[#allocation1 + $0x18] sm:$0xff pattern:$0x73625140]  ;;  %v5547_v61 = vpop.permute.xlu1 %5546 }
 0x632   : > { %v11654_v5 = vadd.f32 %v5236_v18, %v11180_v39  ;;  %v5181_v24 = vpop.f32.mrf.mxu0  ;;  %v5269_v45 = vpop.f32.mrf.mxu1  ;;  %6314 = vrot.lane.b32.xlu2 %v6258_v55, %s8234_s10  ;;  %v5571_v39 = vsel %vm5550_vm9, %v5541_v44, %v5543_v11 }
 0x633   : > { %v11657_v51 = vadd.f32 %v5181_v24, %v11183_v14  ;;  %v11661_v0 = vadd.f32 %v5269_v45, %v13375_v6  ;;  %v5573_v14 = vsel %vm5550_vm9, %v5545_v40, %v5547_v61  ;;  %v5642_v55 = vand.u32 %v5571_v39, %v8328_v37 }
 0x635   : > { %13376 = vst [vmem:[#allocation57_spill] sm:$0xff] %v11661_v0  ;;  %8086 = vmatmul.msk.bf16.vlgmr.msrb.gmra.mxu1 %vm365_vm3, %v11417_v25 }
 0x636   : > { %6059 = vmatpush.bf16.msrb.mxu1 %v5645_v17  ;;  %v5648_v17 = vand.u32 %v5573_v14, %v8328_v37 }
 0x638   : > { %v5219_v18 = vpop.f32.mrf.mxu2 }
 0x639   : > { %v5238_v42 = vpop.f32.mrf.mxu3  ;;  %v11670_v6 = vadd.f32 %v5219_v18, %v11194_v62  ;;  %v6266_v62 = vld.sshfl [vmem:[#allocation1 + $0x38] sm:$0xff pattern:$0x73625140] }
 0x63a   : > { %v11673_v24 = vadd.f32 %v5238_v42, %v11197_v27  ;;  %v5250_v63 = vpop.f32.mrf.mxu0  ;;  %v5271_v0 = vpop.f32.mrf.mxu1  ;;  %v6264_v27 = vld.sshfl [vmem:[#allocation1 + $0x30] sm:$0xff pattern:$0x73625140]  ;;  %6322 = vrot.lane.b32.xlu0 %v6266_v62, %s8234_s10  ;;  %v6262_v42 = vld.sshfl [vmem:[#allocation1 + $0x28] sm:$0xff pattern:$0x73625140] }
 0x63b   : > { %v11676_v45 = vadd.f32 %v5250_v63, %v11200_v28  ;;  %v11681_v44 = vadd.f32 %v5271_v0, %v11205_v26  ;;  %6320 = vrot.lane.b32.xlu2 %v6264_v27, %s8234_s10  ;;  %v6209_v63 = vld [vmem:[%s8276_s21 + $0x22] sm:$0xff] }
 0x63c   : > { %8084 = vmatmul.msk.bf16.vlgmr.msrb.gmra.mxu0 %vm365_vm3, %v11417_v25  ;;  %6269 = vst [vmem:[#allocation1] ss:$4 sm:$0xff] %v6209_v63 }
 0x63d   : > { %8088 = vmatmul.msk.bf16.vlgmr.msrb.gmra.mxu2 %vm365_vm3, %v11417_v25  ;;  %6040 = vmatpush.bf16.msrb.mxu0 %v5642_v55 }
 0x63e   : > { %8090 = vmatmul.msk.bf16.vlgmr.msrb.gmra.mxu3 %vm365_vm3, %v11417_v25  ;;  %6078 = vmatpush.bf16.msrb.mxu2 %v5648_v17 }
 0x640   : > { %v5288_v28 = vpop.f32.mrf.mxu2 }
 0x641   : > { %v5307_v26 = vpop.f32.mrf.mxu3  ;;  %v11692_v40 = vadd.f32 %v5288_v28, %v11214_v57 }
 0x642   : > { %v11695_v0 = vadd.f32 %v5307_v26, %v11217_v46  ;;  %v5252_v11 = vpop.f32.mrf.mxu0  ;;  %v5274_v14 = vpop.f32.mrf.mxu1 }
 0x643   : > { %v11698_v39 = vadd.f32 %v5252_v11, %v11220_v59  ;;  %v11701_v18 = vadd.f32 %v5274_v14, %v11223_v8  ;;  %6318 = vrot.lane.b32.xlu2 %v6262_v42, %s8234_s10 }
 0x644   : > { %v5549_v55 = vpop.permute.xlu2 %5548 }
 0x645   : > { %8087 = vmatmul.msk.bf16.gmra.mxu1 %vm365_vm3, %v11462_v48  ;;  %v5574_v57 = vsel %vm5550_vm9, %v5547_v61, %v5549_v55 }
 0x646   : > { %v5651_v59 = vand.u32 %v5574_v57, %v8328_v37  ;;  %v13377_v57 = vld [vmem:[#allocation106_spill] sm:$0xff] }
 0x648   : > { %v5290_v46 = vpop.f32.mrf.mxu2  ;;  %6097 = vmatpush.bf16.msrb.mxu3 %v5651_v59 }
 0x649   : > { %v5309_v17 = vpop.f32.mrf.mxu3  ;;  %v11710_v62 = vadd.f32 %v5290_v46, %v11231_v15  ;;  %v6276_v15 = vld.sshfl [vmem:[#allocation1 + $0x10] sm:$0xff pattern:$0x73625140] }
 0x64a   : > { %v11713_v8 = vadd.f32 %v5309_v17, %v11234_v43  ;;  %v5255_v27 = vpop.f32.mrf.mxu0  ;;  %v5276_v26 = vpop.f32.mrf.mxu1  ;;  %v6272_v43 = vld.sshfl [vmem:[#allocation1] sm:$0xff pattern:$0x73625140]  ;;  %6328 = vrot.lane.b32.xlu0 %v6276_v15, %s8234_s10  ;;  %v6274_v17 = vld.sshfl [vmem:[#allocation1 + $0x8] sm:$0xff pattern:$0x73625140] }
 0x64b   : > { %v11716_v28 = vadd.f32 %v5255_v27, %v11237_v32  ;;  %v11719_v61 = vadd.f32 %v5276_v26, %v11240_v36  ;;  %6324 = vrot.lane.b32.xlu1 %v6272_v43, %s8234_s10 }
 0x64c   : > { %8085 = vmatmul.msk.bf16.gmra.mxu0 %vm365_vm3, %v11462_v48  ;;  %v6299_v59 = vpop.permute.xlu2 %6298 }
 0x64d   : > { %8089 = vmatmul.msk.bf16.gmra.mxu2 %vm365_vm3, %v11462_v48 }
 0x64e   : > { %8091 = vmatmul.msk.bf16.gmra.mxu3 %vm365_vm3, %v11462_v48 }
 0x650   : > { %v5293_v32 = vpop.f32.mrf.mxu2 }
 0x651   : > { %v5312_v11 = vpop.f32.mrf.mxu3  ;;  %v11730_v36 = vadd.f32 %v5293_v32, %v11250_v29  ;;  %v11744_v29 = vpop.permute.xlu0 %6300 }
 0x652   : > { %v11733_v14 = vadd.f32 %v5312_v11, %v11253_v19  ;;  %v5257_v42 = vpop.f32.mrf.mxu0  ;;  %v5681_v55 = vpop.f32.mrf.mxu1  ;;  %6326 = vrot.lane.b32.xlu0 %v6274_v17, %s8234_s10  ;;  %v6346_v19 = vsel %vm6342_vm10, %v6299_v59, %v11744_v29 }
 0x653   : > { %v11736_v63 = vadd.f32 %v5257_v42, %v11256_v13  ;;  %v11739_v46 = vadd.f32 %v5681_v55, %v13377_v57  ;;  %v6383_v42 = vand.u32 %v6346_v19, %v8328_v37 }
 0x655   : > { %8094 = vmatmul.msk.bf16.vlgmr.msra.gmra.mxu1 %vm365_vm3, %v11417_v25 }
 0x658   : > { %v5295_v27 = vpop.f32.mrf.mxu2 }
 0x659   : > { %v5314_v13 = vpop.f32.mrf.mxu3  ;;  %v11749_v26 = vadd.f32 %v5295_v27, %v11269_v23  ;;  %v6278_v23 = vld.sshfl [vmem:[#allocation1 + $0x18] sm:$0xff pattern:$0x73625140]  ;;  %v13385_v27 = vld [vmem:[#allocation107_spill] sm:$0xff] }
 0x65a   : > { %v11752_v15 = vadd.f32 %v5314_v13, %v11272_v4  ;;  %v5662_v43 = vpop.f32.mrf.mxu0  ;;  %v5683_v11 = vpop.f32.mrf.mxu1  ;;  %6330 = vrot.lane.b32.xlu1 %v6278_v23, %s8234_s10  ;;  %v6210_v23 = vld [vmem:[%s8276_s21 + $0x2a] sm:$0xff] }
 0x65b   : > { %13378 = vst [vmem:[#allocation130_spill] sm:$0xff] %v11749_v26  ;;  %v11755_v32 = vadd.f32 %v5662_v43, %v11277_v35  ;;  %v11759_v55 = vadd.f32 %v5683_v11, %v11283_v9  ;;  %v13383_v9 = vld [vmem:[#allocation33_spill] sm:$0xff]  ;;  %v13387_v11 = vld [vmem:[#allocation34_spill] sm:$0xff] }
 0x65c   : > { %13379 = vst [vmem:[#allocation58_spill] sm:$0xff] %v11752_v15  ;;  %8092 = vmatmul.msk.bf16.vlgmr.msra.gmra.mxu0 %vm365_vm3, %v11417_v25 }
 0x65d   : > { %13380 = vst [vmem:[#allocation59_spill] sm:$0xff] %v11755_v32  ;;  %8096 = vmatmul.msk.bf16.vlgmr.msra.gmra.mxu2 %vm365_vm3, %v11417_v25  ;;  %v6295_v32 = vpop.permute.xlu2 %6294 }
 0x65e   : > { %13381 = vst [vmem:[#allocation60_spill] sm:$0xff] %v11759_v55  ;;  %8098 = vmatmul.msk.bf16.vlgmr.msra.gmra.mxu3 %vm365_vm3, %v11417_v25 }
 0x65f   : > { %6509 = vmatpush.bf16.msra.mxu3 %v6383_v42  ;;  %v6305_v42 = vpop.permute.xlu0 %6304  ;;  %6271 = vst [vmem:[#allocation1 + $0x20] ss:$4 sm:$0xff] %v6210_v23 }
 0x660   : > { %v5700_v4 = vpop.f32.mrf.mxu2 }
 0x661   : > { %v5719_v35 = vpop.f32.mrf.mxu3  ;;  %v11769_v57 = vadd.f32 %v5700_v4, %v11297_v22 }
 0x662   : > { %v11772_v17 = vadd.f32 %v5719_v35, %v13383_v9  ;;  %v5664_v19 = vpop.f32.mrf.mxu0  ;;  %v5686_v43 = vpop.f32.mrf.mxu1 }
 0x663   : > { %13382 = vst [vmem:[#allocation61_spill] sm:$0xff] %v11769_v57  ;;  %v11775_v13 = vadd.f32 %v5664_v19, %v13385_v27  ;;  %v11778_v55 = vadd.f32 %v5686_v43, %v13387_v11  ;;  %v13390_v11 = vld [vmem:[#allocation108_spill] sm:$0xff] }
 0x664   : > { %13384 = vst [vmem:[#allocation131_spill] sm:$0xff] %v11772_v17  ;;  %v6297_v15 = vpop.permute.xlu1 %6296 }
 0x665   : > { %13386 = vst [vmem:[#allocation62_spill] sm:$0xff] %v11775_v13  ;;  %8095 = vmatmul.msk.bf16.gmra.mxu1 %vm365_vm3, %v11462_v48  ;;  %v6345_v22 = vsel %vm6342_vm10, %v6297_v15, %v6299_v59  ;;  %v6344_v4 = vsel %vm6342_vm10, %v6295_v32, %v6297_v15  ;;  %v13392_v13 = vld [vmem:[#allocation35_spill] sm:$0xff]  ;;  %v13394_v59 = vld [vmem:[#allocation29_spill] sm:$0xff] }
 0x666   : > { %13388 = vst [vmem:[#allocation134_spill] sm:$0xff] %v11778_v55  ;;  %v6380_v19 = vand.u32 %v6345_v22, %v8328_v37  ;;  %v6377_v27 = vand.u32 %v6344_v4, %v8328_v37  ;;  %v6282_v26 = vld.sshfl [vmem:[#allocation1 + $0x28] sm:$0xff pattern:$0x73625140] }
 0x667   : > { %v6303_v4 = vpop.permute.xlu0 %6302 }
 0x668   : > { %v5702_v35 = vpop.f32.mrf.mxu2  ;;  %6471 = vmatpush.bf16.msra.mxu1 %v6377_v27  ;;  %6490 = vmatpush.bf16.msra.mxu2 %v6380_v19  ;;  %v13396_v27 = vld [vmem:[#allocation109_spill] sm:$0xff] }
 0x669   : > { %v5721_v9 = vpop.f32.mrf.mxu3  ;;  %v11788_v43 = vadd.f32 %v5702_v35, %v11313_v12  ;;  %v6284_v12 = vld.sshfl [vmem:[#allocation1 + $0x30] sm:$0xff pattern:$0x73625140] }
 0x66a   : > { %v11791_v17 = vadd.f32 %v5721_v9, %v13390_v11  ;;  %v5667_v55 = vpop.f32.mrf.mxu0  ;;  %v5688_v23 = vpop.f32.mrf.mxu1  ;;  %6336 = vrot.lane.b32.xlu1 %v6284_v12, %s8234_s10  ;;  %v13400_v12 = vld [vmem:[#allocation37_spill] sm:$0xff] }
 0x66b   : > { %13389 = vst [vmem:[#allocation132_spill] sm:$0xff] %v11788_v43  ;;  %v11794_v57 = vadd.f32 %v5667_v55, %v13392_v13  ;;  %v11797_v15 = vadd.f32 %v5688_v23, %v13394_v59  ;;  %v6348_v13 = vsel %vm6342_vm10, %v6303_v4, %v6305_v42  ;;  %v13397_v23 = vld [vmem:[#allocation36_spill] sm:$0xff] }
 0x66c   : > { %13391 = vst [vmem:[#allocation63_spill] sm:$0xff] %v11791_v17  ;;  %8093 = vmatmul.msk.bf16.gmra.mxu0 %vm365_vm3, %v11462_v48  ;;  %v6293_v22 = vpop.permute.xlu1 %6292 }
 0x66d   : > { %13393 = vst [vmem:[#allocation133_spill] sm:$0xff] %v11794_v57  ;;  %8097 = vmatmul.msk.bf16.gmra.mxu2 %vm365_vm3, %v11462_v48  ;;  %v6343_v55 = vsel %vm6342_vm10, %v6293_v22, %v6295_v32  ;;  %v6389_v32 = vand.u32 %v6348_v13, %v8328_v37 }
 0x66e   : > { %13395 = vst [vmem:[#allocation64_spill] sm:$0xff] %v11797_v15  ;;  %8099 = vmatmul.msk.bf16.gmra.mxu3 %vm365_vm3, %v11462_v48  ;;  %v6374_v19 = vand.u32 %v6343_v55, %v8328_v37  ;;  %v13399_v15 = vld [vmem:[#allocation110_spill] sm:$0xff] }
 0x670   : > { %v5705_v35 = vpop.f32.mrf.mxu2  ;;  %6452 = vmatpush.bf16.msra.mxu0 %v6374_v19 }
 0x671   : > { %v5724_v9 = vpop.f32.mrf.mxu3  ;;  %v11810_v11 = vadd.f32 %v5705_v35, %v13396_v27 }
 0x672   : > { %v11813_v59 = vadd.f32 %v5724_v9, %v13397_v23  ;;  %v5669_v17 = vpop.f32.mrf.mxu0  ;;  %v5757_v43 = vpop.f32.mrf.mxu1  ;;  %6334 = vrot.lane.b32.xlu1 %v6282_v26, %s8234_s10  ;;  %v6211_v23 = vld [vmem:[%s8276_s21 + $0x32] sm:$0x3] }
 0x673   : > { %v11816_v57 = vadd.f32 %v5669_v17, %v13399_v15  ;;  %v11820_v22 = vadd.f32 %v5757_v43, %v13400_v12  ;;  %v6347_v17 = vsel %vm6342_vm10, %v11744_v29, %v6303_v4  ;;  %v13401_v43 = vld [vmem:[#allocation38_spill] sm:$0xff]  ;;  %v13403_v12 = vld [vmem:[#allocation112_spill] sm:$0xff]  ;;  %6289 = vst [vmem:[#allocation1] ss:$4 sm:$0xff] %v6211_v23 }
 0x674   : > { %13398 = vst [vmem:[#allocation65_spill] sm:$0xff] %v11813_v59  ;;  %v6307_v55 = vpop.permute.xlu1 %6306 }
 0x675   : > { %8102 = vmatmul.msk.bf16.vlgmr.msrb.gmra.mxu1 %vm365_vm3, %v11417_v25  ;;  %v6349_v15 = vsel %vm6342_vm10, %v6305_v42, %v6307_v55  ;;  %v13404_v42 = vld [vmem:[#allocation39_spill] sm:$0xff] }
 0x676   : > { %6547 = vmatpush.bf16.msrb.mxu1 %v6389_v32  ;;  %v6386_v32 = vand.u32 %v6347_v17, %v8328_v37  ;;  %v6392_v29 = vand.u32 %v6349_v15, %v8328_v37 }
 0x678   : > { %v5707_v35 = vpop.f32.mrf.mxu2 }
 0x679   : > { %v5726_v9 = vpop.f32.mrf.mxu3  ;;  %v11829_v13 = vadd.f32 %v5707_v35, %v11352_v41  ;;  %v6309_v41 = vpop.permute.xlu2 %6308 }
 0x67a   : > { %v11832_v19 = vadd.f32 %v5726_v9, %v13401_v43  ;;  %v5738_v27 = vpop.f32.mrf.mxu0  ;;  %v5759_v26 = vpop.f32.mrf.mxu1  ;;  %v6350_v17 = vsel %vm6342_vm10, %v6307_v55, %v6309_v41  ;;  %v13410_v55 = vld [vmem:[#allocation114_spill] sm:$0xff] }
 0x67b   : > { %v11836_v59 = vadd.f32 %v5738_v27, %v13403_v12  ;;  %v11841_v4 = vadd.f32 %v5759_v26, %v13404_v42  ;;  %v6395_v9 = vand.u32 %v6350_v17, %v8328_v37  ;;  %v13406_v27 = vld [vmem:[#allocation113_spill] sm:$0xff]  ;;  %v13408_v42 = vld [vmem:[#allocation40_spill] sm:$0xff] }
 0x67c   : > { %13402 = vst [vmem:[#allocation135_spill] sm:$0xff] %v11832_v19  ;;  %8100 = vmatmul.msk.bf16.vlgmr.msrb.gmra.mxu0 %vm365_vm3, %v11417_v25  ;;  %v6290_v26 = vld.sshfl [vmem:[#allocation1] sm:$0xff pattern:$0x73625140]  ;;  %v6313_v17 = vpop.permute.xlu1 %6312 }
 0x67d   : > { %8104 = vmatmul.msk.bf16.vlgmr.msrb.gmra.mxu2 %vm365_vm3, %v11417_v25  ;;  %6528 = vmatpush.bf16.msrb.mxu0 %v6386_v32 }
 0x67e   : > { %8106 = vmatmul.msk.bf16.vlgmr.msrb.gmra.mxu3 %vm365_vm3, %v11417_v25  ;;  %6566 = vmatpush.bf16.msrb.mxu2 %v6392_v29  ;;  %v6280_v29 = vld.sshfl [vmem:[#allocation1 + $0x20] sm:$0xff pattern:$0x73625140] }
 0x67f   : > { %6585 = vmatpush.bf16.msrb.mxu3 %v6395_v9  ;;  %6340 = vrot.lane.b32.xlu0 %v6290_v26, %s8234_s10  ;;  %v8235_v26 = vmov 0  }
 0x680   : > { %v5776_v35 = vpop.f32.mrf.mxu2  ;;  %6332 = vrot.lane.b32.xlu2 %v6280_v29, %s8234_s10  ;;  %8216 = vset.pattern.permute.xlu0 %v8235_v26 }
 0x681   : > { %v5795_v15 = vpop.f32.mrf.mxu3  ;;  %v11852_v43 = vadd.f32 %v5776_v35, %v11372_v20  ;;  %8217 = vset.pattern.permute.xlu1 %v8235_v26  ;;  %8215 = vset.pattern.permute.xlu2 %v8235_v26  ;;  %v13422_v26 = vld [vmem:[#allocation44_spill] sm:$0xff] }
 0x682   : > { %v11855_v23 = vadd.f32 %v5795_v15, %v13406_v27  ;;  %v5740_v12 = vpop.f32.mrf.mxu0  ;;  %v5762_v25 = vpop.f32.mrf.mxu1  ;;  %v13412_v15 = vld [vmem:[#allocation41_spill] sm:$0xff] }
 0x683   : > { %13405 = vst [vmem:[#allocation66_spill] sm:$0xff] %v11852_v43  ;;  %v11858_v19 = vadd.f32 %v5740_v12, %v13408_v42  ;;  %v11862_v32 = vadd.f32 %v5762_v25, %v13410_v55  ;;  %v13414_v12 = vld [vmem:[#allocation115_spill] sm:$0xff]  ;;  %v6998_v25 = vld [vmem:[%s12630_s2 + $0x8] sm:$0xff] }
 0x684   : > { %13407 = vst [vmem:[#allocation136_spill] sm:$0xff] %v11855_v23  ;;  %v13416_v55 = vld [vmem:[#allocation42_spill] sm:$0xff] }
 0x685   : > { %13409 = vst [vmem:[#allocation67_spill] sm:$0xff] %v11858_v19  ;;  %8103 = vmatmul.msk.bf16.gmra.mxu1 %vm365_vm3, %v11462_v48  ;;  %v13418_v19 = vld [vmem:[#allocation43_spill] sm:$0xff] }
 0x686   : > { %13411 = vst [vmem:[#allocation137_spill] sm:$0xff] %v11862_v32 }
 0x687   : > { %7008 = vperm.xlu0 %8216, %v6998_v25  }
 0x688   : > { %v5778_v20 = vpop.f32.mrf.mxu2 }
 0x689   : > { %v5797_v35 = vpop.f32.mrf.mxu3  ;;  %v11868_v27 = vadd.f32 %v5778_v20, %v13412_v15 }
 0x68a   : > { %v11871_v42 = vadd.f32 %v5797_v35, %v13414_v12  ;;  %v5743_v9 = vpop.f32.mrf.mxu0  ;;  %v5764_v32 = vpop.f32.mrf.mxu1 }
 0x68b   : > { %13413 = vst [vmem:[#allocation68_spill] sm:$0xff] %v11868_v27  ;;  %v11877_v29 = vadd.f32 %v5743_v9, %v13416_v55  ;;  %v11880_v20 = vadd.f32 %v5764_v32, %v13418_v19  ;;  %v6311_v35 = vpop.permute.xlu1 %6310  ;;  %v13420_v55 = vld [vmem:[#allocation116_spill] sm:$0xff] }
 0x68c   : > { %13415 = vst [vmem:[#allocation138_spill] sm:$0xff] %v11871_v42  ;;  %8101 = vmatmul.msk.bf16.gmra.mxu0 %vm365_vm3, %v11462_v48  ;;  %v6352_v15 = vsel %vm6342_vm10, %v6311_v35, %v6313_v17  ;;  %v13424_v42 = vld [vmem:[#allocation111_spill] sm:$0xff] }
 0x68d   : > { %13417 = vst [vmem:[#allocation69_spill] sm:$0xff] %v11877_v29  ;;  %8105 = vmatmul.msk.bf16.gmra.mxu2 %vm365_vm3, %v11462_v48  ;;  %v6286_v29 = vld.sshfl [vmem:[#allocation1 + $0x38] sm:$0xff pattern:$0x73625140] }
 0x68e   : > { %13419 = vst [vmem:[#allocation139_spill] sm:$0xff] %v11880_v20  ;;  %8107 = vmatmul.msk.bf16.gmra.mxu3 %vm365_vm3, %v11462_v48  ;;  %v11898_v20 = vld [vmem:[%s12629_s1 + $0x80] sm:$0xff]  ;;  %v6999_v48 = vld [vmem:[%s12630_s2 + $0x10] sm:$0xff]  ;;  %6338 = vrot.lane.b32.xlu2 %v6286_v29, %s8234_s10 }
 0x68f   : > { %7013 = vperm.xlu1 %8217, %v6999_v48  }
 0x690   : > { %v5781_v12 = vpop.f32.mrf.mxu2 }
 0x691   : > { %v5800_v9 = vpop.f32.mrf.mxu3  ;;  %v11890_v25 = vadd.f32 %v5781_v12, %v13420_v55  ;;  %v6401_v12 = vand.u32 %v6352_v15, %v8328_v37  ;;  %v13430_v15 = vld [vmem:[#allocation118_spill] sm:$0xff] }
 0x692   : > { %v11893_v19 = vadd.f32 %v5800_v9, %v13422_v26  ;;  %v5745_v32 = vpop.f32.mrf.mxu0  ;;  %v5833_v23 = vpop.f32.mrf.mxu1  ;;  %v13426_v9 = vld [vmem:[#allocation117_spill] sm:$0xff] }
 0x693   : > { %13421 = vst [vmem:[#allocation70_spill] sm:$0xff] %v11890_v25  ;;  %v11904_v27 = vadd.f32 %v5745_v32, %v13424_v42  ;;  %v11909_v55 = vadd.f32 %v5833_v23, %v13426_v9  ;;  %v6315_v26 = vpop.permute.xlu2 %6314  ;;  %v6997_v23 = vld [vmem:[%s12630_s2] sm:$0xff]  ;;  %v13432_v9 = vld [vmem:[#allocation46_spill] sm:$0xff] }
 0x694   : > { %13423 = vst [vmem:[#allocation140_spill] sm:$0xff] %v11893_v19  ;;  %v6351_v19 = vsel %vm6342_vm10, %v6309_v41, %v6311_v35  ;;  %v6353_v25 = vsel %vm6342_vm10, %v6313_v17, %v6315_v26  ;;  %v13434_v35 = vld [vmem:[#allocation119_spill] sm:$0xff] }
 0x695   : > { %13425 = vst [vmem:[#allocation71_spill] sm:$0xff] %v11904_v27  ;;  %8122 = vmatmul.msk.bf16.vlgmr.msra.gmra.mxu1 %vm365_vm3, %v11898_v20  ;;  %v13428_v27 = vld [vmem:[#allocation45_spill] sm:$0xff]  ;;  %v6398_v41 = vand.u32 %v6351_v19, %v8328_v37  ;;  %v6404_v17 = vand.u32 %v6353_v25, %v8328_v37  ;;  %v13436_v19 = vld [vmem:[#allocation47_spill] sm:$0xff]  ;;  %v13438_v25 = vld [vmem:[#allocation120_spill] sm:$0xff] }
 0x696   : > { %13427 = vst [vmem:[#allocation141_spill] sm:$0xff] %v11909_v55  ;;  %6623 = vmatpush.bf16.msra.mxu1 %v6401_v12  ;;  %7003 = vperm.xlu2 %8215, %v6997_v23  }
 0x698   : > { %v5783_v42 = vpop.f32.mrf.mxu2 }
 0x699   : > { %v5802_v32 = vpop.f32.mrf.mxu3  ;;  %v11916_v43 = vadd.f32 %v5783_v42, %v13428_v27 }
 0x69a   : > { %v11919_v29 = vadd.f32 %v5802_v32, %v13430_v15  ;;  %v5814_v48 = vpop.f32.mrf.mxu0  ;;  %v5835_v12 = vpop.f32.mrf.mxu1 }
 0x69b   : > { %13429 = vst [vmem:[#allocation72_spill] sm:$0xff] %v11916_v43  ;;  %v11925_v55 = vadd.f32 %v5814_v48, %v13432_v9  ;;  %v11930_v27 = vadd.f32 %v5835_v12, %v13434_v35  ;;  %v11947_v9 = vld [vmem:[%s12629_s1 + $0x88] sm:$0xff]  ;;  %v13440_v35 = vld [vmem:[#allocation48_spill] sm:$0xff] }
 0x69c   : > { %13431 = vst [vmem:[#allocation142_spill] sm:$0xff] %v11919_v29  ;;  %8120 = vmatmul.msk.bf16.vlgmr.msra.gmra.mxu0 %vm365_vm3, %v11898_v20  ;;  %v13444_v29 = vld [vmem:[#allocation49_spill] sm:$0xff] }
 0x69d   : > { %13433 = vst [vmem:[#allocation143_spill] sm:$0xff] %v11925_v55  ;;  %8124 = vmatmul.msk.bf16.vlgmr.msra.gmra.mxu2 %vm365_vm3, %v11898_v20  ;;  %6604 = vmatpush.bf16.msra.mxu0 %v6398_v41  ;;  %v13442_v41 = vld [vmem:[#allocation121_spill] sm:$0xff]  ;;  %v6321_v55 = vpop.permute.xlu2 %6320 }
 0x69e   : > { %13435 = vst [vmem:[#allocation73_spill] sm:$0xff] %v11930_v27  ;;  %8126 = vmatmul.msk.bf16.vlgmr.msra.gmra.mxu3 %vm365_vm3, %v11898_v20  ;;  %6642 = vmatpush.bf16.msra.mxu2 %v6404_v17 }
 0x6a0   : > { %v5852_v42 = vpop.f32.mrf.mxu2 }
 0x6a1   : > { %v5871_v32 = vpop.f32.mrf.mxu3  ;;  %v11939_v15 = vadd.f32 %v5852_v42, %v13436_v19  ;;  %v6317_v42 = vpop.permute.xlu0 %6316 }
 0x6a2   : > { %v11942_v48 = vadd.f32 %v5871_v32, %v13438_v25  ;;  %v5816_v23 = vpop.f32.mrf.mxu0  ;;  %v5838_v12 = vpop.f32.mrf.mxu1  ;;  %v6354_v32 = vsel %vm6342_vm10, %v6315_v26, %v6317_v42 }
 0x6a3   : > { %13437 = vst [vmem:[#allocation74_spill] sm:$0xff] %v11939_v15  ;;  %v11950_v27 = vadd.f32 %v5816_v23, %v13440_v35  ;;  %v11953_v17 = vadd.f32 %v5838_v12, %v13442_v41  ;;  %v13445_v41 = vld [vmem:[#allocation122_spill] sm:$0xff] }
 0x6a4   : > { %13439 = vst [vmem:[#allocation75_spill] sm:$0xff] %v11942_v48  ;;  %v6407_v48 = vand.u32 %v6354_v32, %v8328_v37 }
 0x6a5   : > { %13441 = vst [vmem:[#allocation2_spill] sm:$0xff] %v11950_v27  ;;  %8123 = vmatmul.msk.bf16.gmra.mxu1 %vm365_vm3, %v11947_v9  ;;  %v13446_v27 = vld [vmem:[#allocation50_spill] sm:$0xff] }
 0x6a6   : > { %13443 = vst [vmem:[#allocation76_spill] sm:$0xff] %v11953_v17  ;;  %6661 = vmatpush.bf16.msra.mxu3 %v6407_v48 }
 0x6a8   : > { %v5854_v19 = vpop.f32.mrf.mxu2 }
 0x6a9   : > { %v5873_v25 = vpop.f32.mrf.mxu3  ;;  %v11960_v15 = vadd.f32 %v5854_v19, %v11475_v58  ;;  %v6319_v58 = vpop.permute.xlu2 %6318 }
 0x6aa   : > { %v11963_v23 = vadd.f32 %v5873_v25, %v13444_v29  ;;  %v5819_v35 = vpop.f32.mrf.mxu0  ;;  %v5840_v12 = vpop.f32.mrf.mxu1  ;;  %v6356_v26 = vsel %vm6342_vm10, %v6319_v58, %v6321_v55  ;;  %v7000_v25 = vld [vmem:[%s12630_s2 + $0x18] sm:$0xff] }
 0x6ab   : > { %v11966_v17 = vadd.f32 %v5819_v35, %v13445_v41  ;;  %v11969_v43 = vadd.f32 %v5840_v12, %v13446_v27  ;;  %v6413_v41 = vand.u32 %v6356_v26, %v8328_v37  ;;  %7018 = vperm.xlu2 %8215, %v7000_v25   ;;  %v13450_v25 = vld [vmem:[#allocation123_spill] sm:$0xff] }
 0x6ac   : > { %8121 = vmatmul.msk.bf16.gmra.mxu0 %vm365_vm3, %v11947_v9 }
 0x6ad   : > { %13447 = vst [vmem:[#allocation3_spill] sm:$0xff] %v11969_v43  ;;  %8125 = vmatmul.msk.bf16.gmra.mxu2 %vm365_vm3, %v11947_v9 }
 0x6ae   : > { %8127 = vmatmul.msk.bf16.gmra.mxu3 %vm365_vm3, %v11947_v9 }
 0x6b0   : > { %v5857_v29 = vpop.f32.mrf.mxu2 }
 0x6b1   : > { %v5876_v32 = vpop.f32.mrf.mxu3  ;;  %v11979_v19 = vadd.f32 %v5857_v29, %v11497_v1  ;;  %v6323_v1 = vpop.permute.xlu0 %6322 }
 0x6b2   : > { %v11982_v27 = vadd.f32 %v5876_v32, %v11500_v21  ;;  %v5821_v48 = vpop.f32.mrf.mxu0  ;;  %v5909_v35 = vpop.f32.mrf.mxu1  ;;  %v6355_v21 = vsel %vm6342_vm10, %v6317_v42, %v6319_v58  ;;  %v6357_v29 = vsel %vm6342_vm10, %v6321_v55, %v6323_v1  ;;  %v13452_v42 = vld [vmem:[#allocation51_spill] sm:$0xff] }
 0x6b3   : > { %v11988_v12 = vadd.f32 %v5821_v48, %v11503_v52  ;;  %v11992_v43 = vadd.f32 %v5909_v35, %v11507_v60 }
 0x6b4   : > { %13448 = vst [vmem:[#allocation77_spill] sm:$0xff] %v11982_v27 }
 0x6b5   : > { %13449 = vst [vmem:[#allocation4_spill] sm:$0xff] %v11992_v43  ;;  %8130 = vmatmul.msk.bf16.vlgmr.msrb.gmra.mxu1 %vm365_vm3, %v11898_v20  ;;  %v6410_v43 = vand.u32 %v6355_v21, %v8328_v37 }
 0x6b6   : > { %6699 = vmatpush.bf16.msrb.mxu1 %v6413_v41  ;;  %v6416_v41 = vand.u32 %v6357_v29, %v8328_v37 }
 0x6b8   : > { %v5859_v32 = vpop.f32.mrf.mxu2 }
 0x6b9   : > { %v5878_v27 = vpop.f32.mrf.mxu3  ;;  %v11999_v52 = vadd.f32 %v5859_v32, %v11516_v50  ;;  %v13456_v32 = vld [vmem:[#allocation52_spill] sm:$0xff] }
 0x6ba   : > { %v12002_v26 = vadd.f32 %v5878_v27, %v11519_v47  ;;  %v5890_v48 = vpop.f32.mrf.mxu0  ;;  %v5911_v60 = vpop.f32.mrf.mxu1  ;;  %v13454_v27 = vld [vmem:[#allocation124_spill] sm:$0xff] }
 0x6bb   : > { %v12005_v35 = vadd.f32 %v5890_v48, %v13450_v25  ;;  %v12010_v58 = vadd.f32 %v5911_v60, %v13452_v42  ;;  %v13457_v42 = vld [vmem:[#allocation125_spill] sm:$0xff] }
 0x6bc   : > { %8128 = vmatmul.msk.bf16.vlgmr.msrb.gmra.mxu0 %vm365_vm3, %v11898_v20 }
 0x6bd   : > { %13451 = vst [vmem:[#allocation78_spill] sm:$0xff] %v12005_v35  ;;  %8132 = vmatmul.msk.bf16.vlgmr.msrb.gmra.mxu2 %vm365_vm3, %v11898_v20  ;;  %6680 = vmatpush.bf16.msrb.mxu0 %v6410_v43  ;;  %v6325_v25 = vpop.permute.xlu1 %6324 }
 0x6be   : > { %13453 = vst [vmem:[#allocation5_spill] sm:$0xff] %v12010_v58  ;;  %8134 = vmatmul.msk.bf16.vlgmr.msrb.gmra.mxu3 %vm365_vm3, %v11898_v20  ;;  %6718 = vmatpush.bf16.msrb.mxu2 %v6416_v41  ;;  %v6358_v43 = vsel %vm6342_vm10, %v6323_v1, %v6325_v25  ;;  %v6329_v41 = vpop.permute.xlu0 %6328 }
 0x6bf   : > { %v6419_v35 = vand.u32 %v6358_v43, %v8328_v37 }
 0x6c0   : > { %v5928_v50 = vpop.f32.mrf.mxu2 }
 0x6c1   : > { %v5947_v47 = vpop.f32.mrf.mxu3  ;;  %v12019_v55 = vadd.f32 %v5928_v50, %v11541_v10  ;;  %6737 = vmatpush.bf16.msrb.mxu3 %v6419_v35 }
 0x6c2   : > { %v12022_v21 = vadd.f32 %v5947_v47, %v13454_v27  ;;  %v5892_v29 = vpop.f32.mrf.mxu0  ;;  %v5914_v60 = vpop.f32.mrf.mxu1 }
 0x6c3   : > { %v12025_v48 = vadd.f32 %v5892_v29, %v13456_v32  ;;  %v12028_v58 = vadd.f32 %v5914_v60, %v13457_v42  ;;  %v13459_v32 = vld [vmem:[#allocation53_spill] sm:$0xff]  ;;  %v13461_v42 = vld [vmem:[#allocation126_spill] sm:$0xff] }
 0x6c4   : > { %13455 = vst [vmem:[#allocation79_spill] sm:$0xff] %v12022_v21 }
 0x6c5   : > { %8131 = vmatmul.msk.bf16.gmra.mxu1 %vm365_vm3, %v11947_v9 }
 0x6c8   : > { %v5930_v10 = vpop.f32.mrf.mxu2 }
 0x6c9   : > { %v5949_v50 = vpop.f32.mrf.mxu3  ;;  %v12035_v47 = vadd.f32 %v5930_v10, %v11556_v56  ;;  %v6327_v56 = vpop.permute.xlu0 %6326 }
 0x6ca   : > { %v12038_v27 = vadd.f32 %v5949_v50, %v11559_v33  ;;  %v5895_v29 = vpop.f32.mrf.mxu0  ;;  %v5916_v1 = vpop.f32.mrf.mxu1  ;;  %v6360_v33 = vsel %vm6342_vm10, %v6327_v56, %v6329_v41 }
 0x6cb   : > { %v12041_v60 = vadd.f32 %v5895_v29, %v13459_v32  ;;  %v12044_v21 = vadd.f32 %v5916_v1, %v13461_v42  ;;  %v6425_v42 = vand.u32 %v6360_v33, %v8328_v37 }
 0x6cc   : > { %13458 = vst [vmem:[#allocation6_spill] sm:$0xff] %v12038_v27  ;;  %8129 = vmatmul.msk.bf16.gmra.mxu0 %vm365_vm3, %v11947_v9  ;;  %v13464_v27 = vld [vmem:[#allocation54_spill] sm:$0xff] }
 0x6cd   : > { %13460 = vst [vmem:[#allocation80_spill] sm:$0xff] %v12041_v60  ;;  %8133 = vmatmul.msk.bf16.gmra.mxu2 %vm365_vm3, %v11947_v9  ;;  %v6331_v60 = vpop.permute.xlu1 %6330 }
 0x6ce   : > { %13462 = vst [vmem:[#allocation7_spill] sm:$0xff] %v12044_v21  ;;  %8135 = vmatmul.msk.bf16.gmra.mxu3 %vm365_vm3, %v11947_v9 }
 0x6d0   : > { %v5933_v35 = vpop.f32.mrf.mxu2 }
 0x6d1   : > { %v5952_v43 = vpop.f32.mrf.mxu3  ;;  %v12054_v10 = vadd.f32 %v5933_v35, %v11576_v49  ;;  %v6359_v49 = vsel %vm6342_vm10, %v6325_v25, %v6327_v56 }
 0x6d2   : > { %v12057_v50 = vadd.f32 %v5952_v43, %v11579_v53  ;;  %v5897_v29 = vpop.f32.mrf.mxu0  ;;  %v5985_v32 = vpop.f32.mrf.mxu1  ;;  %v6361_v53 = vsel %vm6342_vm10, %v6329_v41, %v6331_v60 }
 0x6d3   : > { %v12060_v1 = vadd.f32 %v5897_v29, %v11582_v31  ;;  %v12064_v21 = vadd.f32 %v5985_v32, %v13464_v27  ;;  %v6422_v32 = vand.u32 %v6359_v49, %v8328_v37 }
 0x6d4   : > { %13463 = vst [vmem:[#allocation81_spill] sm:$0xff] %v12057_v50 }
 0x6d5   : > { %8138 = vmatmul.msk.bf16.vlgmr.msra.gmra.mxu1 %vm365_vm3, %v11898_v20 }
 0x6d6   : > { %6775 = vmatpush.bf16.msra.mxu1 %v6425_v42  ;;  %v6428_v42 = vand.u32 %v6361_v53, %v8328_v37 }
 0x6d8   : > { %v5935_v35 = vpop.f32.mrf.mxu2 }
 0x6d9   : > { %v5954_v43 = vpop.f32.mrf.mxu3  ;;  %v12071_v50 = vadd.f32 %v5935_v35, %v11594_v2 }
 0x6da   : > { %v12074_v31 = vadd.f32 %v5954_v43, %v11597_v34  ;;  %v5966_v33 = vpop.f32.mrf.mxu0  ;;  %v5987_v29 = vpop.f32.mrf.mxu1 }
 0x6db   : > { %v12077_v27 = vadd.f32 %v5966_v33, %v11600_v30  ;;  %v12082_v25 = vadd.f32 %v5987_v29, %v11605_v3  ;;  %v6333_v2 = vpop.permute.xlu2 %6332  ;;  %v13466_v33 = vld [vmem:[#allocation127_spill] sm:$0xff] }
 0x6dc   : > { %13465 = vst [vmem:[#allocation8_spill] sm:$0xff] %v12074_v31  ;;  %8136 = vmatmul.msk.bf16.vlgmr.msra.gmra.mxu0 %vm365_vm3, %v11898_v20  ;;  %v6362_v34 = vsel %vm6342_vm10, %v6331_v60, %v6333_v2  ;;  %v6337_v60 = vpop.permute.xlu1 %6336  ;;  %v13473_v31 = vld [vmem:[#allocation129_spill] sm:$0xff] }
 0x6dd   : > { %8140 = vmatmul.msk.bf16.vlgmr.msra.gmra.mxu2 %vm365_vm3, %v11898_v20  ;;  %6756 = vmatpush.bf16.msra.mxu0 %v6422_v32  ;;  %v6431_v56 = vand.u32 %v6362_v34, %v8328_v37 }
 0x6de   : > { %8142 = vmatmul.msk.bf16.vlgmr.msra.gmra.mxu3 %vm365_vm3, %v11898_v20  ;;  %6794 = vmatpush.bf16.msra.mxu2 %v6428_v42 }
 0x6df   : > { %6813 = vmatpush.bf16.msra.mxu3 %v6431_v56 }
 0x6e0   : > { %v6004_v30 = vpop.f32.mrf.mxu2 }
 0x6e1   : > { %v6023_v41 = vpop.f32.mrf.mxu3  ;;  %v12093_v3 = vadd.f32 %v6004_v30, %v11616_v54  ;;  %v13467_v54 = vld [vmem:[#allocation55_spill] sm:$0xff] }
 0x6e2   : > { %v12096_v49 = vadd.f32 %v6023_v41, %v11619_v7  ;;  %v5968_v53 = vpop.f32.mrf.mxu0  ;;  %v5990_v43 = vpop.f32.mrf.mxu1  ;;  %v13469_v7 = vld [vmem:[#allocation128_spill] sm:$0xff] }
 0x6e3   : > { %v12099_v35 = vadd.f32 %v5968_v53, %v11622_v16  ;;  %v12102_v29 = vadd.f32 %v5990_v43, %v13466_v33  ;;  %v13471_v16 = vld [vmem:[#allocation56_spill] sm:$0xff] }
 0x6e4   : > { %v6335_v33 = vpop.permute.xlu1 %6334 }
 0x6e5   : > { %8139 = vmatmul.msk.bf16.gmra.mxu1 %vm365_vm3, %v11947_v9 }
 0x6e8   : > { %v6006_v32 = vpop.f32.mrf.mxu2 }
 0x6e9   : > { %v6025_v42 = vpop.f32.mrf.mxu3  ;;  %v12107_v34 = vadd.f32 %v6006_v32, %v13467_v54  ;;  %v6364_v32 = vsel %vm6342_vm10, %v6335_v33, %v6337_v60 }
 0x6ea   : > { %v12110_v30 = vadd.f32 %v6025_v42, %v13469_v7  ;;  %v5971_v41 = vpop.f32.mrf.mxu0  ;;  %v5992_v56 = vpop.f32.mrf.mxu1 }
 0x6eb   : > { %13468 = vst [vmem:[#allocation82_spill] sm:$0xff] %v12107_v34  ;;  %v12113_v53 = vadd.f32 %v5971_v41, %v13471_v16  ;;  %v12116_v43 = vadd.f32 %v5992_v56, %v13473_v31  ;;  %v6339_v34 = vpop.permute.xlu2 %6338 }
 0x6ec   : > { %13470 = vst [vmem:[#allocation9_spill] sm:$0xff] %v12110_v30  ;;  %8137 = vmatmul.msk.bf16.gmra.mxu0 %vm365_vm3, %v11947_v9 }
 0x6ed   : > { %13472 = vst [vmem:[#allocation83_spill] sm:$0xff] %v12113_v53  ;;  %8141 = vmatmul.msk.bf16.gmra.mxu2 %vm365_vm3, %v11947_v9  ;;  %v13476_v53 = vld [vmem:[#allocation57_spill] sm:$0xff] }
 0x6ee   : > { %13474 = vst [vmem:[#allocation10_spill] sm:$0xff] %v12116_v43  ;;  %8143 = vmatmul.msk.bf16.gmra.mxu3 %vm365_vm3, %v11947_v9  ;;  %v6437_v43 = vand.u32 %v6364_v32, %v8328_v37 }
 0x6f0   : > { %v6009_v42 = vpop.f32.mrf.mxu2 }
 0x6f1   : > { %v6028_v54 = vpop.f32.mrf.mxu3  ;;  %v12126_v7 = vadd.f32 %v6009_v42, %v11651_v38  ;;  %v6363_v38 = vsel %vm6342_vm10, %v6333_v2, %v6335_v33  ;;  %v6341_v42 = vpop.permute.xlu0 %6340 }
 0x6f2   : > { %v12129_v31 = vadd.f32 %v6028_v54, %v11654_v5  ;;  %v5973_v41 = vpop.f32.mrf.mxu0  ;;  %v6061_v56 = vpop.f32.mrf.mxu1  ;;  %v6365_v5 = vsel %vm6342_vm10, %v6337_v60, %v6339_v34  ;;  %v6434_v2 = vand.u32 %v6363_v38, %v8328_v37 }
 0x6f3   : > { %v12132_v16 = vadd.f32 %v5973_v41, %v11657_v51  ;;  %v12136_v30 = vadd.f32 %v6061_v56, %v13476_v53  ;;  %v6366_v51 = vsel %vm6342_vm10, %v6339_v34, %v6341_v42  ;;  %v6440_v60 = vand.u32 %v6365_v5, %v8328_v37 }
 0x6f4   : > { %13475 = vst [vmem:[#allocation84_spill] sm:$0xff] %v12129_v31  ;;  %v6443_v34 = vand.u32 %v6366_v51, %v8328_v37 }
 0x6f5   : > { %13477 = vst [vmem:[#allocation11_spill] sm:$0xff] %v12136_v30  ;;  %8146 = vmatmul.msk.bf16.vlgmr.msrb.gmra.mxu1 %vm365_vm3, %v11898_v20 }
 0x6f6   : > { %6851 = vmatpush.bf16.msrb.mxu1 %v6437_v43 }
 0x6f8   : > { %v6011_v54 = vpop.f32.mrf.mxu2 }
 0x6f9   : > { %v6030_v31 = vpop.f32.mrf.mxu3  ;;  %v12144_v41 = vadd.f32 %v6011_v54, %v11670_v6 }
 0x6fa   : > { %v12147_v53 = vadd.f32 %v6030_v31, %v11673_v24  ;;  %v6042_v32 = vpop.f32.mrf.mxu0  ;;  %v6063_v43 = vpop.f32.mrf.mxu1 }
 0x6fb   : > { %v12150_v56 = vadd.f32 %v6042_v32, %v11676_v45  ;;  %v12155_v33 = vadd.f32 %v6063_v43, %v11681_v44 }
 0x6fc   : > { %8144 = vmatmul.msk.bf16.vlgmr.msrb.gmra.mxu0 %vm365_vm3, %v11898_v20 }
 0x6fd   : > { %13478 = vst [vmem:[#allocation85_spill] sm:$0xff] %v12155_v33  ;;  %8148 = vmatmul.msk.bf16.vlgmr.msrb.gmra.mxu2 %vm365_vm3, %v11898_v20  ;;  %6832 = vmatpush.bf16.msrb.mxu0 %v6434_v2 }
 0x6fe   : > { %8150 = vmatmul.msk.bf16.vlgmr.msrb.gmra.mxu3 %vm365_vm3, %v11898_v20  ;;  %6870 = vmatpush.bf16.msrb.mxu2 %v6440_v60 }
 0x6ff   : > { %6889 = vmatpush.bf16.msrb.mxu3 %v6443_v34 }
 0x700   : > { %v6080_v6 = vpop.f32.mrf.mxu2 }
 0x701   : > { %v6099_v24 = vpop.f32.mrf.mxu3  ;;  %v12165_v45 = vadd.f32 %v6080_v6, %v11692_v40  ;;  %v12206_v6 = vpop.permute.xlu2 %7003 }
 0x702   : > { %v12168_v44 = vadd.f32 %v6099_v24, %v11695_v0  ;;  %v6044_v37 = vpop.f32.mrf.mxu0  ;;  %v6066_v38 = vpop.f32.mrf.mxu1 }
 0x703   : > { %13479 = vst [vmem:[#allocation12_spill] sm:$0xff] %v12165_v45  ;;  %v12171_v31 = vadd.f32 %v6044_v37, %v11698_v39  ;;  %v12174_v5 = vadd.f32 %v6066_v38, %v11701_v18  ;;  %v13490_v38 = vld [vmem:[#allocation130_spill] sm:$0xff] }
 0x704   : > { %13480 = vst [vmem:[#allocation86_spill] sm:$0xff] %v12168_v44 }
 0x705   : > { %13481 = vst [vmem:[#allocation13_spill] sm:$0xff] %v12171_v31  ;;  %8147 = vmatmul.msk.bf16.gmra.mxu1 %vm365_vm3, %v11947_v9 }
 0x706   : > { %13482 = vst [vmem:[#allocation87_spill] sm:$0xff] %v12174_v5 }
 0x708   : > { %v6082_v42 = vpop.f32.mrf.mxu2 }
 0x709   : > { %v6101_v54 = vpop.f32.mrf.mxu3  ;;  %v12179_v51 = vadd.f32 %v6082_v42, %v11710_v62  ;;  %v12260_v45 = vpop.permute.xlu2 %7018 }
 0x70a   : > { %v12182_v40 = vadd.f32 %v6101_v54, %v11713_v8  ;;  %v6047_v0 = vpop.f32.mrf.mxu0  ;;  %v6068_v39 = vpop.f32.mrf.mxu1 }
 0x70b   : > { %13483 = vst [vmem:[#allocation14_spill] sm:$0xff] %v12179_v51  ;;  %v12185_v32 = vadd.f32 %v6047_v0, %v11716_v28  ;;  %v12188_v43 = vadd.f32 %v6068_v39, %v11719_v61  ;;  %v13494_v0 = vld [vmem:[#allocation59_spill] sm:$0xff] }
 0x70c   : > { %13484 = vst [vmem:[#allocation88_spill] sm:$0xff] %v12182_v40  ;;  %8145 = vmatmul.msk.bf16.gmra.mxu0 %vm365_vm3, %v11947_v9 }
 0x70d   : > { %13485 = vst [vmem:[#allocation15_spill] sm:$0xff] %v12185_v32  ;;  %8149 = vmatmul.msk.bf16.gmra.mxu2 %vm365_vm3, %v11947_v9 }
 0x70e   : > { %13486 = vst [vmem:[#allocation89_spill] sm:$0xff] %v12188_v43  ;;  %8151 = vmatmul.msk.bf16.gmra.mxu3 %vm365_vm3, %v11947_v9  ;;  %v13495_v43 = vld [vmem:[#allocation60_spill] sm:$0xff] }
 0x710   : > { %v6085_v18 = vpop.f32.mrf.mxu2 }
 0x711   : > { %v6104_v62 = vpop.f32.mrf.mxu3  ;;  %v12197_v8 = vadd.f32 %v6085_v18, %v11730_v36  ;;  %v7213_v36 = vld [vmem:[%s12631_s3] sm:$0x7] }
 0x712   : > { %v12200_v28 = vadd.f32 %v6104_v62, %v11733_v14  ;;  %v6049_v2 = vpop.f32.mrf.mxu0  ;;  %v6473_v60 = vpop.f32.mrf.mxu1  ;;  %v12221_v62 = vperm.slane %v7213_v36, 1  ;;  %v12241_v5 = vperm.slane %v7213_v36, 2 }
 0x713   : > { %13487 = vst [vmem:[#allocation16_spill] sm:$0xff] %v12197_v8  ;;  %v12203_v61 = vadd.f32 %v6049_v2, %v11736_v63  ;;  %v6902_v34 = vadd.f32 %v6473_v60, %v11739_v46  ;;  %v13492_v63 = vld [vmem:[#allocation58_spill] sm:$0xff]  ;;  %v12224_v60 = vperm.slane %v7213_v36, 0 }
 0x714   : > { %13488 = vst [vmem:[#allocation90_spill] sm:$0xff] %v12200_v28 }
 0x715   : > { %13489 = vst [vmem:[#allocation17_spill] sm:$0xff] %v12203_v61  ;;  %8154 = vmatmul.msk.bf16.vlgmr.msra.gmra.mxu1 %vm365_vm3, %v11898_v20  ;;  %v7022_v14 = vadd.f32 %v12206_v6, %v6902_v34 }
 0x717   : > { %v7118_v34 = vmax.f32 %v7022_v14, 0.0 }
 0x718   : > { %v6087_v24 = vpop.f32.mrf.mxu2 }
 0x719   : > { %v6106_v37 = vpop.f32.mrf.mxu3  ;;  %v12215_v42 = vadd.f32 %v6087_v24, %v13490_v38  ;;  %v12229_v24 = vpop.permute.xlu0 %7008 }
 0x71a   : > { %v12218_v54 = vadd.f32 %v6106_v37, %v13492_v63  ;;  %v6454_v46 = vpop.f32.mrf.mxu0  ;;  %v6475_v18 = vpop.f32.mrf.mxu1 }
 0x71b   : > { %13491 = vst [vmem:[#allocation91_spill] sm:$0xff] %v12215_v42  ;;  %v6901_v39 = vadd.f32 %v6454_v46, %v13494_v0  ;;  %v6926_v61 = vadd.f32 %v6475_v18, %v13495_v43  ;;  %v7224_v0 = vmul.f32 %v12221_v62, %v7118_v34  ;;  %v12245_v34 = vpop.permute.xlu1 %7013 }
 0x71c   : > { %13493 = vst [vmem:[#allocation18_spill] sm:$0xff] %v12218_v54  ;;  %8152 = vmatmul.msk.bf16.vlgmr.msra.gmra.mxu0 %vm365_vm3, %v11898_v20  ;;  %v13497_v54 = vld [vmem:[#allocation62_spill] sm:$0xff] }
 0x71d   : > { %v7021_v2 = vadd.f32 %v12206_v6, %v6901_v39  ;;  %8156 = vmatmul.msk.bf16.vlgmr.msra.gmra.mxu2 %vm365_vm3, %v11898_v20  ;;  %v7046_v43 = vadd.f32 %v12229_v24, %v6926_v61  ;;  %v13496_v39 = vld [vmem:[#allocation61_spill] sm:$0xff] }
 0x71e   : > { %8158 = vmatmul.msk.bf16.vlgmr.msra.gmra.mxu3 %vm365_vm3, %v11898_v20 }
 0x71f   : > { %v7117_v37 = vmax.f32 %v7021_v2, 0.0  ;;  %v7142_v51 = vmax.f32 %v7046_v43, 0.0 }
 0x720   : > { %v6492_v63 = vpop.f32.mrf.mxu2 }
 0x721   : > { %v7223_v38 = vmul.f32 %v12224_v60, %v7117_v37  ;;  %v6511_v46 = vpop.f32.mrf.mxu3  ;;  %v6903_v18 = vadd.f32 %v6492_v63, %v13496_v39  ;;  %v13498_v37 = vld [vmem:[#allocation134_spill] sm:$0xff]  ;;  %v7227_v36 = vmul.f32 %v12221_v62, %v7142_v51  ;;  %v13499_v39 = vld [vmem:[#allocation132_spill] sm:$0xff] }
 0x722   : > { %v6456_v14 = vpop.f32.mrf.mxu0  ;;  %v6478_v28 = vpop.f32.mrf.mxu1 }
 0x723   : > { %v6925_v42 = vadd.f32 %v6456_v14, %v13497_v54  ;;  %v7235_v8 = vadd.f32 %v7224_v0, %v7223_v38  ;;  %v7023_v32 = vadd.f32 %v12206_v6, %v6903_v18  ;;  %v6950_v40 = vadd.f32 %v6478_v28, %v13498_v37  ;;  %v13500_v18 = vld [vmem:[#allocation133_spill] sm:$0xff] }
 0x725   : > { %v7045_v2 = vadd.f32 %v12229_v24, %v6925_v42  ;;  %v7119_v33 = vmax.f32 %v7023_v32, 0.0  ;;  %8155 = vmatmul.msk.bf16.gmra.mxu1 %vm365_vm3, %v11947_v9  ;;  %v7070_v42 = vadd.f32 %v12245_v34, %v6950_v40 }
 0x727   : > { %v7141_v61 = vmax.f32 %v7045_v2, 0.0  ;;  %v7225_v54 = vmul.f32 %v12241_v5, %v7119_v33  ;;  %v7166_v51 = vmax.f32 %v7070_v42, 0.0 }
 0x728   : > { %v6494_v63 = vpop.f32.mrf.mxu2 }
 0x729   : > { %v7226_v38 = vmul.f32 %v12224_v60, %v7141_v61  ;;  %v6513_v0 = vpop.f32.mrf.mxu3  ;;  %v6927_v28 = vadd.f32 %v6494_v63, %v13499_v39  ;;  %v7236_v32 = vadd.f32 %v7235_v8, %v7225_v54  ;;  %v13501_v61 = vld [vmem:[#allocation64_spill] sm:$0xff]  ;;  %v7230_v39 = vmul.f32 %v12221_v62, %v7166_v51 }
 0x72a   : > { %v6459_v43 = vpop.f32.mrf.mxu0  ;;  %v6480_v37 = vpop.f32.mrf.mxu1 }
 0x72b   : > { %v6949_v14 = vadd.f32 %v6459_v43, %v13500_v18  ;;  %v7239_v31 = vadd.f32 %v7227_v36, %v7226_v38  ;;  %v7047_v2 = vadd.f32 %v12229_v24, %v6927_v28  ;;  %7237 = vadd.xlane.f32.xlu1 %v7236_v32  ;;  %v6974_v44 = vadd.f32 %v6480_v37, %v13501_v61 }
 0x72c   : > { %8153 = vmatmul.msk.bf16.gmra.mxu0 %vm365_vm3, %v11947_v9 }
 0x72d   : > { %v7069_v33 = vadd.f32 %v12245_v34, %v6949_v14  ;;  %v7143_v40 = vmax.f32 %v7047_v2, 0.0  ;;  %8157 = vmatmul.msk.bf16.gmra.mxu2 %vm365_vm3, %v11947_v9  ;;  %v7094_v42 = vadd.f32 %v12260_v45, %v6974_v44 }
 0x72e   : > { %8159 = vmatmul.msk.bf16.gmra.mxu3 %vm365_vm3, %v11947_v9 }
 0x72f   : > { %v7165_v8 = vmax.f32 %v7069_v33, 0.0  ;;  %v7228_v54 = vmul.f32 %v12241_v5, %v7143_v40  ;;  %v13502_v33 = vld [vmem:[#allocation131_spill] sm:$0xff] }
 0x730   : > { %v6497_v63 = vpop.f32.mrf.mxu2  ;;  %v6904_v61 = vadd.f32 %v6511_v46, %v13502_v33 }
 0x731   : > { %v7229_v38 = vmul.f32 %v12224_v60, %v7165_v8  ;;  %v6516_v36 = vpop.f32.mrf.mxu3  ;;  %v6951_v28 = vadd.f32 %v6497_v63, %v11810_v11  ;;  %v7240_v32 = vadd.f32 %v7239_v31, %v7228_v54  ;;  %v7190_v8 = vmax.f32 %v7094_v42, 0.0 }
 0x732   : > { %v6461_v43 = vpop.f32.mrf.mxu0  ;;  %v6549_v14 = vpop.f32.mrf.mxu1 }
 0x733   : > { %v6973_v18 = vadd.f32 %v6461_v43, %v11816_v57  ;;  %v7243_v37 = vadd.f32 %v7230_v39, %v7229_v38  ;;  %v7071_v2 = vadd.f32 %v12245_v34, %v6951_v28  ;;  %7241 = vadd.xlane.f32.xlu2 %v7240_v32  ;;  %v6906_v11 = vadd.f32 %v6549_v14, %v11820_v22  ;;  %v13503_v14 = vld [vmem:[#allocation63_spill] sm:$0xff] }
 0x734   : > { %v7024_v57 = vadd.f32 %v12206_v6, %v6904_v61  ;;  %v7233_v46 = vmul.f32 %v12221_v62, %v7190_v8 }
 0x735   : > { %v7093_v40 = vadd.f32 %v12260_v45, %v6973_v18  ;;  %v7167_v30 = vmax.f32 %v7071_v2, 0.0  ;;  %8162 = vmatmul.msk.bf16.vlgmr.msrb.gmra.mxu1 %vm365_vm3, %v11898_v20  ;;  %v7026_v28 = vadd.f32 %v12206_v6, %v6906_v11  ;;  %v6928_v2 = vadd.f32 %v6513_v0, %v13503_v14 }
 0x736   : > { %v7120_v18 = vmax.f32 %v7024_v57, 0.0  ;;  %v13504_v57 = vld [vmem:[#allocation66_spill] sm:$0xff] }
 0x737   : > { %v7189_v44 = vmax.f32 %v7093_v40, 0.0  ;;  %v7231_v31 = vmul.f32 %v12241_v5, %v7167_v30  ;;  %v7048_v8 = vadd.f32 %v12229_v24, %v6928_v2  ;;  %v13507_v2 = vld [vmem:[#allocation65_spill] sm:$0xff] }
 0x738   : > { %v6499_v54 = vpop.f32.mrf.mxu2  ;;  %v7262_v0 = vmul.f32 %v12224_v60, %v7120_v18 }
 0x739   : > { %v7232_v51 = vmul.f32 %v12224_v60, %v7189_v44  ;;  %v12281_v38 = vpop.f32.mrf.mxu3  ;;  %v6975_v63 = vadd.f32 %v6499_v54, %v11829_v13  ;;  %v7244_v42 = vadd.f32 %v7243_v37, %v7231_v31  ;;  %v13505_v54 = vld [vmem:[#allocation136_spill] sm:$0xff]  ;;  %v7144_v14 = vmax.f32 %v7048_v8, 0.0 }
 0x73a   : > { %v6530_v39 = vpop.f32.mrf.mxu0  ;;  %v6551_v22 = vpop.f32.mrf.mxu1 }
 0x73b   : > { %v6905_v43 = vadd.f32 %v6530_v39, %v11836_v59  ;;  %v7247_v32 = vadd.f32 %v7233_v46, %v7232_v51  ;;  %v7095_v30 = vadd.f32 %v12260_v45, %v6975_v63  ;;  %7245 = vadd.xlane.f32.xlu0 %v7244_v42  ;;  %v7122_v59 = vmax.f32 %v7026_v28, 0.0  ;;  %v13506_v42 = vld [vmem:[#allocation67_spill] sm:$0xff] }
 0x73c   : > { %8160 = vmatmul.msk.bf16.vlgmr.msrb.gmra.mxu0 %vm365_vm3, %v11898_v20  ;;  %v6930_v61 = vadd.f32 %v6551_v22, %v11841_v4  ;;  %v7265_v8 = vmul.f32 %v12224_v60, %v7144_v14 }
 0x73d   : > { %v7025_v33 = vadd.f32 %v12206_v6, %v6905_v43  ;;  %v7191_v13 = vmax.f32 %v7095_v30, 0.0  ;;  %8164 = vmatmul.msk.bf16.vlgmr.msrb.gmra.mxu2 %vm365_vm3, %v11898_v20  ;;  %v7264_v39 = vmul.f32 %v12241_v5, %v7122_v59 }
 0x73e   : > { %8166 = vmatmul.msk.bf16.vlgmr.msrb.gmra.mxu3 %vm365_vm3, %v11898_v20  ;;  %v7050_v4 = vadd.f32 %v12229_v24, %v6930_v61 }
 0x73f   : > { %v7121_v37 = vmax.f32 %v7025_v33, 0.0  ;;  %v7234_v40 = vmul.f32 %v12241_v5, %v7191_v13  ;;  %v6952_v33 = vadd.f32 %v6516_v36, %v13507_v2 }
 0x740   : > { %v6568_v11 = vpop.f32.mrf.mxu2  ;;  %v7146_v59 = vmax.f32 %v7050_v4, 0.0 }
 0x741   : > { %v7263_v44 = vmul.f32 %v12221_v62, %v7121_v37  ;;  %v6587_v31 = vpop.f32.mrf.mxu3  ;;  %v6907_v51 = vadd.f32 %v6568_v11, %v13504_v57  ;;  %v7248_v20 = vadd.f32 %v7247_v32, %v7234_v40  ;;  %v13508_v11 = vld [vmem:[#allocation137_spill] sm:$0xff]  ;;  %v7072_v36 = vadd.f32 %v12245_v34, %v6952_v33 }
 0x742   : > { %v6908_v46 = vadd.f32 %v6587_v31, %v13505_v54  ;;  %v6532_v63 = vpop.f32.mrf.mxu0  ;;  %v6554_v43 = vpop.f32.mrf.mxu1 }
 0x743   : > { %v6929_v28 = vadd.f32 %v6532_v63, %v13506_v42  ;;  %v7274_v22 = vadd.f32 %v7263_v44, %v7262_v0  ;;  %v7027_v30 = vadd.f32 %v12206_v6, %v6907_v51  ;;  %7249 = vadd.xlane.f32.xlu2 %v7248_v20  ;;  %v6954_v0 = vadd.f32 %v6554_v43, %v13508_v11  ;;  %v13510_v20 = vld [vmem:[#allocation138_spill] sm:$0xff] }
 0x744   : > { %v7028_v18 = vadd.f32 %v12206_v6, %v6908_v46  ;;  %v13509_v46 = vld [vmem:[#allocation68_spill] sm:$0xff] }
 0x745   : > { %v7049_v13 = vadd.f32 %v12229_v24, %v6929_v28  ;;  %v7275_v37 = vadd.f32 %v7274_v22, %v7264_v39  ;;  %v7123_v32 = vmax.f32 %v7027_v30, 0.0  ;;  %8163 = vmatmul.msk.bf16.gmra.mxu1 %vm365_vm3, %v11947_v9  ;;  %v7267_v28 = vmul.f32 %v12241_v5, %v7146_v59  ;;  %v13511_v22 = vld [vmem:[#allocation69_spill] sm:$0xff] }
 0x746   : > { %v7124_v40 = vmax.f32 %v7028_v18, 0.0  ;;  %v7074_v43 = vadd.f32 %v12245_v34, %v6954_v0 }
 0x747   : > { %v7145_v61 = vmax.f32 %v7049_v13, 0.0  ;;  %7276 = vadd.xlane.f32.xlu1 %v7275_v37  ;;  %v7301_v44 = vmul.f32 %v12224_v60, %v7123_v32  ;;  %v7168_v13 = vmax.f32 %v7072_v36, 0.0  ;;  %v13512_v37 = vld [vmem:[#allocation135_spill] sm:$0xff] }
 0x748   : > { %v7302_v31 = vmul.f32 %v12221_v62, %v7124_v40  ;;  %v6570_v51 = vpop.f32.mrf.mxu2  ;;  %v6976_v32 = vadd.f32 %v12281_v38, %v13512_v37  ;;  %v7170_v0 = vmax.f32 %v7074_v43, 0.0 }
 0x749   : > { %v7266_v57 = vmul.f32 %v12221_v62, %v7145_v61  ;;  %v6589_v54 = vpop.f32.mrf.mxu3  ;;  %v6931_v63 = vadd.f32 %v6570_v51, %v13509_v46 }
 0x74a   : > { %v6932_v39 = vadd.f32 %v6589_v54, %v13510_v20  ;;  %v6535_v4 = vpop.f32.mrf.mxu0  ;;  %v12320_v42 = vadd.f32 %v7302_v31, %v7301_v44  ;;  %v6556_v18 = vpop.f32.mrf.mxu1  ;;  %v13513_v31 = vld [vmem:[#allocation139_spill] sm:$0xff]  ;;  %v7096_v51 = vadd.f32 %v12260_v45, %v6976_v32  ;;  %v13514_v20 = vld [vmem:[#allocation70_spill] sm:$0xff] }
 0x74b   : > { %v6953_v30 = vadd.f32 %v6535_v4, %v13511_v22  ;;  %v7278_v14 = vadd.f32 %v7266_v57, %v7265_v8  ;;  %v7051_v2 = vadd.f32 %v12229_v24, %v6931_v63  ;;  %v6978_v8 = vadd.f32 %v6556_v18, %v13513_v31  ;;  %v13516_v18 = vld [vmem:[#allocation71_spill] sm:$0xff] }
 0x74c   : > { %v7052_v33 = vadd.f32 %v12229_v24, %v6932_v39  ;;  %8161 = vmatmul.msk.bf16.gmra.mxu0 %vm365_vm3, %v11947_v9  ;;  %v7268_v57 = vmul.f32 %v12224_v60, %v7168_v13  ;;  %v7270_v22 = vmul.f32 %v12241_v5, %v7170_v0  ;;  %v7192_v32 = vmax.f32 %v7096_v51, 0.0 }
 0x74d   : > { %v7073_v40 = vadd.f32 %v12245_v34, %v6953_v30  ;;  %v7279_v59 = vadd.f32 %v7278_v14, %v7267_v28  ;;  %v7147_v61 = vmax.f32 %v7051_v2, 0.0  ;;  %8165 = vmatmul.msk.bf16.gmra.mxu2 %vm365_vm3, %v11947_v9  ;;  %v7098_v30 = vadd.f32 %v12260_v45, %v6978_v8 }
 0x74e   : > { %v7148_v11 = vmax.f32 %v7052_v33, 0.0  ;;  %8167 = vmatmul.msk.bf16.gmra.mxu3 %vm365_vm3, %v11947_v9  ;;  %v13515_v9 = vld [vmem:[#allocation140_spill] sm:$0xff] }
 0x74f   : > { %v7169_v44 = vmax.f32 %v7073_v40, 0.0  ;;  %7280 = vadd.xlane.f32.xlu2 %v7279_v59  ;;  %v7304_v38 = vmul.f32 %v12224_v60, %v7147_v61 }
 0x750   : > { %v7305_v36 = vmul.f32 %v12221_v62, %v7148_v11  ;;  %v6573_v46 = vpop.f32.mrf.mxu2 }
 0x751   : > { %v7269_v54 = vmul.f32 %v12221_v62, %v7169_v44  ;;  %v6592_v63 = vpop.f32.mrf.mxu3  ;;  %v6955_v39 = vadd.f32 %v6573_v46, %v13514_v20  ;;  %v7194_v44 = vmax.f32 %v7098_v30, 0.0  ;;  %v13517_v46 = vld [vmem:[#allocation72_spill] sm:$0xff] }
 0x752   : > { %v6956_v4 = vadd.f32 %v6592_v63, %v13515_v9  ;;  %v6537_v28 = vpop.f32.mrf.mxu0  ;;  %v12344_v43 = vadd.f32 %v7305_v36, %v7304_v38  ;;  %v6625_v2 = vpop.f32.mrf.mxu1  ;;  %v7271_v38 = vmul.f32 %v12224_v60, %v7192_v32  ;;  %v13518_v63 = vld [vmem:[#allocation142_spill] sm:$0xff] }
 0x753   : > { %v6977_v14 = vadd.f32 %v6537_v28, %v13516_v18  ;;  %v7282_v33 = vadd.f32 %v7269_v54, %v7268_v57  ;;  %v7075_v13 = vadd.f32 %v12245_v34, %v6955_v39  ;;  %v13519_v28 = vld [vmem:[#allocation143_spill] sm:$0xff] }
 0x754   : > { %v7076_v37 = vadd.f32 %v12245_v34, %v6956_v4  ;;  %v7273_v4 = vmul.f32 %v12241_v5, %v7194_v44 }
 0x755   : > { %v7097_v40 = vadd.f32 %v12260_v45, %v6977_v14  ;;  %v7283_v59 = vadd.f32 %v7282_v33, %v7270_v22  ;;  %v7171_v61 = vmax.f32 %v7075_v13, 0.0  ;;  %v13520_v14 = vld [vmem:[#allocation141_spill] sm:$0xff] }
 0x756   : > { %v7172_v11 = vmax.f32 %v7076_v37, 0.0  ;;  %v6910_v33 = vadd.f32 %v6625_v2, %v13520_v14 }
 0x757   : > { %v7193_v31 = vmax.f32 %v7097_v40, 0.0  ;;  %7284 = vadd.xlane.f32.xlu0 %v7283_v59  ;;  %v7307_v0 = vmul.f32 %v12224_v60, %v7171_v61 }
 0x758   : > { %v7308_v8 = vmul.f32 %v12221_v62, %v7172_v11  ;;  %v6575_v57 = vpop.f32.mrf.mxu2 }
 0x759   : > { %v7272_v36 = vmul.f32 %v12221_v62, %v7193_v31  ;;  %v6594_v54 = vpop.f32.mrf.mxu3  ;;  %v6979_v51 = vadd.f32 %v6575_v57, %v13517_v46  ;;  %v7030_v31 = vadd.f32 %v12206_v6, %v6910_v33 }
 0x75a   : > { %v6980_v20 = vadd.f32 %v6594_v54, %v13518_v63  ;;  %v6606_v39 = vpop.f32.mrf.mxu0  ;;  %v12358_v9 = vadd.f32 %v7308_v8, %v7307_v0  ;;  %v6627_v30 = vpop.f32.mrf.mxu1  ;;  %v13522_v54 = vld [vmem:[#allocation75_spill] sm:$0xff] }
 0x75b   : > { %v6909_v22 = vadd.f32 %v6606_v39, %v13519_v28  ;;  %v7286_v18 = vadd.f32 %v7272_v36, %v7271_v38  ;;  %v7099_v13 = vadd.f32 %v12260_v45, %v6979_v51  ;;  %v13521_v36 = vld [vmem:[#allocation74_spill] sm:$0xff] }
 0x75c   : > { %v7100_v37 = vadd.f32 %v12260_v45, %v6980_v20  ;;  %v13523_v20 = vld [vmem:[#allocation2_spill] sm:$0xff] }
 0x75d   : > { %v7029_v32 = vadd.f32 %v12206_v6, %v6909_v22  ;;  %v7287_v40 = vadd.f32 %v7286_v18, %v7273_v4  ;;  %v7195_v59 = vmax.f32 %v7099_v13, 0.0  ;;  %v7126_v22 = vmax.f32 %v7030_v31, 0.0  ;;  %v13524_v18 = vld [vmem:[#allocation73_spill] sm:$0xff] }
 0x75e   : > { %v7196_v61 = vmax.f32 %v7100_v37, 0.0  ;;  %v6934_v14 = vadd.f32 %v6627_v30, %v13524_v18 }
 0x75f   : > { %v7125_v11 = vmax.f32 %v7029_v32, 0.0  ;;  %7288 = vadd.xlane.f32.xlu1 %v7287_v40  ;;  %v7310_v44 = vmul.f32 %v12224_v60, %v7195_v59 }
 0x760   : > { %v7311_v0 = vmul.f32 %v12221_v62, %v7196_v61  ;;  %v6644_v2 = vpop.f32.mrf.mxu2  ;;  %v7340_v61 = vmul.f32 %v12224_v60, %v7126_v22 }
 0x761   : > { %v7303_v8 = vmul.f32 %v12241_v5, %v7125_v11  ;;  %v6663_v38 = vpop.f32.mrf.mxu3  ;;  %v6911_v57 = vadd.f32 %v6644_v2, %v13521_v36  ;;  %v7054_v11 = vadd.f32 %v12229_v24, %v6934_v14 }
 0x762   : > { %v6912_v46 = vadd.f32 %v6663_v38, %v13522_v54  ;;  %v6608_v51 = vpop.f32.mrf.mxu0  ;;  %v12372_v63 = vadd.f32 %v7311_v0, %v7310_v44  ;;  %v6630_v4 = vpop.f32.mrf.mxu1 }
 0x763   : > { %v6933_v39 = vadd.f32 %v6608_v51, %v13523_v20  ;;  %v7314_v28 = vadd.f32 %v12320_v42, %v7303_v8  ;;  %v7031_v33 = vadd.f32 %v12206_v6, %v6911_v57  ;;  %v13525_v57 = vld [vmem:[#allocation76_spill] sm:$0xff] }
 0x764   : > { %v7032_v13 = vadd.f32 %v12206_v6, %v6912_v46  ;;  %v6958_v54 = vadd.f32 %v6630_v4, %v13525_v57 }
 0x765   : > { %v7053_v37 = vadd.f32 %v12229_v24, %v6933_v39  ;;  %7315 = vadd.xlane.f32.xlu2 %v7314_v28  ;;  %v7127_v32 = vmax.f32 %v7031_v33, 0.0  ;;  %v7150_v39 = vmax.f32 %v7054_v11, 0.0 }
 0x766   : > { %v7128_v40 = vmax.f32 %v7032_v13, 0.0  ;;  %v7078_v33 = vadd.f32 %v12245_v34, %v6958_v54 }
 0x767   : > { %v7149_v59 = vmax.f32 %v7053_v37, 0.0  ;;  %v7341_v44 = vmul.f32 %v12221_v62, %v7127_v32  ;;  %v7343_v4 = vmul.f32 %v12224_v60, %v7150_v39 }
 0x768   : > { %v6646_v31 = vpop.f32.mrf.mxu2  ;;  %v7342_v0 = vmul.f32 %v12241_v5, %v7128_v40 }
 0x769   : > { %v7306_v42 = vmul.f32 %v12241_v5, %v7149_v59  ;;  %v6665_v30 = vpop.f32.mrf.mxu3  ;;  %v6935_v8 = vadd.f32 %v6646_v31, %v11960_v15  ;;  %v7352_v36 = vadd.f32 %v7341_v44, %v7340_v61  ;;  %v13526_v61 = vld [vmem:[#allocation77_spill] sm:$0xff]  ;;  %v7174_v31 = vmax.f32 %v7078_v33, 0.0 }
 0x76a   : > { %v6936_v2 = vadd.f32 %v6665_v30, %v11963_v23  ;;  %v6611_v38 = vpop.f32.mrf.mxu0  ;;  %v6632_v51 = vpop.f32.mrf.mxu1 }
 0x76b   : > { %v6957_v46 = vadd.f32 %v6611_v38, %v11966_v17  ;;  %v7318_v20 = vadd.f32 %v12344_v43, %v7306_v42  ;;  %v7055_v28 = vadd.f32 %v12229_v24, %v6935_v8  ;;  %v7353_v18 = vadd.f32 %v7352_v36, %v7342_v0 }
 0x76c   : > { %v7056_v22 = vadd.f32 %v12229_v24, %v6936_v2  ;;  %v13527_v2 = vld [vmem:[#allocation3_spill] sm:$0xff] }
 0x76d   : > { %v7077_v14 = vadd.f32 %v12245_v34, %v6957_v46  ;;  %7319 = vadd.xlane.f32.xlu0 %v7318_v20  ;;  %v7151_v15 = vmax.f32 %v7055_v28, 0.0  ;;  %v6982_v38 = vadd.f32 %v6632_v51, %v13527_v2 }
 0x76e   : > { %v7152_v23 = vmax.f32 %v7056_v22, 0.0 }
 0x76f   : > { %v7173_v13 = vmax.f32 %v7077_v14, 0.0  ;;  %v7344_v17 = vmul.f32 %v12221_v62, %v7151_v15 }
 0x770   : > { %v6649_v37 = vpop.f32.mrf.mxu2  ;;  %v7345_v40 = vmul.f32 %v12241_v5, %v7152_v23 }
 0x771   : > { %v7309_v43 = vmul.f32 %v12241_v5, %v7173_v13  ;;  %v6668_v32 = vpop.f32.mrf.mxu3  ;;  %v6959_v59 = vadd.f32 %v6649_v37, %v11979_v19  ;;  %v7356_v42 = vadd.f32 %v7344_v17, %v7343_v4  ;;  %v13528_v19 = vld [vmem:[#allocation4_spill] sm:$0xff]  ;;  %v13529_v37 = vld [vmem:[#allocation78_spill] sm:$0xff] }
 0x772   : > { %v6960_v11 = vadd.f32 %v6668_v32, %v13526_v61  ;;  %v6613_v44 = vpop.f32.mrf.mxu0  ;;  %v6701_v0 = vpop.f32.mrf.mxu1 }
 0x773   : > { %v6981_v30 = vadd.f32 %v6613_v44, %v11988_v12  ;;  %v7322_v8 = vadd.f32 %v12358_v9, %v7309_v43  ;;  %v7079_v36 = vadd.f32 %v12245_v34, %v6959_v59  ;;  %v7357_v54 = vadd.f32 %v7356_v42, %v7345_v40 }
 0x774   : > { %v7080_v57 = vadd.f32 %v12245_v34, %v6960_v11  ;;  %v6914_v20 = vadd.f32 %v6701_v0, %v13528_v19  ;;  %v7346_v12 = vmul.f32 %v12224_v60, %v7174_v31  ;;  %v7102_v9 = vadd.f32 %v12260_v45, %v6982_v38  ;;  %v13530_v0 = vld [vmem:[#allocation5_spill] sm:$0xff] }
 0x775   : > { %v7101_v46 = vadd.f32 %v12260_v45, %v6981_v30  ;;  %7354 = vadd.xlane.f32.xlu0 %v7353_v18  ;;  %7323 = vadd.xlane.f32.xlu1 %v7322_v8  ;;  %v7175_v39 = vmax.f32 %v7079_v36, 0.0 }
 0x776   : > { %v7176_v28 = vmax.f32 %v7080_v57, 0.0  ;;  %v7034_v15 = vadd.f32 %v12206_v6, %v6914_v20  ;;  %v7198_v61 = vmax.f32 %v7102_v9, 0.0 }
 0x777   : > { %v7197_v22 = vmax.f32 %v7101_v46, 0.0  ;;  %v7347_v51 = vmul.f32 %v12221_v62, %v7175_v39 }
 0x778   : > { %v6651_v23 = vpop.f32.mrf.mxu2  ;;  %v7348_v13 = vmul.f32 %v12241_v5, %v7176_v28  ;;  %v7130_v31 = vmax.f32 %v7034_v15, 0.0  ;;  %v7349_v38 = vmul.f32 %v12224_v60, %v7198_v61 }
 0x779   : > { %v7312_v14 = vmul.f32 %v12241_v5, %v7197_v22  ;;  %v6670_v33 = vpop.f32.mrf.mxu3  ;;  %v6983_v18 = vadd.f32 %v6651_v23, %v11999_v52  ;;  %v7360_v43 = vadd.f32 %v7347_v51, %v7346_v12 }
 0x77a   : > { %v6984_v4 = vadd.f32 %v6670_v33, %v12002_v26  ;;  %v6682_v17 = vpop.f32.mrf.mxu0  ;;  %v6703_v40 = vpop.f32.mrf.mxu1  ;;  %v7380_v36 = vmul.f32 %v12221_v62, %v7130_v31 }
 0x77b   : > { %v6913_v32 = vadd.f32 %v6682_v17, %v13529_v37  ;;  %v7326_v59 = vadd.f32 %v12372_v63, %v7312_v14  ;;  %v7103_v11 = vadd.f32 %v12260_v45, %v6983_v18  ;;  %v7361_v42 = vadd.f32 %v7360_v43, %v7348_v13 }
 0x77c   : > { %v7104_v44 = vadd.f32 %v12260_v45, %v6984_v4  ;;  %v6938_v52 = vadd.f32 %v6703_v40, %v13530_v0 }
 0x77d   : > { %v7033_v30 = vadd.f32 %v12206_v6, %v6913_v32  ;;  %7358 = vadd.xlane.f32.xlu1 %v7357_v54  ;;  %7327 = vadd.xlane.f32.xlu2 %v7326_v59  ;;  %v7199_v26 = vmax.f32 %v7103_v11, 0.0  ;;  %v13531_v11 = vld [vmem:[#allocation80_spill] sm:$0xff] }
 0x77e   : > { %v7200_v8 = vmax.f32 %v7104_v44, 0.0  ;;  %v7058_v46 = vadd.f32 %v12229_v24, %v6938_v52  ;;  %v13532_v52 = vld [vmem:[#allocation7_spill] sm:$0xff] }
 0x77f   : > { %v7129_v2 = vmax.f32 %v7033_v30, 0.0  ;;  %v7350_v63 = vmul.f32 %v12221_v62, %v7199_v26 }
 0x780   : > { %v6720_v19 = vpop.f32.mrf.mxu2  ;;  %v7351_v39 = vmul.f32 %v12241_v5, %v7200_v8  ;;  %v7154_v23 = vmax.f32 %v7058_v46, 0.0 }
 0x781   : > { %v7379_v57 = vmul.f32 %v12224_v60, %v7129_v2  ;;  %v6739_v20 = vpop.f32.mrf.mxu3  ;;  %v6915_v54 = vadd.f32 %v6720_v19, %v12019_v55  ;;  %v7364_v22 = vadd.f32 %v7350_v63, %v7349_v38 }
 0x782   : > { %v6684_v28 = vpop.f32.mrf.mxu0  ;;  %v6706_v9 = vpop.f32.mrf.mxu1  ;;  %v7383_v17 = vmul.f32 %v12221_v62, %v7154_v23 }
 0x783   : > { %v6937_v12 = vadd.f32 %v6684_v28, %v12025_v48  ;;  %v7391_v51 = vadd.f32 %v7380_v36, %v7379_v57  ;;  %v7035_v14 = vadd.f32 %v12206_v6, %v6915_v54  ;;  %v7365_v15 = vadd.f32 %v7364_v22, %v7351_v39 }
 0x784   : > { %v6962_v13 = vadd.f32 %v6706_v9, %v12028_v58 }
 0x785   : > { %v7057_v33 = vadd.f32 %v12229_v24, %v6937_v12  ;;  %7362 = vadd.xlane.f32.xlu2 %v7361_v42  ;;  %v7131_v18 = vmax.f32 %v7035_v14, 0.0  ;;  %7366 = vadd.xlane.f32.xlu1 %v7365_v15 }
 0x786   : > { %v7082_v43 = vadd.f32 %v12245_v34, %v6962_v13 }
 0x787   : > { %v7153_v4 = vmax.f32 %v7057_v33, 0.0  ;;  %v7381_v55 = vmul.f32 %v12241_v5, %v7131_v18 }
 0x788   : > { %v6722_v37 = vpop.f32.mrf.mxu2  ;;  %v7178_v30 = vmax.f32 %v7082_v43, 0.0 }
 0x789   : > { %v7382_v48 = vmul.f32 %v12224_v60, %v7153_v4  ;;  %v6741_v32 = vpop.f32.mrf.mxu3  ;;  %v6939_v40 = vadd.f32 %v6722_v37, %v12035_v47  ;;  %v7392_v61 = vadd.f32 %v7391_v51, %v7381_v55  ;;  %v13533_v51 = vld [vmem:[#allocation79_spill] sm:$0xff] }
 0x78a   : > { %v6687_v59 = vpop.f32.mrf.mxu0  ;;  %v6708_v44 = vpop.f32.mrf.mxu1  ;;  %v7386_v47 = vmul.f32 %v12221_v62, %v7178_v30  ;;  %v6916_v14 = vadd.f32 %v6739_v20, %v13533_v51  ;;  %v13535_v51 = vld [vmem:[#allocation81_spill] sm:$0xff] }
 0x78b   : > { %v6961_v58 = vadd.f32 %v6687_v59, %v13531_v11  ;;  %v7395_v42 = vadd.f32 %v7383_v17, %v7382_v48  ;;  %v7059_v31 = vadd.f32 %v12229_v24, %v6939_v40  ;;  %v6986_v26 = vadd.f32 %v6708_v44, %v13532_v52  ;;  %v13534_v44 = vld [vmem:[#allocation6_spill] sm:$0xff] }
 0x78c   : > { %v7036_v4 = vadd.f32 %v12206_v6, %v6916_v14 }
 0x78d   : > { %v7081_v0 = vadd.f32 %v12245_v34, %v6961_v58  ;;  %7393 = vadd.xlane.f32.xlu2 %v7392_v61  ;;  %v7155_v8 = vmax.f32 %v7059_v31, 0.0  ;;  %v7106_v36 = vadd.f32 %v12260_v45, %v6986_v26 }
 0x78e   : > { %v7132_v58 = vmax.f32 %v7036_v4, 0.0 }
 0x78f   : > { %v7177_v2 = vmax.f32 %v7081_v0, 0.0  ;;  %v7384_v38 = vmul.f32 %v12241_v5, %v7155_v8  ;;  %v7202_v15 = vmax.f32 %v7106_v36, 0.0 }
 0x790   : > { %v6725_v57 = vpop.f32.mrf.mxu2  ;;  %v7418_v8 = vmul.f32 %v12224_v60, %v7132_v58 }
 0x791   : > { %v7385_v63 = vmul.f32 %v12224_v60, %v7177_v2  ;;  %v6744_v46 = vpop.f32.mrf.mxu3  ;;  %v6963_v19 = vadd.f32 %v6725_v57, %v12054_v10  ;;  %v7396_v54 = vadd.f32 %v7395_v42, %v7384_v38  ;;  %v6940_v42 = vadd.f32 %v6741_v32, %v13534_v44 }
 0x792   : > { %v6689_v39 = vpop.f32.mrf.mxu0  ;;  %v6777_v22 = vpop.f32.mrf.mxu1 }
 0x793   : > { %v6985_v28 = vadd.f32 %v6689_v39, %v12060_v1  ;;  %v7399_v12 = vadd.f32 %v7386_v47, %v7385_v63  ;;  %v7083_v9 = vadd.f32 %v12245_v34, %v6963_v19  ;;  %7397 = vadd.xlane.f32.xlu1 %v7396_v54  ;;  %v6918_v18 = vadd.f32 %v6777_v22, %v12064_v21 }
 0x794   : > { %v7389_v1 = vmul.f32 %v12221_v62, %v7202_v15 }
 0x795   : > { %v7105_v23 = vadd.f32 %v12260_v45, %v6985_v28  ;;  %v7179_v33 = vmax.f32 %v7083_v9, 0.0  ;;  %v7038_v40 = vadd.f32 %v12206_v6, %v6918_v18 }
 0x797   : > { %v7201_v13 = vmax.f32 %v7105_v23, 0.0  ;;  %v7387_v10 = vmul.f32 %v12241_v5, %v7179_v33  ;;  %v7134_v0 = vmax.f32 %v7038_v40, 0.0 }
 0x798   : > { %v6727_v17 = vpop.f32.mrf.mxu2 }
 0x799   : > { %v7388_v55 = vmul.f32 %v12224_v60, %v7201_v13  ;;  %v12455_v48 = vpop.f32.mrf.mxu3  ;;  %v6987_v20 = vadd.f32 %v6727_v17, %v12071_v50  ;;  %v7400_v37 = vadd.f32 %v7399_v12, %v7387_v10  ;;  %v7420_v19 = vmul.f32 %v12241_v5, %v7134_v0 }
 0x79a   : > { %v6758_v43 = vpop.f32.mrf.mxu0  ;;  %v6779_v21 = vpop.f32.mrf.mxu1 }
 0x79b   : > { %v6917_v59 = vadd.f32 %v6758_v43, %v12077_v27  ;;  %v7403_v61 = vadd.f32 %v7389_v1, %v7388_v55  ;;  %v7107_v11 = vadd.f32 %v12260_v45, %v6987_v20  ;;  %7401 = vadd.xlane.f32.xlu2 %v7400_v37  ;;  %v6942_v50 = vadd.f32 %v6779_v21, %v12082_v25  ;;  %v13536_v20 = vld [vmem:[#allocation82_spill] sm:$0xff]  ;;  %v13537_v37 = vld [vmem:[#allocation9_spill] sm:$0xff] }
 0x79c   : > { %v7060_v27 = vadd.f32 %v12229_v24, %v6940_v42 }
 0x79d   : > { %v7037_v31 = vadd.f32 %v12206_v6, %v6917_v59  ;;  %v7203_v30 = vmax.f32 %v7107_v11, 0.0  ;;  %v7062_v25 = vadd.f32 %v12229_v24, %v6942_v50  ;;  %v13538_v11 = vld [vmem:[#allocation83_spill] sm:$0xff] }
 0x79e   : > { %v7156_v9 = vmax.f32 %v7060_v27, 0.0 }
 0x79f   : > { %v7133_v52 = vmax.f32 %v7037_v31, 0.0  ;;  %v7390_v26 = vmul.f32 %v12241_v5, %v7203_v30  ;;  %v7158_v33 = vmax.f32 %v7062_v25, 0.0 }
 0x7a0   : > { %v6796_v38 = vpop.f32.mrf.mxu2  ;;  %v7421_v4 = vmul.f32 %v12224_v60, %v7156_v9 }
 0x7a1   : > { %v7419_v2 = vmul.f32 %v12221_v62, %v7133_v52  ;;  %v6815_v47 = vpop.f32.mrf.mxu3  ;;  %v6919_v63 = vadd.f32 %v6796_v38, %v12093_v3  ;;  %v7404_v57 = vadd.f32 %v7403_v61, %v7390_v26  ;;  %v6964_v3 = vadd.f32 %v6744_v46, %v13535_v51  ;;  %v13539_v52 = vld [vmem:[#allocation8_spill] sm:$0xff] }
 0x7a2   : > { %v6920_v32 = vadd.f32 %v6815_v47, %v12096_v49  ;;  %v6760_v36 = vpop.f32.mrf.mxu0  ;;  %v6782_v54 = vpop.f32.mrf.mxu1  ;;  %v6988_v50 = vadd.f32 %v12455_v48, %v13539_v52 }
 0x7a3   : > { %v6941_v39 = vadd.f32 %v6760_v36, %v12099_v35  ;;  %v7430_v28 = vadd.f32 %v7419_v2, %v7418_v8  ;;  %v7039_v22 = vadd.f32 %v12206_v6, %v6919_v63  ;;  %7405 = vadd.xlane.f32.xlu1 %v7404_v57  ;;  %v6966_v18 = vadd.f32 %v6782_v54, %v12102_v29  ;;  %v13540_v63 = vld [vmem:[#allocation10_spill] sm:$0xff] }
 0x7a4   : > { %v7040_v12 = vadd.f32 %v12206_v6, %v6920_v32  ;;  %v7084_v1 = vadd.f32 %v12245_v34, %v6964_v3  ;;  %v7423_v29 = vmul.f32 %v12241_v5, %v7158_v33  ;;  %v7108_v25 = vadd.f32 %v12260_v45, %v6988_v50 }
 0x7a5   : > { %v7061_v49 = vadd.f32 %v12229_v24, %v6941_v39  ;;  %v7431_v14 = vadd.f32 %v7430_v28, %v7420_v19  ;;  %v7135_v15 = vmax.f32 %v7039_v22, 0.0  ;;  %v7086_v61 = vadd.f32 %v12245_v34, %v6966_v18  ;;  %v13541_v22 = vld [vmem:[#allocation84_spill] sm:$0xff] }
 0x7a6   : > { %v7136_v23 = vmax.f32 %v7040_v12, 0.0  ;;  %v7180_v0 = vmax.f32 %v7084_v1, 0.0  ;;  %v7204_v18 = vmax.f32 %v7108_v25, 0.0 }
 0x7a7   : > { %v7157_v13 = vmax.f32 %v7061_v49, 0.0  ;;  %7432 = vadd.xlane.f32.xlu0 %v7431_v14  ;;  %v7457_v35 = vmul.f32 %v12224_v60, %v7135_v15  ;;  %v7182_v38 = vmax.f32 %v7086_v61, 0.0 }
 0x7a8   : > { %v7458_v10 = vmul.f32 %v12221_v62, %v7136_v23  ;;  %v6798_v55 = vpop.f32.mrf.mxu2  ;;  %v7424_v19 = vmul.f32 %v12224_v60, %v7180_v0 }
 0x7a9   : > { %v7422_v46 = vmul.f32 %v12221_v62, %v7157_v13  ;;  %v6817_v17 = vpop.f32.mrf.mxu3  ;;  %v6943_v43 = vadd.f32 %v6798_v55, %v13536_v20  ;;  %v7426_v3 = vmul.f32 %v12241_v5, %v7182_v38 }
 0x7aa   : > { %v6944_v40 = vadd.f32 %v6817_v17, %v13537_v37  ;;  %v6763_v59 = vpop.f32.mrf.mxu0  ;;  %v12485_v21 = vadd.f32 %v7458_v10, %v7457_v35  ;;  %v6784_v44 = vpop.f32.mrf.mxu1 }
 0x7ab   : > { %v6965_v58 = vadd.f32 %v6763_v59, %v13538_v11  ;;  %v7434_v42 = vadd.f32 %v7422_v46, %v7421_v4  ;;  %v7063_v31 = vadd.f32 %v12229_v24, %v6943_v43  ;;  %v6990_v32 = vadd.f32 %v6784_v44, %v13540_v63 }
 0x7ac   : > { %v7064_v30 = vadd.f32 %v12229_v24, %v6944_v40 }
 0x7ad   : > { %v7085_v26 = vadd.f32 %v12245_v34, %v6965_v58  ;;  %v7435_v8 = vadd.f32 %v7434_v42, %v7423_v29  ;;  %v7159_v27 = vmax.f32 %v7063_v31, 0.0  ;;  %v7110_v49 = vadd.f32 %v12260_v45, %v6990_v32  ;;  %v13542_v42 = vld [vmem:[#allocation11_spill] sm:$0xff]  ;;  %v13543_v32 = vld [vmem:[#allocation12_spill] sm:$0xff] }
 0x7ae   : > { %v7160_v2 = vmax.f32 %v7064_v30, 0.0 }
 0x7af   : > { %v7181_v47 = vmax.f32 %v7085_v26, 0.0  ;;  %7436 = vadd.xlane.f32.xlu1 %v7435_v8  ;;  %v7460_v36 = vmul.f32 %v12224_v60, %v7159_v27  ;;  %v7206_v1 = vmax.f32 %v7110_v49, 0.0 }
 0x7b0   : > { %v7461_v57 = vmul.f32 %v12221_v62, %v7160_v2  ;;  %v6801_v39 = vpop.f32.mrf.mxu2 }
 0x7b1   : > { %v7425_v48 = vmul.f32 %v12221_v62, %v7181_v47  ;;  %v6820_v54 = vpop.f32.mrf.mxu3  ;;  %v6967_v28 = vadd.f32 %v6801_v39, %v12126_v7  ;;  %v7429_v11 = vmul.f32 %v12241_v5, %v7206_v1  ;;  %v13545_v39 = vld [vmem:[#allocation13_spill] sm:$0xff] }
 0x7b2   : > { %v6968_v12 = vadd.f32 %v6820_v54, %v13541_v22  ;;  %v6765_v9 = vpop.f32.mrf.mxu0  ;;  %v12503_v51 = vadd.f32 %v7461_v57, %v7460_v36  ;;  %v6853_v15 = vpop.f32.mrf.mxu1  ;;  %v13544_v57 = vld [vmem:[#allocation86_spill] sm:$0xff] }
 0x7b3   : > { %v6989_v14 = vadd.f32 %v6765_v9, %v12132_v16  ;;  %v7438_v23 = vadd.f32 %v7425_v48, %v7424_v19  ;;  %v7087_v33 = vadd.f32 %v12245_v34, %v6967_v28  ;;  %v7427_v16 = vmul.f32 %v12224_v60, %v7204_v18 }
 0x7b4   : > { %v7088_v13 = vadd.f32 %v12245_v34, %v6968_v12  ;;  %v6922_v31 = vadd.f32 %v6853_v15, %v13542_v42  ;;  %v13546_v12 = vld [vmem:[#allocation85_spill] sm:$0xff] }
 0x7b5   : > { %v7109_v7 = vadd.f32 %v12260_v45, %v6989_v14  ;;  %v7439_v35 = vadd.f32 %v7438_v23, %v7426_v3  ;;  %v7183_v10 = vmax.f32 %v7087_v33, 0.0 }
 0x7b6   : > { %v7184_v4 = vmax.f32 %v7088_v13, 0.0  ;;  %v7042_v27 = vadd.f32 %v12206_v6, %v6922_v31 }
 0x7b7   : > { %v7205_v46 = vmax.f32 %v7109_v7, 0.0  ;;  %7440 = vadd.xlane.f32.xlu0 %v7439_v35  ;;  %v7463_v55 = vmul.f32 %v12224_v60, %v7183_v10 }
 0x7b8   : > { %v7464_v17 = vmul.f32 %v12221_v62, %v7184_v4  ;;  %v6803_v43 = vpop.f32.mrf.mxu2  ;;  %v7138_v22 = vmax.f32 %v7042_v27, 0.0 }
 0x7b9   : > { %v7428_v20 = vmul.f32 %v12221_v62, %v7205_v46  ;;  %v6822_v37 = vpop.f32.mrf.mxu3  ;;  %v6991_v40 = vadd.f32 %v6803_v43, %v12144_v41  ;;  %v13549_v43 = vld [vmem:[#allocation87_spill] sm:$0xff] }
 0x7ba   : > { %v6992_v59 = vadd.f32 %v6822_v37, %v12147_v53  ;;  %v6834_v29 = vpop.f32.mrf.mxu0  ;;  %v12517_v61 = vadd.f32 %v7464_v17, %v7463_v55  ;;  %v6855_v52 = vpop.f32.mrf.mxu1  ;;  %v7496_v18 = vmul.f32 %v12224_v60, %v7138_v22  ;;  %v13548_v55 = vld [vmem:[#allocation88_spill] sm:$0xff] }
 0x7bb   : > { %v6921_v58 = vadd.f32 %v6834_v29, %v12150_v56  ;;  %v7442_v44 = vadd.f32 %v7428_v20, %v7427_v16  ;;  %v7111_v30 = vadd.f32 %v12260_v45, %v6991_v40  ;;  %v6946_v9 = vadd.f32 %v6855_v52, %v13546_v12  ;;  %v13550_v40 = vld [vmem:[#allocation15_spill] sm:$0xff] }
 0x7bc   : > { %v7112_v0 = vadd.f32 %v12260_v45, %v6992_v59 }
 0x7bd   : > { %v7041_v50 = vadd.f32 %v12206_v6, %v6921_v58  ;;  %v7443_v41 = vadd.f32 %v7442_v44, %v7429_v11  ;;  %v7207_v26 = vmax.f32 %v7111_v30, 0.0  ;;  %v7066_v7 = vadd.f32 %v12229_v24, %v6946_v9 }
 0x7be   : > { %v7208_v53 = vmax.f32 %v7112_v0, 0.0 }
 0x7bf   : > { %v7137_v8 = vmax.f32 %v7041_v50, 0.0  ;;  %7444 = vadd.xlane.f32.xlu1 %v7443_v41  ;;  %v7466_v2 = vmul.f32 %v12224_v60, %v7207_v26  ;;  %v7162_v11 = vmax.f32 %v7066_v7, 0.0  ;;  %v13555_v7 = vld [vmem:[#allocation91_spill] sm:$0xff] }
 0x7c0   : > { %v7467_v56 = vmul.f32 %v12221_v62, %v7208_v53  ;;  %v6872_v47 = vpop.f32.mrf.mxu2 }
 0x7c1   : > { %v7459_v38 = vmul.f32 %v12241_v5, %v7137_v8  ;;  %v6891_v63 = vpop.f32.mrf.mxu3  ;;  %v6923_v36 = vadd.f32 %v6872_v47, %v13543_v32  ;;  %v7499_v41 = vmul.f32 %v12224_v60, %v7162_v11  ;;  %v7238_v11 = vpop.xlane.xlu1 %7237 }
 0x7c2   : > { %v6924_v19 = vadd.f32 %v6891_v63, %v13544_v57  ;;  %v6836_v25 = vpop.f32.mrf.mxu0  ;;  %v12531_v48 = vadd.f32 %v7467_v56, %v7466_v2  ;;  %v6858_v33 = vpop.f32.mrf.mxu1  ;;  %v13551_v2 = vld [vmem:[#allocation16_spill] sm:$0xff]  ;;  %v13553_v57 = vld [vmem:[#allocation17_spill] sm:$0xff] }
 0x7c3   : > { %v6945_v54 = vadd.f32 %v6836_v25, %v13545_v39  ;;  %v7470_v28 = vadd.f32 %v12485_v21, %v7459_v38  ;;  %v7043_v3 = vadd.f32 %v12206_v6, %v6923_v36  ;;  %v6970_v37 = vadd.f32 %v6858_v33, %v13549_v43  ;;  %v13552_v38 = vld [vmem:[#allocation90_spill] sm:$0xff]  ;;  %v13554_v39 = vld [vmem:[#allocation89_spill] sm:$0xff] }
 0x7c4   : > { %v7044_v49 = vadd.f32 %v12206_v6, %v6924_v19  ;;  %v13547_v6 = vld [vmem:[#allocation14_spill] sm:$0xff] }
 0x7c5   : > { %v7065_v14 = vadd.f32 %v12229_v24, %v6945_v54  ;;  %7471 = vadd.xlane.f32.xlu0 %v7470_v28  ;;  %v7139_v15 = vmax.f32 %v7043_v3, 0.0  ;;  %v7090_v52 = vadd.f32 %v12245_v34, %v6970_v37 }
 0x7c6   : > { %v7140_v23 = vmax.f32 %v7044_v49, 0.0 }
 0x7c7   : > { %v7161_v13 = vmax.f32 %v7065_v14, 0.0  ;;  %v7497_v21 = vmul.f32 %v12221_v62, %v7139_v15  ;;  %v7186_v36 = vmax.f32 %v7090_v52, 0.0 }
 0x7c8   : > { %v6874_v10 = vpop.f32.mrf.mxu2  ;;  %v7498_v1 = vmul.f32 %v12241_v5, %v7140_v23 }
 0x7c9   : > { %v7462_v35 = vmul.f32 %v12241_v5, %v7161_v13  ;;  %v6893_v4 = vpop.f32.mrf.mxu3  ;;  %v6947_v46 = vadd.f32 %v6874_v10, %v13547_v6  ;;  %v7508_v20 = vadd.f32 %v7497_v21, %v7496_v18  ;;  %v7502_v15 = vmul.f32 %v12224_v60, %v7186_v36 }
 0x7ca   : > { %v6948_v17 = vadd.f32 %v6893_v4, %v13548_v55  ;;  %v6839_v16 = vpop.f32.mrf.mxu0 }
 0x7cb   : > { %v6969_v59 = vadd.f32 %v6839_v16, %v13550_v40  ;;  %v7474_v29 = vadd.f32 %v12503_v51, %v7462_v35  ;;  %v7067_v58 = vadd.f32 %v12229_v24, %v6947_v46  ;;  %v7509_v42 = vadd.f32 %v7508_v20, %v7498_v1  ;;  %v6860_v51 = vpop.f32.mrf.mxu1  ;;  %v13556_v35 = vld [vmem:[#allocation18_spill] sm:$0xff] }
 0x7cc   : > { %v7068_v44 = vadd.f32 %v12229_v24, %v6948_v17  ;;  %v6994_v54 = vadd.f32 %v6860_v51, %v13554_v39 }
 0x7cd   : > { %v7089_v31 = vadd.f32 %v12245_v34, %v6969_v59  ;;  %7475 = vadd.xlane.f32.xlu2 %v7474_v29  ;;  %v7163_v30 = vmax.f32 %v7067_v58, 0.0  ;;  %7510 = vadd.xlane.f32.xlu0 %v7509_v42 }
 0x7ce   : > { %v7164_v0 = vmax.f32 %v7068_v44, 0.0  ;;  %v7114_v23 = vadd.f32 %v12260_v45, %v6994_v54  ;;  %v7277_v44 = vpop.xlane.xlu1 %7276 }
 0x7cf   : > { %v7185_v50 = vmax.f32 %v7089_v31, 0.0  ;;  %v7500_v26 = vmul.f32 %v12221_v62, %v7163_v30 }
 0x7d0   : > { %v6877_v8 = vpop.f32.mrf.mxu2  ;;  %v7501_v24 = vmul.f32 %v12241_v5, %v7164_v0  ;;  %v7210_v6 = vmax.f32 %v7114_v23, 0.0 }
 0x7d1   : > { %v7465_v53 = vmul.f32 %v12241_v5, %v7185_v50  ;;  %v6896_v27 = vpop.f32.mrf.mxu3  ;;  %v6971_v56 = vadd.f32 %v6877_v8, %v13551_v2  ;;  %v7512_v32 = vadd.f32 %v7500_v26, %v7499_v41  ;;  %v7214_v26 = vlaneseq }
 0x7d2   : > { %v6972_v47 = vadd.f32 %v6896_v27, %v13552_v38  ;;  %v6841_v63 = vpop.f32.mrf.mxu0  ;;  %v7505_v43 = vmul.f32 %v12224_v60, %v7210_v6  ;;  %v8236_v2 = vmov 0.0  }
 0x7d3   : > { %v6993_v19 = vadd.f32 %v6841_v63, %v13553_v57  ;;  %v7478_v25 = vadd.f32 %v12517_v61, %v7465_v53  ;;  %v7091_v28 = vadd.f32 %v12245_v34, %v6971_v56  ;;  %v7513_v12 = vadd.f32 %v7512_v32, %v7501_v24 }
 0x7d4   : > { %v7092_v22 = vadd.f32 %v12245_v34, %v6972_v47  ;;  %v7215_v8 = vand.u32 127, %v7214_v26 }
 0x7d5   : > { %v7113_v9 = vadd.f32 %v12260_v45, %v6993_v19  ;;  %v7187_v3 = vmax.f32 %v7091_v28, 0.0  ;;  %7514 = vadd.xlane.f32.xlu2 %v7513_v12  ;;  %7479 = vadd.xlane.f32.xlu0 %v7478_v25 }
 0x7d6   : > { %v7188_v49 = vmax.f32 %v7092_v22, 0.0  ;;  %v12582_v31 = vpop.xlane.xlu1 %7288  ;;  %vm7290_vm11 = vcmp.eq.s32.totalorder %v7215_v8, 1  ;;  %vm7251_vm12 = vcmp.eq.s32.totalorder %v7215_v8, 0  ;;  %vm7329_vm13 = vcmp.eq.s32.totalorder %v7215_v8, 2 }
 0x7d7   : > { %v7209_v14 = vmax.f32 %v7113_v9, 0.0  ;;  %v7503_v61 = vmul.f32 %v12221_v62, %v7187_v3  ;;  %v8169_v56 = vsel %vm7290_vm11, 1.0, %v8236_v2  ;;  %vm7368_vm14 = vcmp.eq.s32.totalorder %v7215_v8, 3 }
 0x7d8   : > { %v6879_v13 = vpop.f32.mrf.mxu2  ;;  %v7504_v34 = vmul.f32 %v12241_v5, %v7188_v49  ;;  %v8168_v47 = vsel %vm7251_vm12, 1.0, %v8236_v2  ;;  %v8170_v63 = vsel %vm7329_vm13, 1.0, %v8236_v2  ;;  %v7293_v32 = vmul.f32 %v8169_v56, %v7277_v44 }
 0x7d9   : > { %v7468_v33 = vmul.f32 %v12241_v5, %v7209_v14  ;;  %v6898_v18 = vpop.f32.mrf.mxu3  ;;  %v6995_v21 = vadd.f32 %v6879_v13, %v13555_v7  ;;  %v7516_v4 = vadd.f32 %v7503_v61, %v7502_v15  ;;  %vm7407_vm15 = vcmp.eq.s32.totalorder %v7215_v8, 4 }
 0x7da   : > { %v6996_v10 = vadd.f32 %v6898_v18, %v13556_v35  ;;  %v12590_v36 = vsel %vm7368_vm14, 1.0, %v8236_v2  ;;  %v7254_v57 = vmul.f32 %v8168_v47, %v7238_v11  ;;  %vm7446_vm0 = vcmp.eq.s32.totalorder %v7215_v8, 5 }
 0x7db   : > { %v7482_v1 = vadd.f32 %v12531_v48, %v7468_v33  ;;  %v7115_v46 = vadd.f32 %v12260_v45, %v6995_v21  ;;  %v7517_v17 = vadd.f32 %v7516_v4, %v7504_v34  ;;  %v7242_v48 = vpop.xlane.xlu2 %7241  ;;  %v12592_v25 = vsel %vm7407_vm15, 1.0, %v8236_v2 }
 0x7dc   : > { %v7116_v55 = vadd.f32 %v12260_v45, %v6996_v10  ;;  %v12580_v45 = vpop.xlane.xlu0 %7245  ;;  %v7297_v39 = vadd.f32 %v7293_v32, %v7254_v57  ;;  %vm7485_vm1 = vcmp.eq.s32.totalorder %v7215_v8, 6  ;;  %v12595_v9 = vsel %vm7446_vm0, 1.0, %v8236_v2 }
 0x7dd   : > { %v7211_v16 = vmax.f32 %v7115_v46, 0.0  ;;  %7518 = vadd.xlane.f32.xlu2 %v7517_v17  ;;  %7483 = vadd.xlane.f32.xlu0 %v7482_v1  ;;  %v12598_v14 = vsel %vm7485_vm1, 1.0, %v8236_v2  ;;  %vm7524_vm2 = vcmp.eq.s32.totalorder %v7215_v8, 7  ;;  %v7255_v33 = vmul.f32 %v8168_v47, %v7242_v48 }
 0x7de   : > { %v7212_v20 = vmax.f32 %v7116_v55, 0.0  ;;  %v8175_v7 = vsel %vm7524_vm2, 1.0, %v8236_v2 }
 0x7df   : > { %v7506_v37 = vmul.f32 %v12221_v62, %v7211_v16 }
 0x7e0   : > { %v7507_v40 = vmul.f32 %v12241_v5, %v7212_v20 }
 0x7e1   : > { %v7520_v59 = vadd.f32 %v7506_v37, %v7505_v43 }
 0x7e3   : > { %v7521_v29 = vadd.f32 %v7520_v59, %v7507_v40  ;;  %v12578_v58 = vpop.xlane.xlu2 %7249  ;;  %v7256_v59 = vmul.f32 %v8168_v47, %v12580_v45 }
 0x7e4   : > { %v7285_v30 = vpop.xlane.xlu0 %7284 }
 0x7e5   : > { %7522 = vadd.xlane.f32.xlu1 %v7521_v29  ;;  %v7295_v20 = vmul.f32 %v8169_v56, %v7285_v30 }
 0x7e8   : > { %v7324_v60 = vpop.xlane.xlu1 %7323 }
 0x7e9   : > { %v7334_v29 = vmul.f32 %v8170_v63, %v7324_v60 }
 0x7eb   : > { %v7281_v42 = vpop.xlane.xlu2 %7280 }
 0x7ec   : > { %v7320_v52 = vpop.xlane.xlu0 %7319  ;;  %v7294_v15 = vmul.f32 %v8169_v56, %v7281_v42  ;;  %v7299_v42 = vadd.f32 %v7295_v20, %v7256_v59 }
 0x7ed   : > { %v7333_v13 = vmul.f32 %v8170_v63, %v7320_v52 }
 0x7ee   : > { %v7298_v21 = vadd.f32 %v7294_v15, %v7255_v33  ;;  %v7338_v26 = vadd.f32 %v7334_v29, %v7299_v42 }
 0x7f0   : > { %v7359_v5 = vpop.xlane.xlu1 %7358  ;;  %v7337_v46 = vadd.f32 %v7333_v13, %v7298_v21 }
 0x7f1   : > { %v7372_v35 = vmul.f32 %v12590_v36, %v7359_v5 }
 0x7f3   : > { %v7316_v0 = vpop.xlane.xlu2 %7315  ;;  %v7376_v43 = vadd.f32 %v7372_v35, %v7337_v46 }
 0x7f4   : > { %v7355_v50 = vpop.xlane.xlu0 %7354  ;;  %v7332_v19 = vmul.f32 %v8170_v63, %v7316_v0 }
 0x7f5   : > { %v7371_v54 = vmul.f32 %v12590_v36, %v7355_v50 }
 0x7f6   : > { %v7336_v3 = vadd.f32 %v7332_v19, %v7297_v39 }
 0x7f8   : > { %v12586_v53 = vpop.xlane.xlu1 %7366  ;;  %v7375_v23 = vadd.f32 %v7371_v54, %v7336_v3 }
 0x7f9   : > { %v7374_v54 = vmul.f32 %v12590_v36, %v12586_v53 }
 0x7fb   : > { %v12584_v62 = vpop.xlane.xlu2 %7327 }
 0x803   : > { %v7363_v41 = vpop.xlane.xlu2 %7362 }
 0x804   : > { %v7373_v0 = vmul.f32 %v12590_v36, %v7363_v41  ;;  %v7335_v41 = vmul.f32 %v8170_v63, %v12584_v62 }
 0x806   : > { %v7398_v38 = vpop.xlane.xlu1 %7397  ;;  %v7377_v45 = vadd.f32 %v7373_v0, %v7338_v26 }
 0x807   : > { %v7411_v55 = vmul.f32 %v12592_v25, %v7398_v38  ;;  %v7257_v38 = vmul.f32 %v8168_v47, %v12578_v58 }
 0x809   : > { %v7415_v48 = vadd.f32 %v7411_v55, %v7376_v43 }
 0x80b   : > { %v7394_v27 = vpop.xlane.xlu2 %7393 }
 0x80c   : > { %v7410_v49 = vmul.f32 %v12592_v25, %v7394_v27  ;;  %v7296_v27 = vmul.f32 %v8169_v56, %v12582_v31 }
 0x80e   : > { %v7414_v18 = vadd.f32 %v7410_v49, %v7375_v23  ;;  %v7300_v39 = vadd.f32 %v7296_v27, %v7257_v38 }
 0x813   : > { %v7402_v28 = vpop.xlane.xlu2 %7401 }
 0x814   : > { %v7412_v30 = vmul.f32 %v12592_v25, %v7402_v28 }
 0x816   : > { %v7406_v12 = vpop.xlane.xlu1 %7405  ;;  %v7416_v32 = vadd.f32 %v7412_v30, %v7377_v45 }
 0x81a   : > { %v7433_v51 = vpop.xlane.xlu0 %7432 }
 0x81b   : > { %v7449_v61 = vmul.f32 %v12595_v9, %v7433_v51 }
 0x81d   : > { %v7453_v10 = vadd.f32 %v7449_v61, %v7414_v18 }
 0x822   : > { %v7437_v1 = vpop.xlane.xlu1 %7436 }
 0x823   : > { %v7450_v37 = vmul.f32 %v12595_v9, %v7437_v1 }
 0x825   : > { %v7454_v52 = vadd.f32 %v7450_v37, %v7415_v48 }
 0x82a   : > { %v12588_v24 = vpop.xlane.xlu0 %7440 }
 0x82b   : > { %v7451_v60 = vmul.f32 %v12595_v9, %v12588_v24  ;;  %v7413_v24 = vmul.f32 %v12592_v25, %v7406_v12 }
 0x82d   : > { %v7455_v28 = vadd.f32 %v7451_v60, %v7416_v32 }
 0x832   : > { %v7445_v31 = vpop.xlane.xlu1 %7444 }
 0x833   : > { %v7452_v47 = vmul.f32 %v12595_v9, %v7445_v31 }
 0x838   : > { %v7472_v22 = vpop.xlane.xlu0 %7471 }
 0x839   : > { %v7488_v34 = vmul.f32 %v12598_v14, %v7472_v22  ;;  %v7339_v22 = vadd.f32 %v7335_v41, %v7300_v39 }
 0x83b   : > { %v7492_v17 = vadd.f32 %v7488_v34, %v7453_v10  ;;  %v7378_v62 = vadd.f32 %v7374_v54, %v7339_v22 }
 0x83d   : > { %v7417_v15 = vadd.f32 %v7413_v24, %v7378_v62 }
 0x83f   : > { %v7456_v36 = vadd.f32 %v7452_v47, %v7417_v15 }
 0x840   : > { %v7476_v4 = vpop.xlane.xlu2 %7475  ;;  %v7511_v6 = vpop.xlane.xlu0 %7510 }
 0x841   : > { %v7527_v16 = vmul.f32 %v8175_v7, %v7511_v6  ;;  %v7489_v44 = vmul.f32 %v12598_v14, %v7476_v4 }
 0x843   : > { %v7531_v40 = vadd.f32 %v7527_v16, %v7492_v17  ;;  %v7493_v51 = vadd.f32 %v7489_v44, %v7454_v52 }
 0x845   : > { %v7535_v11 = vmul.f32 0.00390625, %v7531_v40 }
 0x847   : > { %7539 = vxpose.xlu2.b32.start [1/4] (short) (narrow) %v7535_v11, 8 }
 0x848   : > { %v7515_v5 = vpop.xlane.xlu2 %7514  ;;  %v7480_v50 = vpop.xlane.xlu0 %7479 }
 0x849   : > { %v7528_v8 = vmul.f32 %v8175_v7, %v7515_v5  ;;  %v7490_v19 = vmul.f32 %v12598_v14, %v7480_v50 }
 0x84b   : > { %v7532_v2 = vadd.f32 %v7528_v8, %v7493_v51  ;;  %v7494_v3 = vadd.f32 %v7490_v19, %v7455_v28 }
 0x84d   : > { %v7536_v57 = vmul.f32 0.00390625, %v7532_v2 }
 0x84f   : > { %7540 = vxpose.xlu2.b32.cont [2/4] (short) (narrow) %v7536_v57, 8 }
 0x850   : > { %v7519_v56 = vpop.xlane.xlu2 %7518  ;;  %v7484_v58 = vpop.xlane.xlu0 %7483 }
 0x851   : > { %v7529_v49 = vmul.f32 %v8175_v7, %v7519_v56  ;;  %v7491_v53 = vmul.f32 %v12598_v14, %v7484_v58 }
 0x853   : > { %v7533_v63 = vadd.f32 %v7529_v49, %v7494_v3  ;;  %v7495_v33 = vadd.f32 %v7491_v53, %v7456_v36 }
 0x855   : > { %v7537_v23 = vmul.f32 0.00390625, %v7533_v63 }
 0x857   : > { %7541 = vxpose.xlu2.b32.cont [3/4] (short) (narrow) %v7537_v23, 8 }
 0x858   : > { %v7523_v61 = vpop.xlane.xlu1 %7522 }
 0x859   : > { %v7530_v13 = vmul.f32 %v8175_v7, %v7523_v61 }
 0x85b   : > { %v7534_v18 = vadd.f32 %v7530_v13, %v7495_v33 }
 0x85d   : > { %v7538_v25 = vmul.f32 0.00390625, %v7534_v18 }
 0x85f   : > { %7542 = vxpose.xlu2.b32.end [4/4] (short) (narrow) %v7538_v25, 8 }
 0x8e0   : > { %v7555_v12 = vpop.trf.xlu2 }
 0x8e1   : > { %7571 = vst [vmem:[%s197_s6] sm:$0xff] %v7555_v12 }
 0x8e2 PF: > { %s14_s15 = sadd.s32 1, %s8224_s15  }
 0x8e3   : > { %p11_p5 = scmp.ge.s32.totalorder %s14_s15, 4  }
 0x8e5   :  { %13 = sbr.rel (!%p11_p5) target bundleno = 1 (0x1), region = 83 }

</bundles_post_ra>
